<compile_context>
chip_gen: v6e
topology: v6e:2x2x1
jax: 0.10.0
libtpu: 0.0.40
codegen_flags: <defaults>
</compile_context>

<pallas_src>
import jax
import jax.numpy as jnp
from jax.experimental import pallas as pl
from jax.experimental.pallas import tpu as pltpu

H = W = 32           # the module requires 32x32 inputs (fc1 = channels*15*15)
HW = H * W           # 1024 spatial positions, flattened onto the lane axis
POOL = 15            # MaxPool2d(3, stride=2) output size for 32x32
CIN1 = 8             # conv1 input channels zero-padded 3 -> 8 (aligned tap slices)
SELPAD = 256         # per-channel pooled features 15*15 padded into a 16x16 block
FC1_OUT = 128
FC2_PAD = 128        # fc2 output (10) zero-padded to a lane-dense 128


# ----------------------------------------------------------------------------
# Fused Pallas kernel: whole forward pass for Bt batch samples per grid step
# ----------------------------------------------------------------------------
def _convnet_kernel(x_ref, w1_ref, w2_ref, sel_ref, w1c_ref, b1_ref,
                    w2p_ref, b2_ref, o_ref):
    L = x_ref.shape[2]             # Bt * HW lanes
    Bt = L // HW
    C = w2_ref.shape[0]

    # Per-sample lane bookkeeping (lane % HW) for the 3x3 / padding=1 taps.
    lane = jax.lax.broadcasted_iota(jnp.int32, (1, L), 1)
    pos = lane % HW                # position inside the sample
    col = pos % W
    row_ok = {0: pos >= W, 1: None, 2: pos < HW - W}     # need i-1 >= 0 / i+1 <= 31
    col_ok = {0: col >= 1, 1: None, 2: col <= W - 2}     # need j-1 >= 0 / j+1 <= 31

    def conv3x3(act, w_ref):
        # act: (Cin, L); w_ref: (Cout, 9*Cin), columns ordered (tap, cin).
        taps = []
        for t in range(9):
            di, dj = divmod(t, 3)
            s = (di - 1) * W + (dj - 1)                  # tap[n] = act[n + s]
            tap = act if s == 0 else pltpu.roll(act, (-s) % L, 1)
            m = None
            for cond in (row_ok[di], col_ok[dj]):
                if cond is not None:
                    m = cond if m is None else (m & cond)
            if m is not None:
                # zero the padded-border taps (also kills cross-sample roll reads)
                tap = jnp.where(m, tap, 0.0)
            taps.append(tap)
        stack = jnp.concatenate(taps, axis=0)            # (9*Cin, L)
        return jnp.dot(w_ref[...], stack, preferred_element_type=jnp.float32)

    a1 = jnp.tanh(conv3x3(x_ref[0], w1_ref))             # (C, L)
    a2 = jnp.tanh(conv3x3(a1, w2_ref))                   # (C, L)

    # Separable 3x3 stride-1 running max (4 rolls).  Only lanes
    # n = 64*oi + 2*oj (oi, oj < 15) are read downstream, and those windows
    # never wrap across rows or across samples, so no masking is needed.
    cm = jnp.maximum(a2, jnp.maximum(pltpu.roll(a2, L - 1, 1),
                                     pltpu.roll(a2, L - 2, 1)))
    fm = jnp.maximum(cm, jnp.maximum(pltpu.roll(cm, L - W, 1),
                                     pltpu.roll(cm, L - 2 * W, 1)))

    # Stride-2 subsample + compaction: one (Bt*C, HW) @ (HW, 256) MXU dot against
    # a shared 0/1 selection matrix (lane 64*oi+2*oj -> column 16*oi+oj).
    fm_bt = jnp.concatenate([fm[:, b * HW:(b + 1) * HW] for b in range(Bt)],
                            axis=0)                                    # (Bt*C, HW)
    p = jnp.dot(fm_bt, sel_ref[...], preferred_element_type=jnp.float32)  # (Bt*C, 256)

    # PyTorch NCHW flatten: sample row b gets channel c's 256 pooled features at
    # lanes [c*256, (c+1)*256).  Built from cheap single-row slices + concats
    # (~32 KiB of shuffles), giving a single fc1 dot with M = Bt.
    flat = jnp.concatenate(
        [jnp.concatenate([p[b * C + c:b * C + c + 1, :] for c in range(C)], axis=1)
         for b in range(Bt)],
        axis=0)                                                        # (Bt, C*256)

    h = jnp.tanh(jnp.dot(flat, w1c_ref[...], preferred_element_type=jnp.float32)
                 + b1_ref[...])                                        # (Bt, 128)

    # fc2 (output padded to 128 lanes -> unmasked lane-dense store)
    o_ref[0] = (jnp.dot(h, w2p_ref[...], preferred_element_type=jnp.float32)
                + b2_ref[...]).astype(o_ref.dtype)


# ----------------------------------------------------------------------------
# Wrapper
# ----------------------------------------------------------------------------
def _pick_bt(batch):
    # Largest batch tile (<= 8) that divides the batch; prefer grid >= 2 so
    # dimension_semantics=("parallel",) can still shard across v7x's two TCs.
    cands = [d for d in range(1, min(batch, 8) + 1) if batch % d == 0]
    two_core = [d for d in cands if batch // d >= 2]
    return max(two_core) if two_core else max(cands)


@jax.jit
def convnet_forward(x_nchw, params):
    B, cin, hx, wx = x_nchw.shape
    assert (cin, hx, wx) == (3, H, W), "ConvNet needs 3x32x32 inputs (fc1 = C*15*15)"
    C = params["w2f"].shape[0]
    assert params["w1f"].shape == (C, 9 * CIN1)
    assert params["w2f"].shape == (C, 9 * C)
    assert params["sel"].shape == (HW, SELPAD)
    assert params["w1c"].shape == (C * SELPAD, FC1_OUT)
    assert params["b1"].shape == (1, FC1_OUT)
    assert params["w2p"].shape == (FC1_OUT, FC2_PAD)
    assert params["b2p"].shape == (1, FC2_PAD)

    bt = _pick_bt(B)
    ng = B // bt
    L = bt * HW

    # Pack Bt samples into the lane axis: (ng, CIN1, bt*HW), channel zero-pad 3->8.
    xp = jnp.pad(x_nchw.astype(jnp.float32), ((0, 0), (0, CIN1 - 3), (0, 0), (0, 0)))
    xg = xp.reshape(ng, bt, CIN1, HW).transpose(0, 2, 1, 3).reshape(ng, CIN1, L)

    out = pl.pallas_call(
        _convnet_kernel,
        out_shape=jax.ShapeDtypeStruct((ng, bt, FC2_PAD), jnp.float32),
        grid=(ng,),
        in_specs=[
            pl.BlockSpec((1, CIN1, L), lambda g: (g, 0, 0)),            # x tile
            pl.BlockSpec((C, 9 * CIN1), lambda g: (0, 0)),              # conv1 w
            pl.BlockSpec((C, 9 * C), lambda g: (0, 0)),                 # conv2 w
            pl.BlockSpec((HW, SELPAD), lambda g: (0, 0)),               # pool selection
            pl.BlockSpec((C * SELPAD, FC1_OUT), lambda g: (0, 0)),      # fc1 w (compact)
            pl.BlockSpec((1, FC1_OUT), lambda g: (0, 0)),               # fc1 bias
            pl.BlockSpec((FC1_OUT, FC2_PAD), lambda g: (0, 0)),         # fc2 w (padded)
            pl.BlockSpec((1, FC2_PAD), lambda g: (0, 0)),               # fc2 bias
        ],
        out_specs=pl.BlockSpec((1, bt, FC2_PAD), lambda g: (g, 0, 0)),
        compiler_params=pltpu.CompilerParams(
            dimension_semantics=("parallel",),
            vmem_limit_bytes=32 * 1024 * 1024,
        ),
    )(xg, params["w1f"], params["w2f"], params["sel"], params["w1c"],
      params["b1"], params["w2p"], params["b2p"])

    return out.reshape(B, FC2_PAD)[:, :10]


# ----------------------------------------------------------------------------
# Deterministic parameter init (PyTorch-style U(-1/sqrt(fan_in), +1/sqrt(fan_in))),
# stored directly in the layouts the fused kernel consumes.
# ----------------------------------------------------------------------------
def init_params(key, channels):
    C = channels
    k1, k2, k3, k4, k5, k6 = jax.random.split(key, 6)

    def uni(k, shape, fan_in):
        b = 1.0 / (fan_in ** 0.5)
        return jax.random.uniform(k, shape, jnp.float32, -b, b)

    # conv weights (bias=False in the module); columns ordered (tap=di*3+dj, cin)
    w1 = uni(k1, (C, 3, 3, 3), 3 * 9)                                  # (Cout,Cin,kh,kw)
    w1 = jnp.pad(w1, ((0, 0), (0, CIN1 - 3), (0, 0), (0, 0)))          # pad Cin 3->8
    w1f = w1.transpose(0, 2, 3, 1).reshape(C, 9 * CIN1)

    w2 = uni(k2, (C, C, 3, 3), C * 9)
    w2f = w2.transpose(0, 2, 3, 1).reshape(C, 9 * C)

    # shared pool-subsample selection matrix: lane 64*oi+2*oj -> column 16*oi+oj
    oi = jnp.arange(POOL)
    oj = jnp.arange(POOL)
    rows = (64 * oi[:, None] + 2 * oj[None, :]).reshape(-1)
    cols = (16 * oi[:, None] + oj[None, :]).reshape(-1)
    sel = jnp.zeros((HW, SELPAD), jnp.float32).at[rows, cols].set(1.0)

    # fc1: dense (C*15*15, 128) placed into per-channel 16x16 blocks -> (C*256, 128)
    fc1_in = C * POOL * POOL
    fc1_w = uni(k3, (C, POOL, POOL, FC1_OUT), fc1_in)
    b1 = uni(k4, (1, FC1_OUT), fc1_in)
    w1c = jnp.zeros((C, 16, 16, FC1_OUT), jnp.float32).at[:, :POOL, :POOL, :].set(fc1_w)
    w1c = w1c.reshape(C * SELPAD, FC1_OUT)

    # fc2: output dim zero-padded 10 -> 128 for lane-dense stores
    fc2_w = uni(k5, (FC1_OUT, 10), FC1_OUT)
    fc2_b = uni(k6, (10,), FC1_OUT)
    w2p = jnp.zeros((FC1_OUT, FC2_PAD), jnp.float32).at[:, :10].set(fc2_w)
    b2p = jnp.zeros((1, FC2_PAD), jnp.float32).at[0, :10].set(fc2_b)

    return dict(w1f=w1f, w2f=w2f, sel=sel, w1c=w1c, b1=b1, w2p=w2p, b2p=b2p)


# ----------------------------------------------------------------------------
# Plain-JAX reference of the same forward pass (correctness check only)
# ----------------------------------------------------------------------------
def _conv_ref(x, wflat):
    cout = wflat.shape[0]
    cin = wflat.shape[1] // 9
    w = wflat.reshape(cout, 3, 3, cin).transpose(0, 3, 1, 2)           # OIHW
    return jax.lax.conv_general_dilated(
        x, w, (1, 1), ((1, 1), (1, 1)),
        dimension_numbers=("NCHW", "OIHW", "NCHW"),
        precision=jax.lax.Precision.HIGHEST)


def convnet_reference(x_nchw, params):
    B = x_nchw.shape[0]
    C = params["w2f"].shape[0]
    hi = jax.lax.Precision.HIGHEST

    x8 = jnp.pad(x_nchw.astype(jnp.float32), ((0, 0), (0, CIN1 - 3), (0, 0), (0, 0)))
    y = jnp.tanh(_conv_ref(x8, params["w1f"]))
    y = jnp.tanh(_conv_ref(y, params["w2f"]))
    y = jax.lax.reduce_window(y, -jnp.inf, jax.lax.max,
                              (1, 1, 3, 3), (1, 1, 2, 2), "VALID")      # (B,C,15,15)
    flat = y.reshape(B, C * POOL * POOL)
    w1 = params["w1c"].reshape(C, 16, 16, FC1_OUT)[:, :POOL, :POOL, :]
    w1 = w1.reshape(C * POOL * POOL, FC1_OUT)
    h = jnp.tanh(jnp.dot(flat, w1, precision=hi) + params["b1"])
    out = jnp.dot(h, params["w2p"], precision=hi) + params["b2p"]
    return out[:, :10]


if __name__ == "__main__":
    batch, channels = 8, 8                      # spatial must be 32 (fc1 = C*15*15)

    key = jax.random.PRNGKey(0)
    kx, kp = jax.random.split(key)
    x = jax.random.normal(kx, (batch, 3, H, W), dtype=jnp.float32)
    params = init_params(kp, channels)

    out = jax.block_until_ready(convnet_forward(x, params))
    assert out.shape == (batch, 10), out.shape

    ref = jax.block_until_ready(convnet_reference(x, params))
    max_err = float(jnp.max(jnp.abs(out - ref)))
    assert max_err < 1e-3, f"kernel/reference mismatch, max abs err = {max_err}"

    print("KERNEL_OK")
</pallas_src>

<mosaic_0001>
module attributes {stable_mosaic.version = 11 : i64} {
  func.func @_convnet_kernel(%arg0: i32, %arg1: memref<1x8x4096xf32, #tpu.memory_space<vmem>>, %arg2: memref<8x72xf32, #tpu.memory_space<vmem>>, %arg3: memref<8x72xf32, #tpu.memory_space<vmem>>, %arg4: memref<1024x256xf32, #tpu.memory_space<vmem>>, %arg5: memref<2048x128xf32, #tpu.memory_space<vmem>>, %arg6: memref<1x128xf32, #tpu.memory_space<vmem>>, %arg7: memref<128x128xf32, #tpu.memory_space<vmem>>, %arg8: memref<1x128xf32, #tpu.memory_space<vmem>>, %arg9: memref<1x4x128xf32, #tpu.memory_space<vmem>>) attributes {dimension_semantics = [#tpu.dimension_semantics<parallel>], iteration_bounds = array<i64: 2>, scalar_prefetch = 0 : i64, scratch_operands = 0 : i64, tpu.core_type = #tpu.core_type<tc>, window_params = [{transform_indices = @transform_0, window_bounds = array<i64: 1, 8, 4096>}, {pipeline_mode = #tpu.pipeline_mode<synchronous>, transform_indices = @transform_1, window_bounds = array<i64: 8, 72>}, {pipeline_mode = #tpu.pipeline_mode<synchronous>, transform_indices = @transform_2, window_bounds = array<i64: 8, 72>}, {pipeline_mode = #tpu.pipeline_mode<synchronous>, transform_indices = @transform_3, window_bounds = array<i64: 1024, 256>}, {pipeline_mode = #tpu.pipeline_mode<synchronous>, transform_indices = @transform_4, window_bounds = array<i64: 2048, 128>}, {pipeline_mode = #tpu.pipeline_mode<synchronous>, transform_indices = @transform_5, window_bounds = array<i64: 1, 128>}, {pipeline_mode = #tpu.pipeline_mode<synchronous>, transform_indices = @transform_6, window_bounds = array<i64: 128, 128>}, {pipeline_mode = #tpu.pipeline_mode<synchronous>, transform_indices = @transform_7, window_bounds = array<i64: 1, 128>}, {transform_indices = @transform_8, window_bounds = array<i64: 1, 4, 128>}]} {
    %0 = tpu.iota {dimensions = array<i32: 1>} : vector<1x4096xi32>
    %c1024_i32 = arith.constant 1024 : i32
    %c0_i32 = arith.constant 0 : i32
    %1 = arith.cmpi eq, %c1024_i32, %c0_i32 : i32
    %c1_i32 = arith.constant 1 : i32
    %2 = arith.select %1, %c1_i32, %c1024_i32 : i32
    %3 = vector.broadcast %2 : i32 to vector<1x4096xi32>
    %4 = arith.remsi %0, %3 : vector<1x4096xi32>
    %c0_i32_0 = arith.constant 0 : i32
    %5 = vector.broadcast %c0_i32_0 : i32 to vector<1x4096xi32>
    %6 = arith.cmpi ne, %4, %5 : vector<1x4096xi32>
    %c0_i32_1 = arith.constant 0 : i32
    %7 = vector.broadcast %c0_i32_1 : i32 to vector<1x4096xi32>
    %8 = arith.cmpi slt, %4, %7 : vector<1x4096xi32>
    %c0_i32_2 = arith.constant 0 : i32
    %9 = arith.cmpi slt, %2, %c0_i32_2 : i32
    %10 = vector.broadcast %9 : i1 to vector<1x4096xi1>
    %11 = vector.broadcast %10 : vector<1x4096xi1> to vector<1x4096xi1>
    %12 = arith.xori %8, %11 : vector<1x4096xi1>
    %13 = arith.andi %12, %6 : vector<1x4096xi1>
    %14 = vector.broadcast %2 : i32 to vector<1x4096xi32>
    %15 = arith.addi %4, %14 : vector<1x4096xi32>
    %16 = arith.select %13, %15, %4 : vector<1x4096xi1>, vector<1x4096xi32>
    %c32_i32 = arith.constant 32 : i32
    %c0_i32_3 = arith.constant 0 : i32
    %17 = arith.cmpi eq, %c32_i32, %c0_i32_3 : i32
    %c1_i32_4 = arith.constant 1 : i32
    %18 = arith.select %17, %c1_i32_4, %c32_i32 : i32
    %19 = vector.broadcast %18 : i32 to vector<1x4096xi32>
    %20 = arith.remsi %16, %19 : vector<1x4096xi32>
    %c0_i32_5 = arith.constant 0 : i32
    %21 = vector.broadcast %c0_i32_5 : i32 to vector<1x4096xi32>
    %22 = arith.cmpi ne, %20, %21 : vector<1x4096xi32>
    %c0_i32_6 = arith.constant 0 : i32
    %23 = vector.broadcast %c0_i32_6 : i32 to vector<1x4096xi32>
    %24 = arith.cmpi slt, %20, %23 : vector<1x4096xi32>
    %c0_i32_7 = arith.constant 0 : i32
    %25 = arith.cmpi slt, %18, %c0_i32_7 : i32
    %26 = vector.broadcast %25 : i1 to vector<1x4096xi1>
    %27 = vector.broadcast %26 : vector<1x4096xi1> to vector<1x4096xi1>
    %28 = arith.xori %24, %27 : vector<1x4096xi1>
    %29 = arith.andi %28, %22 : vector<1x4096xi1>
    %30 = vector.broadcast %18 : i32 to vector<1x4096xi32>
    %31 = arith.addi %20, %30 : vector<1x4096xi32>
    %32 = arith.select %29, %31, %20 : vector<1x4096xi1>, vector<1x4096xi32>
    %c32_i32_8 = arith.constant 32 : i32
    %33 = vector.broadcast %c32_i32_8 : i32 to vector<1x4096xi32>
    %34 = arith.cmpi sge, %16, %33 : vector<1x4096xi32>
    %c992_i32 = arith.constant 992 : i32
    %35 = vector.broadcast %c992_i32 : i32 to vector<1x4096xi32>
    %36 = arith.cmpi slt, %16, %35 : vector<1x4096xi32>
    %c1_i32_9 = arith.constant 1 : i32
    %37 = vector.broadcast %c1_i32_9 : i32 to vector<1x4096xi32>
    %38 = arith.cmpi sge, %32, %37 : vector<1x4096xi32>
    %c30_i32 = arith.constant 30 : i32
    %39 = vector.broadcast %c30_i32 : i32 to vector<1x4096xi32>
    %40 = arith.cmpi sle, %32, %39 : vector<1x4096xi32>
    %c0 = arith.constant 0 : index
    %c0_10 = arith.constant 0 : index
    %c0_11 = arith.constant 0 : index
    %41 = vector.load %arg1[%c0, %c0_10, %c0_11] : memref<1x8x4096xf32, #tpu.memory_space<vmem>>, vector<1x8x4096xf32>
    %42 = vector.shape_cast %41 : vector<1x8x4096xf32> to vector<8x4096xf32>
    %c33_i32 = arith.constant 33 : i32
    %43 = tpu.dynamic_rotate %42 by %c33_i32 dim 1 : vector<8x4096xf32>, i32 -> vector<8x4096xf32>
    %44 = arith.andi %34, %38 : vector<1x4096xi1>
    %cst = arith.constant 0.000000e+00 : f32
    %45 = vector.shape_cast %44 : vector<1x4096xi1> to vector<1x4096xi1>
    %46 = vector.broadcast %45 : vector<1x4096xi1> to vector<8x4096xi1>
    %47 = vector.broadcast %cst : f32 to vector<8x4096xf32>
    %48 = arith.select %46, %43, %47 : vector<8x4096xi1>, vector<8x4096xf32>
    %c32_i32_12 = arith.constant 32 : i32
    %49 = tpu.dynamic_rotate %42 by %c32_i32_12 dim 1 : vector<8x4096xf32>, i32 -> vector<8x4096xf32>
    %cst_13 = arith.constant 0.000000e+00 : f32
    %50 = vector.shape_cast %34 : vector<1x4096xi1> to vector<1x4096xi1>
    %51 = vector.broadcast %50 : vector<1x4096xi1> to vector<8x4096xi1>
    %52 = vector.broadcast %cst_13 : f32 to vector<8x4096xf32>
    %53 = arith.select %51, %49, %52 : vector<8x4096xi1>, vector<8x4096xf32>
    %c31_i32 = arith.constant 31 : i32
    %54 = tpu.dynamic_rotate %42 by %c31_i32 dim 1 : vector<8x4096xf32>, i32 -> vector<8x4096xf32>
    %55 = arith.andi %34, %40 : vector<1x4096xi1>
    %cst_14 = arith.constant 0.000000e+00 : f32
    %56 = vector.shape_cast %55 : vector<1x4096xi1> to vector<1x4096xi1>
    %57 = vector.broadcast %56 : vector<1x4096xi1> to vector<8x4096xi1>
    %58 = vector.broadcast %cst_14 : f32 to vector<8x4096xf32>
    %59 = arith.select %57, %54, %58 : vector<8x4096xi1>, vector<8x4096xf32>
    %c1_i32_15 = arith.constant 1 : i32
    %60 = tpu.dynamic_rotate %42 by %c1_i32_15 dim 1 : vector<8x4096xf32>, i32 -> vector<8x4096xf32>
    %cst_16 = arith.constant 0.000000e+00 : f32
    %61 = vector.shape_cast %38 : vector<1x4096xi1> to vector<1x4096xi1>
    %62 = vector.broadcast %61 : vector<1x4096xi1> to vector<8x4096xi1>
    %63 = vector.broadcast %cst_16 : f32 to vector<8x4096xf32>
    %64 = arith.select %62, %60, %63 : vector<8x4096xi1>, vector<8x4096xf32>
    %c4095_i32 = arith.constant 4095 : i32
    %65 = tpu.dynamic_rotate %42 by %c4095_i32 dim 1 : vector<8x4096xf32>, i32 -> vector<8x4096xf32>
    %cst_17 = arith.constant 0.000000e+00 : f32
    %66 = vector.shape_cast %40 : vector<1x4096xi1> to vector<1x4096xi1>
    %67 = vector.broadcast %66 : vector<1x4096xi1> to vector<8x4096xi1>
    %68 = vector.broadcast %cst_17 : f32 to vector<8x4096xf32>
    %69 = arith.select %67, %65, %68 : vector<8x4096xi1>, vector<8x4096xf32>
    %c4065_i32 = arith.constant 4065 : i32
    %70 = tpu.dynamic_rotate %42 by %c4065_i32 dim 1 : vector<8x4096xf32>, i32 -> vector<8x4096xf32>
    %71 = arith.andi %36, %38 : vector<1x4096xi1>
    %cst_18 = arith.constant 0.000000e+00 : f32
    %72 = vector.shape_cast %71 : vector<1x4096xi1> to vector<1x4096xi1>
    %73 = vector.broadcast %72 : vector<1x4096xi1> to vector<8x4096xi1>
    %74 = vector.broadcast %cst_18 : f32 to vector<8x4096xf32>
    %75 = arith.select %73, %70, %74 : vector<8x4096xi1>, vector<8x4096xf32>
    %c4064_i32 = arith.constant 4064 : i32
    %76 = tpu.dynamic_rotate %42 by %c4064_i32 dim 1 : vector<8x4096xf32>, i32 -> vector<8x4096xf32>
    %cst_19 = arith.constant 0.000000e+00 : f32
    %77 = vector.shape_cast %36 : vector<1x4096xi1> to vector<1x4096xi1>
    %78 = vector.broadcast %77 : vector<1x4096xi1> to vector<8x4096xi1>
    %79 = vector.broadcast %cst_19 : f32 to vector<8x4096xf32>
    %80 = arith.select %78, %76, %79 : vector<8x4096xi1>, vector<8x4096xf32>
    %c4063_i32 = arith.constant 4063 : i32
    %81 = tpu.dynamic_rotate %42 by %c4063_i32 dim 1 : vector<8x4096xf32>, i32 -> vector<8x4096xf32>
    %82 = arith.andi %36, %40 : vector<1x4096xi1>
    %cst_20 = arith.constant 0.000000e+00 : f32
    %83 = vector.shape_cast %82 : vector<1x4096xi1> to vector<1x4096xi1>
    %84 = vector.broadcast %83 : vector<1x4096xi1> to vector<8x4096xi1>
    %85 = vector.broadcast %cst_20 : f32 to vector<8x4096xf32>
    %86 = arith.select %84, %81, %85 : vector<8x4096xi1>, vector<8x4096xf32>
    %87 = tpu.concatenate %48, %53, %59, %64, %42, %69, %75, %80, %86 in 0 : vector<8x4096xf32>, vector<8x4096xf32>, vector<8x4096xf32>, vector<8x4096xf32>, vector<8x4096xf32>, vector<8x4096xf32>, vector<8x4096xf32>, vector<8x4096xf32>, vector<8x4096xf32> -> vector<72x4096xf32>
    %c0_21 = arith.constant 0 : index
    %c0_22 = arith.constant 0 : index
    %88 = vector.load %arg2[%c0_21, %c0_22] : memref<8x72xf32, #tpu.memory_space<vmem>>, vector<8x72xf32>
    %cst_23 = arith.constant dense<0.000000e+00> : vector<8x4096xf32>
    %89 = tpu.matmul %88, %87, %cst_23 {dimension_numbers = #tpu.dot_dimension_numbers<[1], [0], [0], [1], [0, 0, 1, 1], [], []>} : vector<8x72xf32>, vector<72x4096xf32>, vector<8x4096xf32> -> vector<8x4096xf32>
    %90 = math.tanh %89 : vector<8x4096xf32>
    %c33_i32_24 = arith.constant 33 : i32
    %91 = tpu.dynamic_rotate %90 by %c33_i32_24 dim 1 : vector<8x4096xf32>, i32 -> vector<8x4096xf32>
    %92 = arith.andi %34, %38 : vector<1x4096xi1>
    %cst_25 = arith.constant 0.000000e+00 : f32
    %93 = vector.shape_cast %92 : vector<1x4096xi1> to vector<1x4096xi1>
    %94 = vector.broadcast %93 : vector<1x4096xi1> to vector<8x4096xi1>
    %95 = vector.broadcast %cst_25 : f32 to vector<8x4096xf32>
    %96 = arith.select %94, %91, %95 : vector<8x4096xi1>, vector<8x4096xf32>
    %c32_i32_26 = arith.constant 32 : i32
    %97 = tpu.dynamic_rotate %90 by %c32_i32_26 dim 1 : vector<8x4096xf32>, i32 -> vector<8x4096xf32>
    %cst_27 = arith.constant 0.000000e+00 : f32
    %98 = vector.shape_cast %34 : vector<1x4096xi1> to vector<1x4096xi1>
    %99 = vector.broadcast %98 : vector<1x4096xi1> to vector<8x4096xi1>
    %100 = vector.broadcast %cst_27 : f32 to vector<8x4096xf32>
    %101 = arith.select %99, %97, %100 : vector<8x4096xi1>, vector<8x4096xf32>
    %c31_i32_28 = arith.constant 31 : i32
    %102 = tpu.dynamic_rotate %90 by %c31_i32_28 dim 1 : vector<8x4096xf32>, i32 -> vector<8x4096xf32>
    %103 = arith.andi %34, %40 : vector<1x4096xi1>
    %cst_29 = arith.constant 0.000000e+00 : f32
    %104 = vector.shape_cast %103 : vector<1x4096xi1> to vector<1x4096xi1>
    %105 = vector.broadcast %104 : vector<1x4096xi1> to vector<8x4096xi1>
    %106 = vector.broadcast %cst_29 : f32 to vector<8x4096xf32>
    %107 = arith.select %105, %102, %106 : vector<8x4096xi1>, vector<8x4096xf32>
    %c1_i32_30 = arith.constant 1 : i32
    %108 = tpu.dynamic_rotate %90 by %c1_i32_30 dim 1 : vector<8x4096xf32>, i32 -> vector<8x4096xf32>
    %cst_31 = arith.constant 0.000000e+00 : f32
    %109 = vector.shape_cast %38 : vector<1x4096xi1> to vector<1x4096xi1>
    %110 = vector.broadcast %109 : vector<1x4096xi1> to vector<8x4096xi1>
    %111 = vector.broadcast %cst_31 : f32 to vector<8x4096xf32>
    %112 = arith.select %110, %108, %111 : vector<8x4096xi1>, vector<8x4096xf32>
    %c4095_i32_32 = arith.constant 4095 : i32
    %113 = tpu.dynamic_rotate %90 by %c4095_i32_32 dim 1 : vector<8x4096xf32>, i32 -> vector<8x4096xf32>
    %cst_33 = arith.constant 0.000000e+00 : f32
    %114 = vector.shape_cast %40 : vector<1x4096xi1> to vector<1x4096xi1>
    %115 = vector.broadcast %114 : vector<1x4096xi1> to vector<8x4096xi1>
    %116 = vector.broadcast %cst_33 : f32 to vector<8x4096xf32>
    %117 = arith.select %115, %113, %116 : vector<8x4096xi1>, vector<8x4096xf32>
    %c4065_i32_34 = arith.constant 4065 : i32
    %118 = tpu.dynamic_rotate %90 by %c4065_i32_34 dim 1 : vector<8x4096xf32>, i32 -> vector<8x4096xf32>
    %119 = arith.andi %36, %38 : vector<1x4096xi1>
    %cst_35 = arith.constant 0.000000e+00 : f32
    %120 = vector.shape_cast %119 : vector<1x4096xi1> to vector<1x4096xi1>
    %121 = vector.broadcast %120 : vector<1x4096xi1> to vector<8x4096xi1>
    %122 = vector.broadcast %cst_35 : f32 to vector<8x4096xf32>
    %123 = arith.select %121, %118, %122 : vector<8x4096xi1>, vector<8x4096xf32>
    %c4064_i32_36 = arith.constant 4064 : i32
    %124 = tpu.dynamic_rotate %90 by %c4064_i32_36 dim 1 : vector<8x4096xf32>, i32 -> vector<8x4096xf32>
    %cst_37 = arith.constant 0.000000e+00 : f32
    %125 = vector.shape_cast %36 : vector<1x4096xi1> to vector<1x4096xi1>
    %126 = vector.broadcast %125 : vector<1x4096xi1> to vector<8x4096xi1>
    %127 = vector.broadcast %cst_37 : f32 to vector<8x4096xf32>
    %128 = arith.select %126, %124, %127 : vector<8x4096xi1>, vector<8x4096xf32>
    %c4063_i32_38 = arith.constant 4063 : i32
    %129 = tpu.dynamic_rotate %90 by %c4063_i32_38 dim 1 : vector<8x4096xf32>, i32 -> vector<8x4096xf32>
    %130 = arith.andi %36, %40 : vector<1x4096xi1>
    %cst_39 = arith.constant 0.000000e+00 : f32
    %131 = vector.shape_cast %130 : vector<1x4096xi1> to vector<1x4096xi1>
    %132 = vector.broadcast %131 : vector<1x4096xi1> to vector<8x4096xi1>
    %133 = vector.broadcast %cst_39 : f32 to vector<8x4096xf32>
    %134 = arith.select %132, %129, %133 : vector<8x4096xi1>, vector<8x4096xf32>
    %135 = tpu.concatenate %96, %101, %107, %112, %90, %117, %123, %128, %134 in 0 : vector<8x4096xf32>, vector<8x4096xf32>, vector<8x4096xf32>, vector<8x4096xf32>, vector<8x4096xf32>, vector<8x4096xf32>, vector<8x4096xf32>, vector<8x4096xf32>, vector<8x4096xf32> -> vector<72x4096xf32>
    %c0_40 = arith.constant 0 : index
    %c0_41 = arith.constant 0 : index
    %136 = vector.load %arg3[%c0_40, %c0_41] : memref<8x72xf32, #tpu.memory_space<vmem>>, vector<8x72xf32>
    %cst_42 = arith.constant dense<0.000000e+00> : vector<8x4096xf32>
    %137 = tpu.matmul %136, %135, %cst_42 {dimension_numbers = #tpu.dot_dimension_numbers<[1], [0], [0], [1], [0, 0, 1, 1], [], []>} : vector<8x72xf32>, vector<72x4096xf32>, vector<8x4096xf32> -> vector<8x4096xf32>
    %138 = math.tanh %137 : vector<8x4096xf32>
    %c4095_i32_43 = arith.constant 4095 : i32
    %139 = tpu.dynamic_rotate %138 by %c4095_i32_43 dim 1 : vector<8x4096xf32>, i32 -> vector<8x4096xf32>
    %c4094_i32 = arith.constant 4094 : i32
    %140 = tpu.dynamic_rotate %138 by %c4094_i32 dim 1 : vector<8x4096xf32>, i32 -> vector<8x4096xf32>
    %141 = arith.maximumf %139, %140 : vector<8x4096xf32>
    %142 = arith.maximumf %138, %141 : vector<8x4096xf32>
    %c4064_i32_44 = arith.constant 4064 : i32
    %143 = tpu.dynamic_rotate %142 by %c4064_i32_44 dim 1 : vector<8x4096xf32>, i32 -> vector<8x4096xf32>
    %c4032_i32 = arith.constant 4032 : i32
    %144 = tpu.dynamic_rotate %142 by %c4032_i32 dim 1 : vector<8x4096xf32>, i32 -> vector<8x4096xf32>
    %145 = arith.maximumf %143, %144 : vector<8x4096xf32>
    %146 = arith.maximumf %142, %145 : vector<8x4096xf32>
    %147 = vector.extract_strided_slice %146 {offsets = [0, 0], sizes = [8, 1024], strides = [1, 1]} : vector<8x4096xf32> to vector<8x1024xf32>
    %148 = vector.extract_strided_slice %146 {offsets = [0, 1024], sizes = [8, 1024], strides = [1, 1]} : vector<8x4096xf32> to vector<8x1024xf32>
    %149 = vector.extract_strided_slice %146 {offsets = [0, 2048], sizes = [8, 1024], strides = [1, 1]} : vector<8x4096xf32> to vector<8x1024xf32>
    %150 = vector.extract_strided_slice %146 {offsets = [0, 3072], sizes = [8, 1024], strides = [1, 1]} : vector<8x4096xf32> to vector<8x1024xf32>
    %151 = tpu.concatenate %147, %148, %149, %150 in 0 : vector<8x1024xf32>, vector<8x1024xf32>, vector<8x1024xf32>, vector<8x1024xf32> -> vector<32x1024xf32>
    %c0_45 = arith.constant 0 : index
    %c0_46 = arith.constant 0 : index
    %152 = vector.load %arg4[%c0_45, %c0_46] : memref<1024x256xf32, #tpu.memory_space<vmem>>, vector<1024x256xf32>
    %cst_47 = arith.constant dense<0.000000e+00> : vector<32x256xf32>
    %153 = tpu.matmul %151, %152, %cst_47 {dimension_numbers = #tpu.dot_dimension_numbers<[1], [0], [0], [1], [0, 0, 1, 1], [], []>} : vector<32x1024xf32>, vector<1024x256xf32>, vector<32x256xf32> -> vector<32x256xf32>
    %154 = vector.extract_strided_slice %153 {offsets = [0, 0], sizes = [1, 256], strides = [1, 1]} : vector<32x256xf32> to vector<1x256xf32>
    %155 = vector.extract_strided_slice %153 {offsets = [1, 0], sizes = [1, 256], strides = [1, 1]} : vector<32x256xf32> to vector<1x256xf32>
    %156 = vector.extract_strided_slice %153 {offsets = [2, 0], sizes = [1, 256], strides = [1, 1]} : vector<32x256xf32> to vector<1x256xf32>
    %157 = vector.extract_strided_slice %153 {offsets = [3, 0], sizes = [1, 256], strides = [1, 1]} : vector<32x256xf32> to vector<1x256xf32>
    %158 = vector.extract_strided_slice %153 {offsets = [4, 0], sizes = [1, 256], strides = [1, 1]} : vector<32x256xf32> to vector<1x256xf32>
    %159 = vector.extract_strided_slice %153 {offsets = [5, 0], sizes = [1, 256], strides = [1, 1]} : vector<32x256xf32> to vector<1x256xf32>
    %160 = vector.extract_strided_slice %153 {offsets = [6, 0], sizes = [1, 256], strides = [1, 1]} : vector<32x256xf32> to vector<1x256xf32>
    %161 = vector.extract_strided_slice %153 {offsets = [7, 0], sizes = [1, 256], strides = [1, 1]} : vector<32x256xf32> to vector<1x256xf32>
    %162 = tpu.concatenate %154, %155, %156, %157, %158, %159, %160, %161 in 1 : vector<1x256xf32>, vector<1x256xf32>, vector<1x256xf32>, vector<1x256xf32>, vector<1x256xf32>, vector<1x256xf32>, vector<1x256xf32>, vector<1x256xf32> -> vector<1x2048xf32>
    %163 = vector.extract_strided_slice %153 {offsets = [8, 0], sizes = [1, 256], strides = [1, 1]} : vector<32x256xf32> to vector<1x256xf32>
    %164 = vector.extract_strided_slice %153 {offsets = [9, 0], sizes = [1, 256], strides = [1, 1]} : vector<32x256xf32> to vector<1x256xf32>
    %165 = vector.extract_strided_slice %153 {offsets = [10, 0], sizes = [1, 256], strides = [1, 1]} : vector<32x256xf32> to vector<1x256xf32>
    %166 = vector.extract_strided_slice %153 {offsets = [11, 0], sizes = [1, 256], strides = [1, 1]} : vector<32x256xf32> to vector<1x256xf32>
    %167 = vector.extract_strided_slice %153 {offsets = [12, 0], sizes = [1, 256], strides = [1, 1]} : vector<32x256xf32> to vector<1x256xf32>
    %168 = vector.extract_strided_slice %153 {offsets = [13, 0], sizes = [1, 256], strides = [1, 1]} : vector<32x256xf32> to vector<1x256xf32>
    %169 = vector.extract_strided_slice %153 {offsets = [14, 0], sizes = [1, 256], strides = [1, 1]} : vector<32x256xf32> to vector<1x256xf32>
    %170 = vector.extract_strided_slice %153 {offsets = [15, 0], sizes = [1, 256], strides = [1, 1]} : vector<32x256xf32> to vector<1x256xf32>
    %171 = tpu.concatenate %163, %164, %165, %166, %167, %168, %169, %170 in 1 : vector<1x256xf32>, vector<1x256xf32>, vector<1x256xf32>, vector<1x256xf32>, vector<1x256xf32>, vector<1x256xf32>, vector<1x256xf32>, vector<1x256xf32> -> vector<1x2048xf32>
    %172 = vector.extract_strided_slice %153 {offsets = [16, 0], sizes = [1, 256], strides = [1, 1]} : vector<32x256xf32> to vector<1x256xf32>
    %173 = vector.extract_strided_slice %153 {offsets = [17, 0], sizes = [1, 256], strides = [1, 1]} : vector<32x256xf32> to vector<1x256xf32>
    %174 = vector.extract_strided_slice %153 {offsets = [18, 0], sizes = [1, 256], strides = [1, 1]} : vector<32x256xf32> to vector<1x256xf32>
    %175 = vector.extract_strided_slice %153 {offsets = [19, 0], sizes = [1, 256], strides = [1, 1]} : vector<32x256xf32> to vector<1x256xf32>
    %176 = vector.extract_strided_slice %153 {offsets = [20, 0], sizes = [1, 256], strides = [1, 1]} : vector<32x256xf32> to vector<1x256xf32>
    %177 = vector.extract_strided_slice %153 {offsets = [21, 0], sizes = [1, 256], strides = [1, 1]} : vector<32x256xf32> to vector<1x256xf32>
    %178 = vector.extract_strided_slice %153 {offsets = [22, 0], sizes = [1, 256], strides = [1, 1]} : vector<32x256xf32> to vector<1x256xf32>
    %179 = vector.extract_strided_slice %153 {offsets = [23, 0], sizes = [1, 256], strides = [1, 1]} : vector<32x256xf32> to vector<1x256xf32>
    %180 = tpu.concatenate %172, %173, %174, %175, %176, %177, %178, %179 in 1 : vector<1x256xf32>, vector<1x256xf32>, vector<1x256xf32>, vector<1x256xf32>, vector<1x256xf32>, vector<1x256xf32>, vector<1x256xf32>, vector<1x256xf32> -> vector<1x2048xf32>
    %181 = vector.extract_strided_slice %153 {offsets = [24, 0], sizes = [1, 256], strides = [1, 1]} : vector<32x256xf32> to vector<1x256xf32>
    %182 = vector.extract_strided_slice %153 {offsets = [25, 0], sizes = [1, 256], strides = [1, 1]} : vector<32x256xf32> to vector<1x256xf32>
    %183 = vector.extract_strided_slice %153 {offsets = [26, 0], sizes = [1, 256], strides = [1, 1]} : vector<32x256xf32> to vector<1x256xf32>
    %184 = vector.extract_strided_slice %153 {offsets = [27, 0], sizes = [1, 256], strides = [1, 1]} : vector<32x256xf32> to vector<1x256xf32>
    %185 = vector.extract_strided_slice %153 {offsets = [28, 0], sizes = [1, 256], strides = [1, 1]} : vector<32x256xf32> to vector<1x256xf32>
    %186 = vector.extract_strided_slice %153 {offsets = [29, 0], sizes = [1, 256], strides = [1, 1]} : vector<32x256xf32> to vector<1x256xf32>
    %187 = vector.extract_strided_slice %153 {offsets = [30, 0], sizes = [1, 256], strides = [1, 1]} : vector<32x256xf32> to vector<1x256xf32>
    %188 = vector.extract_strided_slice %153 {offsets = [31, 0], sizes = [1, 256], strides = [1, 1]} : vector<32x256xf32> to vector<1x256xf32>
    %189 = tpu.concatenate %181, %182, %183, %184, %185, %186, %187, %188 in 1 : vector<1x256xf32>, vector<1x256xf32>, vector<1x256xf32>, vector<1x256xf32>, vector<1x256xf32>, vector<1x256xf32>, vector<1x256xf32>, vector<1x256xf32> -> vector<1x2048xf32>
    %190 = tpu.concatenate %162, %171, %180, %189 in 0 : vector<1x2048xf32>, vector<1x2048xf32>, vector<1x2048xf32>, vector<1x2048xf32> -> vector<4x2048xf32>
    %c0_48 = arith.constant 0 : index
    %c0_49 = arith.constant 0 : index
    %191 = vector.load %arg5[%c0_48, %c0_49] : memref<2048x128xf32, #tpu.memory_space<vmem>>, vector<2048x128xf32>
    %cst_50 = arith.constant dense<0.000000e+00> : vector<4x128xf32>
    %192 = tpu.matmul %190, %191, %cst_50 {dimension_numbers = #tpu.dot_dimension_numbers<[1], [0], [0], [1], [0, 0, 1, 1], [], []>} : vector<4x2048xf32>, vector<2048x128xf32>, vector<4x128xf32> -> vector<4x128xf32>
    %c0_51 = arith.constant 0 : index
    %c0_52 = arith.constant 0 : index
    %193 = vector.load %arg6[%c0_51, %c0_52] : memref<1x128xf32, #tpu.memory_space<vmem>>, vector<1x128xf32>
    %194 = vector.broadcast %193 : vector<1x128xf32> to vector<4x128xf32>
    %195 = arith.addf %192, %194 : vector<4x128xf32>
    %196 = math.tanh %195 : vector<4x128xf32>
    %c0_53 = arith.constant 0 : index
    %c0_54 = arith.constant 0 : index
    %197 = vector.load %arg7[%c0_53, %c0_54] : memref<128x128xf32, #tpu.memory_space<vmem>>, vector<128x128xf32>
    %cst_55 = arith.constant dense<0.000000e+00> : vector<4x128xf32>
    %198 = tpu.matmul %196, %197, %cst_55 {dimension_numbers = #tpu.dot_dimension_numbers<[1], [0], [0], [1], [0, 0, 1, 1], [], []>} : vector<4x128xf32>, vector<128x128xf32>, vector<4x128xf32> -> vector<4x128xf32>
    %c0_56 = arith.constant 0 : index
    %c0_57 = arith.constant 0 : index
    %199 = vector.load %arg8[%c0_56, %c0_57] : memref<1x128xf32, #tpu.memory_space<vmem>>, vector<1x128xf32>
    %200 = vector.broadcast %199 : vector<1x128xf32> to vector<4x128xf32>
    %201 = arith.addf %198, %200 : vector<4x128xf32>
    %c0_58 = arith.constant 0 : index
    %c0_59 = arith.constant 0 : index
    %c0_60 = arith.constant 0 : index
    %202 = vector.load %arg9[%c0_58, %c0_59, %c0_60] : memref<1x4x128xf32, #tpu.memory_space<vmem>>, vector<1x4x128xf32>
    %203 = vector.shape_cast %202 : vector<1x4x128xf32> to vector<4x128xf32>
    %204 = vector.shape_cast %201 : vector<4x128xf32> to vector<1x4x128xf32>
    tpu.vector_store %arg9[%c0_58, %c0_59, %c0_60], %204 {strides = array<i32>} : memref<1x4x128xf32, #tpu.memory_space<vmem>>, vector<1x4x128xf32>,
    return
  }
  func.func @transform_0(%arg0: i32) -> (i32, i32, i32) {
    %c0_i32 = arith.constant 0 : i32
    %c0_i32_0 = arith.constant 0 : i32
    %c0_i32_1 = arith.constant 0 : i32
    return %arg0, %c0_i32, %c0_i32_0 : i32, i32, i32
  }
  func.func @transform_1(%arg0: i32) -> (i32, i32) {
    %c0_i32 = arith.constant 0 : i32
    %c0_i32_0 = arith.constant 0 : i32
    %c0_i32_1 = arith.constant 0 : i32
    return %c0_i32, %c0_i32_0 : i32, i32
  }
  func.func @transform_2(%arg0: i32) -> (i32, i32) {
    %c0_i32 = arith.constant 0 : i32
    %c0_i32_0 = arith.constant 0 : i32
    %c0_i32_1 = arith.constant 0 : i32
    return %c0_i32, %c0_i32_0 : i32, i32
  }
  func.func @transform_3(%arg0: i32) -> (i32, i32) {
    %c0_i32 = arith.constant 0 : i32
    %c0_i32_0 = arith.constant 0 : i32
    %c0_i32_1 = arith.constant 0 : i32
    return %c0_i32, %c0_i32_0 : i32, i32
  }
  func.func @transform_4(%arg0: i32) -> (i32, i32) {
    %c0_i32 = arith.constant 0 : i32
    %c0_i32_0 = arith.constant 0 : i32
    %c0_i32_1 = arith.constant 0 : i32
    return %c0_i32, %c0_i32_0 : i32, i32
  }
  func.func @transform_5(%arg0: i32) -> (i32, i32) {
    %c0_i32 = arith.constant 0 : i32
    %c0_i32_0 = arith.constant 0 : i32
    %c0_i32_1 = arith.constant 0 : i32
    return %c0_i32, %c0_i32_0 : i32, i32
  }
  func.func @transform_6(%arg0: i32) -> (i32, i32) {
    %c0_i32 = arith.constant 0 : i32
    %c0_i32_0 = arith.constant 0 : i32
    %c0_i32_1 = arith.constant 0 : i32
    return %c0_i32, %c0_i32_0 : i32, i32
  }
  func.func @transform_7(%arg0: i32) -> (i32, i32) {
    %c0_i32 = arith.constant 0 : i32
    %c0_i32_0 = arith.constant 0 : i32
    %c0_i32_1 = arith.constant 0 : i32
    return %c0_i32, %c0_i32_0 : i32, i32
  }
  func.func @transform_8(%arg0: i32) -> (i32, i32, i32) {
    %c0_i32 = arith.constant 0 : i32
    %c0_i32_0 = arith.constant 0 : i32
    %c0_i32_1 = arith.constant 0 : i32
    return %arg0, %c0_i32, %c0_i32_0 : i32, i32, i32
  }
}

</mosaic_0001>

<bundles_post_ra>
// kernel: convnet_forward.1
= control target key start
LH: loop header
LB: loop body
LE: loop exit
PB: predicated region body
PF: predicated region fallthrough
CT: control target
= control target key end

     0   :  { %13 = vsyncpa [#allocation3], 0  ;;  %s17241_s0 = inlined_call_operand.vmem [shape: f32[2,8,4096], index: 0, kind: input, shape index: {}]   ;;  %s17242_s1 = inlined_call_operand.vmem [shape: f32[8,72], index: 1, kind: input, shape index: {}]   ;;  %s17243_s2 = inlined_call_operand.vmem [shape: f32[8,72], index: 2, kind: input, shape index: {}]   ;;  %s17244_s3 = inlined_call_operand.vmem [shape: f32[1024,256], index: 3, kind: input, shape index: {}]   ;;  %s17245_s4 = inlined_call_operand.vmem [shape: f32[2048,128], index: 4, kind: input, shape index: {}]   ;;  %s17246_s5 = inlined_call_operand.vmem [shape: f32[1,128], index: 5, kind: input, shape index: {}]   ;;  %s17247_s6 = inlined_call_operand.vmem [shape: f32[128,128], index: 6, kind: input, shape index: {}]   ;;  %s17248_s7 = inlined_call_operand.vmem [shape: f32[1,128], index: 7, kind: input, shape index: {}]   ;;  %s17249_s8 = inlined_call_operand.hbm [shape: f32[2,4,128], index: 8, kind: output, shape index: {}]  }
   0x1   :  { %15 = vsyncpa [#allocation3 + $0x1], 0  ;;  %s10090_s27 = smov 0   ;;  %s10092_s28 = smov 0  }
   0x2   :  { %s10094_s29 = smov 0   ;;  %s10096_s30 = smov 0  }
   0x3 LB: > { %s10111_s9 = sadd.s32 4294967295, %s10030_s30   ;;  %s8642_s10 = sadd.s32 4294967294, %s10030_s30   ;;  %s10030_s30 = sphi %s10096_s30, %s18610_s30   ;;  %s10026_s29 = sphi %s10094_s29, %s18609_s29   ;;  %s10022_s28 = sphi %s10092_s28, %s18608_s28   ;;  %s10018_s27 = sphi %s10090_s27, %s18607_s27  }
   0x4   : > { %s10115_s11 = sadd.s32 1, %s10030_s30   ;;  %s201_s12 = sadd.s32 1, %s10026_s29 }
   0x5   : > { %s198_s13 = ssub.s32 %s10030_s30, %s10115_s11  ;;  %p211_p0 = scmp.ne.s32.totalorder %s10026_s29, %s10022_s28 }
   0x6   : > { %p199_p1 = scmp.eq.s32.totalorder %s198_s13, 0  ;;  %p212_p2 = scmp.eq.s32.totalorder %s10111_s9, 1 }
   0x7   : > { %p217_p3 = scmp.ne.s32.totalorder %s10022_s28, %s10018_s27  ;;  %p218_p4 = scmp.eq.s32.totalorder %s8642_s10, 1 }
   0x8   : > { %s10126_s14 = scalar_select %p199_p1, %s10026_s29, %s201_s12  }
   0x9   : > { %p10128_p5 = por %p212_p2, %p211_p0  ;;  %p10132_p6 = por %p218_p4, %p217_p3 }
   0xa   : > { %p8645_p7 = scmp.ge.s32.totalorder %s10030_s30, 1  ;;  %p265_p8 = scmp.lt.s32.totalorder %s10030_s30, 3 }
   0xc   : > { %p266_p9 = pnand %p8645_p7, %p265_p8 }
   0xe   : > { %269 = sbr.rel (%p266_p9) target bundleno = 2574 (0xa0e), region = 52 }
  0x13   : > { %p299_p10 = scmp.lt.s32.totalorder %s10111_s9, 1  ;;  %s10032_s22 = smov 95   ;;  %v17265_v4 = vmov 0.0   ;;  %v304_v10 = vlaneseq  ;;  %v17510_v47 = vmov 0  ;;  %v17513_v50 = vmov 0 }
  0x14   : > { %s10033_s23 = smov 96   ;;  %s10034_s24 = smov 97   ;;  %3006 = vmatprep.mubr.f32.mxu1 %v17265_v4  ;;  %3148 = vmatprep.mubr.f32.mxu0 %v17265_v4  ;;  %vm17304_vm15 = vcmask 588800  }
  0x15   : > { %s300_s17 = scalar_select %p299_p10, %s10111_s9, 1  ;;  %v10260_v11 = vand.u32 127, %v304_v10 }
  0x16   : > { %s10035_s25 = smov 127   ;;  %s10036_s26 = smov 1  }
  0x17   : > { %s9123_s18 = sshll.u32 %s300_s17, 8  ;;  %s10037_s10 = smov 31   ;;  %v306_v13 = vadd.s32 128, %v10260_v11  ;;  %v341_v15 = vand.u32 1023, %v10260_v11  ;;  %vm17259_vm1 = vcmp.lt.s32.totalorder %v10260_v11, 95  ;;  %vm17260_vm3 = vcmp.lt.s32.totalorder %v10260_v11, 96 }
  0x18   : > { %s10143_s21 = scalar_lea.vmem %s17241_s0, %s9123_s18  ;;  %s10038_s12 = smov 32   ;;  %vm17313_vm4 = vcmp.lt.s32.totalorder %v10260_v11, 97  ;;  %vm17312_vm7 = vcmp.lt.s32.totalorder %v10260_v11, 127  ;;  %vm17282_vm8 = vcmp.lt.s32.totalorder %v10260_v11, 1  ;;  %vm17261_vm10 = vcmp.lt.s32.totalorder %v10260_v11, 31 }
  0x19   : > { %v10146_v0 = vld [vmem:[%s10143_s21 + $0x8] sm:$0xff]  ;;  %v10149_v1 = vld [vmem:[%s10143_s21] sm:$0xff]  ;;  %v10156_v2 = vld [vmem:[%s10143_s21 + $0x10] sm:$0xff]  ;;  %s10040_s13 = smov 33   ;;  %v348_v14 = vand.u32 1023, %v306_v13  ;;  %v10281_v19 = vand.u32 31, %v341_v15 }
  0x1a   : > { %2714 = vrot.lane.b32.xlu0 %v10146_v0, %s10032_s22  ;;  %2712 = vrot.lane.b32.xlu1 %v10149_v1, %s10032_s22  ;;  %v1264_v3 = vld [vmem:[%s10143_s21 + $0xf8] sm:$0xff]  ;;  %v1237_v6 = vld [vmem:[%s10143_s21 + $0x20] sm:$0xff]  ;;  %vm10388_vm9 = vcmp.ge.s32.totalorder %v341_v15, 32  ;;  %vm17256_vm12 = vcmp.lt.s32.totalorder %v10260_v11, 32  ;;  %v308_v53 = vadd.s32 384, %v10260_v11  ;;  %v307_v56 = vadd.s32 256, %v10260_v11 }
  0x1b   : > { %v10202_v5 = vld [vmem:[%s10143_s21 + $0x18] sm:$0xff]  ;;  %v1241_v8 = vld [vmem:[%s10143_s21 + $0x40] sm:$0xff]  ;;  %v10241_v9 = vld [vmem:[%s10143_s21 + $0x30] sm:$0xff]  ;;  %v10275_v16 = vand.u32 31, %v348_v14  ;;  %17509 = vst [vmem:[#allocation6_spill] sm:$0xff] %v10281_v19  ;;  %vm17251_vm2 = vcmp.le.s32.totalorder %v10281_v19, 30 }
  0x1c   : > { %v10234_v7 = vld [vmem:[%s10143_s21 + $0x38] sm:$0xff]  ;;  %v1238_v12 = vld [vmem:[%s10143_s21 + $0x28] sm:$0xff]  ;;  %v1245_v31 = vld [vmem:[%s10143_s21 + $0x60] sm:$0xff]  ;;  %vm17250_vm6 = vcmp.ge.s32.totalorder %v10281_v19, 1  ;;  %v17511_v47 = vsel %vm10388_vm9, 4294967295, %v17510_v47  ;;  %v362_v59 = vand.u32 1023, %v308_v53 }
  0x1d   : > { %17508 = vst [vmem:[#allocation5_spill] sm:$0xff] %v10275_v16  ;;  %vm17253_vm0 = vcmp.le.s32.totalorder %v10275_v16, 30  ;;  %v10321_v28 = vld [vmem:[%s10143_s21 + $0x58] sm:$0xff]  ;;  %vm17252_vm5 = vcmp.ge.s32.totalorder %v10275_v16, 1  ;;  %v10336_v33 = vld [vmem:[%s10143_s21 + $0x50] sm:$0xff]  ;;  %17512 = vst [vmem:[#allocation7_spill] sm:$0xff] %v17511_v47 }
  0x1e   : > { %2716 = vrot.lane.b32.xlu0 %v10156_v2, %s10032_s22  ;;  %2521 = vrot.lane.b32.xlu1 %v10146_v0, %s10033_s23  ;;  %vm10407_vm11 = vmand %vm10388_vm9, %vm17251_vm2  ;;  %v1242_v58 = vld [vmem:[%s10143_s21 + $0x48] sm:$0xff]  ;;  %v355_v62 = vand.u32 1023, %v307_v56  ;;  %vm17362_vm13 = vcmp.lt.s32.totalorder %v10260_v11, 33  ;;  %v10473_v13 = vld [vmem:[%s17242_s1] sm:$0xff]  ;;  %s10042_s20 = smov 64   ;;  %s9120_s17 = sshll.u32 %s10111_s9, 6 }
  0x1f   : > { %v17514_v50 = vsel %vm10407_vm11, 4294967295, %v17513_v50  ;;  %vm10458_vm14 = vmand %vm10388_vm9, %vm17250_vm6  ;;  %s10044_s18 = smov [#allocation2]  }
  0x20   : > { %17515 = vst [vmem:[#allocation8_spill] sm:$0xff] %v17514_v50  ;;  %v320_v50 = vadd.s32 1920, %v10260_v11  ;;  %s9974_s9 = sshll.u32 %s10044_s18, 4  ;;  %s9975_s9 = int_to_ptr.vmem [resolvable:$false] %s9974_s9 }
  0x22   : > { %2523 = vrot.lane.b32.xlu0 %v10156_v2, %s10033_s23  ;;  %2519 = vrot.lane.b32.xlu1 %v10149_v1, %s10033_s23 }
  0x26   : > { %2296 = vrot.lane.b32.xlu0 %v10146_v0, %s10034_s24  ;;  %2298 = vrot.lane.b32.xlu1 %v10156_v2, %s10034_s24 }
  0x2a   : > { %2294 = vrot.lane.b32.xlu0 %v10149_v1, %s10034_s24  ;;  %2103 = vrot.lane.b32.xlu1 %v10146_v0, %s10035_s25 }
  0x2e   : > { %2105 = vrot.lane.b32.xlu0 %v10156_v2, %s10035_s25  ;;  %2101 = vrot.lane.b32.xlu1 %v10149_v1, %s10035_s25 }
  0x32   : > { %1908 = vrot.lane.b32.xlu0 %v10149_v1, %s10036_s26  ;;  %1910 = vrot.lane.b32.xlu1 %v10146_v0, %s10036_s26 }
  0x36   : > { %1970 = vrot.lane.b32.xlu0 %v1264_v3, %s10036_s26  ;;  %1683 = vrot.lane.b32.xlu1 %v10149_v1, %s10037_s10 }
  0x3a   : > { %1685 = vrot.lane.b32.xlu0 %v10146_v0, %s10037_s10  ;;  %1745 = vrot.lane.b32.xlu1 %v1264_v3, %s10037_s10 }
  0x3e   : > { %1490 = vrot.lane.b32.xlu0 %v10149_v1, %s10038_s12  ;;  %1492 = vrot.lane.b32.xlu1 %v10146_v0, %s10038_s12 }
  0x42   : > { %1552 = vrot.lane.b32.xlu0 %v1264_v3, %s10038_s12  ;;  %1265 = vrot.lane.b32.xlu1 %v10149_v1, %s10040_s13 }
  0x46   : > { %1267 = vrot.lane.b32.xlu0 %v10146_v0, %s10040_s13  ;;  %1327 = vrot.lane.b32.xlu1 %v1264_v3, %s10040_s13 }
  0x4a   : > { %2718 = vrot.lane.b32.xlu0 %v10202_v5, %s10032_s22  ;;  %2720 = vrot.lane.b32.xlu1 %v1237_v6, %s10032_s22 }
  0x4e   : > { %2525 = vrot.lane.b32.xlu0 %v10202_v5, %s10033_s23  ;;  %2527 = vrot.lane.b32.xlu1 %v1237_v6, %s10033_s23 }
  0x52   : > { %2300 = vrot.lane.b32.xlu0 %v10202_v5, %s10034_s24  ;;  %2302 = vrot.lane.b32.xlu1 %v1237_v6, %s10034_s24 }
  0x56   : > { %2107 = vrot.lane.b32.xlu0 %v10202_v5, %s10035_s25  ;;  %2109 = vrot.lane.b32.xlu1 %v1237_v6, %s10035_s25  ;;  %v17517_v6 = vmov 0 }
  0x57   : > { %v17518_v6 = vsel %vm10458_vm14, 4294967295, %v17517_v6 }
  0x58   : > { %17519 = vst [vmem:[#allocation10_spill] sm:$0xff] %v17518_v6 }
  0x5a   : > { %1912 = vrot.lane.b32.xlu0 %v10156_v2, %s10036_s26  ;;  %1914 = vrot.lane.b32.xlu1 %v10202_v5, %s10036_s26 }
  0x5e   : > { %1687 = vrot.lane.b32.xlu0 %v10156_v2, %s10037_s10  ;;  %1689 = vrot.lane.b32.xlu1 %v10202_v5, %s10037_s10 }
  0x62   : > { %1494 = vrot.lane.b32.xlu0 %v10156_v2, %s10038_s12  ;;  %1496 = vrot.lane.b32.xlu1 %v10202_v5, %s10038_s12 }
  0x66   : > { %1269 = vrot.lane.b32.xlu0 %v10156_v2, %s10040_s13  ;;  %1271 = vrot.lane.b32.xlu1 %v10202_v5, %s10040_s13 }
  0x6a   : > { %2726 = vrot.lane.b32.xlu0 %v10234_v7, %s10032_s22  ;;  %2728 = vrot.lane.b32.xlu1 %v1241_v8, %s10032_s22 }
  0x6e   : > { %2724 = vrot.lane.b32.xlu0 %v10241_v9, %s10032_s22  ;;  %2533 = vrot.lane.b32.xlu1 %v10234_v7, %s10033_s23 }
  0x72   : > { %2535 = vrot.lane.b32.xlu0 %v1241_v8, %s10033_s23  ;;  %2531 = vrot.lane.b32.xlu1 %v10241_v9, %s10033_s23 }
  0x76   : > { %2308 = vrot.lane.b32.xlu0 %v10234_v7, %s10034_s24  ;;  %2310 = vrot.lane.b32.xlu1 %v1241_v8, %s10034_s24 }
  0x7a   : > { %2306 = vrot.lane.b32.xlu0 %v10241_v9, %s10034_s24  ;;  %2115 = vrot.lane.b32.xlu1 %v10234_v7, %s10035_s25 }
  0x7e   : > { %2117 = vrot.lane.b32.xlu0 %v1241_v8, %s10035_s25  ;;  %2113 = vrot.lane.b32.xlu1 %v10241_v9, %s10035_s25  ;;  %v10462_v8 = vand.u32 31, %v355_v62 }
  0x80   : > { %17520 = vst [vmem:[#allocation11_spill] sm:$0xff] %v10462_v8 }
  0x82   : > { %1920 = vrot.lane.b32.xlu0 %v10241_v9, %s10036_s26  ;;  %1922 = vrot.lane.b32.xlu1 %v10234_v7, %s10036_s26 }
  0x86   : > { %1918 = vrot.lane.b32.xlu0 %v1238_v12, %s10036_s26  ;;  %1695 = vrot.lane.b32.xlu1 %v10241_v9, %s10037_s10 }
  0x8a   : > { %1697 = vrot.lane.b32.xlu0 %v10234_v7, %s10037_s10  ;;  %1693 = vrot.lane.b32.xlu1 %v1238_v12, %s10037_s10 }
  0x8c   : > { %v2715_v17 = vpop.permute.xlu0 %2714  ;;  %v10277_v18 = vpop.permute.xlu1 %2712 }
  0x8d   : > { %v2807_v23 = vsel %vm17259_vm1, %v10277_v18, %v2715_v17 }
  0x8e   : > { %1502 = vrot.lane.b32.xlu0 %v10241_v9, %s10038_s12  ;;  %1504 = vrot.lane.b32.xlu1 %v10234_v7, %s10038_s12 }
  0x90   : > { %v10289_v20 = vpop.permute.xlu0 %2716  ;;  %v2522_v21 = vpop.permute.xlu1 %2521 }
  0x91   : > { %v2806_v22 = vsel %vm17259_vm1, %v2715_v17, %v10289_v20 }
  0x92   : > { %8649 = vmatprep.subr.msk.mxu1 %vm17253_vm0, %v2806_v22  ;;  %1500 = vrot.lane.b32.xlu0 %v1238_v12, %s10038_s12 }
  0x93   : > { %1277 = vrot.lane.b32.xlu1 %v10241_v9, %s10040_s13  ;;  %8650 = vmatpush1.msk.msra.mxu1 %vm17251_vm2, %v2807_v23 }
  0x94   : > { %v10306_v24 = vpop.permute.xlu0 %2523  ;;  %v10308_v25 = vpop.permute.xlu1 %2519 }
  0x95   : > { %v2613_v26 = vsel %vm17260_vm3, %v2522_v21, %v10306_v24  ;;  %v2614_v27 = vsel %vm17260_vm3, %v10308_v25, %v2522_v21 }
  0x96   : > { %1279 = vrot.lane.b32.xlu0 %v10234_v7, %s10040_s13  ;;  %2958 = vmatprep.subr.mxu1 %v2613_v26 }
  0x97   : > { %1275 = vrot.lane.b32.xlu1 %v1238_v12, %s10040_s13  ;;  %2959 = vmatpush1.msra.mxu1 %v2614_v27 }
  0x98   : > { %v2297_v29 = vpop.permute.xlu0 %2296  ;;  %v10324_v30 = vpop.permute.xlu1 %2298 }
  0x99   : > { %v2388_v32 = vsel %vm17313_vm4, %v2297_v29, %v10324_v30 }
  0x9a   : > { %2734 = vrot.lane.b32.xlu0 %v10321_v28, %s10032_s22  ;;  %8651 = vmatprep.subr.msk.mxu1 %vm17252_vm5, %v2388_v32  ;;  %v10532_v32 = vld [vmem:[%s10143_s21 + $0x78] sm:$0xff] }
  0x9b   : > { %2736 = vrot.lane.b32.xlu1 %v1245_v31, %s10032_s22 }
  0x9c   : > { %v10339_v34 = vpop.permute.xlu0 %2294  ;;  %v2104_v35 = vpop.permute.xlu1 %2103 }
  0x9d   : > { %v2389_v36 = vsel %vm17313_vm4, %v10339_v34, %v2297_v29 }
  0x9e   : > { %2732 = vrot.lane.b32.xlu0 %v10336_v33, %s10032_s22  ;;  %8652 = vmatpush1.msk.msra.mxu1 %vm17250_vm6, %v2389_v36  ;;  %v1249_v36 = vld [vmem:[%s10143_s21 + $0x80] sm:$0xff] }
  0x9f   : > { %2541 = vrot.lane.b32.xlu1 %v10321_v28, %s10033_s23 }
  0xa0   : > { %v10351_v37 = vpop.permute.xlu0 %2105  ;;  %v10353_v38 = vpop.permute.xlu1 %2101 }
  0xa1   : > { %v2195_v39 = vsel %vm17312_vm7, %v2104_v35, %v10351_v37  ;;  %v2196_v40 = vsel %vm17312_vm7, %v10353_v38, %v2104_v35 }
  0xa2   : > { %2543 = vrot.lane.b32.xlu0 %v1245_v31, %s10033_s23  ;;  %8653 = vmatprep.subr.msk.mxu1 %vm17253_vm0, %v2195_v39 }
  0xa3   : > { %2539 = vrot.lane.b32.xlu1 %v10336_v33, %s10033_s23  ;;  %8654 = vmatpush1.msk.msra.mxu1 %vm17251_vm2, %v2196_v40  ;;  %vm17254_vm2 = vcmp.le.s32.totalorder %v10462_v8, 30 }
  0xa4   : > { %v1909_v41 = vpop.permute.xlu0 %1908  ;;  %2964 = vmatprep.subr.mxu1 %v10146_v0  ;;  %v10370_v42 = vpop.permute.xlu1 %1910  ;;  %v10448_v0 = vand.u32 31, %v362_v59 }
  0xa5   : > { %2965 = vmatpush1.msra.mxu1 %v10149_v1  ;;  %v2003_v43 = vsel %vm17282_vm8, %v1909_v41, %v10370_v42 }
  0xa6   : > { %2316 = vrot.lane.b32.xlu0 %v10321_v28, %s10034_s24  ;;  %8655 = vmatprep.subr.msk.mxu1 %vm17252_vm5, %v2003_v43  ;;  %17516 = vst [vmem:[#allocation9_spill] sm:$0xff] %v10448_v0 }
  0xa7   : > { %2318 = vrot.lane.b32.xlu1 %v1245_v31, %s10034_s24 }
  0xa8   : > { %v10381_v44 = vpop.permute.xlu0 %1970  ;;  %v1684_v45 = vpop.permute.xlu1 %1683 }
  0xa9   : > { %v2004_v46 = vsel %vm17282_vm8, %v10381_v44, %v1909_v41  ;;  %v10551_v41 = vld [vmem:[%s10143_s21 + $0x70] sm:$0xff] }
  0xaa   : > { %2314 = vrot.lane.b32.xlu0 %v10336_v33, %s10034_s24  ;;  %8656 = vmatpush1.msk.msra.mxu1 %vm17250_vm6, %v2004_v46  ;;  %vm17255_vm6 = vcmp.le.s32.totalorder %v10448_v0, 30 }
  0xab   : > { %2123 = vrot.lane.b32.xlu1 %v10321_v28, %s10035_s25 }
  0xac   : > { %v10399_v48 = vpop.permute.xlu0 %1685  ;;  %v10401_v49 = vpop.permute.xlu1 %1745 }
  0xad   : > { %v1778_v51 = vsel %vm17261_vm10, %v1684_v45, %v10399_v48  ;;  %v1779_v52 = vsel %vm17261_vm10, %v10401_v49, %v1684_v45  ;;  %v312_v45 = vadd.s32 896, %v10260_v11 }
  0xae   : > { %2125 = vrot.lane.b32.xlu0 %v1245_v31, %s10035_s25  ;;  %8657 = vmatprep.subr.msk.mxu1 %vm17253_vm0, %v1778_v51  ;;  %vm17257_vm0 = vcmp.ge.s32.totalorder %v10462_v8, 1 }
  0xaf   : > { %2121 = vrot.lane.b32.xlu1 %v10336_v33, %s10035_s25  ;;  %8658 = vmatpush1.msk.msra.mxu1 %vm10407_vm11, %v1779_v52 }
  0xb0   : > { %v1491_v54 = vpop.permute.xlu0 %1490  ;;  %v10426_v55 = vpop.permute.xlu1 %1492 }
  0xb1   : > { %v1585_v57 = vsel %vm17256_vm12, %v1491_v54, %v10426_v55 }
  0xb2   : > { %1928 = vrot.lane.b32.xlu0 %v10336_v33, %s10036_s26  ;;  %2970 = vmatprep.subr.mxu1 %v1585_v57 }
  0xb3   : > { %1930 = vrot.lane.b32.xlu1 %v10321_v28, %s10036_s26 }
  0xb4   : > { %v10437_v60 = vpop.permute.xlu0 %1552  ;;  %v1266_v61 = vpop.permute.xlu1 %1265 }
  0xb5   : > { %v1586_v63 = vsel %vm17256_vm12, %v10437_v60, %v1491_v54  ;;  %v311_v54 = vadd.s32 768, %v10260_v11 }
  0xb6   : > { %1926 = vrot.lane.b32.xlu0 %v1242_v58, %s10036_s26  ;;  %8659 = vmatpush1.msk.msra.mxu1 %vm10388_vm9, %v1586_v63 }
  0xb7   : > { %1703 = vrot.lane.b32.xlu1 %v10336_v33, %s10037_s10 }
  0xb8   : > { %v10450_v1 = vpop.permute.xlu0 %1267  ;;  %v10452_v3 = vpop.permute.xlu1 %1327 }
  0xb9   : > { %v1360_v10 = vsel %vm17362_vm13, %v1266_v61, %v10450_v1  ;;  %v1361_v12 = vsel %vm17362_vm13, %v10452_v3, %v1266_v61  ;;  %v383_v61 = vand.u32 1023, %v311_v54 }
  0xba   : > { %1705 = vrot.lane.b32.xlu0 %v10321_v28, %s10037_s10  ;;  %8660 = vmatprep.subr.msk.mxu1 %vm17252_vm5, %v1360_v10  ;;  %vm17258_vm5 = vcmp.ge.s32.totalorder %v10448_v0, 1  ;;  %v17522_v10 = vmov 0 }
  0xbb   : > { %1701 = vrot.lane.b32.xlu1 %v1242_v58, %s10037_s10  ;;  %8661 = vmatpush1.msk.msra.mxu1 %vm10458_vm14, %v1361_v12 }
  0xbc   : > { %v2719_v14 = vpop.permute.xlu0 %2718  ;;  %v10483_v15 = vpop.permute.xlu1 %2720  ;;  %8662 = vmatmul.mubr.msk.f32.vlgmr.msra.gmra.mxu1 %vm17304_vm15, %v10473_v13 }
  0xbd   : > { %v2805_v17 = vsel %vm17259_vm1, %v10289_v20, %v2719_v14  ;;  %v2804_v21 = vsel %vm17259_vm1, %v2719_v14, %v10483_v15  ;;  %3077 = vmatprep.mubr.f32.mxu1 %v17265_v4  ;;  %v10630_v14 = vand.u32 31, %v383_v61 }
  0xbe   : > { %1510 = vrot.lane.b32.xlu0 %v10336_v33, %s10038_s12  ;;  %8663 = vmatprep.subr.msk.mxu1 %vm17255_vm6, %v2804_v21 }
  0xbf   : > { %1512 = vrot.lane.b32.xlu1 %v10321_v28, %s10038_s12  ;;  %8664 = vmatpush1.msk.msra.mxu1 %vm17254_vm2, %v2805_v17  ;;  %17528 = vst [vmem:[#allocation15_spill] sm:$0xff] %v10630_v14 }
  0xc0   : > { %v2526_v22 = vpop.permute.xlu0 %2525  ;;  %v10503_v20 = vpop.permute.xlu1 %2527 }
  0xc1   : > { %v2611_v23 = vsel %vm17260_vm3, %v2526_v22, %v10503_v20  ;;  %v2612_v26 = vsel %vm17260_vm3, %v10306_v24, %v2526_v22 }
  0xc2   : > { %1508 = vrot.lane.b32.xlu0 %v1242_v58, %s10038_s12  ;;  %3029 = vmatprep.subr.mxu1 %v2611_v23 }
  0xc3   : > { %1285 = vrot.lane.b32.xlu1 %v10336_v33, %s10040_s13  ;;  %3030 = vmatpush1.msra.mxu1 %v2612_v26 }
  0xc4   : > { %v2301_v27 = vpop.permute.xlu0 %2300  ;;  %v10515_v29 = vpop.permute.xlu1 %2302 }
  0xc5   : > { %v2387_v31 = vsel %vm17313_vm4, %v10324_v30, %v2301_v27  ;;  %v2386_v24 = vsel %vm17313_vm4, %v2301_v27, %v10515_v29 }
  0xc6   : > { %1287 = vrot.lane.b32.xlu0 %v10321_v28, %s10040_s13  ;;  %8665 = vmatprep.subr.msk.mxu1 %vm17258_vm5, %v2386_v24 }
  0xc7   : > { %1283 = vrot.lane.b32.xlu1 %v1242_v58, %s10040_s13  ;;  %8666 = vmatpush1.msk.msra.mxu1 %vm17257_vm0, %v2387_v31  ;;  %v10658_v31 = vld [vmem:[%s10143_s21 + $0x68] sm:$0xff] }
  0xc8   : > { %v2108_v35 = vpop.permute.xlu0 %2107  ;;  %v10534_v30 = vpop.permute.xlu1 %2109 }
  0xc9   : > { %v2194_v39 = vsel %vm17312_vm7, %v10351_v37, %v2108_v35  ;;  %v2193_v40 = vsel %vm17312_vm7, %v2108_v35, %v10534_v30 }
  0xca   : > { %2742 = vrot.lane.b32.xlu0 %v10532_v32, %s10032_s22  ;;  %8667 = vmatprep.subr.msk.mxu1 %vm17255_vm6, %v2193_v40  ;;  %v17529_v40 = vmov 0 }
  0xcb   : > { %2744 = vrot.lane.b32.xlu1 %v1249_v36, %s10032_s22  ;;  %8668 = vmatpush1.msk.msra.mxu1 %vm17254_vm2, %v2194_v39 }
  0xcc   : > { %v1913_v43 = vpop.permute.xlu0 %1912  ;;  %3035 = vmatprep.subr.mxu1 %v10202_v5  ;;  %v10554_v37 = vpop.permute.xlu1 %1914 }
  0xcd   : > { %v2002_v46 = vsel %vm17282_vm8, %v10370_v42, %v1913_v43  ;;  %3036 = vmatpush1.msra.mxu1 %v10156_v2  ;;  %v2001_v51 = vsel %vm17282_vm8, %v1913_v43, %v10554_v37  ;;  %v390_v2 = vand.u32 1023, %v312_v45 }
  0xce   : > { %2740 = vrot.lane.b32.xlu0 %v10551_v41, %s10032_s22  ;;  %8669 = vmatprep.subr.msk.mxu1 %vm17258_vm5, %v2001_v51 }
  0xcf   : > { %2549 = vrot.lane.b32.xlu1 %v10532_v32, %s10033_s23  ;;  %8670 = vmatpush1.msk.msra.mxu1 %vm17257_vm0, %v2002_v46 }
  0xd0   : > { %v1688_v5 = vpop.permute.xlu0 %1687  ;;  %v10572_v42 = vpop.permute.xlu1 %1689 }
  0xd1   : > { %v1777_v52 = vsel %vm17261_vm10, %v10399_v48, %v1688_v5  ;;  %v1776_v53 = vsel %vm17261_vm10, %v1688_v5, %v10572_v42  ;;  %v10590_v48 = vand.u32 31, %v390_v2 }
  0xd2   : > { %2551 = vrot.lane.b32.xlu0 %v1249_v36, %s10033_s23  ;;  %8671 = vmatprep.subr.msk.mxu1 %vm17255_vm6, %v1776_v53 }
  0xd3   : > { %2547 = vrot.lane.b32.xlu1 %v10551_v41, %s10033_s23  ;;  %8672 = vmatpush1.msk.msra.mxu1 %vm17254_vm2, %v1777_v52  ;;  %17521 = vst [vmem:[#allocation12_spill] sm:$0xff] %v10590_v48  ;;  %vm10603_vm2 = vcmp.lt.s32.totalorder %v390_v2, 992  ;;  %vm17262_vm6 = vcmp.le.s32.totalorder %v10590_v48, 30 }
  0xd4   : > { %v1495_v56 = vpop.permute.xlu0 %1494  ;;  %v10588_v57 = vpop.permute.xlu1 %1496  ;;  %v17523_v10 = vsel %vm10603_vm2, 4294967295, %v17522_v10 }
  0xd5   : > { %v1583_v58 = vsel %vm17256_vm12, %v1495_v56, %v10588_v57  ;;  %v1584_v59 = vsel %vm17256_vm12, %v10426_v55, %v1495_v56  ;;  %17524 = vst [vmem:[#allocation13_spill] sm:$0xff] %v17523_v10  ;;  %vm10626_vm12 = vmand %vm10603_vm2, %vm17262_vm6 }
  0xd6   : > { %2324 = vrot.lane.b32.xlu0 %v10532_v32, %s10034_s24  ;;  %3041 = vmatprep.subr.mxu1 %v1583_v58 }
  0xd7   : > { %2326 = vrot.lane.b32.xlu1 %v1249_v36, %s10034_s24  ;;  %3042 = vmatpush1.msra.mxu1 %v1584_v59 }
  0xd8   : > { %v1270_v62 = vpop.permute.xlu0 %1269  ;;  %v10601_v63 = vpop.permute.xlu1 %1271 }
  0xd9   : > { %v1359_v55 = vsel %vm17362_vm13, %v10450_v1, %v1270_v62  ;;  %v1358_v12 = vsel %vm17362_vm13, %v1270_v62, %v10601_v63  ;;  %v17525_v1 = vmov 0  ;;  %v10740_v62 = vld [vmem:[%s10143_s21 + $0x98] sm:$0xff] }
  0xda   : > { %2322 = vrot.lane.b32.xlu0 %v10551_v41, %s10034_s24  ;;  %8673 = vmatprep.subr.msk.mxu1 %vm17258_vm5, %v1358_v12  ;;  %v17526_v1 = vsel %vm10626_vm12, 4294967295, %v17525_v1  ;;  %vm17263_vm5 = vcmp.ge.s32.totalorder %v10590_v48, 1  ;;  %v10745_v12 = vld [vmem:[%s10143_s21 + $0xa0] sm:$0xff] }
  0xdb   : > { %2131 = vrot.lane.b32.xlu1 %v10532_v32, %s10035_s25  ;;  %8674 = vmatpush1.msk.msra.mxu1 %vm17257_vm0, %v1359_v55  ;;  %17527 = vst [vmem:[#allocation14_spill] sm:$0xff] %v17526_v1  ;;  %vm17269_vm0 = vcmp.le.s32.totalorder %v10630_v14, 30 }
  0xdc   : > { %v2727_v17 = vpop.permute.xlu0 %2726  ;;  %v10632_v21 = vpop.permute.xlu1 %2728  ;;  %8675 = vmatmul.mubr.msk.f32.vlgmr.msra.gmra.mxu1 %vm17304_vm15, %v10473_v13 }
  0xdd   : > { %v2800_v22 = vsel %vm17259_vm1, %v2727_v17, %v10632_v21  ;;  %3219 = vmatprep.mubr.f32.mxu1 %v17265_v4 }
  0xde   : > { %2133 = vrot.lane.b32.xlu0 %v1249_v36, %s10035_s25  ;;  %8689 = vmatprep.subr.msk.mxu1 %vm10626_vm12, %v2800_v22 }
  0xdf   : > { %2129 = vrot.lane.b32.xlu1 %v10551_v41, %s10035_s25 }
  0xe0   : > { %v10646_v23 = vpop.permute.xlu0 %2724  ;;  %v2534_v26 = vpop.permute.xlu1 %2533 }
  0xe1   : > { %v2801_v27 = vsel %vm17259_vm1, %v10646_v23, %v2727_v17  ;;  %vm10681_vm1 = vmand %vm10603_vm2, %vm17263_vm5  ;;  %v10757_v17 = vld [vmem:[%s10143_s21 + $0x90] sm:$0xff] }
  0xe2   : > { %1936 = vrot.lane.b32.xlu0 %v10551_v41, %s10036_s26  ;;  %8690 = vmatpush1.msk.msra.mxu1 %vm17269_vm0, %v2801_v27  ;;  %v17530_v40 = vsel %vm10681_vm1, 4294967295, %v17529_v40 }
  0xe3   : > { %1938 = vrot.lane.b32.xlu1 %v10532_v32, %s10036_s26  ;;  %17531 = vst [vmem:[#allocation16_spill] sm:$0xff] %v17530_v40 }
  0xe4   : > { %v10660_v24 = vpop.permute.xlu0 %2535  ;;  %v10662_v35 = vpop.permute.xlu1 %2531 }
  0xe5   : > { %v2607_v36 = vsel %vm17260_vm3, %v2534_v26, %v10660_v24  ;;  %v2608_v39 = vsel %vm17260_vm3, %v10662_v35, %v2534_v26  ;;  %vm17264_vm3 = vcmp.ge.s32.totalorder %v10630_v14, 1 }
  0xe6   : > { %1934 = vrot.lane.b32.xlu0 %v10658_v31, %s10036_s26  ;;  %8691 = vmatprep.subr.msk.mxu1 %vm10603_vm2, %v2607_v36 }
  0xe7   : > { %1711 = vrot.lane.b32.xlu1 %v10551_v41, %s10037_s10  ;;  %3172 = vmatpush1.msra.mxu1 %v2608_v39 }
  0xe8   : > { %v2309_v43 = vpop.permute.xlu0 %2308  ;;  %v10685_v45 = vpop.permute.xlu1 %2310 }
  0xe9   : > { %v2382_v46 = vsel %vm17313_vm4, %v2309_v43, %v10685_v45 }
  0xea   : > { %1713 = vrot.lane.b32.xlu0 %v10532_v32, %s10037_s10  ;;  %8692 = vmatprep.subr.msk.mxu1 %vm10681_vm1, %v2382_v46  ;;  %v316_v46 = vadd.s32 1408, %v10260_v11 }
  0xeb   : > { %1709 = vrot.lane.b32.xlu1 %v10658_v31, %s10037_s10 }
  0xec   : > { %v10697_v51 = vpop.permute.xlu0 %2306  ;;  %v2116_v5 = vpop.permute.xlu1 %2115 }
  0xed   : > { %v2383_v2 = vsel %vm17313_vm4, %v10697_v51, %v2309_v43 }
  0xee   : > { %1518 = vrot.lane.b32.xlu0 %v10551_v41, %s10038_s12  ;;  %8693 = vmatpush1.msk.msra.mxu1 %vm17264_vm3, %v2383_v2  ;;  %v315_v2 = vadd.s32 1280, %v10260_v11 }
  0xef   : > { %1520 = vrot.lane.b32.xlu1 %v10532_v32, %s10038_s12 }
  0xf0   : > { %v10708_v52 = vpop.permute.xlu0 %2117  ;;  %v10710_v53 = vpop.permute.xlu1 %2113 }
  0xf1   : > { %v2190_v54 = vsel %vm17312_vm7, %v10710_v53, %v2116_v5  ;;  %v2189_v56 = vsel %vm17312_vm7, %v2116_v5, %v10708_v52 }
  0xf2   : > { %1516 = vrot.lane.b32.xlu0 %v10658_v31, %s10038_s12  ;;  %8694 = vmatprep.subr.msk.mxu1 %vm17262_vm6, %v2189_v56  ;;  %v418_v56 = vand.u32 1023, %v316_v46 }
  0xf3   : > { %1293 = vrot.lane.b32.xlu1 %v10551_v41, %s10040_s13  ;;  %8695 = vmatpush1.msk.msra.mxu1 %vm17269_vm0, %v2190_v54 }
  0xf4   : > { %v1921_v58 = vpop.permute.xlu0 %1920  ;;  %3177 = vmatprep.subr.mxu1 %v10234_v7  ;;  %v10727_v59 = vpop.permute.xlu1 %1922 }
  0xf5   : > { %17532 = vst [vmem:[#allocation17_spill] sm:$0xff] %v10727_v59  ;;  %3178 = vmatpush1.msra.mxu1 %v10241_v9  ;;  %v1997_v61 = vsel %vm17282_vm8, %v1921_v58, %v10727_v59 }
  0xf6   : > { %1295 = vrot.lane.b32.xlu0 %v10532_v32, %s10040_s13  ;;  %8696 = vmatprep.subr.msk.mxu1 %vm17263_vm5, %v1997_v61 }
  0xf7   : > { %1291 = vrot.lane.b32.xlu1 %v10658_v31, %s10040_s13 }
  0xf8   : > { %v10742_v7 = vpop.permute.xlu0 %1918  ;;  %v1696_v55 = vpop.permute.xlu1 %1695 }
  0xf9   : > { %v1998_v9 = vsel %vm17282_vm8, %v10742_v7, %v1921_v58 }
  0xfa   : > { %2750 = vrot.lane.b32.xlu0 %v10740_v62, %s10032_s22  ;;  %8697 = vmatpush1.msk.msra.mxu1 %vm17264_vm3, %v1998_v9 }
  0xfb   : > { %2752 = vrot.lane.b32.xlu1 %v10745_v12, %s10032_s22 }
  0xfc   : > { %v10759_v22 = vpop.permute.xlu0 %1697  ;;  %v10761_v26 = vpop.permute.xlu1 %1693 }
  0xfd   : > { %17533 = vst [vmem:[#allocation18_spill] sm:$0xff] %v10759_v22  ;;  %v1773_v27 = vsel %vm17261_vm10, %v10761_v26, %v1696_v55  ;;  %v1772_v36 = vsel %vm17261_vm10, %v1696_v55, %v10759_v22  ;;  %vm17535_vm10 = vcmp.lt.s32.totalorder %v10260_v11, 32  ;;  %v411_v55 = vand.u32 1023, %v315_v2 }
  0xfe   : > { %2748 = vrot.lane.b32.xlu0 %v10757_v17, %s10032_s22  ;;  %8698 = vmatprep.subr.msk.mxu1 %vm17262_vm6, %v1772_v36  ;;  %vm17536_vm6 = vmmov %vm17535_vm10 }
  0xff   : > { %2557 = vrot.lane.b32.xlu1 %v10740_v62, %s10033_s23  ;;  %8699 = vmatpush1.msk.msra.mxu1 %vm17269_vm0, %v1773_v27  ;;  %v10799_v27 = vand.u32 31, %v418_v56 }
 0x100   : > { %v1503_v39 = vpop.permute.xlu0 %1502  ;;  %v10777_v43 = vpop.permute.xlu1 %1504 }
 0x101   : > { %17534 = vst [vmem:[#allocation19_spill] sm:$0xff] %v10777_v43  ;;  %v1579_v5 = vsel %vm17535_vm10, %v1503_v39, %v10777_v43  ;;  %17538 = vst [vmem:[#allocation21_spill] sm:$0xff] %v10799_v27  ;;  %vm17541_vm10 = vcmp.lt.s32.totalorder %v10260_v11, 95  ;;  %vm17297_vm0 = vcmp.ge.s32.totalorder %v10799_v27, 1 }
 0x102   : > { %2559 = vrot.lane.b32.xlu0 %v10745_v12, %s10033_s23  ;;  %3183 = vmatprep.subr.mxu1 %v1579_v5  ;;  %v10817_v5 = vand.u32 31, %v411_v55 }
 0x103   : > { %2555 = vrot.lane.b32.xlu1 %v10757_v17, %s10033_s23 }
 0x104   : > { %v10788_v54 = vpop.permute.xlu0 %1500  ;;  %17539 = vst [vmem:[#allocation22_spill] sm:$0xff] %v10817_v5 }
 0x105   : > { %v1278_v58 = vpop.permute.xlu1 %1277  ;;  %v1580_v61 = vsel %vm17536_vm6, %v10788_v54, %v1503_v39  ;;  %vm17298_vm6 = vcmp.le.s32.totalorder %v10799_v27, 30  ;;  %v17568_v27 = vmov 0.0  }
 0x106   : > { %2332 = vrot.lane.b32.xlu0 %v10740_v62, %s10034_s24  ;;  %3184 = vmatpush1.msra.mxu1 %v1580_v61 }
 0x107   : > { %2334 = vrot.lane.b32.xlu1 %v10745_v12, %s10034_s24 }
 0x108   : > { %v10797_v9 = vpop.permute.xlu0 %1279 }
 0x109   : > { %17537 = vst [vmem:[#allocation20_spill] sm:$0xff] %v10797_v9  ;;  %v10801_v36 = vpop.permute.xlu1 %1275  ;;  %v1354_v46 = vsel %vm17362_vm13, %v1278_v58, %v10797_v9 }
 0x10a   : > { %v1355_v39 = vsel %vm17362_vm13, %v10801_v36, %v1278_v58  ;;  %2330 = vrot.lane.b32.xlu0 %v10757_v17, %s10034_s24  ;;  %8700 = vmatprep.subr.msk.mxu1 %vm17263_vm5, %v1354_v46  ;;  %vm17293_vm5 = vcmp.le.s32.totalorder %v10817_v5, 30 }
 0x10b   : > { %2139 = vrot.lane.b32.xlu1 %v10740_v62, %s10035_s25  ;;  %8701 = vmatpush1.msk.msra.mxu1 %vm17264_vm3, %v1355_v39  ;;  %vm17542_vm3 = vmmov %vm17541_vm10  ;;  %v10847_v39 = vld [vmem:[%s10143_s21 + $0x88] sm:$0xff] }
 0x10c   : > { %v2735_v2 = vpop.permute.xlu0 %2734  ;;  %8702 = vmatmul.mubr.msk.f32.vlgmr.msra.gmra.mxu1 %vm17304_vm15, %v10473_v13 }
 0x10d   : > { %v10822_v56 = vpop.permute.xlu1 %2736  ;;  %3361 = vmatprep.mubr.f32.mxu1 %v17265_v4 }
 0x10e   : > { %17540 = vst [vmem:[#allocation23_spill] sm:$0xff] %v10822_v56  ;;  %2141 = vrot.lane.b32.xlu0 %v10745_v12, %s10035_s25  ;;  %v2796_v58 = vsel %vm17541_vm10, %v2735_v2, %v10822_v56  ;;  %vm17544_vm10 = vcmp.lt.s32.totalorder %v10260_v11, 96 }
 0x10f   : > { %2137 = vrot.lane.b32.xlu1 %v10757_v17, %s10035_s25  ;;  %8717 = vmatprep.subr.msk.mxu1 %vm17298_vm6, %v2796_v58 }
 0x110   : > { %v10835_v61 = vpop.permute.xlu0 %2732 }
 0x111   : > { %v2797_v55 = vsel %vm17542_vm3, %v10835_v61, %v2735_v2  ;;  %v2542_v46 = vpop.permute.xlu1 %2541  ;;  %vm17545_vm3 = vmmov %vm17544_vm10 }
 0x112   : > { %1944 = vrot.lane.b32.xlu0 %v10757_v17, %s10036_s26  ;;  %8718 = vmatpush1.msk.msra.mxu1 %vm17293_vm5, %v2797_v55 }
 0x113   : > { %1946 = vrot.lane.b32.xlu1 %v10740_v62, %s10036_s26 }
 0x114   : > { %v10849_v58 = vpop.permute.xlu0 %2543 }
 0x115   : > { %17543 = vst [vmem:[#allocation24_spill] sm:$0xff] %v10849_v58  ;;  %v10851_v4 = vpop.permute.xlu1 %2539  ;;  %v2603_v2 = vsel %vm17544_vm10, %v2542_v46, %v10849_v58  ;;  %vm17296_vm10 = vcmp.ge.s32.totalorder %v10817_v5, 1 }
 0x116   : > { %1942 = vrot.lane.b32.xlu0 %v10847_v39, %s10036_s26  ;;  %3313 = vmatprep.subr.mxu1 %v2603_v2  ;;  %v2604_v55 = vsel %vm17545_vm3, %v10851_v4, %v2542_v46  ;;  %vm17551_vm3 = vcmp.lt.s32.totalorder %v10260_v11, 31 }
 0x117   : > { %1719 = vrot.lane.b32.xlu1 %v10757_v17, %s10037_s10  ;;  %3314 = vmatpush1.msra.mxu1 %v2604_v55 }
 0x118   : > { %v2317_v48 = vpop.permute.xlu0 %2316 }
 0x119   : > { %v10864_v40 = vpop.permute.xlu1 %2318 }
 0x11a   : > { %17546 = vst [vmem:[#allocation25_spill] sm:$0xff] %v10864_v40  ;;  %1721 = vrot.lane.b32.xlu0 %v10740_v62, %s10037_s10  ;;  %v2378_v2 = vsel %vm17313_vm4, %v2317_v48, %v10864_v40 }
 0x11b   : > { %1717 = vrot.lane.b32.xlu1 %v10847_v39, %s10037_s10  ;;  %8719 = vmatprep.subr.msk.mxu1 %vm17297_vm0, %v2378_v2 }
 0x11c   : > { %v10876_v46 = vpop.permute.xlu0 %2314 }
 0x11d   : > { %v2379_v55 = vsel %vm17313_vm4, %v10876_v46, %v2317_v48  ;;  %v2124_v10 = vpop.permute.xlu1 %2123 }
 0x11e   : > { %1526 = vrot.lane.b32.xlu0 %v10757_v17, %s10038_s12  ;;  %8720 = vmatpush1.msk.msra.mxu1 %vm17296_vm10, %v2379_v55 }
 0x11f   : > { %1528 = vrot.lane.b32.xlu1 %v10740_v62, %s10038_s12 }
 0x120   : > { %v10887_v14 = vpop.permute.xlu0 %2125 }
 0x121   : > { %17547 = vst [vmem:[#allocation26_spill] sm:$0xff] %v10887_v14  ;;  %v10889_v2 = vpop.permute.xlu1 %2121  ;;  %v2185_v1 = vsel %vm17312_vm7, %v2124_v10, %v10887_v14 }
 0x122   : > { %v2186_v48 = vsel %vm17312_vm7, %v10889_v2, %v2124_v10  ;;  %1524 = vrot.lane.b32.xlu0 %v10847_v39, %s10038_s12  ;;  %8721 = vmatprep.subr.msk.mxu1 %vm17298_vm6, %v2185_v1  ;;  %v10919_v1 = vld [vmem:[%s10143_s21 + $0xb8] sm:$0xff] }
 0x123   : > { %1301 = vrot.lane.b32.xlu1 %v10757_v17, %s10040_s13  ;;  %8722 = vmatpush1.msk.msra.mxu1 %vm17293_vm5, %v2186_v48  ;;  %v10924_v48 = vld [vmem:[%s10143_s21 + $0xc0] sm:$0xff] }
 0x124   : > { %v1929_v55 = vpop.permute.xlu0 %1928  ;;  %3319 = vmatprep.subr.mxu1 %v10321_v28 }
 0x125   : > { %v10906_v6 = vpop.permute.xlu1 %1930  ;;  %3320 = vmatpush1.msra.mxu1 %v10336_v33 }
 0x126   : > { %17548 = vst [vmem:[#allocation27_spill] sm:$0xff] %v10906_v6  ;;  %1303 = vrot.lane.b32.xlu0 %v10740_v62, %s10040_s13  ;;  %v1993_v10 = vsel %vm17282_vm8, %v1929_v55, %v10906_v6 }
 0x127   : > { %1299 = vrot.lane.b32.xlu1 %v10847_v39, %s10040_s13  ;;  %8723 = vmatprep.subr.msk.mxu1 %vm17297_vm0, %v1993_v10  ;;  %v10936_v10 = vld [vmem:[%s10143_s21 + $0xb0] sm:$0xff] }
 0x128   : > { %v10921_v28 = vpop.permute.xlu0 %1926 }
 0x129   : > { %v1994_v33 = vsel %vm17282_vm8, %v10921_v28, %v1929_v55  ;;  %v1704_v47 = vpop.permute.xlu1 %1703  ;;  %vm17552_vm8 = vmmov %vm17551_vm3 }
 0x12a   : > { %2758 = vrot.lane.b32.xlu0 %v10919_v1, %s10032_s22  ;;  %8724 = vmatpush1.msk.msra.mxu1 %vm17296_vm10, %v1994_v33 }
 0x12b   : > { %2760 = vrot.lane.b32.xlu1 %v10924_v48, %s10032_s22 }
 0x12c   : > { %v10938_v8 = vpop.permute.xlu0 %1705 }
 0x12d   : > { %17549 = vst [vmem:[#allocation28_spill] sm:$0xff] %v10938_v8  ;;  %v10940_v0 = vpop.permute.xlu1 %1701  ;;  %v1768_v55 = vsel %vm17551_vm3, %v1704_v47, %v10938_v8  ;;  %v446_v8 = vand.u32 1023, %v320_v50 }
 0x12e   : > { %17550 = vst [vmem:[#allocation29_spill] sm:$0xff] %v10940_v0  ;;  %v1769_v19 = vsel %vm17552_vm8, %v10940_v0, %v1704_v47  ;;  %2756 = vrot.lane.b32.xlu0 %v10936_v10, %s10032_s22  ;;  %8725 = vmatprep.subr.msk.mxu1 %vm17298_vm6, %v1768_v55  ;;  %vm17554_vm8 = vcmp.lt.s32.totalorder %v10260_v11, 32  ;;  %v319_v55 = vadd.s32 1792, %v10260_v11 }
 0x12f   : > { %2565 = vrot.lane.b32.xlu1 %v10919_v1, %s10033_s23  ;;  %8726 = vmatpush1.msk.msra.mxu1 %vm17293_vm5, %v1769_v19  ;;  %vm17556_vm3 = vmmov %vm17554_vm8  ;;  %v10972_v14 = vand.u32 31, %v446_v8 }
 0x130   : > { %v1511_v33 = vpop.permute.xlu0 %1510 }
 0x131   : > { %v10957_v16 = vpop.permute.xlu1 %1512  ;;  %17557 = vst [vmem:[#allocation32_spill] sm:$0xff] %v10972_v14 }
 0x132   : > { %17553 = vst [vmem:[#allocation30_spill] sm:$0xff] %v10957_v16  ;;  %2567 = vrot.lane.b32.xlu0 %v10924_v48, %s10033_s23  ;;  %v1575_v47 = vsel %vm17554_vm8, %v1511_v33, %v10957_v16  ;;  %v439_v16 = vand.u32 1023, %v319_v55  ;;  %vm10985_vm8 = vcmp.lt.s32.totalorder %v446_v8, 992 }
 0x133   : > { %2563 = vrot.lane.b32.xlu1 %v10936_v10, %s10033_s23  ;;  %3325 = vmatprep.subr.mxu1 %v1575_v47 }
 0x134   : > { %v10967_v6 = vpop.permute.xlu0 %1508  ;;  %v11001_v8 = vand.u32 31, %v439_v16 }
 0x135   : > { %17555 = vst [vmem:[#allocation31_spill] sm:$0xff] %v10967_v6  ;;  %v1286_v19 = vpop.permute.xlu1 %1285  ;;  %v1576_v50 = vsel %vm17556_vm3, %v10967_v6, %v1511_v33  ;;  %v17560_v33 = vmov 0  ;;  %vm17327_vm3 = vcmp.le.s32.totalorder %v10972_v14, 30 }
 0x136   : > { %2340 = vrot.lane.b32.xlu0 %v10919_v1, %s10034_s24  ;;  %3326 = vmatpush1.msra.mxu1 %v1576_v50  ;;  %v17561_v33 = vsel %vm10985_vm8, 4294967295, %v17560_v33  ;;  %17563 = vst [vmem:[#allocation36_spill] sm:$0xff] %v11001_v8  ;;  %vm11007_vm5 = vmand %vm10985_vm8, %vm17327_vm3 }
 0x137   : > { %2342 = vrot.lane.b32.xlu1 %v10924_v48, %s10034_s24  ;;  %17562 = vst [vmem:[#allocation35_spill] sm:$0xff] %v17561_v33 }
 0x138   : > { %v10978_v47 = vpop.permute.xlu0 %1287 }
 0x139   : > { %17558 = vst [vmem:[#allocation33_spill] sm:$0xff] %v10978_v47  ;;  %v10980_v40 = vpop.permute.xlu1 %1283  ;;  %v1350_v58 = vsel %vm17362_vm13, %v1286_v19, %v10978_v47 }
 0x13a   : > { %17559 = vst [vmem:[#allocation34_spill] sm:$0xff] %v10980_v40  ;;  %v1351_v50 = vsel %vm17362_vm13, %v10980_v40, %v1286_v19  ;;  %2338 = vrot.lane.b32.xlu0 %v10936_v10, %s10034_s24  ;;  %8727 = vmatprep.subr.msk.mxu1 %vm17297_vm0, %v1350_v58  ;;  %v17564_v19 = vmov 0  ;;  %vm17335_vm0 = vcmp.le.s32.totalorder %v11001_v8, 30 }
 0x13b   : > { %2147 = vrot.lane.b32.xlu1 %v10919_v1, %s10035_s25  ;;  %8728 = vmatpush1.msk.msra.mxu1 %vm17296_vm10, %v1351_v50  ;;  %v17565_v19 = vsel %vm11007_vm5, 4294967295, %v17564_v19  ;;  %vm17569_vm10 = vcmp.lt.s32.totalorder %v10260_v11, 95 }
 0x13c   : > { %v2743_v55 = vpop.permute.xlu0 %2742  ;;  %17566 = vst [vmem:[#allocation37_spill] sm:$0xff] %v17565_v19  ;;  %8729 = vmatmul.mubr.msk.f32.vlgmr.msra.gmra.mxu1 %vm17304_vm15, %v10473_v13  ;;  %vm17571_vm6 = vmmov %vm17569_vm10  ;;  %v11038_v19 = vld [vmem:[%s10143_s21 + $0xa8] sm:$0xff] }
 0x13d   : > { %v11013_v58 = vpop.permute.xlu1 %2744  ;;  %3503 = vmatprep.mubr.f32.mxu1 %v17568_v27 }
 0x13e   : > { %17567 = vst [vmem:[#allocation38_spill] sm:$0xff] %v11013_v58  ;;  %2149 = vrot.lane.b32.xlu0 %v10924_v48, %s10035_s25  ;;  %v2792_v16 = vsel %vm17569_vm10, %v2743_v55, %v11013_v58  ;;  %vm17574_vm10 = vcmp.lt.s32.totalorder %v10260_v11, 96 }
 0x13f   : > { %2145 = vrot.lane.b32.xlu1 %v10936_v10, %s10035_s25  ;;  %8743 = vmatprep.subr.msk.mxu1 %vm11007_vm5, %v2792_v16  ;;  %vm17575_vm15 = vmmov %vm17574_vm10  ;;  %vm17859_vm5 = vcmp.lt.s32.totalorder %v10260_v11, 95 }
 0x140   : > { %v11026_v50 = vpop.permute.xlu0 %2740 }
 0x141   : > { %17570 = vst [vmem:[#allocation39_spill] sm:$0xff] %v11026_v50  ;;  %v2793_v5 = vsel %vm17571_vm6, %v11026_v50, %v2743_v55  ;;  %v2550_v47 = vpop.permute.xlu1 %2549  ;;  %vm17326_vm6 = vcmp.ge.s32.totalorder %v10972_v14, 1  ;;  %v11227_v14 = vld [vmem:[%s10143_s21 + $0xc8] sm:$0xff] }
 0x142   : > { %1952 = vrot.lane.b32.xlu0 %v10936_v10, %s10036_s26  ;;  %8744 = vmatpush1.msk.msra.mxu1 %vm17335_vm0, %v2793_v5 }
 0x143   : > { %1954 = vrot.lane.b32.xlu1 %v10919_v1, %s10036_s26 }
 0x144   : > { %v11040_v16 = vpop.permute.xlu0 %2551 }
 0x145   : > { %17572 = vst [vmem:[#allocation40_spill] sm:$0xff] %v11040_v16  ;;  %v11042_v58 = vpop.permute.xlu1 %2547  ;;  %v2599_v55 = vsel %vm17574_vm10, %v2550_v47, %v11040_v16  ;;  %vm11061_vm10 = vmand %vm10985_vm8, %vm17326_vm6  ;;  %v17576_v16 = vmov 0 }
 0x146   : > { %17573 = vst [vmem:[#allocation41_spill] sm:$0xff] %v11042_v58  ;;  %1950 = vrot.lane.b32.xlu0 %v11038_v19, %s10036_s26  ;;  %8745 = vmatprep.subr.msk.mxu1 %vm10985_vm8, %v2599_v55  ;;  %v2600_v5 = vsel %vm17575_vm15, %v11042_v58, %v2550_v47  ;;  %v17577_v16 = vsel %vm11061_vm10, 4294967295, %v17576_v16  ;;  %vm17333_vm15 = vcmp.ge.s32.totalorder %v11001_v8, 1  ;;  %v324_v58 = vadd.s32 2432, %v10260_v11 }
 0x147   : > { %1727 = vrot.lane.b32.xlu1 %v10936_v10, %s10037_s10  ;;  %3456 = vmatpush1.msra.mxu1 %v2600_v5  ;;  %17578 = vst [vmem:[#allocation42_spill] sm:$0xff] %v17577_v16  ;;  %vm17822_vm8 = vcmp.lt.s32.totalorder %v10260_v11, 95 }
 0x148   : > { %v2325_v56 = vpop.permute.xlu0 %2324 }
 0x149   : > { %v11065_v50 = vpop.permute.xlu1 %2326 }
 0x14a   : > { %17579 = vst [vmem:[#allocation43_spill] sm:$0xff] %v11065_v50  ;;  %1729 = vrot.lane.b32.xlu0 %v10919_v1, %s10037_s10  ;;  %v2374_v47 = vsel %vm17313_vm4, %v2325_v56, %v11065_v50 }
 0x14b   : > { %1725 = vrot.lane.b32.xlu1 %v11038_v19, %s10037_s10  ;;  %8746 = vmatprep.subr.msk.mxu1 %vm11061_vm10, %v2374_v47 }
 0x14c   : > { %v11077_v55 = vpop.permute.xlu0 %2322 }
 0x14d   : > { %17580 = vst [vmem:[#allocation44_spill] sm:$0xff] %v11077_v55  ;;  %v2375_v5 = vsel %vm17313_vm4, %v11077_v55, %v2325_v56  ;;  %v2132_v33 = vpop.permute.xlu1 %2131 }
 0x14e   : > { %1534 = vrot.lane.b32.xlu0 %v10936_v10, %s10038_s12  ;;  %8747 = vmatpush1.msk.msra.mxu1 %vm17333_vm15, %v2375_v5 }
 0x14f   : > { %1536 = vrot.lane.b32.xlu1 %v10919_v1, %s10038_s12 }
 0x150   : > { %v11088_v16 = vpop.permute.xlu0 %2133 }
 0x151   : > { %17581 = vst [vmem:[#allocation45_spill] sm:$0xff] %v11088_v16  ;;  %v11090_v47 = vpop.permute.xlu1 %2129  ;;  %v2181_v50 = vsel %vm17312_vm7, %v2132_v33, %v11088_v16 }
 0x152   : > { %17582 = vst [vmem:[#allocation46_spill] sm:$0xff] %v11090_v47  ;;  %v2182_v56 = vsel %vm17312_vm7, %v11090_v47, %v2132_v33  ;;  %1532 = vrot.lane.b32.xlu0 %v11038_v19, %s10038_s12  ;;  %8748 = vmatprep.subr.msk.mxu1 %vm17327_vm3, %v2181_v50  ;;  %vm17584_vm7 = vcmp.lt.s32.totalorder %v10260_v11, 1  ;;  %v11120_v50 = vld [vmem:[%s10143_s21 + $0xd8] sm:$0xff] }
 0x153   : > { %1309 = vrot.lane.b32.xlu1 %v10936_v10, %s10040_s13  ;;  %8749 = vmatpush1.msk.msra.mxu1 %vm17335_vm0, %v2182_v56  ;;  %v11125_v56 = vld [vmem:[%s10143_s21 + $0xe0] sm:$0xff]  ;;  %vm17586_vm4 = vmmov %vm17584_vm7 }
 0x154   : > { %v1937_v5 = vpop.permute.xlu0 %1936  ;;  %3461 = vmatprep.subr.mxu1 %v10532_v32 }
 0x155   : > { %v11107_v16 = vpop.permute.xlu1 %1938  ;;  %3462 = vmatpush1.msra.mxu1 %v10551_v41 }
 0x156   : > { %17583 = vst [vmem:[#allocation47_spill] sm:$0xff] %v11107_v16  ;;  %1311 = vrot.lane.b32.xlu0 %v10919_v1, %s10040_s13  ;;  %v1989_v33 = vsel %vm17584_vm7, %v1937_v5, %v11107_v16  ;;  %vm17589_vm7 = vcmp.lt.s32.totalorder %v10260_v11, 31 }
 0x157   : > { %1307 = vrot.lane.b32.xlu1 %v11038_v19, %s10040_s13  ;;  %8750 = vmatprep.subr.msk.mxu1 %vm17326_vm6, %v1989_v33  ;;  %v11137_v33 = vld [vmem:[%s10143_s21 + $0xd0] sm:$0xff] }
 0x158   : > { %v11122_v32 = vpop.permute.xlu0 %1934 }
 0x159   : > { %17585 = vst [vmem:[#allocation48_spill] sm:$0xff] %v11122_v32  ;;  %v1990_v41 = vsel %vm17586_vm4, %v11122_v32, %v1937_v5  ;;  %v1712_v47 = vpop.permute.xlu1 %1711  ;;  %vm17590_vm4 = vmmov %vm17589_vm7 }
 0x15a   : > { %2766 = vrot.lane.b32.xlu0 %v11120_v50, %s10032_s22  ;;  %8751 = vmatpush1.msk.msra.mxu1 %vm17333_vm15, %v1990_v41 }
 0x15b   : > { %2768 = vrot.lane.b32.xlu1 %v11125_v56, %s10032_s22 }
 0x15c   : > { %v11139_v16 = vpop.permute.xlu0 %1713 }
 0x15d   : > { %17587 = vst [vmem:[#allocation49_spill] sm:$0xff] %v11139_v16  ;;  %v11141_v55 = vpop.permute.xlu1 %1709  ;;  %v1764_v5 = vsel %vm17589_vm7, %v1712_v47, %v11139_v16  ;;  %vm17592_vm7 = vcmp.lt.s32.totalorder %v10260_v11, 32 }
 0x15e   : > { %17588 = vst [vmem:[#allocation50_spill] sm:$0xff] %v11141_v55  ;;  %v1765_v32 = vsel %vm17590_vm4, %v11141_v55, %v1712_v47  ;;  %2764 = vrot.lane.b32.xlu0 %v11137_v33, %s10032_s22  ;;  %8752 = vmatprep.subr.msk.mxu1 %vm17327_vm3, %v1764_v5  ;;  %v323_v5 = vadd.s32 2304, %v10260_v11  ;;  %vm17594_vm4 = vmmov %vm17592_vm7 }
 0x15f   : > { %2573 = vrot.lane.b32.xlu1 %v11120_v50, %s10033_s23  ;;  %8753 = vmatpush1.msk.msra.mxu1 %vm17335_vm0, %v1765_v32  ;;  %v474_v32 = vand.u32 1023, %v324_v58 }
 0x160   : > { %v1519_v41 = vpop.permute.xlu0 %1518 }
 0x161   : > { %v11158_v16 = vpop.permute.xlu1 %1520 }
 0x162   : > { %17591 = vst [vmem:[#allocation51_spill] sm:$0xff] %v11158_v16  ;;  %2575 = vrot.lane.b32.xlu0 %v11125_v56, %s10033_s23  ;;  %v1571_v47 = vsel %vm17592_vm7, %v1519_v41, %v11158_v16  ;;  %v467_v16 = vand.u32 1023, %v323_v5 }
 0x163   : > { %2571 = vrot.lane.b32.xlu1 %v11137_v33, %s10033_s23  ;;  %3467 = vmatprep.subr.mxu1 %v1571_v47  ;;  %v11179_v47 = vand.u32 31, %v474_v32 }
 0x164   : > { %v11168_v55 = vpop.permute.xlu0 %1516 }
 0x165   : > { %17593 = vst [vmem:[#allocation52_spill] sm:$0xff] %v11168_v55  ;;  %v1294_v9 = vpop.permute.xlu1 %1293  ;;  %v1572_v40 = vsel %vm17594_vm4, %v11168_v55, %v1519_v41  ;;  %17596 = vst [vmem:[#allocation54_spill] sm:$0xff] %v11179_v47  ;;  %vm17353_vm7 = vcmp.le.s32.totalorder %v11179_v47, 30  ;;  %vm17599_vm4 = vcmask 588800   ;;  %v11352_v55 = vld [vmem:[%s10143_s21 + $0x28] sm:$0xff] }
 0x166   : > { %2348 = vrot.lane.b32.xlu0 %v11120_v50, %s10034_s24  ;;  %3468 = vmatpush1.msra.mxu1 %v1572_v40  ;;  %v11197_v40 = vand.u32 31, %v467_v16 }
 0x167   : > { %2350 = vrot.lane.b32.xlu1 %v11125_v56, %s10034_s24 }
 0x168   : > { %v11177_v43 = vpop.permute.xlu0 %1295  ;;  %17598 = vst [vmem:[#allocation56_spill] sm:$0xff] %v11197_v40  ;;  %vm17352_vm3 = vcmp.le.s32.totalorder %v11197_v40, 30 }
 0x169   : > { %17595 = vst [vmem:[#allocation53_spill] sm:$0xff] %v11177_v43  ;;  %v11181_v6 = vpop.permute.xlu1 %1291  ;;  %v1346_v58 = vsel %vm17362_vm13, %v1294_v9, %v11177_v43 }
 0x16a   : > { %17597 = vst [vmem:[#allocation55_spill] sm:$0xff] %v11181_v6  ;;  %v1347_v41 = vsel %vm17362_vm13, %v11181_v6, %v1294_v9  ;;  %2346 = vrot.lane.b32.xlu0 %v11137_v33, %s10034_s24  ;;  %8754 = vmatprep.subr.msk.mxu1 %vm17326_vm6, %v1346_v58  ;;  %vm17601_vm6 = vcmp.lt.s32.totalorder %v10260_v11, 95 }
 0x16b   : > { %2155 = vrot.lane.b32.xlu1 %v11120_v50, %s10035_s25  ;;  %8755 = vmatpush1.msk.msra.mxu1 %vm17333_vm15, %v1347_v41  ;;  %vm17355_vm15 = vcmp.ge.s32.totalorder %v11179_v47, 1 }
 0x16c   : > { %v2751_v5 = vpop.permute.xlu0 %2750  ;;  %8756 = vmatmul.mubr.msk.f32.vlgmr.msra.gmra.mxu1 %vm17599_vm4, %v10473_v13  ;;  %vm17603_vm4 = vmmov %vm17601_vm6 }
 0x16d   : > { %v11202_v9 = vpop.permute.xlu1 %2752  ;;  %3645 = vmatprep.mubr.f32.mxu1 %v17568_v27 }
 0x16e   : > { %17600 = vst [vmem:[#allocation57_spill] sm:$0xff] %v11202_v9  ;;  %2157 = vrot.lane.b32.xlu0 %v11125_v56, %s10035_s25  ;;  %v2788_v32 = vsel %vm17601_vm6, %v2751_v5, %v11202_v9  ;;  %vm17606_vm6 = vcmp.lt.s32.totalorder %v10260_v11, 96 }
 0x16f   : > { %2153 = vrot.lane.b32.xlu1 %v11137_v33, %s10035_s25  ;;  %8771 = vmatprep.subr.msk.mxu1 %vm17353_vm7, %v2788_v32 }
 0x170   : > { %v11215_v16 = vpop.permute.xlu0 %2748 }
 0x171   : > { %17602 = vst [vmem:[#allocation58_spill] sm:$0xff] %v11215_v16  ;;  %v2789_v58 = vsel %vm17603_vm4, %v11215_v16, %v2751_v5  ;;  %v2558_v41 = vpop.permute.xlu1 %2557  ;;  %vm17607_vm4 = vmmov %vm17606_vm6 }
 0x172   : > { %1960 = vrot.lane.b32.xlu0 %v11137_v33, %s10036_s26  ;;  %8772 = vmatpush1.msk.msra.mxu1 %vm17352_vm3, %v2789_v58 }
 0x173   : > { %1962 = vrot.lane.b32.xlu1 %v11120_v50, %s10036_s26 }
 0x174   : > { %v11229_v32 = vpop.permute.xlu0 %2559 }
 0x175   : > { %17604 = vst [vmem:[#allocation59_spill] sm:$0xff] %v11229_v32  ;;  %v11231_v8 = vpop.permute.xlu1 %2555  ;;  %v2595_v5 = vsel %vm17606_vm6, %v2558_v41, %v11229_v32  ;;  %vm17609_vm6 = vcmp.lt.s32.totalorder %v10260_v11, 97 }
 0x176   : > { %17605 = vst [vmem:[#allocation60_spill] sm:$0xff] %v11231_v8  ;;  %1958 = vrot.lane.b32.xlu0 %v11227_v14, %s10036_s26  ;;  %3597 = vmatprep.subr.mxu1 %v2595_v5  ;;  %v2596_v58 = vsel %vm17607_vm4, %v11231_v8, %v2558_v41  ;;  %vm17354_vm4 = vcmp.ge.s32.totalorder %v11197_v40, 1  ;;  %vm17611_vm0 = vmmov %vm17609_vm6 }
 0x177   : > { %1735 = vrot.lane.b32.xlu1 %v11137_v33, %s10037_s10  ;;  %3598 = vmatpush1.msra.mxu1 %v2596_v58 }
 0x178   : > { %v2333_v9 = vpop.permute.xlu0 %2332 }
 0x179   : > { %v11244_v43 = vpop.permute.xlu1 %2334 }
 0x17a   : > { %17608 = vst [vmem:[#allocation61_spill] sm:$0xff] %v11244_v43  ;;  %1737 = vrot.lane.b32.xlu0 %v11120_v50, %s10037_s10  ;;  %v2370_v5 = vsel %vm17609_vm6, %v2333_v9, %v11244_v43  ;;  %vm17614_vm6 = vcmp.lt.s32.totalorder %v10260_v11, 127 }
 0x17b   : > { %1733 = vrot.lane.b32.xlu1 %v11227_v14, %s10037_s10  ;;  %8773 = vmatprep.subr.msk.mxu1 %vm17355_vm15, %v2370_v5 }
 0x17c   : > { %v11256_v41 = vpop.permute.xlu0 %2330 }
 0x17d   : > { %17610 = vst [vmem:[#allocation62_spill] sm:$0xff] %v11256_v41  ;;  %v2371_v58 = vsel %vm17611_vm0, %v11256_v41, %v2333_v9  ;;  %v2140_v32 = vpop.permute.xlu1 %2139  ;;  %vm17615_vm0 = vmmov %vm17614_vm6 }
 0x17e   : > { %1542 = vrot.lane.b32.xlu0 %v11137_v33, %s10038_s12  ;;  %8774 = vmatpush1.msk.msra.mxu1 %vm17354_vm4, %v2371_v58 }
 0x17f   : > { %1544 = vrot.lane.b32.xlu1 %v11120_v50, %s10038_s12 }
 0x180   : > { %v11267_v43 = vpop.permute.xlu0 %2141 }
 0x181   : > { %17612 = vst [vmem:[#allocation63_spill] sm:$0xff] %v11267_v43  ;;  %v11269_v5 = vpop.permute.xlu1 %2137  ;;  %v2177_v8 = vsel %vm17614_vm6, %v2140_v32, %v11267_v43  ;;  %vm17617_vm6 = vcmp.lt.s32.totalorder %v10260_v11, 1 }
 0x182   : > { %17613 = vst [vmem:[#allocation64_spill] sm:$0xff] %v11269_v5  ;;  %v2178_v9 = vsel %vm17615_vm0, %v11269_v5, %v2140_v32  ;;  %1540 = vrot.lane.b32.xlu0 %v11227_v14, %s10038_s12  ;;  %8775 = vmatprep.subr.msk.mxu1 %vm17353_vm7, %v2177_v8  ;;  %vm17619_vm0 = vmmov %vm17617_vm6  ;;  %v11307_v5 = vld [vmem:[%s10143_s21 + $0xf8] sm:$0xff] }
 0x183   : > { %1317 = vrot.lane.b32.xlu1 %v11137_v33, %s10040_s13  ;;  %8776 = vmatpush1.msk.msra.mxu1 %vm17352_vm3, %v2178_v9 }
 0x184   : > { %v1945_v58 = vpop.permute.xlu0 %1944  ;;  %3603 = vmatprep.subr.mxu1 %v10740_v62  ;;  %v11301_v62 = vld [vmem:[%s10143_s21 + $0xf0] sm:$0xff] }
 0x185   : > { %v11286_v43 = vpop.permute.xlu1 %1946  ;;  %3604 = vmatpush1.msra.mxu1 %v10757_v17 }
 0x186   : > { %17616 = vst [vmem:[#allocation65_spill] sm:$0xff] %v11286_v43  ;;  %1319 = vrot.lane.b32.xlu0 %v11120_v50, %s10040_s13  ;;  %v1985_v8 = vsel %vm17617_vm6, %v1945_v58, %v11286_v43  ;;  %vm17622_vm6 = vcmp.lt.s32.totalorder %v10260_v11, 31 }
 0x187   : > { %1315 = vrot.lane.b32.xlu1 %v11227_v14, %s10040_s13  ;;  %8777 = vmatprep.subr.msk.mxu1 %vm17355_vm15, %v1985_v8 }
 0x188   : > { %v11298_v32 = vpop.permute.xlu0 %1942 }
 0x189   : > { %17618 = vst [vmem:[#allocation66_spill] sm:$0xff] %v11298_v32  ;;  %v1986_v17 = vsel %vm17619_vm0, %v11298_v32, %v1945_v58  ;;  %v1720_v9 = vpop.permute.xlu1 %1719  ;;  %v328_v32 = vadd.s32 2944, %v10260_v11  ;;  %vm17623_vm0 = vmmov %vm17622_vm6 }
 0x18a   : > { %2774 = vrot.lane.b32.xlu0 %v11307_v5, %s10032_s22  ;;  %8778 = vmatpush1.msk.msra.mxu1 %vm17354_vm4, %v1986_v17 }
 0x18b   : > { %2772 = vrot.lane.b32.xlu1 %v11301_v62, %s10032_s22  ;;  %v502_v16 = vand.u32 1023, %v328_v32 }
 0x18c   : > { %v11315_v8 = vpop.permute.xlu0 %1721 }
 0x18d   : > { %17620 = vst [vmem:[#allocation67_spill] sm:$0xff] %v11315_v8  ;;  %v11317_v43 = vpop.permute.xlu1 %1717  ;;  %v1760_v58 = vsel %vm17622_vm6, %v1720_v9, %v11315_v8  ;;  %vm17625_vm6 = vcmp.lt.s32.totalorder %v10260_v11, 32  ;;  %v11349_v6 = vand.u32 31, %v502_v16 }
 0x18e   : > { %17621 = vst [vmem:[#allocation68_spill] sm:$0xff] %v11317_v43  ;;  %v1761_v41 = vsel %vm17623_vm0, %v11317_v43, %v1720_v9  ;;  %2581 = vrot.lane.b32.xlu0 %v11307_v5, %s10033_s23  ;;  %8779 = vmatprep.subr.msk.mxu1 %vm17353_vm7, %v1760_v58  ;;  %v327_v58 = vadd.s32 2816, %v10260_v11  ;;  %vm17627_vm0 = vmmov %vm17625_vm6  ;;  %vm17638_vm7 = vcmask 588800  }
 0x18f   : > { %2579 = vrot.lane.b32.xlu1 %v11301_v62, %s10033_s23  ;;  %8780 = vmatpush1.msk.msra.mxu1 %vm17352_vm3, %v1761_v41  ;;  %17628 = vst [vmem:[#allocation71_spill] sm:$0xff] %v11349_v6 }
 0x190   : > { %v1527_v17 = vpop.permute.xlu0 %1526 }
 0x191   : > { %v11334_v8 = vpop.permute.xlu1 %1528 }
 0x192   : > { %17624 = vst [vmem:[#allocation69_spill] sm:$0xff] %v11334_v8  ;;  %2356 = vrot.lane.b32.xlu0 %v11307_v5, %s10034_s24  ;;  %v1567_v9 = vsel %vm17625_vm6, %v1527_v17, %v11334_v8  ;;  %vm11365_vm6 = vcmp.lt.s32.totalorder %v502_v16, 992 }
 0x193   : > { %2354 = vrot.lane.b32.xlu1 %v11301_v62, %s10034_s24  ;;  %3609 = vmatprep.subr.mxu1 %v1567_v9  ;;  %v495_v9 = vand.u32 1023, %v327_v58 }
 0x194   : > { %v11344_v43 = vpop.permute.xlu0 %1524 }
 0x195   : > { %17626 = vst [vmem:[#allocation70_spill] sm:$0xff] %v11344_v43  ;;  %v1302_v41 = vpop.permute.xlu1 %1301  ;;  %v1568_v32 = vsel %vm17627_vm0, %v11344_v43, %v1527_v17  ;;  %v17631_v43 = vmov 0  ;;  %vm17384_vm0 = vcmp.le.s32.totalorder %v11349_v6, 30  ;;  %v11381_v16 = vand.u32 31, %v495_v9 }
 0x196   : > { %2722 = vrot.lane.b32.xlu0 %v11352_v55, %s10032_s22  ;;  %3610 = vmatpush1.msra.mxu1 %v1568_v32  ;;  %v17632_v43 = vsel %vm11365_vm6, 4294967295, %v17631_v43  ;;  %vm11387_vm3 = vmand %vm11365_vm6, %vm17384_vm0 }
 0x197   : > { %2163 = vrot.lane.b32.xlu1 %v11307_v5, %s10035_s25  ;;  %17633 = vst [vmem:[#allocation74_spill] sm:$0xff] %v17632_v43  ;;  %17634 = vst [vmem:[#allocation75_spill] sm:$0xff] %v11381_v16 }
 0x198   : > { %v11358_v8 = vpop.permute.xlu0 %1303 }
 0x199   : > { %17629 = vst [vmem:[#allocation72_spill] sm:$0xff] %v11358_v8  ;;  %v11360_v22 = vpop.permute.xlu1 %1299  ;;  %v1342_v17 = vsel %vm17362_vm13, %v1302_v41, %v11358_v8 }
 0x19a   : > { %17630 = vst [vmem:[#allocation73_spill] sm:$0xff] %v11360_v22  ;;  %v1343_v32 = vsel %vm17362_vm13, %v11360_v22, %v1302_v41  ;;  %2161 = vrot.lane.b32.xlu0 %v11301_v62, %s10035_s25  ;;  %8781 = vmatprep.subr.msk.mxu1 %vm17355_vm15, %v1342_v17  ;;  %v17635_v41 = vmov 0 }
 0x19b   : > { %2529 = vrot.lane.b32.xlu1 %v11352_v55, %s10033_s23  ;;  %8782 = vmatpush1.msk.msra.mxu1 %vm17354_vm4, %v1343_v32  ;;  %v17636_v41 = vsel %vm11387_vm3, 4294967295, %v17635_v41  ;;  %vm17640_vm4 = vcmp.lt.s32.totalorder %v10260_v11, 95  ;;  %v11406_v32 = vld [vmem:[%s10143_s21 + $0xe8] sm:$0xff] }
 0x19c   : > { %v2759_v58 = vpop.permute.xlu0 %2758  ;;  %17637 = vst [vmem:[#allocation76_spill] sm:$0xff] %v17636_v41  ;;  %8783 = vmatmul.mubr.msk.f32.vlgmr.msra.gmra.mxu1 %vm17638_vm7, %v10473_v13  ;;  %vm17366_vm7 = vcmp.le.s32.totalorder %v11381_v16, 30  ;;  %vm17642_vm15 = vmmov %vm17640_vm4 }
 0x19d   : > { %v11393_v17 = vpop.permute.xlu1 %2760  ;;  %3787 = vmatprep.mubr.f32.mxu1 %v17568_v27 }
 0x19e   : > { %17639 = vst [vmem:[#allocation77_spill] sm:$0xff] %v11393_v17  ;;  %2304 = vrot.lane.b32.xlu0 %v11352_v55, %s10034_s24  ;;  %v2784_v9 = vsel %vm17640_vm4, %v2759_v58, %v11393_v17  ;;  %vm17645_vm4 = vcmp.lt.s32.totalorder %v10260_v11, 96 }
 0x19f   : > { %1968 = vrot.lane.b32.xlu1 %v11301_v62, %s10036_s26  ;;  %8797 = vmatprep.subr.msk.mxu1 %vm11387_vm3, %v2784_v9  ;;  %vm17646_vm13 = vmmov %vm17645_vm4 }
 0x1a0   : > { %v11409_v13 = vpop.permute.xlu0 %2756 }
 0x1a1   : > { %17641 = vst [vmem:[#allocation78_spill] sm:$0xff] %v11409_v13  ;;  %v2785_v40 = vsel %vm17642_vm15, %v11409_v13, %v2759_v58  ;;  %v2566_v47 = vpop.permute.xlu1 %2565  ;;  %vm17365_vm15 = vcmp.ge.s32.totalorder %v11349_v6, 1 }
 0x1a2   : > { %1966 = vrot.lane.b32.xlu0 %v11406_v32, %s10036_s26  ;;  %8798 = vmatpush1.msk.msra.mxu1 %vm17366_vm7, %v2785_v40 }
 0x1a3   : > { %2111 = vrot.lane.b32.xlu1 %v11352_v55, %s10035_s25 }
 0x1a4   : > { %v11420_v9 = vpop.permute.xlu0 %2567 }
 0x1a5   : > { %17643 = vst [vmem:[#allocation79_spill] sm:$0xff] %v11420_v9  ;;  %v11422_v41 = vpop.permute.xlu1 %2563  ;;  %v2591_v17 = vsel %vm17645_vm4, %v2566_v47, %v11420_v9  ;;  %vm11441_vm4 = vmand %vm11365_vm6, %vm17365_vm15  ;;  %v17647_v9 = vmov 0  ;;  %vm17371_vm15 = vcmp.ge.s32.totalorder %v11381_v16, 1 }
 0x1a6   : > { %17644 = vst [vmem:[#allocation80_spill] sm:$0xff] %v11422_v41  ;;  %1743 = vrot.lane.b32.xlu0 %v11301_v62, %s10037_s10  ;;  %8799 = vmatprep.subr.msk.mxu1 %vm11365_vm6, %v2591_v17  ;;  %v2592_v40 = vsel %vm17646_vm13, %v11422_v41, %v2566_v47  ;;  %v17648_v9 = vsel %vm11441_vm4, 4294967295, %v17647_v9  ;;  %vm17651_vm13 = vcmp.lt.s32.totalorder %v10260_v11, 97  ;;  %v11463_v41 = vld [vmem:[%s10143_s21 + $0x20] sm:$0xff] }
 0x1a7   : > { %1741 = vrot.lane.b32.xlu1 %v11406_v32, %s10037_s10  ;;  %3740 = vmatpush1.msra.mxu1 %v2592_v40  ;;  %17649 = vst [vmem:[#allocation81_spill] sm:$0xff] %v17648_v9  ;;  %vm17653_vm7 = vmmov %vm17651_vm13 }
 0x1a8   : > { %v2341_v58 = vpop.permute.xlu0 %2340 }
 0x1a9   : > { %v11445_v8 = vpop.permute.xlu1 %2342 }
 0x1aa   : > { %17650 = vst [vmem:[#allocation82_spill] sm:$0xff] %v11445_v8  ;;  %1550 = vrot.lane.b32.xlu0 %v11301_v62, %s10038_s12  ;;  %v2366_v47 = vsel %vm17651_vm13, %v2341_v58, %v11445_v8  ;;  %vm17656_vm13 = vcmp.lt.s32.totalorder %v10260_v11, 127 }
 0x1ab   : > { %1548 = vrot.lane.b32.xlu1 %v11406_v32, %s10038_s12  ;;  %8800 = vmatprep.subr.msk.mxu1 %vm11441_vm4, %v2366_v47 }
 0x1ac   : > { %v11457_v17 = vpop.permute.xlu0 %2338 }
 0x1ad   : > { %17652 = vst [vmem:[#allocation83_spill] sm:$0xff] %v11457_v17  ;;  %v2367_v40 = vsel %vm17653_vm7, %v11457_v17, %v2341_v58  ;;  %v2148_v43 = vpop.permute.xlu1 %2147  ;;  %vm17657_vm7 = vmmov %vm17656_vm13  ;;  %v11538_v17 = vld [vmem:[%s10143_s21 + $0x40] sm:$0xff] }
 0x1ae   : > { %1916 = vrot.lane.b32.xlu0 %v11463_v41, %s10036_s26  ;;  %8801 = vmatpush1.msk.msra.mxu1 %vm17371_vm15, %v2367_v40  ;;  %vm17658_vm15 = vcmp.le.s32.totalorder %v11381_v16, 30 }
 0x1af   : > { %1325 = vrot.lane.b32.xlu1 %v11301_v62, %s10040_s13 }
 0x1b0   : > { %v11471_v47 = vpop.permute.xlu0 %2149 }
 0x1b1   : > { %17654 = vst [vmem:[#allocation84_spill] sm:$0xff] %v11471_v47  ;;  %v11473_v9 = vpop.permute.xlu1 %2145  ;;  %v2173_v58 = vsel %vm17656_vm13, %v2148_v43, %v11471_v47  ;;  %vm17660_vm13 = vcmp.lt.s32.totalorder %v10260_v11, 1 }
 0x1b2   : > { %17655 = vst [vmem:[#allocation85_spill] sm:$0xff] %v11473_v9  ;;  %v2174_v8 = vsel %vm17657_vm7, %v11473_v9, %v2148_v43  ;;  %1323 = vrot.lane.b32.xlu0 %v11406_v32, %s10040_s13  ;;  %8802 = vmatprep.subr.msk.mxu1 %vm17384_vm0, %v2173_v58  ;;  %vm17661_vm7 = vcmp.ge.s32.totalorder %v11349_v6, 1  ;;  %v11508_v58 = vld [vmem:[%s10143_s21 + $0x48] sm:$0xff]  ;;  %v332_v9 = vadd.s32 3456, %v10260_v11 }
 0x1b3   : > { %1691 = vrot.lane.b32.xlu1 %v11463_v41, %s10037_s10  ;;  %8803 = vmatpush1.msk.msra.mxu1 %vm17658_vm15, %v2174_v8  ;;  %vm17663_vm15 = vmmov %vm17660_vm13 }
 0x1b4   : > { %v1953_v40 = vpop.permute.xlu0 %1952  ;;  %3745 = vmatprep.subr.mxu1 %v10919_v1 }
 0x1b5   : > { %v11490_v47 = vpop.permute.xlu1 %1954  ;;  %3746 = vmatpush1.msra.mxu1 %v10936_v10 }
 0x1b6   : > { %17659 = vst [vmem:[#allocation86_spill] sm:$0xff] %v11490_v47  ;;  %1498 = vrot.lane.b32.xlu0 %v11463_v41, %s10038_s12  ;;  %v1981_v43 = vsel %vm17660_vm13, %v1953_v40, %v11490_v47  ;;  %vm17664_vm13 = vcmp.ge.s32.totalorder %v11381_v16, 1 }
 0x1b7   : > { %1273 = vrot.lane.b32.xlu1 %v11463_v41, %s10040_s13  ;;  %8804 = vmatprep.subr.msk.mxu1 %vm17661_vm7, %v1981_v43  ;;  %vm17667_vm7 = vcmp.lt.s32.totalorder %v10260_v11, 31 }
 0x1b8   : > { %v11502_v8 = vpop.permute.xlu0 %1950 }
 0x1b9   : > { %17662 = vst [vmem:[#allocation87_spill] sm:$0xff] %v11502_v8  ;;  %v1982_v1 = vsel %vm17663_vm15, %v11502_v8, %v1953_v40  ;;  %v1728_v10 = vpop.permute.xlu1 %1727  ;;  %vm17668_vm15 = vmmov %vm17667_vm7 }
 0x1ba   : > { %2730 = vrot.lane.b32.xlu0 %v11508_v58, %s10032_s22  ;;  %8805 = vmatpush1.msk.msra.mxu1 %vm17664_vm13, %v1982_v1  ;;  %vm17669_vm13 = vcmp.le.s32.totalorder %v11381_v16, 30 }
 0x1bb   : > { %2537 = vrot.lane.b32.xlu1 %v11508_v58, %s10033_s23 }
 0x1bc   : > { %v11516_v43 = vpop.permute.xlu0 %1729 }
 0x1bd   : > { %17665 = vst [vmem:[#allocation88_spill] sm:$0xff] %v11516_v43  ;;  %v11518_v47 = vpop.permute.xlu1 %1725  ;;  %v1756_v40 = vsel %vm17667_vm7, %v1728_v10, %v11516_v43  ;;  %vm17671_vm7 = vcmp.lt.s32.totalorder %v10260_v11, 32 }
 0x1be   : > { %17666 = vst [vmem:[#allocation89_spill] sm:$0xff] %v11518_v47  ;;  %v1757_v8 = vsel %vm17668_vm15, %v11518_v47, %v1728_v10  ;;  %2312 = vrot.lane.b32.xlu0 %v11508_v58, %s10034_s24  ;;  %8806 = vmatprep.subr.msk.mxu1 %vm17384_vm0, %v1756_v40  ;;  %v530_v47 = vand.u32 1023, %v332_v9  ;;  %vm17672_vm15 = vmmov %vm17671_vm7  ;;  %vm17678_vm0 = vcmp.ge.s32.totalorder %v11381_v16, 1  ;;  %v11606_v16 = vld [vmem:[%s10143_s21 + $0x60] sm:$0xff] }
 0x1bf   : > { %2119 = vrot.lane.b32.xlu1 %v11508_v58, %s10035_s25  ;;  %8807 = vmatpush1.msk.msra.mxu1 %vm17669_vm13, %v1757_v8  ;;  %v331_v8 = vadd.s32 3328, %v10260_v11  ;;  %vm17675_vm13 = vcmp.lt.s32.totalorder %v10260_v11, 33 }
 0x1c0   : > { %v1535_v1 = vpop.permute.xlu0 %1534 }
 0x1c1   : > { %v11535_v43 = vpop.permute.xlu1 %1536 }
 0x1c2   : > { %17670 = vst [vmem:[#allocation90_spill] sm:$0xff] %v11535_v43  ;;  %1924 = vrot.lane.b32.xlu0 %v11538_v17, %s10036_s26  ;;  %v1563_v10 = vsel %vm17671_vm7, %v1535_v1, %v11535_v43  ;;  %v523_v43 = vand.u32 1023, %v331_v8  ;;  %vm17676_vm7 = vmmov %vm17675_vm13 }
 0x1c3   : > { %1699 = vrot.lane.b32.xlu1 %v11538_v17, %s10037_s10  ;;  %3751 = vmatprep.subr.mxu1 %v1563_v10  ;;  %v11559_v10 = vand.u32 31, %v530_v47 }
 0x1c4   : > { %v11548_v40 = vpop.permute.xlu0 %1532 }
 0x1c5   : > { %v1310_v13 = vpop.permute.xlu1 %1309  ;;  %v1564_v22 = vsel %vm17672_vm15, %v11548_v40, %v1535_v1  ;;  %17674 = vst [vmem:[#allocation92_spill] sm:$0xff] %v11559_v10  ;;  %vm17677_vm15 = vcmp.ge.s32.totalorder %v11349_v6, 1  ;;  %vm17724_vm4 = vcmp.ge.s32.totalorder %v11559_v10, 1 }
 0x1c6   : > { %1506 = vrot.lane.b32.xlu0 %v11538_v17, %s10038_s12  ;;  %3752 = vmatpush1.msra.mxu1 %v1564_v22  ;;  %v11577_v22 = vand.u32 31, %v523_v43 }
 0x1c7   : > { %1281 = vrot.lane.b32.xlu1 %v11538_v17, %s10040_s13 }
 0x1c8   : > { %v11557_v0 = vpop.permute.xlu0 %1311  ;;  %17679 = vst [vmem:[#allocation93_spill] sm:$0xff] %v11577_v22 }
 0x1c9   : > { %17673 = vst [vmem:[#allocation91_spill] sm:$0xff] %v11557_v0  ;;  %v11561_v59 = vpop.permute.xlu1 %1307  ;;  %v1338_v9 = vsel %vm17675_vm13, %v1310_v13, %v11557_v0  ;;  %vm17392_vm13 = vcmp.le.s32.totalorder %v11559_v10, 30 }
 0x1ca   : > { %v1339_v1 = vsel %vm17676_vm7, %v11561_v59, %v1310_v13  ;;  %2738 = vrot.lane.b32.xlu0 %v10658_v31, %s10032_s22  ;;  %8808 = vmatprep.subr.msk.mxu1 %vm17677_vm15, %v1338_v9  ;;  %v11583_v13 = vld [vmem:[%s17242_s1] sm:$0xff]  ;;  %vm17680_vm7 = vcmask 588800   ;;  %vm17390_vm15 = vcmp.le.s32.totalorder %v11577_v22, 30 }
 0x1cb   : > { %2545 = vrot.lane.b32.xlu1 %v10658_v31, %s10033_s23  ;;  %8809 = vmatpush1.msk.msra.mxu1 %vm17678_vm0, %v1339_v1  ;;  %vm17682_vm0 = vcmp.lt.s32.totalorder %v10260_v11, 95 }
 0x1cc   : > { %v2767_v47 = vpop.permute.xlu0 %2766  ;;  %8810 = vmatmul.mubr.msk.f32.vlgmr.msra.gmra.mxu1 %vm17680_vm7, %v11583_v13  ;;  %vm17684_vm7 = vmmov %vm17682_vm0 }
 0x1cd   : > { %v11587_v8 = vpop.permute.xlu1 %2768  ;;  %3929 = vmatprep.mubr.f32.mxu1 %v17568_v27 }
 0x1ce   : > { %17681 = vst [vmem:[#allocation94_spill] sm:$0xff] %v11587_v8  ;;  %2320 = vrot.lane.b32.xlu0 %v10658_v31, %s10034_s24  ;;  %v2780_v43 = vsel %vm17682_vm0, %v2767_v47, %v11587_v8  ;;  %vm17687_vm0 = vcmp.lt.s32.totalorder %v10260_v11, 96 }
 0x1cf   : > { %2127 = vrot.lane.b32.xlu1 %v10658_v31, %s10035_s25  ;;  %8825 = vmatprep.subr.msk.mxu1 %vm17392_vm13, %v2780_v43 }
 0x1d0   : > { %v11600_v9 = vpop.permute.xlu0 %2764 }
 0x1d1   : > { %17683 = vst [vmem:[#allocation95_spill] sm:$0xff] %v11600_v9  ;;  %v2781_v1 = vsel %vm17684_vm7, %v11600_v9, %v2767_v47  ;;  %v2574_v6 = vpop.permute.xlu1 %2573  ;;  %vm17688_vm7 = vmmov %vm17687_vm0  ;;  %v11734_v9 = vld [vmem:[%s10143_s21 + $0xa0] sm:$0xff] }
 0x1d2   : > { %1932 = vrot.lane.b32.xlu0 %v11606_v16, %s10036_s26  ;;  %8826 = vmatpush1.msk.msra.mxu1 %vm17390_vm15, %v2781_v1  ;;  %vm17398_vm15 = vcmp.ge.s32.totalorder %v11559_v10, 1 }
 0x1d3   : > { %1707 = vrot.lane.b32.xlu1 %v11606_v16, %s10037_s10 }
 0x1d4   : > { %v11614_v31 = vpop.permute.xlu0 %2575 }
 0x1d5   : > { %17685 = vst [vmem:[#allocation96_spill] sm:$0xff] %v11614_v31  ;;  %v11616_v43 = vpop.permute.xlu1 %2571  ;;  %v2587_v47 = vsel %vm17687_vm0, %v2574_v6, %v11614_v31  ;;  %vm17690_vm0 = vcmp.lt.s32.totalorder %v10260_v11, 97 }
 0x1d6   : > { %17686 = vst [vmem:[#allocation97_spill] sm:$0xff] %v11616_v43  ;;  %1514 = vrot.lane.b32.xlu0 %v11606_v16, %s10038_s12  ;;  %3881 = vmatprep.subr.mxu1 %v2587_v47  ;;  %v2588_v8 = vsel %vm17688_vm7, %v11616_v43, %v2574_v6  ;;  %vm17397_vm7 = vcmp.ge.s32.totalorder %v11577_v22, 1  ;;  %vm17692_vm13 = vmmov %vm17690_vm0 }
 0x1d7   : > { %1289 = vrot.lane.b32.xlu1 %v11606_v16, %s10040_s13  ;;  %3882 = vmatpush1.msra.mxu1 %v2588_v8 }
 0x1d8   : > { %v2349_v1 = vpop.permute.xlu0 %2348 }
 0x1d9   : > { %v11629_v0 = vpop.permute.xlu1 %2350 }
 0x1da   : > { %17689 = vst [vmem:[#allocation98_spill] sm:$0xff] %v11629_v0  ;;  %2746 = vrot.lane.b32.xlu0 %v10847_v39, %s10032_s22  ;;  %v2362_v47 = vsel %vm17690_vm0, %v2349_v1, %v11629_v0  ;;  %vm17695_vm0 = vcmp.lt.s32.totalorder %v10260_v11, 127 }
 0x1db   : > { %2553 = vrot.lane.b32.xlu1 %v10847_v39, %s10033_s23  ;;  %8827 = vmatprep.subr.msk.mxu1 %vm17398_vm15, %v2362_v47  ;;  %vm17698_vm15 = vcmp.le.s32.totalorder %v11577_v22, 30 }
 0x1dc   : > { %v11641_v6 = vpop.permute.xlu0 %2346 }
 0x1dd   : > { %17691 = vst [vmem:[#allocation99_spill] sm:$0xff] %v11641_v6  ;;  %v2363_v8 = vsel %vm17692_vm13, %v11641_v6, %v2349_v1  ;;  %v2156_v31 = vpop.permute.xlu1 %2155  ;;  %vm17696_vm13 = vmmov %vm17695_vm0  ;;  %v11663_v6 = vld [vmem:[%s10143_s21 + $0x80] sm:$0xff] }
 0x1de   : > { %2328 = vrot.lane.b32.xlu0 %v10847_v39, %s10034_s24  ;;  %8828 = vmatpush1.msk.msra.mxu1 %vm17397_vm7, %v2363_v8  ;;  %vm17697_vm7 = vcmp.le.s32.totalorder %v11559_v10, 30 }
 0x1df   : > { %2135 = vrot.lane.b32.xlu1 %v10847_v39, %s10035_s25 }
 0x1e0   : > { %v11652_v0 = vpop.permute.xlu0 %2157 }
 0x1e1   : > { %17693 = vst [vmem:[#allocation100_spill] sm:$0xff] %v11652_v0  ;;  %v11654_v47 = vpop.permute.xlu1 %2153  ;;  %v2169_v43 = vsel %vm17695_vm0, %v2156_v31, %v11652_v0  ;;  %vm17700_vm0 = vcmp.lt.s32.totalorder %v10260_v11, 1 }
 0x1e2   : > { %17694 = vst [vmem:[#allocation101_spill] sm:$0xff] %v11654_v47  ;;  %v2170_v1 = vsel %vm17696_vm13, %v11654_v47, %v2156_v31  ;;  %1940 = vrot.lane.b32.xlu0 %v11663_v6, %s10036_s26  ;;  %8829 = vmatprep.subr.msk.mxu1 %vm17697_vm7, %v2169_v43  ;;  %vm17701_vm7 = vcmp.ge.s32.totalorder %v11559_v10, 1  ;;  %vm17704_vm13 = vcmp.ge.s32.totalorder %v11577_v22, 1 }
 0x1e3   : > { %1715 = vrot.lane.b32.xlu1 %v11663_v6, %s10037_s10  ;;  %8830 = vmatpush1.msk.msra.mxu1 %vm17698_vm15, %v2170_v1  ;;  %vm17703_vm15 = vmmov %vm17700_vm0 }
 0x1e4   : > { %v1961_v39 = vpop.permute.xlu0 %1960  ;;  %3887 = vmatprep.subr.mxu1 %v11120_v50 }
 0x1e5   : > { %v11674_v8 = vpop.permute.xlu1 %1962  ;;  %3888 = vmatpush1.msra.mxu1 %v11137_v33 }
 0x1e6   : > { %17699 = vst [vmem:[#allocation102_spill] sm:$0xff] %v11674_v8  ;;  %1522 = vrot.lane.b32.xlu0 %v11663_v6, %s10038_s12  ;;  %v1977_v31 = vsel %vm17700_vm0, %v1961_v39, %v11674_v8  ;;  %vm17707_vm0 = vcmp.lt.s32.totalorder %v10260_v11, 31 }
 0x1e7   : > { %1297 = vrot.lane.b32.xlu1 %v11663_v6, %s10040_s13  ;;  %8831 = vmatprep.subr.msk.mxu1 %vm17701_vm7, %v1977_v31  ;;  %v336_v31 = vadd.s32 3968, %v10260_v11  ;;  %vm17708_vm7 = vmmov %vm17707_vm0 }
 0x1e8   : > { %v11686_v43 = vpop.permute.xlu0 %1958 }
 0x1e9   : > { %17702 = vst [vmem:[#allocation103_spill] sm:$0xff] %v11686_v43  ;;  %v1978_v50 = vsel %vm17703_vm15, %v11686_v43, %v1961_v39  ;;  %v1736_v33 = vpop.permute.xlu1 %1735  ;;  %vm17709_vm15 = vcmp.le.s32.totalorder %v11559_v10, 30  ;;  %v558_v43 = vand.u32 1023, %v336_v31 }
 0x1ea   : > { %2754 = vrot.lane.b32.xlu0 %v11038_v19, %s10032_s22  ;;  %8832 = vmatpush1.msk.msra.mxu1 %vm17704_vm13, %v1978_v50  ;;  %vm17710_vm13 = vcmp.le.s32.totalorder %v11577_v22, 30 }
 0x1eb   : > { %2561 = vrot.lane.b32.xlu1 %v11038_v19, %s10033_s23 }
 0x1ec   : > { %v11697_v1 = vpop.permute.xlu0 %1737 }
 0x1ed   : > { %17705 = vst [vmem:[#allocation104_spill] sm:$0xff] %v11697_v1  ;;  %v11700_v8 = vpop.permute.xlu1 %1733  ;;  %v1752_v39 = vsel %vm17707_vm0, %v1736_v33, %v11697_v1  ;;  %v335_v1 = vadd.s32 3840, %v10260_v11  ;;  %vm17712_vm0 = vcmp.lt.s32.totalorder %v10260_v11, 32 }
 0x1ee   : > { %17706 = vst [vmem:[#allocation105_spill] sm:$0xff] %v11700_v8  ;;  %v1753_v0 = vsel %vm17708_vm7, %v11700_v8, %v1736_v33  ;;  %2336 = vrot.lane.b32.xlu0 %v11038_v19, %s10034_s24  ;;  %8833 = vmatprep.subr.msk.mxu1 %vm17709_vm15, %v1752_v39  ;;  %vm17715_vm7 = vmmov %vm17712_vm0  ;;  %vm11742_vm15 = vcmp.lt.s32.totalorder %v558_v43, 992 }
 0x1ef   : > { %2143 = vrot.lane.b32.xlu1 %v11038_v19, %s10035_s25  ;;  %8834 = vmatpush1.msk.msra.mxu1 %vm17710_vm13, %v1753_v0  ;;  %v11728_v0 = vand.u32 31, %v558_v43  ;;  %v551_v31 = vand.u32 1023, %v335_v1  ;;  %vm17725_vm13 = vcmp.ge.s32.totalorder %v11577_v22, 1  ;;  %v17727_v43 = vmov 0 }
 0x1f0   : > { %v1543_v50 = vpop.permute.xlu0 %1542  ;;  %v309_v22 = vadd.s32 512, %v10260_v11 }
 0x1f1   : > { %v11717_v47 = vpop.permute.xlu1 %1544  ;;  %17714 = vst [vmem:[#allocation108_spill] sm:$0xff] %v11728_v0  ;;  %v11747_v1 = vand.u32 31, %v551_v31  ;;  %vm17726_vm6 = vcmp.le.s32.totalorder %v11728_v0, 30  ;;  %v310_v31 = vadd.s32 640, %v10260_v11 }
 0x1f2   : > { %17711 = vst [vmem:[#allocation106_spill] sm:$0xff] %v11717_v47  ;;  %1948 = vrot.lane.b32.xlu0 %v10745_v12, %s10036_s26  ;;  %v1559_v33 = vsel %vm17712_vm0, %v1543_v50, %v11717_v47  ;;  %vm17722_vm0 = vcmp.lt.s32.totalorder %v10260_v11, 33 }
 0x1f3   : > { %1723 = vrot.lane.b32.xlu1 %v10745_v12, %s10037_s10  ;;  %3893 = vmatprep.subr.mxu1 %v1559_v33  ;;  %v17717_v33 = vmov 0  ;;  %17720 = vst [vmem:[#allocation111_spill] sm:$0xff] %v11747_v1 }
 0x1f4   : > { %v11726_v19 = vpop.permute.xlu0 %1540  ;;  %v17718_v33 = vsel %vm11742_vm15, 4294967295, %v17717_v33 }
 0x1f5   : > { %17713 = vst [vmem:[#allocation107_spill] sm:$0xff] %v11726_v19  ;;  %v1318_v39 = vpop.permute.xlu1 %1317  ;;  %v1560_v8 = vsel %vm17715_vm7, %v11726_v19, %v1543_v50  ;;  %17719 = vst [vmem:[#allocation110_spill] sm:$0xff] %v17718_v33 }
 0x1f6   : > { %1530 = vrot.lane.b32.xlu0 %v11734_v9, %s10038_s12  ;;  %3894 = vmatpush1.msra.mxu1 %v1560_v8  ;;  %vm17723_vm7 = vmmov %vm17722_vm0 }
 0x1f7   : > { %1305 = vrot.lane.b32.xlu1 %v11734_v9, %s10040_s13 }
 0x1f8   : > { %v11740_v12 = vpop.permute.xlu0 %1319 }
 0x1f9   : > { %17716 = vst [vmem:[#allocation109_spill] sm:$0xff] %v11740_v12  ;;  %v11749_v50 = vpop.permute.xlu1 %1315  ;;  %v1334_v47 = vsel %vm17722_vm0, %v1318_v39, %v11740_v12  ;;  %vm11769_vm0 = vmand %vm11742_vm15, %vm17726_vm6 }
 0x1fa   : > { %17721 = vst [vmem:[#allocation112_spill] sm:$0xff] %v11749_v50  ;;  %v1335_v8 = vsel %vm17723_vm7, %v11749_v50, %v1318_v39  ;;  %2762 = vrot.lane.b32.xlu0 %v11227_v14, %s10032_s22  ;;  %8835 = vmatprep.subr.msk.mxu1 %vm17724_vm4, %v1334_v47  ;;  %v17728_v43 = vsel %vm11769_vm0, 4294967295, %v17727_v43  ;;  %vm17730_vm7 = vcmask 588800   ;;  %vm17417_vm4 = vcmp.le.s32.totalorder %v11747_v1, 30  ;;  %v3008_v50 = vpop.f32.mrf.mxu1 }
 0x1fb   : > { %2569 = vrot.lane.b32.xlu1 %v11227_v14, %s10033_s23  ;;  %8836 = vmatpush1.msk.msra.mxu1 %vm17725_vm13, %v1335_v8  ;;  %17729 = vst [vmem:[#allocation113_spill] sm:$0xff] %v17728_v43  ;;  %vm17732_vm13 = vcmp.lt.s32.totalorder %v10260_v11, 95  ;;  %v12933_v43 = vld [vmem:[%s17243_s2] sm:$0xff] }
 0x1fc   : > { %v2775_v39 = vpop.permute.xlu0 %2774  ;;  %8837 = vmatmul.mubr.msk.f32.vlgmr.msra.gmra.mxu1 %vm17730_vm7, %v11583_v13  ;;  %vm17733_vm6 = vmmov %vm17732_vm13  ;;  %vm17418_vm7 = vcmp.ge.s32.totalorder %v11728_v0, 1 }
 0x1fd   : > { %v11777_v47 = vpop.permute.xlu1 %2772  ;;  %v2808_v8 = vsel %vm17732_vm13, %v2775_v39, %v10277_v18  ;;  %4071 = vmatprep.mubr.f32.mxu1 %v17568_v27  ;;  %v376_v18 = vand.u32 1023, %v310_v31  ;;  %vm17734_vm13 = vcmp.lt.s32.totalorder %v10260_v11, 96  ;;  %v3010_v31 = vpop.f32.mrf.mxu1 }
 0x1fe   : > { %17731 = vst [vmem:[#allocation114_spill] sm:$0xff] %v11777_v47  ;;  %v2777_v10 = vsel %vm17733_vm6, %v11777_v47, %v2775_v39  ;;  %2344 = vrot.lane.b32.xlu0 %v11227_v14, %s10034_s24  ;;  %8851 = vmatprep.subr.msk.mxu1 %vm11769_vm0, %v2808_v8  ;;  %v369_v47 = vand.u32 1023, %v309_v22  ;;  %vm17735_vm6 = vmmov %vm17734_vm13  ;;  %9822 = vtanh.f32 %v3010_v31 }
 0x1ff   : > { %2151 = vrot.lane.b32.xlu1 %v11227_v14, %s10035_s25  ;;  %8852 = vmatpush1.msk.msra.mxu1 %vm17417_vm4, %v2777_v10  ;;  %v11818_v10 = vand.u32 31, %v376_v18  ;;  %vm17421_vm4 = vcmp.ge.s32.totalorder %v11747_v1, 1 }
 0x200   : > { %v2582_v12 = vpop.permute.xlu0 %2581 }
 0x201   : > { %v11796_v19 = vpop.permute.xlu1 %2579  ;;  %v2615_v39 = vsel %vm17734_vm13, %v2582_v12, %v10308_v25  ;;  %vm11814_vm13 = vmand %vm11742_vm15, %vm17418_vm7  ;;  %v17736_v25 = vmov 0 }
 0x202   : > { %1956 = vrot.lane.b32.xlu0 %v10924_v48, %s10036_s26  ;;  %8853 = vmatprep.subr.msk.mxu1 %vm11742_vm15, %v2615_v39  ;;  %v2584_v14 = vsel %vm17735_vm6, %v11796_v19, %v2582_v12  ;;  %v17737_v25 = vsel %vm11814_vm13, 4294967295, %v17736_v25  ;;  %vm17739_vm6 = vcmp.lt.s32.totalorder %v10260_v11, 97  ;;  %v11826_v39 = vand.u32 31, %v369_v47  ;;  %v3079_v47 = vpop.f32.mrf.mxu1 }
 0x203   : > { %1731 = vrot.lane.b32.xlu1 %v10924_v48, %s10037_s10  ;;  %4024 = vmatpush1.msra.mxu1 %v2584_v14  ;;  %17738 = vst [vmem:[#allocation115_spill] sm:$0xff] %v17737_v25  ;;  %vm17740_vm7 = vmmov %vm17739_vm6  ;;  %9824 = vtanh.f32 %v3079_v47 }
 0x204   : > { %v2357_v22 = vpop.permute.xlu0 %2356  ;;  %vm17422_vm15 = vcmp.le.s32.totalorder %v11826_v39, 30  ;;  %9826 = vtanh.f32 %v3008_v50  ;;  %vm17784_vm0 = vcmp.ge.s32.totalorder %v11826_v39, 1 }
 0x205   : > { %v11821_v8 = vpop.permute.xlu1 %2354  ;;  %v2390_v12 = vsel %vm17739_vm6, %v2357_v22, %v10339_v34  ;;  %vm17423_vm6 = vcmp.le.s32.totalorder %v11818_v10, 30 }
 0x206   : > { %v2359_v14 = vsel %vm17740_vm7, %v11821_v8, %v2357_v22  ;;  %1538 = vrot.lane.b32.xlu0 %v10924_v48, %s10038_s12  ;;  %8854 = vmatprep.subr.msk.mxu1 %vm11814_vm13, %v2390_v12  ;;  %vm17741_vm7 = vcmp.lt.s32.totalorder %v10260_v11, 95 }
 0x207   : > { %1313 = vrot.lane.b32.xlu1 %v10924_v48, %s10040_s13  ;;  %8855 = vmatpush1.msk.msra.mxu1 %vm17421_vm4, %v2359_v14  ;;  %vm17742_vm13 = vmmov %vm17741_vm7  ;;  %vm17743_vm4 = vcmp.lt.s32.totalorder %v10260_v11, 127 }
 0x208   : > { %v2723_v34 = vpop.permute.xlu0 %2722 }
 0x209   : > { %v2164_v18 = vpop.permute.xlu1 %2163  ;;  %v2802_v22 = vsel %vm17741_vm7, %v2723_v34, %v10646_v23  ;;  %v2803_v12 = vsel %vm17742_vm13, %v10483_v15, %v2723_v34  ;;  %vm17744_vm7 = vcmp.le.s32.totalorder %v11728_v0, 30  ;;  %vm17745_vm13 = vmmov %vm17743_vm4 }
 0x20a   : > { %2770 = vrot.lane.b32.xlu0 %v11406_v32, %s10032_s22  ;;  %8676 = vmatprep.subr.msk.mxu0 %vm17423_vm6, %v2802_v22  ;;  %v2197_v48 = vsel %vm17743_vm4, %v2164_v18, %v10353_v38  ;;  %vm17746_vm4 = vcmp.lt.s32.totalorder %v10260_v11, 96  ;;  %vm17751_vm6 = vcmp.lt.s32.totalorder %v10260_v11, 1 }
 0x20b   : > { %2577 = vrot.lane.b32.xlu1 %v11406_v32, %s10033_s23  ;;  %8856 = vmatprep.subr.msk.mxu1 %vm17744_vm7, %v2197_v48  ;;  %vm17747_vm7 = vcmp.le.s32.totalorder %v11747_v1, 30  ;;  %v11915_v47 = vpop.eup %9822 }
 0x20c   : > { %8677 = vmatpush1.msk.msra.mxu0 %vm17422_vm15, %v2803_v12  ;;  %v11860_v15 = vpop.permute.xlu0 %2161  ;;  %vm17748_vm15 = vmmov %vm17746_vm4 }
 0x20d   : > { %v2166_v23 = vsel %vm17745_vm13, %v11860_v15, %v2164_v18  ;;  %v2530_v31 = vpop.permute.xlu1 %2529  ;;  %vm17424_vm13 = vcmp.ge.s32.totalorder %v11818_v10, 1 }
 0x20e   : > { %2352 = vrot.lane.b32.xlu0 %v11406_v32, %s10034_s24  ;;  %v2609_v38 = vsel %vm17746_vm4, %v2530_v31, %v10662_v35  ;;  %8857 = vmatpush1.msk.msra.mxu1 %vm17747_vm7, %v2166_v23  ;;  %v2610_v14 = vsel %vm17748_vm15, %v10503_v20, %v2530_v31  ;;  %vm17749_vm4 = vcmp.lt.s32.totalorder %v10260_v11, 97  ;;  %vm17425_vm7 = vcmp.ge.s32.totalorder %v11826_v39, 1 }
 0x20f   : > { %2159 = vrot.lane.b32.xlu1 %v11406_v32, %s10035_s25  ;;  %3100 = vmatprep.subr.mxu0 %v2609_v38  ;;  %vm17750_vm15 = vmmov %vm17749_vm4 }
 0x210   : > { %3101 = vmatpush1.msra.mxu0 %v2610_v14  ;;  %v2305_v50 = vpop.permute.xlu0 %2304  ;;  %4029 = vmatprep.subr.mxu1 %v11307_v5  ;;  %v11921_v18 = vpop.eup %9824 }
 0x211   : > { %v1969_v34 = vpop.permute.xlu1 %1968  ;;  %4030 = vmatpush1.msra.mxu1 %v11301_v62  ;;  %v2384_v35 = vsel %vm17749_vm4, %v2305_v50, %v10697_v51  ;;  %v2385_v20 = vsel %vm17750_vm15, %v10515_v29, %v2305_v50  ;;  %vm17752_vm4 = vcmp.ge.s32.totalorder %v11728_v0, 1  ;;  %vm17753_vm15 = vmmov %vm17751_vm6  ;;  %v11938_v12 = vpop.eup %9826  ;;  %v11965_v50 = vadd.s32 1024, %v10260_v11 }
 0x212   : > { %1964 = vrot.lane.b32.xlu0 %v11125_v56, %s10036_s26  ;;  %8678 = vmatprep.subr.msk.mxu0 %vm17424_vm13, %v2384_v35  ;;  %v1973_v5 = vsel %vm17751_vm6, %v1969_v34, %v10381_v44  ;;  %vm17754_vm6 = vcmp.lt.s32.totalorder %v10260_v11, 127  ;;  %vm17755_vm13 = vcmp.ge.s32.totalorder %v11747_v1, 1 }
 0x213   : > { %1739 = vrot.lane.b32.xlu1 %v11125_v56, %s10037_s10  ;;  %8858 = vmatprep.subr.msk.mxu1 %vm17752_vm4, %v1973_v5  ;;  %vm17756_vm4 = vmmov %vm17754_vm6  ;;  %v397_v5 = vand.u32 1023, %v11965_v50 }
 0x214   : > { %8679 = vmatpush1.msk.msra.mxu0 %vm17425_vm7, %v2385_v20  ;;  %v11900_v29 = vpop.permute.xlu0 %1966  ;;  %vm17758_vm7 = vcmp.le.s32.totalorder %v11826_v39, 30 }
 0x215   : > { %v1974_v51 = vsel %vm17753_vm15, %v11900_v29, %v1969_v34  ;;  %v2112_v62 = vpop.permute.xlu1 %2111  ;;  %vm17757_vm15 = vcmp.le.s32.totalorder %v11818_v10, 30 }
 0x216   : > { %1546 = vrot.lane.b32.xlu0 %v11125_v56, %s10038_s12  ;;  %v2191_v44 = vsel %vm17754_vm6, %v2112_v62, %v10710_v53  ;;  %8859 = vmatpush1.msk.msra.mxu1 %vm17755_vm13, %v1974_v51  ;;  %v2192_v32 = vsel %vm17756_vm4, %v10534_v30, %v2112_v62  ;;  %vm17759_vm13 = vcmp.lt.s32.totalorder %v10260_v11, 31  ;;  %vm17761_vm4 = vcmp.le.s32.totalorder %v11728_v0, 30 }
 0x217   : > { %1321 = vrot.lane.b32.xlu1 %v11125_v56, %s10040_s13  ;;  %8680 = vmatprep.subr.msk.mxu0 %vm17757_vm15, %v2191_v44  ;;  %vm17760_vm6 = vmmov %vm17759_vm13  ;;  %vm17763_vm15 = vcmp.lt.s32.totalorder %v10260_v11, 32 }
 0x218   : > { %8681 = vmatpush1.msk.msra.mxu0 %vm17758_vm7, %v2192_v32  ;;  %v1744_v53 = vpop.permute.xlu0 %1743  ;;  %vm17762_vm7 = vcmp.le.s32.totalorder %v11747_v1, 30 }
 0x219   : > { %v11925_v22 = vpop.permute.xlu1 %1741  ;;  %v1748_v30 = vsel %vm17759_vm13, %v1744_v53, %v10401_v49  ;;  %3106 = vmatprep.subr.mxu0 %v11352_v55  ;;  %vm17764_vm13 = vmmov %vm17763_vm15 }
 0x21a   : > { %v1749_v56 = vsel %vm17760_vm6, %v11925_v22, %v1744_v53  ;;  %5008 = vrot.lane.b32.xlu0 %v11915_v47, %s10032_s22  ;;  %8860 = vmatprep.subr.msk.mxu1 %vm17761_vm4, %v1748_v30  ;;  %vm17765_vm6 = vcmp.lt.s32.totalorder %v10260_v11, 1  ;;  %v12012_v53 = vand.u32 31, %v397_v5 }
 0x21b   : > { %5010 = vrot.lane.b32.xlu1 %v11921_v18, %s10032_s22  ;;  %8861 = vmatpush1.msk.msra.mxu1 %vm17762_vm7, %v1749_v56  ;;  %vm17766_vm4 = vmmov %vm17765_vm6  ;;  %vm17767_vm7 = vcmp.ge.s32.totalorder %v11818_v10, 1 }
 0x21c   : > { %v1551_v49 = vpop.permute.xlu0 %1550  ;;  %3107 = vmatpush1.msra.mxu0 %v11463_v41  ;;  %v314_v41 = vadd.s32 1152, %v10260_v11  ;;  %vm17803_vm3 = vcmp.ge.s32.totalorder %v12012_v53, 1 }
 0x21d   : > { %v11945_v55 = vpop.permute.xlu1 %1548  ;;  %v1555_v48 = vsel %vm17763_vm15, %v1551_v49, %v10437_v60  ;;  %vm17768_vm15 = vcmp.lt.s32.totalorder %v10260_v11, 33 }
 0x21e   : > { %5006 = vrot.lane.b32.xlu0 %v11938_v12, %s10032_s22  ;;  %4035 = vmatprep.subr.mxu1 %v1555_v48  ;;  %v1556_v23 = vsel %vm17764_vm13, %v11945_v55, %v1551_v49  ;;  %vm17769_vm13 = vcmp.ge.s32.totalorder %v11728_v0, 1 }
 0x21f   : > { %4880 = vrot.lane.b32.xlu1 %v11915_v47, %s10033_s23  ;;  %4036 = vmatpush1.msra.mxu1 %v1556_v23 }
 0x220   : > { %v1917_v31 = vpop.permute.xlu0 %1916 }
 0x221   : > { %v1326_v38 = vpop.permute.xlu1 %1325  ;;  %v1999_v60 = vsel %vm17765_vm6, %v1917_v31, %v10742_v7  ;;  %v2000_v14 = vsel %vm17766_vm4, %v10554_v37, %v1917_v31  ;;  %v404_v37 = vand.u32 1023, %v314_v41  ;;  %vm17770_vm6 = vcmp.ge.s32.totalorder %v11826_v39, 1  ;;  %vm17771_vm4 = vmmov %vm17768_vm15 }
 0x222   : > { %4882 = vrot.lane.b32.xlu0 %v11921_v18, %s10033_s23  ;;  %8682 = vmatprep.subr.msk.mxu0 %vm17767_vm7, %v1999_v60  ;;  %v1330_v34 = vsel %vm17768_vm15, %v1326_v38, %v10452_v3  ;;  %vm17772_vm7 = vcmp.lt.s32.totalorder %v10260_v11, 31  ;;  %vm17773_vm15 = vcmp.ge.s32.totalorder %v11747_v1, 1  ;;  %v18166_v60 = vld [vmem:[#allocation22_spill] sm:$0xff] }
 0x223   : > { %8862 = vmatprep.subr.msk.mxu1 %vm17769_vm13, %v1330_v34  ;;  %4878 = vrot.lane.b32.xlu1 %v11938_v12, %s10033_s23  ;;  %vm17774_vm13 = vmmov %vm17772_vm7  ;;  %v12000_v62 = vand.u32 31, %v404_v37  ;;  %v17798_v34 = vld [vmem:[#allocation17_spill] sm:$0xff] }
 0x224   : > { %8683 = vmatpush1.msk.msra.mxu0 %vm17770_vm6, %v2000_v14  ;;  %v11980_v7 = vpop.permute.xlu0 %1323  ;;  %vm17775_vm6 = vcmp.le.s32.totalorder %v11818_v10, 30 }
 0x225   : > { %v1331_v35 = vsel %vm17771_vm4, %v11980_v7, %v1326_v38  ;;  %v1692_v20 = vpop.permute.xlu1 %1691  ;;  %vm17776_vm4 = vcmp.le.s32.totalorder %v11826_v39, 30  ;;  %vm17820_vm10 = vcmp.ge.s32.totalorder %v12000_v62, 1 }
 0x226   : > { %4752 = vrot.lane.b32.xlu0 %v11915_v47, %s10034_s24  ;;  %v1774_v3 = vsel %vm17772_vm7, %v1692_v20, %v10761_v26  ;;  %8863 = vmatpush1.msk.msra.mxu1 %vm17773_vm15, %v1331_v35  ;;  %v1775_v51 = vsel %vm17774_vm13, %v10572_v42, %v1692_v20  ;;  %vm17777_vm7 = vcmask 588800   ;;  %vm17778_vm15 = vcmp.lt.s32.totalorder %v10260_v11, 32 }
 0x227   : > { %8684 = vmatprep.subr.msk.mxu0 %vm17775_vm6, %v1774_v3  ;;  %4754 = vrot.lane.b32.xlu1 %v11921_v18, %s10034_s24  ;;  %vm17779_vm13 = vmmov %vm17778_vm15  ;;  %vm17780_vm6 = vcmp.lt.s32.totalorder %v10260_v11, 33 }
 0x228   : > { %8685 = vmatpush1.msk.msra.mxu0 %vm17776_vm4, %v1775_v51  ;;  %8864 = vmatmul.mubr.msk.f32.vlgmr.msra.gmra.mxu1 %vm17777_vm7, %v11583_v13  ;;  %v1499_v26 = vpop.permute.xlu0 %1498  ;;  %vm17781_vm7 = vcmp.ge.s32.totalorder %v11818_v10, 1  ;;  %vm17430_vm4 = vcmp.le.s32.totalorder %v12012_v53, 30 }
 0x229   : > { %v1274_v44 = vpop.permute.xlu1 %1273  ;;  %v1581_v42 = vsel %vm17778_vm15, %v1499_v26, %v10788_v54  ;;  %v1582_v32 = vsel %vm17779_vm13, %v10588_v57, %v1499_v26  ;;  %5273 = vmatprep.mubr.f32.mxu1 %v17568_v27  ;;  %vm17782_vm15 = vmmov %vm17780_vm6  ;;  %vm17783_vm13 = vcmp.lt.s32.totalorder %v10260_v11, 95 }
 0x22a   : > { %4750 = vrot.lane.b32.xlu0 %v11938_v12, %s10034_s24  ;;  %3112 = vmatprep.subr.mxu0 %v1581_v42  ;;  %v1356_v54 = vsel %vm17780_vm6, %v1274_v44, %v10801_v36  ;;  %v1357_v57 = vsel %vm17782_vm15, %v10601_v63, %v1274_v44  ;;  %vm17785_vm6 = vmmov %vm17783_vm13  ;;  %vm17787_vm15 = vcmask 588800   ;;  %v17809_v44 = vld [vmem:[#allocation31_spill] sm:$0xff] }
 0x22b   : > { %4624 = vrot.lane.b32.xlu1 %v11915_v47, %s10035_s25  ;;  %3113 = vmatpush1.msra.mxu0 %v1582_v32  ;;  %v17811_v32 = vld [vmem:[#allocation19_spill] sm:$0xff] }
 0x22c   : > { %v2731_v30 = vpop.permute.xlu0 %2730  ;;  %8686 = vmatprep.subr.msk.mxu0 %vm17781_vm7, %v1356_v54  ;;  %vm17786_vm7 = vcmp.le.s32.totalorder %v12000_v62, 30 }
 0x22d   : > { %v2799_v56 = vsel %vm17783_vm13, %v10632_v21, %v2731_v30  ;;  %v2538_v49 = vpop.permute.xlu1 %2537  ;;  %8687 = vmatpush1.msk.msra.mxu0 %vm17784_vm0, %v1357_v57  ;;  %v2798_v36 = vsel %vm17785_vm6, %v2731_v30, %v10835_v61  ;;  %vm17788_vm0 = vcmp.lt.s32.totalorder %v10260_v11, 96  ;;  %vm17427_vm13 = vcmp.ge.s32.totalorder %v12000_v62, 1 }
 0x22e   : > { %4626 = vrot.lane.b32.xlu0 %v11921_v18, %s10035_s25  ;;  %8703 = vmatprep.subr.msk.mxu0 %vm17786_vm7, %v2798_v36  ;;  %v2605_v21 = vsel %vm17788_vm0, %v2538_v49, %v10851_v4  ;;  %vm17789_vm6 = vcmp.lt.s32.totalorder %v10260_v11, 97  ;;  %vm17790_vm7 = vmmov %vm17788_vm0  ;;  %vm17428_vm0 = vcmp.ge.s32.totalorder %v12012_v53, 1  ;;  %v318_v4 = vadd.s32 1664, %v10260_v11  ;;  %v17818_v36 = vld [vmem:[#allocation20_spill] sm:$0xff] }
 0x22f   : > { %4622 = vrot.lane.b32.xlu1 %v11938_v12, %s10035_s25  ;;  %8688 = vmatmul.mubr.msk.f32.vlgmr.msra.gmra.mxu0 %vm17787_vm15, %v11583_v13  ;;  %v2606_v23 = vsel %vm17790_vm7, %v10660_v24, %v2538_v49  ;;  %vm17791_vm15 = vmmov %vm17789_vm6 }
 0x230   : > { %8704 = vmatpush1.msk.msra.mxu0 %vm17430_vm4, %v2799_v56  ;;  %v2313_v63 = vpop.permute.xlu0 %2312  ;;  %3290 = vmatprep.mubr.f32.mxu0 %v17568_v27  ;;  %v432_v14 = vand.u32 1023, %v318_v4  ;;  %v17816_v56 = vld [vmem:[#allocation34_spill] sm:$0xff] }
 0x231   : > { %v2381_v61 = vsel %vm17789_vm6, %v10685_v45, %v2313_v63  ;;  %3242 = vmatprep.subr.mxu0 %v2605_v21  ;;  %v2120_v48 = vpop.permute.xlu1 %2119  ;;  %v2380_v41 = vsel %vm17791_vm15, %v2313_v63, %v10876_v46  ;;  %v317_v45 = vadd.s32 1536, %v10260_v11  ;;  %vm17792_vm6 = vcmp.lt.s32.totalorder %v10260_v11, 127 }
 0x232   : > { %3243 = vmatpush1.msra.mxu0 %v2606_v23  ;;  %4494 = vrot.lane.b32.xlu0 %v11938_v12, %s10036_s26  ;;  %v2187_v46 = vsel %vm17792_vm6, %v2120_v48, %v10889_v2  ;;  %vm17793_vm7 = vmmov %vm17792_vm6  ;;  %vm17794_vm15 = vcmp.le.s32.totalorder %v12000_v62, 30  ;;  %vm17797_vm6 = vcmp.lt.s32.totalorder %v10260_v11, 1  ;;  %v12111_v20 = vand.u32 31, %v432_v14  ;;  %v17823_v23 = vld [vmem:[#allocation23_spill] sm:$0xff]  ;;  %v17830_v14 = vld [vmem:[#allocation44_spill] sm:$0xff] }
 0x233   : > { %8705 = vmatprep.subr.msk.mxu0 %vm17427_vm13, %v2380_v41  ;;  %4496 = vrot.lane.b32.xlu1 %v11915_v47, %s10036_s26  ;;  %v2188_v31 = vsel %vm17793_vm7, %v10708_v52, %v2120_v48  ;;  %vm12082_vm13 = vcmp.ge.s32.totalorder %v397_v5, 32  ;;  %v425_v50 = vand.u32 1023, %v317_v45  ;;  %vm17799_vm7 = vmmov %vm17797_vm6  ;;  %v17806_v5 = vld [vmem:[#allocation18_spill] sm:$0xff]  ;;  %v17826_v45 = vld [vmem:[#allocation41_spill] sm:$0xff] }
 0x234   : > { %8706 = vmatpush1.msk.msra.mxu0 %vm17428_vm0, %v2381_v61  ;;  %v1925_v24 = vpop.permute.xlu0 %1924  ;;  %vm12102_vm0 = vmand %vm12082_vm13, %vm17430_vm4  ;;  %v17821_v61 = vld [vmem:[#allocation39_spill] sm:$0xff] }
 0x235   : > { %8707 = vmatprep.subr.msk.mxu0 %vm17794_vm15, %v2187_v46  ;;  %v1700_v38 = vpop.permute.xlu1 %1699  ;;  %v1995_v2 = vsel %vm17797_vm6, %v1925_v24, %v10921_v28  ;;  %v1996_v37 = vsel %vm17799_vm7, %v17798_v34, %v1925_v24  ;;  %vm17800_vm15 = vcmp.ge.s32.totalorder %v12000_v62, 1  ;;  %v17804_v28 = vld [vmem:[#allocation29_spill] sm:$0xff]  ;;  %vm17805_vm6 = vcmp.lt.s32.totalorder %v10260_v11, 31  ;;  %v17828_v46 = vld [vmem:[#allocation24_spill] sm:$0xff] }
 0x236   : > { %8708 = vmatpush1.msk.msra.mxu0 %vm17430_vm4, %v2188_v31  ;;  %vm17807_vm7 = vmmov %vm17805_vm6  ;;  %v12118_v51 = vand.u32 31, %v425_v50  ;;  %vm17433_vm4 = vcmp.le.s32.totalorder %v12111_v20, 30 }
 0x237   : > { %3248 = vmatprep.subr.mxu0 %v11508_v58  ;;  %4366 = vrot.lane.b32.xlu1 %v11938_v12, %s10037_s10  ;;  %v1771_v3 = vsel %vm17807_vm7, %v17806_v5, %v1700_v38  ;;  %vm17813_vm7 = vcmp.ge.s32.totalorder %v12012_v53, 1  ;;  %v17836_v5 = vld [vmem:[#allocation26_spill] sm:$0xff] }
 0x238   : > { %3249 = vmatpush1.msra.mxu0 %v11538_v17  ;;  %v1507_v52 = vpop.permute.xlu0 %1506  ;;  %v1770_v17 = vsel %vm17805_vm6, %v1700_v38, %v17804_v28  ;;  %v17834_v28 = vld [vmem:[#allocation46_spill] sm:$0xff] }
 0x239   : > { %8709 = vmatprep.subr.msk.mxu0 %vm17800_vm15, %v1995_v2  ;;  %v1282_v35 = vpop.permute.xlu1 %1281  ;;  %vm17808_vm15 = vcmp.le.s32.totalorder %v12000_v62, 30  ;;  %v17832_v2 = vld [vmem:[#allocation25_spill] sm:$0xff] }
 0x23a   : > { %8710 = vmatpush1.msk.msra.mxu0 %vm17803_vm3, %v1996_v37  ;;  %vm17810_vm3 = vcmp.lt.s32.totalorder %v10260_v11, 32 }
 0x23b   : > { %8711 = vmatprep.subr.msk.mxu0 %vm17808_vm15, %v1770_v17  ;;  %v1577_v42 = vsel %vm17810_vm3, %v1507_v52, %v17809_v44  ;;  %vm17812_vm6 = vmmov %vm17810_vm3  ;;  %vm17817_vm3 = vcmp.lt.s32.totalorder %v10260_v11, 33 }
 0x23c   : > { %8712 = vmatpush1.msk.msra.mxu0 %vm12102_vm0, %v1771_v3  ;;  %v2739_v26 = vpop.permute.xlu0 %2738  ;;  %v1578_v54 = vsel %vm17812_vm6, %v17811_v32, %v1507_v52  ;;  %vm12132_vm15 = vmand %vm12082_vm13, %vm17813_vm7  ;;  %v1352_v49 = vsel %vm17817_vm3, %v1282_v35, %v17816_v56  ;;  %vm17434_vm7 = vcmp.le.s32.totalorder %v12118_v51, 30  ;;  %v322_v52 = vadd.s32 2176, %v10260_v11 }
 0x23d   : > { %3254 = vmatprep.subr.mxu0 %v1577_v42  ;;  %v2546_v30 = vpop.permute.xlu1 %2545  ;;  %vm17819_vm6 = vmmov %vm17817_vm3  ;;  %v2794_v48 = vsel %vm17822_vm8, %v2739_v26, %v17821_v61  ;;  %v9961_v42 = vld [vmem:[%s10143_s21 + $0x68] sm:$0xff] }
 0x23e   : > { %8713 = vmatpush1.msk.msra.mxu0 %vm12082_vm13, %v1578_v54  ;;  %v1353_v63 = vsel %vm17819_vm6, %v17818_v36, %v1282_v35  ;;  %vm17824_vm3 = vmmov %vm17822_vm8  ;;  %vm17827_vm6 = vcmp.lt.s32.totalorder %v10260_v11, 96  ;;  %vm17437_vm8 = vcmp.ge.s32.totalorder %v12111_v20, 1  ;;  %v12181_v35 = vadd.s32 2048, %v10260_v11 }
 0x23f   : > { %8714 = vmatprep.subr.msk.mxu0 %vm17820_vm10, %v1352_v49  ;;  %v2795_v41 = vsel %vm17824_vm3, %v17823_v23, %v2739_v26  ;;  %vm17825_vm10 = vcmask 588800   ;;  %v2601_v24 = vsel %vm17827_vm6, %v2546_v30, %v17826_v45  ;;  %vm17829_vm3 = vmmov %vm17827_vm6  ;;  %v460_v44 = vand.u32 1023, %v322_v52  ;;  %v17841_v49 = vld [vmem:[#allocation27_spill] sm:$0xff]  ;;  %v17849_v45 = vld [vmem:[#allocation52_spill] sm:$0xff] }
 0x240   : > { %8715 = vmatpush1.msk.msra.mxu0 %vm12132_vm15, %v1353_v63  ;;  %v2321_v21 = vpop.permute.xlu0 %2320  ;;  %v2602_v31 = vsel %vm17829_vm3, %v17828_v46, %v2546_v30  ;;  %vm17835_vm3 = vcmp.lt.s32.totalorder %v10260_v11, 127  ;;  %v453_v54 = vand.u32 1023, %v12181_v35  ;;  %v17839_v30 = vld [vmem:[#allocation48_spill] sm:$0xff]  ;;  %v17851_v46 = vld [vmem:[#allocation30_spill] sm:$0xff]  ;;  %v17855_v52 = vld [vmem:[#allocation33_spill] sm:$0xff] }
 0x241   : > { %8730 = vmatprep.subr.msk.mxu0 %vm17433_vm4, %v2794_v48  ;;  %v2128_v4 = vpop.permute.xlu1 %2127  ;;  %8716 = vmatmul.mubr.msk.f32.vlgmr.msra.gmra.mxu0 %vm17825_vm10, %v11583_v13  ;;  %vm17435_vm4 = vcmp.ge.s32.totalorder %v12118_v51, 1  ;;  %vm17831_vm10 = vcmp.lt.s32.totalorder %v10260_v11, 97  ;;  %v17845_v48 = vld [vmem:[#allocation28_spill] sm:$0xff] }
 0x242   : > { %8731 = vmatpush1.msk.msra.mxu0 %vm17434_vm7, %v2795_v41  ;;  %3432 = vmatprep.mubr.f32.mxu0 %v17568_v27  ;;  %v2376_v50 = vsel %vm17831_vm10, %v2321_v21, %v17830_v14  ;;  %vm17833_vm6 = vmmov %vm17831_vm10  ;;  %v2183_v17 = vsel %vm17835_vm3, %v2128_v4, %v17834_v28  ;;  %v17853_v14 = vld [vmem:[#allocation55_spill] sm:$0xff]  ;;  %v17860_v28 = vld [vmem:[#allocation38_spill] sm:$0xff] }
 0x243   : > { %3384 = vmatprep.subr.mxu0 %v2601_v24  ;;  %v2377_v34 = vsel %vm17833_vm6, %v17832_v2, %v2321_v21  ;;  %vm17837_vm10 = vmmov %vm17835_vm3  ;;  %vm17838_vm6 = vcmp.le.s32.totalorder %v12111_v20, 30  ;;  %vm17840_vm3 = vcmp.lt.s32.totalorder %v10260_v11, 1  ;;  %v17843_v21 = vld [vmem:[#allocation50_spill] sm:$0xff] }
 0x244   : > { %3385 = vmatpush1.msra.mxu0 %v2602_v31  ;;  %v1933_v38 = vpop.permute.xlu0 %1932  ;;  %v2184_v3 = vsel %vm17837_vm10, %v17836_v5, %v2128_v4  ;;  %vm17842_vm10 = vmmov %vm17840_vm3  ;;  %v12218_v4 = vand.u32 31, %v453_v54 }
 0x245   : > { %8732 = vmatprep.subr.msk.mxu0 %vm17437_vm8, %v2376_v50  ;;  %v1708_v37 = vpop.permute.xlu1 %1707  ;;  %v1991_v56 = vsel %vm17840_vm3, %v1933_v38, %v17839_v30  ;;  %v1992_v36 = vsel %vm17842_vm10, %v17841_v49, %v1933_v38  ;;  %vm17848_vm10 = vcmp.le.s32.totalorder %v12118_v51, 30  ;;  %v17867_v30 = vld [vmem:[#allocation62_spill] sm:$0xff]  ;;  %v326_v49 = vadd.s32 2688, %v10260_v11 }
 0x246   : > { %8733 = vmatpush1.msk.msra.mxu0 %vm17435_vm4, %v2377_v34 }
 0x247   : > { %8734 = vmatprep.subr.msk.mxu0 %vm17838_vm6, %v2183_v17  ;;  %vm17844_vm6 = vcmp.lt.s32.totalorder %v10260_v11, 31 }
 0x248   : > { %8735 = vmatpush1.msk.msra.mxu0 %vm17434_vm7, %v2184_v3  ;;  %v1515_v26 = vpop.permute.xlu0 %1514  ;;  %v1766_v61 = vsel %vm17844_vm6, %v1708_v37, %v17843_v21  ;;  %vm17846_vm3 = vmmov %vm17844_vm6  ;;  %vm17847_vm7 = vcmp.le.s32.totalorder %v12111_v20, 30  ;;  %v17863_v3 = vld [vmem:[#allocation60_spill] sm:$0xff]  ;;  %v325_v21 = vadd.s32 2560, %v10260_v11 }
 0x249   : > { %3390 = vmatprep.subr.mxu0 %v9961_v42  ;;  %v1290_v32 = vpop.permute.xlu1 %1289  ;;  %v1767_v23 = vsel %vm17846_vm3, %v17845_v48, %v1708_v37  ;;  %v17858_v37 = vld [vmem:[#allocation58_spill] sm:$0xff]  ;;  %v17865_v42 = vld [vmem:[#allocation40_spill] sm:$0xff] }
 0x24a   : > { %3391 = vmatpush1.msra.mxu0 %v11606_v16  ;;  %v12211_v16 = vand.u32 31, %v460_v44  ;;  %v17871_v48 = vld [vmem:[#allocation64_spill] sm:$0xff] }
 0x24b   : > { %8736 = vmatprep.subr.msk.mxu0 %vm17437_vm8, %v1991_v56 }
 0x24c   : > { %8737 = vmatpush1.msk.msra.mxu0 %vm17435_vm4, %v1992_v36  ;;  %v2747_v63 = vpop.permute.xlu0 %2746  ;;  %vm17850_vm4 = vcmp.lt.s32.totalorder %v10260_v11, 32  ;;  %vm17438_vm3 = vcmp.le.s32.totalorder %v12211_v16, 30  ;;  %v17869_v36 = vld [vmem:[#allocation43_spill] sm:$0xff] }
 0x24d   : > { %8738 = vmatprep.subr.msk.mxu0 %vm17847_vm7, %v1766_v61  ;;  %v2554_v41 = vpop.permute.xlu1 %2553  ;;  %v1573_v24 = vsel %vm17850_vm4, %v1515_v26, %v17849_v45  ;;  %vm17852_vm6 = vmmov %vm17850_vm4  ;;  %vm17854_vm7 = vcmp.lt.s32.totalorder %v10260_v11, 33  ;;  %vm17440_vm4 = vcmp.le.s32.totalorder %v12218_v4, 30  ;;  %v2790_v35 = vsel %vm17859_vm5, %v2747_v63, %v17858_v37 }
 0x24e   : > { %8739 = vmatpush1.msk.msra.mxu0 %vm17848_vm10, %v1767_v23  ;;  %v1574_v31 = vsel %vm17852_vm6, %v17851_v46, %v1515_v26  ;;  %v1348_v50 = vsel %vm17854_vm7, %v1290_v32, %v17853_v14  ;;  %vm17856_vm10 = vmmov %vm17854_vm7  ;;  %vm17857_vm6 = vcmp.ge.s32.totalorder %v12118_v51, 1  ;;  %v17875_v46 = vmov 0 }
 0x24f   : > { %3396 = vmatprep.subr.mxu0 %v1573_v24  ;;  %v1349_v2 = vsel %vm17856_vm10, %v17855_v52, %v1290_v32  ;;  %vm17861_vm7 = vmmov %vm17859_vm5  ;;  %vm17862_vm10 = vcmask 588800   ;;  %vm17439_vm5 = vcmp.ge.s32.totalorder %v12211_v16, 1  ;;  %v481_v14 = vand.u32 1023, %v325_v21  ;;  %v17877_v52 = vld [vmem:[#allocation66_spill] sm:$0xff] }
 0x250   : > { %3397 = vmatpush1.msra.mxu0 %v1574_v31  ;;  %v2329_v38 = vpop.permute.xlu0 %2328  ;;  %v2791_v17 = vsel %vm17861_vm7, %v17860_v28, %v2747_v63  ;;  %v488_v31 = vand.u32 1023, %v326_v49 }
 0x251   : > { %8740 = vmatprep.subr.msk.mxu0 %vm17437_vm8, %v1348_v50  ;;  %v2136_v34 = vpop.permute.xlu1 %2135  ;;  %vm17868_vm8 = vcmp.lt.s32.totalorder %v10260_v11, 97 }
 0x252   : > { %8741 = vmatpush1.msk.msra.mxu0 %vm17857_vm6, %v1349_v2  ;;  %vm17864_vm6 = vcmp.lt.s32.totalorder %v10260_v11, 96  ;;  %v2372_v56 = vsel %vm17868_vm8, %v2329_v38, %v17867_v30 }
 0x253   : > { %8757 = vmatprep.subr.msk.mxu0 %vm17438_vm3, %v2790_v35  ;;  %8742 = vmatmul.mubr.msk.f32.vlgmr.msra.gmra.mxu0 %vm17862_vm10, %v11583_v13  ;;  %v2597_v26 = vsel %vm17864_vm6, %v2554_v41, %v17863_v3  ;;  %vm17866_vm7 = vmmov %vm17864_vm6  ;;  %vm17442_vm10 = vcmp.ge.s32.totalorder %v12218_v4, 1  ;;  %v17881_v35 = vmov 0 }
 0x254   : > { %8758 = vmatpush1.msk.msra.mxu0 %vm17440_vm4, %v2791_v17  ;;  %v1941_v5 = vpop.permute.xlu0 %1940  ;;  %3574 = vmatprep.mubr.f32.mxu0 %v17568_v27  ;;  %v2598_v32 = vsel %vm17866_vm7, %v17865_v42, %v2554_v41  ;;  %vm17870_vm6 = vmmov %vm17868_vm8  ;;  %vm17872_vm7 = vcmp.lt.s32.totalorder %v10260_v11, 127  ;;  %v17873_v41 = vld [vmem:[#allocation45_spill] sm:$0xff]  ;;  %v12310_v17 = vand.u32 31, %v488_v31 }
 0x255   : > { %3526 = vmatprep.subr.mxu0 %v2597_v26  ;;  %v1716_v44 = vpop.permute.xlu1 %1715  ;;  %v2373_v63 = vsel %vm17870_vm6, %v17869_v36, %v2329_v38  ;;  %v2179_v23 = vsel %vm17872_vm7, %v2136_v34, %v17871_v48  ;;  %vm17874_vm8 = vmmov %vm17872_vm7  ;;  %vm12283_vm6 = vcmp.ge.s32.totalorder %v453_v54, 32  ;;  %v9962_v38 = vld [vmem:[%s10143_s21 + $0x88] sm:$0xff]  ;;  %vm17878_vm7 = vcmp.lt.s32.totalorder %v10260_v11, 1 }
 0x256   : > { %3527 = vmatpush1.msra.mxu0 %v2598_v32  ;;  %v2180_v45 = vsel %vm17874_vm8, %v17873_v41, %v2136_v34  ;;  %v17876_v46 = vsel %vm12283_vm6, 4294967295, %v17875_v46  ;;  %v1987_v2 = vsel %vm17878_vm7, %v1941_v5, %v17877_v52  ;;  %v17879_v34 = vld [vmem:[#allocation47_spill] sm:$0xff]  ;;  %vm17880_vm8 = vmmov %vm17878_vm7  ;;  %vm17884_vm7 = vcmp.lt.s32.totalorder %v10260_v11, 31  ;;  %v17888_v32 = vld [vmem:[#allocation70_spill] sm:$0xff] }
 0x257   : > { %8759 = vmatprep.subr.msk.mxu0 %vm17439_vm5, %v2372_v56  ;;  %v1988_v37 = vsel %vm17880_vm8, %v17879_v34, %v1941_v5  ;;  %v17885_v5 = vld [vmem:[#allocation49_spill] sm:$0xff]  ;;  %vm17886_vm8 = vmmov %vm17884_vm7  ;;  %v12317_v26 = vand.u32 31, %v481_v14  ;;  %v17890_v56 = vld [vmem:[#allocation51_spill] sm:$0xff] }
 0x258   : > { %8760 = vmatpush1.msk.msra.mxu0 %vm17442_vm10, %v2373_v63  ;;  %v1523_v61 = vpop.permute.xlu0 %1522  ;;  %v1763_v3 = vsel %vm17886_vm8, %v17885_v5, %v1716_v44  ;;  %v17894_v63 = vld [vmem:[#allocation73_spill] sm:$0xff]  ;;  %vm17444_vm8 = vcmp.le.s32.totalorder %v12310_v17, 30  ;;  %v17899_v41 = vld [vmem:[#allocation78_spill] sm:$0xff]  ;;  %v17904_v14 = vld [vmem:[#allocation80_spill] sm:$0xff] }
 0x259   : > { %8761 = vmatprep.subr.msk.mxu0 %vm17438_vm3, %v2179_v23  ;;  %v1298_v24 = vpop.permute.xlu1 %1297  ;;  %vm12301_vm3 = vmand %vm12283_vm6, %vm17440_vm4  ;;  %v17901_v31 = vld [vmem:[#allocation57_spill] sm:$0xff] }
 0x25a   : > { %8762 = vmatpush1.msk.msra.mxu0 %vm17440_vm4, %v2180_v45  ;;  %v17882_v35 = vsel %vm12301_vm3, 4294967295, %v17881_v35  ;;  %vm17889_vm4 = vcmp.lt.s32.totalorder %v10260_v11, 32  ;;  %v17910_v5 = vld [vmem:[#allocation61_spill] sm:$0xff] }
 0x25b   : > { %3532 = vmatprep.subr.mxu0 %v9962_v38  ;;  %v1569_v30 = vsel %vm17889_vm4, %v1523_v61, %v17888_v32 }
 0x25c   : > { %3533 = vmatpush1.msra.mxu0 %v11663_v6  ;;  %v2755_v50 = vpop.permute.xlu0 %2754  ;;  %v17883_v6 = vld [vmem:[#allocation68_spill] sm:$0xff] }
 0x25d   : > { %8763 = vmatprep.subr.msk.mxu0 %vm17439_vm5, %v1987_v2  ;;  %v2562_v54 = vpop.permute.xlu1 %2561  ;;  %v1762_v28 = vsel %vm17884_vm7, %v1716_v44, %v17883_v6  ;;  %vm17887_vm5 = vcmp.le.s32.totalorder %v12211_v16, 30  ;;  %vm17891_vm7 = vmmov %vm17889_vm4  ;;  %v17892_v44 = vmov 0  ;;  %vm17895_vm4 = vcmp.lt.s32.totalorder %v10260_v11, 33 }
 0x25e   : > { %8764 = vmatpush1.msk.msra.mxu0 %vm17442_vm10, %v1988_v37  ;;  %v1570_v49 = vsel %vm17891_vm7, %v17890_v56, %v1523_v61  ;;  %v1344_v21 = vsel %vm17895_vm4, %v1298_v24, %v17894_v63  ;;  %v17896_v61 = vld [vmem:[#allocation53_spill] sm:$0xff]  ;;  %vm17897_vm7 = vmmov %vm17895_vm4  ;;  %v17908_v37 = vld [vmem:[#allocation83_spill] sm:$0xff] }
 0x25f   : > { %8765 = vmatprep.subr.msk.mxu0 %vm17887_vm5, %v1762_v28  ;;  %vm12331_vm5 = vmand %vm12283_vm6, %vm17442_vm10  ;;  %v1345_v48 = vsel %vm17897_vm7, %v17896_v61, %v1298_v24  ;;  %vm17445_vm10 = vcmp.le.s32.totalorder %v12317_v26, 30  ;;  %vm17905_vm7 = vcmp.lt.s32.totalorder %v10260_v11, 96  ;;  %v330_v28 = vadd.s32 3200, %v10260_v11  ;;  %v9963_v61 = vld [vmem:[%s10143_s21 + $0xa8] sm:$0xff] }
 0x260   : > { %8766 = vmatpush1.msk.msra.mxu0 %vm12301_vm3, %v1763_v3  ;;  %v2337_v42 = vpop.permute.xlu0 %2336  ;;  %v17893_v44 = vsel %vm12331_vm5, 4294967295, %v17892_v44  ;;  %vm17898_vm3 = vcmp.ge.s32.totalorder %v12211_v16, 1  ;;  %v2593_v52 = vsel %vm17905_vm7, %v2562_v54, %v17904_v14 }
 0x261   : > { %3538 = vmatprep.subr.mxu0 %v1569_v30  ;;  %v2144_v36 = vpop.permute.xlu1 %2143  ;;  %v17912_v30 = vld [vmem:[#allocation85_spill] sm:$0xff] }
 0x262   : > { %8767 = vmatpush1.msk.msra.mxu0 %vm12283_vm6, %v1570_v49  ;;  %vm17900_vm6 = vcmp.lt.s32.totalorder %v10260_v11, 95  ;;  %v17914_v49 = vld [vmem:[#allocation63_spill] sm:$0xff] }
 0x263   : > { %8768 = vmatprep.subr.msk.mxu0 %vm17898_vm3, %v1344_v21  ;;  %v2786_v45 = vsel %vm17900_vm6, %v2755_v50, %v17899_v41  ;;  %vm17902_vm4 = vmmov %vm17900_vm6  ;;  %vm17903_vm3 = vcmask 588800   ;;  %vm17448_vm6 = vcmp.ge.s32.totalorder %v12310_v17, 1  ;;  %v516_v21 = vand.u32 1023, %v330_v28 }
 0x264   : > { %8769 = vmatpush1.msk.msra.mxu0 %vm12331_vm5, %v1345_v48  ;;  %v1949_v23 = vpop.permute.xlu0 %1948  ;;  %v2787_v38 = vsel %vm17902_vm4, %v17901_v31, %v2755_v50  ;;  %v17906_v50 = vld [vmem:[#allocation59_spill] sm:$0xff]  ;;  %vm17907_vm4 = vmmov %vm17905_vm7  ;;  %vm17935_vm5 = vcmp.lt.s32.totalorder %v10260_v11, 95 }
 0x265   : > { %8784 = vmatprep.subr.msk.mxu0 %vm17444_vm8, %v2786_v45  ;;  %v1724_v24 = vpop.permute.xlu1 %1723  ;;  %8770 = vmatmul.mubr.msk.f32.vlgmr.msra.gmra.mxu0 %vm17903_vm3, %v11583_v13  ;;  %v2594_v2 = vsel %vm17907_vm4, %v17906_v50, %v2562_v54  ;;  %vm17446_vm8 = vcmp.ge.s32.totalorder %v12317_v26, 1  ;;  %vm17909_vm3 = vcmp.lt.s32.totalorder %v10260_v11, 97  ;;  %v12380_v54 = vadd.s32 3072, %v10260_v11  ;;  %v17917_v45 = vld [vmem:[#allocation87_spill] sm:$0xff] }
 0x266   : > { %8785 = vmatpush1.msk.msra.mxu0 %vm17445_vm10, %v2787_v38  ;;  %3716 = vmatprep.mubr.f32.mxu0 %v17568_v27  ;;  %v2368_v6 = vsel %vm17909_vm3, %v2337_v42, %v17908_v37  ;;  %vm17911_vm7 = vmmov %vm17909_vm3  ;;  %vm17913_vm4 = vcmp.lt.s32.totalorder %v10260_v11, 127 }
 0x267   : > { %3668 = vmatprep.subr.mxu0 %v2593_v52  ;;  %v2369_v3 = vsel %vm17911_vm7, %v17910_v5, %v2337_v42  ;;  %v2175_v56 = vsel %vm17913_vm4, %v2144_v36, %v17912_v30  ;;  %vm17915_vm3 = vmmov %vm17913_vm4  ;;  %vm17916_vm7 = vcmp.le.s32.totalorder %v12310_v17, 30  ;;  %v509_v41 = vand.u32 1023, %v12380_v54  ;;  %v17921_v52 = vld [vmem:[#allocation89_spill] sm:$0xff]  ;;  %v17931_v30 = vld [vmem:[#allocation72_spill] sm:$0xff] }
 0x268   : > { %3669 = vmatpush1.msra.mxu0 %v2594_v2  ;;  %v1531_v34 = vpop.permute.xlu0 %1530  ;;  %v2176_v63 = vsel %vm17915_vm3, %v17914_v49, %v2144_v36  ;;  %vm17918_vm4 = vcmp.lt.s32.totalorder %v10260_v11, 1  ;;  %v17919_v36 = vld [vmem:[#allocation65_spill] sm:$0xff]  ;;  %v17923_v2 = vld [vmem:[#allocation67_spill] sm:$0xff] }
 0x269   : > { %8786 = vmatprep.subr.msk.mxu0 %vm17448_vm6, %v2368_v6  ;;  %v1306_v32 = vpop.permute.xlu1 %1305  ;;  %v1983_v31 = vsel %vm17918_vm4, %v1949_v23, %v17917_v45  ;;  %vm17920_vm3 = vmmov %vm17918_vm4  ;;  %v12417_v6 = vand.u32 31, %v509_v41  ;;  %v17928_v5 = vld [vmem:[#allocation69_spill] sm:$0xff]  ;;  %v17941_v45 = vld [vmem:[#allocation79_spill] sm:$0xff] }
 0x26a   : > { %8787 = vmatpush1.msk.msra.mxu0 %vm17446_vm8, %v2369_v3  ;;  %v1984_v38 = vsel %vm17920_vm3, %v17919_v36, %v1949_v23  ;;  %vm17926_vm3 = vcmp.le.s32.totalorder %v12317_v26, 30 }
 0x26b   : > { %8788 = vmatprep.subr.msk.mxu0 %vm17916_vm7, %v2175_v56  ;;  %vm17922_vm7 = vcmp.lt.s32.totalorder %v10260_v11, 31 }
 0x26c   : > { %8789 = vmatpush1.msk.msra.mxu0 %vm17445_vm10, %v2176_v63  ;;  %v2763_v42 = vpop.permute.xlu0 %2762  ;;  %v1758_v50 = vsel %vm17922_vm7, %v1724_v24, %v17921_v52  ;;  %vm17924_vm4 = vmmov %vm17922_vm7  ;;  %vm17925_vm10 = vcmp.le.s32.totalorder %v12310_v17, 30  ;;  %v17945_v52 = vld [vmem:[#allocation82_spill] sm:$0xff] }
 0x26d   : > { %3674 = vmatprep.subr.mxu0 %v9963_v61  ;;  %v2570_v48 = vpop.permute.xlu1 %2569  ;;  %v1759_v37 = vsel %vm17924_vm4, %v17923_v2, %v1724_v24 }
 0x26e   : > { %3675 = vmatpush1.msra.mxu0 %v11734_v9  ;;  %v12410_v9 = vand.u32 31, %v516_v21  ;;  %v17939_v21 = vld [vmem:[#allocation97_spill] sm:$0xff] }
 0x26f   : > { %8790 = vmatprep.subr.msk.mxu0 %vm17448_vm6, %v1983_v31 }
 0x270   : > { %8791 = vmatpush1.msk.msra.mxu0 %vm17446_vm8, %v1984_v38  ;;  %v2345_v14 = vpop.permute.xlu0 %2344  ;;  %vm17927_vm8 = vcmp.lt.s32.totalorder %v10260_v11, 32  ;;  %vm17449_vm4 = vcmp.le.s32.totalorder %v12410_v9, 30  ;;  %v334_v38 = vadd.s32 3712, %v10260_v11 }
 0x271   : > { %8792 = vmatprep.subr.msk.mxu0 %vm17925_vm10, %v1758_v50  ;;  %v2152_v23 = vpop.permute.xlu1 %2151  ;;  %v1565_v28 = vsel %vm17927_vm8, %v1531_v34, %v11548_v40  ;;  %vm17929_vm7 = vmmov %vm17927_vm8  ;;  %vm17930_vm10 = vcmp.lt.s32.totalorder %v10260_v11, 33  ;;  %vm17451_vm8 = vcmp.le.s32.totalorder %v12417_v6, 30 }
 0x272   : > { %8793 = vmatpush1.msk.msra.mxu0 %vm17926_vm3, %v1759_v37  ;;  %v1566_v3 = vsel %vm17929_vm7, %v17928_v5, %v1531_v34  ;;  %v1340_v54 = vsel %vm17930_vm10, %v1306_v32, %v11561_v59  ;;  %vm17932_vm3 = vmmov %vm17930_vm10  ;;  %vm17933_vm7 = vcmp.ge.s32.totalorder %v12317_v26, 1  ;;  %v17934_v34 = vld [vmem:[#allocation95_spill] sm:$0xff]  ;;  %v17936_v59 = vld [vmem:[#allocation77_spill] sm:$0xff] }
 0x273   : > { %3680 = vmatprep.subr.mxu0 %v1565_v28  ;;  %v1341_v56 = vsel %vm17932_vm3, %v17931_v30, %v1306_v32  ;;  %v2782_v49 = vsel %vm17935_vm5, %v2763_v42, %v17934_v34  ;;  %vm17937_vm10 = vmmov %vm17935_vm5  ;;  %vm17938_vm3 = vcmask 588800   ;;  %vm17450_vm5 = vcmp.ge.s32.totalorder %v12410_v9, 1  ;;  %v17947_v37 = vld [vmem:[#allocation101_spill] sm:$0xff]  ;;  %v17949_v5 = vld [vmem:[#allocation84_spill] sm:$0xff] }
 0x274   : > { %3681 = vmatpush1.msra.mxu0 %v1566_v3  ;;  %v1957_v24 = vpop.permute.xlu0 %1956  ;;  %v2783_v63 = vsel %vm17937_vm10, %v17936_v59, %v2763_v42  ;;  %v544_v30 = vand.u32 1023, %v334_v38 }
 0x275   : > { %8794 = vmatprep.subr.msk.mxu0 %vm17448_vm6, %v1340_v54  ;;  %v1732_v40 = vpop.permute.xlu1 %1731  ;;  %vm17944_vm6 = vcmp.lt.s32.totalorder %v10260_v11, 97  ;;  %v17951_v54 = vmov 0 }
 0x276   : > { %8795 = vmatpush1.msk.msra.mxu0 %vm17933_vm7, %v1341_v56  ;;  %vm17940_vm7 = vcmp.lt.s32.totalorder %v10260_v11, 96  ;;  %v9964_v56 = vld [vmem:[%s10143_s21 + $0xc8] sm:$0xff] }
 0x277   : > { %8811 = vmatprep.subr.msk.mxu0 %vm17449_vm4, %v2782_v49  ;;  %8796 = vmatmul.mubr.msk.f32.vlgmr.msra.gmra.mxu0 %vm17938_vm3, %v11583_v13  ;;  %v2589_v61 = vsel %vm17940_vm7, %v2570_v48, %v17939_v21  ;;  %vm17942_vm10 = vmmov %vm17940_vm7  ;;  %vm17453_vm3 = vcmp.ge.s32.totalorder %v12417_v6, 1  ;;  %v17943_v13 = vld [vmem:[#allocation99_spill] sm:$0xff]  ;;  %v9965_v49 = vld [vmem:[%s10143_s21 + $0xc0] sm:$0xff] }
 0x278   : > { %8812 = vmatpush1.msk.msra.mxu0 %vm17451_vm8, %v2783_v63  ;;  %v1539_v32 = vpop.permute.xlu0 %1538  ;;  %3858 = vmatprep.mubr.f32.mxu0 %v17568_v27  ;;  %v2590_v31 = vsel %vm17942_vm10, %v17941_v45, %v2570_v48  ;;  %v2364_v36 = vsel %vm17944_vm6, %v2345_v14, %v17943_v13  ;;  %vm17946_vm7 = vmmov %vm17944_vm6  ;;  %v333_v48 = vadd.s32 3584, %v10260_v11  ;;  %vm17948_vm10 = vcmp.lt.s32.totalorder %v10260_v11, 127  ;;  %v17953_v63 = vld [vmem:[#allocation103_spill] sm:$0xff]  ;;  %v17955_v21 = vld [vmem:[#allocation86_spill] sm:$0xff] }
 0x279   : > { %3810 = vmatprep.subr.mxu0 %v2589_v61  ;;  %v1314_v42 = vpop.permute.xlu1 %1313  ;;  %v2365_v50 = vsel %vm17946_vm7, %v17945_v52, %v2345_v14  ;;  %v2171_v28 = vsel %vm17948_vm10, %v2152_v23, %v17947_v37  ;;  %vm17950_vm6 = vmmov %vm17948_vm10  ;;  %vm12482_vm7 = vcmp.ge.s32.totalorder %v509_v41, 32  ;;  %vm17954_vm10 = vcmp.lt.s32.totalorder %v10260_v11, 1 }
 0x27a   : > { %3811 = vmatpush1.msra.mxu0 %v2590_v31  ;;  %v2172_v3 = vsel %vm17950_vm6, %v17949_v5, %v2152_v23  ;;  %v17952_v54 = vsel %vm12482_vm7, 4294967295, %v17951_v54  ;;  %v537_v34 = vand.u32 1023, %v333_v48  ;;  %v1979_v23 = vsel %vm17954_vm10, %v1957_v24, %v17953_v63  ;;  %vm17956_vm6 = vmmov %vm17954_vm10  ;;  %v17959_v31 = vld [vmem:[#allocation105_spill] sm:$0xff]  ;;  %v17966_v48 = vld [vmem:[#allocation107_spill] sm:$0xff] }
 0x27b   : > { %8813 = vmatprep.subr.msk.mxu0 %vm17450_vm5, %v2364_v36  ;;  %v1980_v61 = vsel %vm17956_vm6, %v17955_v21, %v1957_v24  ;;  %v17957_v45 = vmov 0  ;;  %vm17960_vm10 = vcmp.lt.s32.totalorder %v10260_v11, 31  ;;  %v12509_v24 = vand.u32 31, %v544_v30  ;;  %v17962_v36 = vld [vmem:[#allocation88_spill] sm:$0xff]  ;;  %v17977_v63 = vld [vmem:[#allocation114_spill] sm:$0xff] }
 0x27c   : > { %8814 = vmatpush1.msk.msra.mxu0 %vm17453_vm3, %v2365_v50  ;;  %v2771_v2 = vpop.permute.xlu0 %2770  ;;  %v1754_v13 = vsel %vm17960_vm10, %v1732_v40, %v17959_v31  ;;  %vm17963_vm6 = vmmov %vm17960_vm10  ;;  %v12516_v52 = vand.u32 31, %v537_v34  ;;  %v17972_v30 = vld [vmem:[#allocation112_spill] sm:$0xff]  ;;  %v17979_v21 = vld [vmem:[#allocation94_spill] sm:$0xff] }
 0x27d   : > { %8815 = vmatprep.subr.msk.mxu0 %vm17449_vm4, %v2171_v28  ;;  %v2578_v14 = vpop.permute.xlu1 %2577  ;;  %vm12500_vm4 = vmand %vm12482_vm7, %vm17451_vm8  ;;  %17961 = vst [vmem:[#allocation17_spill] sm:$0xff] %v12509_v24  ;;  %v1755_v38 = vsel %vm17963_vm6, %v17962_v36, %v1732_v40  ;;  %v17968_v28 = vld [vmem:[#allocation90_spill] sm:$0xff]  ;;  %vm17455_vm6 = vcmp.le.s32.totalorder %v12509_v24, 30  ;;  %v9966_v31 = vld [vmem:[%s17242_s1] sm:$0xff] }
 0x27e   : > { %8816 = vmatpush1.msk.msra.mxu0 %vm17451_vm8, %v2172_v3  ;;  %v17958_v45 = vsel %vm12500_vm4, 4294967295, %v17957_v45  ;;  %17965 = vst [vmem:[#allocation29_spill] sm:$0xff] %v12516_v52  ;;  %vm17967_vm8 = vcmp.lt.s32.totalorder %v10260_v11, 32 }
 0x27f   : > { %3816 = vmatprep.subr.mxu0 %v9964_v56  ;;  %v1561_v37 = vsel %vm17967_vm8, %v1539_v32, %v17966_v48  ;;  %vm17969_vm10 = vmmov %vm17967_vm8  ;;  %vm17973_vm8 = vcmp.lt.s32.totalorder %v10260_v11, 33 }
 0x280   : > { %3817 = vmatpush1.msra.mxu0 %v9965_v49  ;;  %v2353_v59 = vpop.permute.xlu0 %2352  ;;  %v1562_v5 = vsel %vm17969_vm10, %v17968_v28, %v1539_v32  ;;  %v1336_v56 = vsel %vm17973_vm8, %v1314_v42, %v17972_v30  ;;  %v17974_v32 = vld [vmem:[#allocation91_spill] sm:$0xff]  ;;  %vm17975_vm10 = vmmov %vm17973_vm8  ;;  %v9967_v30 = vld [vmem:[%s10143_s21 + $0xe8] sm:$0xff] }
 0x281   : > { %8817 = vmatprep.subr.msk.mxu0 %vm17450_vm5, %v1979_v23  ;;  %v2160_v41 = vpop.permute.xlu1 %2159  ;;  %vm17964_vm5 = vcmp.le.s32.totalorder %v12410_v9, 30  ;;  %v1337_v34 = vsel %vm17975_vm10, %v17974_v32, %v1314_v42  ;;  %vm17458_vm10 = vcmp.ge.s32.totalorder %v12509_v24, 1  ;;  %v9968_v32 = vld [vmem:[%s10143_s21 + $0xe0] sm:$0xff]  ;;  %s296_s21 = sand.u32 1, %s10022_s28  }
 0x282   : > { %8818 = vmatpush1.msk.msra.mxu0 %vm17453_vm3, %v1980_v61  ;;  %s8646_s19 = sshll.u32 %s296_s21, 2 }
 0x283   : > { %8819 = vmatprep.subr.msk.mxu0 %vm17964_vm5, %v1754_v13  ;;  %vm12530_vm5 = vmand %vm12482_vm7, %vm17453_vm3  ;;  %vm17456_vm3 = vcmp.le.s32.totalorder %v12516_v52, 30 }
 0x284   : > { %8820 = vmatpush1.msk.msra.mxu0 %vm12500_vm4, %v1755_v38  ;;  %v1965_v50 = vpop.permute.xlu0 %1964  ;;  %vm17976_vm4 = vcmp.ge.s32.totalorder %v12410_v9, 1 }
 0x285   : > { %3822 = vmatprep.subr.mxu0 %v1561_v37  ;;  %v1740_v3 = vpop.permute.xlu1 %1739 }
 0x286   : > { %8821 = vmatpush1.msk.msra.mxu0 %vm12482_vm7, %v1562_v5  ;;  %vm17978_vm7 = vcmp.lt.s32.totalorder %v10260_v11, 95  ;;  %v17989_v5 = vld [vmem:[#allocation100_spill] sm:$0xff] }
 0x287   : > { %8822 = vmatprep.subr.msk.mxu0 %vm17976_vm4, %v1336_v56  ;;  %v2778_v23 = vsel %vm17978_vm7, %v2771_v2, %v17977_v63  ;;  %vm17980_vm8 = vmmov %vm17978_vm7  ;;  %vm17981_vm4 = vcmask 588800   ;;  %vm17982_vm7 = vcmp.lt.s32.totalorder %v10260_v11, 96 }
 0x288   : > { %8823 = vmatpush1.msk.msra.mxu0 %vm12530_vm5, %v1337_v34  ;;  %v1547_v49 = vpop.permute.xlu0 %1546  ;;  %v2779_v61 = vsel %vm17980_vm8, %v17979_v21, %v2771_v2  ;;  %v2585_v13 = vsel %vm17982_vm7, %v2578_v14, %v11796_v19  ;;  %v17983_v2 = vld [vmem:[#allocation96_spill] sm:$0xff]  ;;  %vm17984_vm8 = vmmov %vm17982_vm7  ;;  %v17986_v19 = vld [vmem:[#allocation98_spill] sm:$0xff] }
 0x289   : > { %8838 = vmatprep.subr.msk.mxu0 %vm17455_vm6, %v2778_v23  ;;  %v1322_v42 = vpop.permute.xlu1 %1321  ;;  %8824 = vmatmul.mubr.msk.f32.vlgmr.msra.gmra.mxu0 %vm17981_vm4, %v9966_v31  ;;  %v2586_v36 = vsel %vm17984_vm8, %v17983_v2, %v2578_v14  ;;  %vm17457_vm6 = vcmp.ge.s32.totalorder %v12516_v52, 1  ;;  %vm17985_vm4 = vcmp.lt.s32.totalorder %v10260_v11, 97  ;;  %vm17988_vm8 = vcmp.lt.s32.totalorder %v10260_v11, 127  ;;  %v17995_v34 = vld [vmem:[#allocation102_spill] sm:$0xff]  ;;  %v17998_v21 = vld [vmem:[#allocation104_spill] sm:$0xff] }
 0x28a   : > { %8839 = vmatpush1.msk.msra.mxu0 %vm17456_vm3, %v2779_v61  ;;  %4000 = vmatprep.mubr.f32.mxu0 %v17568_v27  ;;  %v2360_v48 = vsel %vm17985_vm4, %v2353_v59, %v11821_v8  ;;  %vm17987_vm7 = vmmov %vm17985_vm4  ;;  %v2167_v14 = vsel %vm17988_vm8, %v2160_v41, %v11860_v15  ;;  %vm17991_vm4 = vcmp.le.s32.totalorder %v12509_v24, 30 }
 0x28b   : > { %3952 = vmatprep.subr.mxu0 %v2585_v13  ;;  %v2361_v37 = vsel %vm17987_vm7, %v17986_v19, %v2353_v59  ;;  %vm17990_vm3 = vmmov %vm17988_vm8  ;;  %vm17992_vm7 = vcmp.le.s32.totalorder %v12516_v52, 30  ;;  %vm17994_vm8 = vcmp.lt.s32.totalorder %v10260_v11, 1  ;;  %v18004_v13 = vld [vmem:[#allocation106_spill] sm:$0xff] }
 0x28c   : > { %3953 = vmatpush1.msra.mxu0 %v2586_v36  ;;  %v5009_v38 = vpop.permute.xlu0 %5008  ;;  %v2168_v8 = vsel %vm17990_vm3, %v17989_v5, %v2160_v41  ;;  %v1975_v15 = vsel %vm17994_vm8, %v1965_v50, %v11900_v29  ;;  %vm17996_vm3 = vmmov %vm17994_vm8  ;;  %vm18000_vm8 = vcmp.le.s32.totalorder %v12509_v24, 30 }
 0x28d   : > { %8840 = vmatprep.subr.msk.mxu0 %vm17458_vm10, %v2360_v48  ;;  %v12579_v28 = vpop.permute.xlu1 %5010  ;;  %v1976_v41 = vsel %vm17996_vm3, %v17995_v34, %v1965_v50  ;;  %vm18002_vm3 = vcmp.le.s32.totalorder %v12516_v52, 30  ;;  %v18008_v48 = vld [vmem:[#allocation109_spill] sm:$0xff] }
 0x28e   : > { %8841 = vmatpush1.msk.msra.mxu0 %vm17457_vm6, %v2361_v37  ;;  %v18013_v37 = vld [vmem:[#allocation5_spill] sm:$0xff] }
 0x28f   : > { %8842 = vmatprep.subr.msk.mxu0 %vm17991_vm4, %v2167_v14  ;;  %vm17997_vm4 = vcmp.lt.s32.totalorder %v10260_v11, 31  ;;  %v18018_v14 = vld [vmem:[#allocation6_spill] sm:$0xff] }
 0x290   : > { %8843 = vmatpush1.msk.msra.mxu0 %vm17992_vm7, %v2168_v8  ;;  %v12593_v59 = vpop.permute.xlu0 %5006  ;;  %v1750_v23 = vsel %vm17997_vm4, %v1740_v3, %v11925_v22  ;;  %vm17999_vm7 = vmmov %vm17997_vm4 }
 0x291   : > { %17993 = vst [vmem:[#allocation18_spill] sm:$0xff] %v12593_v59  ;;  %3958 = vmatprep.subr.mxu0 %v9967_v30  ;;  %v4881_v56 = vpop.permute.xlu1 %4880  ;;  %v1751_v29 = vsel %vm17999_vm7, %v17998_v21, %v1740_v3  ;;  %vm18006_vm7 = vcmp.lt.s32.totalorder %v10260_v11, 33  ;;  %v3081_v21 = vpop.f32.mrf.mxu1 }
 0x292   : > { %3959 = vmatpush1.msra.mxu0 %v9968_v32  ;;  %v1332_v3 = vsel %vm18006_vm7, %v1322_v42, %v11980_v7 }
 0x293   : > { %8844 = vmatprep.subr.msk.mxu0 %vm17458_vm10, %v1975_v15 }
 0x294   : > { %8845 = vmatpush1.msk.msra.mxu0 %vm17457_vm6, %v1976_v41  ;;  %v12607_v63 = vpop.permute.xlu0 %4882  ;;  %vm18003_vm6 = vcmp.lt.s32.totalorder %v10260_v11, 32 }
 0x295   : > { %8846 = vmatprep.subr.msk.mxu0 %vm18000_vm8, %v1750_v23  ;;  %v12617_v50 = vpop.permute.xlu1 %4878  ;;  %v1557_v61 = vsel %vm18003_vm6, %v1547_v49, %v11945_v55  ;;  %vm18005_vm4 = vmmov %vm18003_vm6  ;;  %vm18007_vm8 = vcmp.lt.s32.totalorder %v10260_v11, 95 }
 0x296   : > { %18001 = vst [vmem:[#allocation31_spill] sm:$0xff] %v12617_v50  ;;  %8847 = vmatpush1.msk.msra.mxu0 %vm18002_vm3, %v1751_v29  ;;  %v1558_v22 = vsel %vm18005_vm4, %v18004_v13, %v1547_v49  ;;  %v5099_v36 = vsel %vm18007_vm8, %v5009_v38, %v12579_v28  ;;  %vm18009_vm3 = vmmov %vm18006_vm7  ;;  %vm18011_vm4 = vcmp.ge.s32.totalorder %v12516_v52, 1  ;;  %vm18012_vm7 = vcmp.lt.s32.totalorder %v10260_v11, 96  ;;  %v3221_v29 = vpop.f32.mrf.mxu1 }
 0x297   : > { %3964 = vmatprep.subr.mxu0 %v1557_v61  ;;  %v1333_v19 = vsel %vm18009_vm3, %v18008_v48, %v1322_v42  ;;  %vm18010_vm6 = vmmov %vm18007_vm8  ;;  %v4971_v7 = vsel %vm18012_vm7, %v4881_v56, %v12607_v63  ;;  %vm18014_vm8 = vcmp.le.s32.totalorder %v18013_v37, 30  ;;  %vm18015_vm3 = vcmask 588800  }
 0x298   : > { %3965 = vmatpush1.msra.mxu0 %v1558_v22  ;;  %v4753_v2 = vpop.permute.xlu0 %4752  ;;  %v5100_v55 = vsel %vm18010_vm6, %v12593_v59, %v5009_v38  ;;  %vm18016_vm6 = vmmov %vm18012_vm7  ;;  %v3223_v61 = vpop.f32.mrf.mxu1 }
 0x299   : > { %8848 = vmatprep.subr.msk.mxu0 %vm17458_vm10, %v1332_v3  ;;  %v12641_v49 = vpop.permute.xlu1 %4754  ;;  %v4972_v42 = vsel %vm18016_vm6, %v12617_v50, %v4881_v56  ;;  %vm18019_vm10 = vcmp.le.s32.totalorder %v18018_v14, 30 }
 0x29a   : > { %8849 = vmatpush1.msk.msra.mxu0 %vm18011_vm4, %v1333_v19  ;;  %vm18020_vm4 = vcmp.lt.s32.totalorder %v10260_v11, 97  ;;  %v12695_v13 = vpop.f32.mrf.mxu1 }
 0x29b   : > { %8865 = vmatprep.subr.msk.mxu0 %vm18014_vm8, %v5099_v36  ;;  %8850 = vmatmul.mubr.msk.f32.vlgmr.msra.gmra.mxu0 %vm18015_vm3, %v9966_v31  ;;  %v4843_v5 = vsel %vm18020_vm4, %v4753_v2, %v12641_v49  ;;  %vm18021_vm7 = vmmov %vm18020_vm4  ;;  %vm18022_vm8 = vcmp.ge.s32.totalorder %v18013_v37, 1  ;;  %vm18025_vm3 = vcmp.lt.s32.totalorder %v10260_v11, 127  ;;  %vm18027_vm4 = vcmp.le.s32.totalorder %v18013_v37, 30 }
 0x29c   : > { %v12654_v38 = vpop.permute.xlu0 %4750  ;;  %8866 = vmatpush1.msk.msra.mxu0 %vm18019_vm10, %v5100_v55  ;;  %5202 = vmatprep.mubr.f32.mxu0 %v17568_v27  ;;  %vm18023_vm10 = vcmp.ge.s32.totalorder %v18018_v14, 1  ;;  %vm18026_vm6 = vmmov %vm18025_vm3  ;;  %v12697_v22 = vpop.f32.mrf.mxu1 }
 0x29d   : > { %18017 = vst [vmem:[#allocation19_spill] sm:$0xff] %v12654_v38  ;;  %v4844_v8 = vsel %vm18021_vm7, %v12654_v38, %v4753_v2  ;;  %v4625_v31 = vpop.permute.xlu1 %4624  ;;  %5154 = vmatprep.subr.mxu0 %v4971_v7  ;;  %vm18028_vm7 = vcmp.le.s32.totalorder %v18018_v14, 30 }
 0x29e   : > { %5155 = vmatpush1.msra.mxu0 %v4972_v42  ;;  %v12699_v2 = vpop.f32.mrf.mxu1 }
 0x29f   : > { %8867 = vmatprep.subr.msk.mxu0 %vm18022_vm8, %v4843_v5  ;;  %vm18029_vm8 = vcmp.lt.s32.totalorder %v10260_v11, 1 }
 0x2a0   : > { %v12667_v30 = vpop.permute.xlu0 %4626  ;;  %8868 = vmatpush1.msk.msra.mxu0 %vm18023_vm10, %v4844_v8  ;;  %vm18030_vm10 = vcmp.ge.s32.totalorder %v18013_v37, 1  ;;  %v12701_v3 = vpop.f32.mrf.mxu1 }
 0x2a1   : > { %v12671_v56 = vpop.permute.xlu1 %4622  ;;  %v4715_v32 = vsel %vm18025_vm3, %v4625_v31, %v12667_v30  ;;  %vm18033_vm3 = vmmov %vm18029_vm8 }
 0x2a2   : > { %18024 = vst [vmem:[#allocation34_spill] sm:$0xff] %v12671_v56  ;;  %v4716_v15 = vsel %vm18026_vm6, %v12671_v56, %v4625_v31  ;;  %8869 = vmatprep.subr.msk.mxu0 %vm18027_vm4, %v4715_v32  ;;  %v12703_v36 = vpop.f32.mrf.mxu1  ;;  %vm18034_vm6 = vcmp.ge.s32.totalorder %v18018_v14, 1  ;;  %vm18035_vm4 = vcmp.lt.s32.totalorder %v10260_v11, 31 }
 0x2a3   : > { %8870 = vmatpush1.msk.msra.mxu0 %vm18028_vm7, %v4716_v15  ;;  %vm18036_vm7 = vmmov %vm18035_vm4 }
 0x2a4   : > { %5160 = vmatprep.subr.mxu0 %v11915_v47  ;;  %v12684_v34 = vpop.permute.xlu0 %4494  ;;  %v12705_v48 = vpop.f32.mrf.mxu1 }
 0x2a5   : > { %5161 = vmatpush1.msra.mxu0 %v11938_v12  ;;  %v12687_v41 = vpop.permute.xlu1 %4496 }
 0x2a6   : > { %v4588_v23 = vsel %vm18029_vm8, %v12684_v34, %v12687_v41  ;;  %v12707_v19 = vpop.f32.mrf.mxu1  ;;  %vm18037_vm8 = vcmp.le.s32.totalorder %v18013_v37, 30 }
 0x2a7   : > { %8871 = vmatprep.subr.msk.mxu0 %vm18030_vm10, %v4588_v23  ;;  %vm18039_vm10 = vcmp.lt.s32.totalorder %v10260_v11, 32 }
 0x2a8   : > { %v12709_v55 = vpop.f32.mrf.mxu1 }
 0x2bc   : > { %v12711_v7 = vpop.f32.mrf.mxu1 }
 0x2be   : > { %v12713_v42 = vpop.f32.mrf.mxu1 }
 0x2e8   : > { %v12715_v5 = vpop.f32.mrf.mxu1 }
 0x2ea   : > { %v4075_v8 = vpop.f32.mrf.mxu1 }
 0x2eb   : > { %9828 = vtanh.f32 %v4075_v8 }
 0x2ef   : > { %v3150_v31 = vpop.f32.mrf.mxu0 }
 0x2f0   : > { %9830 = vtanh.f32 %v3150_v31 }
 0x2f1   : > { %9832 = vtanh.f32 %v3081_v21  ;;  %v3152_v21 = vpop.f32.mrf.mxu0 }
 0x2f2   : > { %9834 = vtanh.f32 %v3221_v29 }
 0x2f3   : > { %9836 = vtanh.f32 %v3152_v21 }
 0x2f8   : > { %v12717_v32 = vpop.eup %9828 }
 0x2f9   : > { %4428 = vrot.lane.b32.xlu1 %v12717_v32, %s10037_s10  ;;  %4556 = vrot.lane.b32.xlu0 %v12717_v32, %s10036_s26 }
 0x2fd   : > { %4240 = vrot.lane.b32.xlu1 %v11915_v47, %s10038_s12  ;;  %4368 = vrot.lane.b32.xlu0 %v11915_v47, %s10037_s10  ;;  %v12727_v15 = vpop.eup %9830 }
 0x2fe   : > { %v12733_v23 = vpop.eup %9832 }
 0x301   : > { %4238 = vrot.lane.b32.xlu0 %v11938_v12, %s10038_s12  ;;  %5014 = vrot.lane.b32.xlu1 %v12727_v15, %s10032_s22 }
 0x305   : > { %5012 = vrot.lane.b32.xlu0 %v12733_v23, %s10032_s22  ;;  %4110 = vrot.lane.b32.xlu1 %v11938_v12, %s10040_s13  ;;  %v12751_v12 = vpop.eup %9834 }
 0x306   : > { %v12757_v29 = vpop.eup %9836 }
 0x309   : > { %4300 = vrot.lane.b32.xlu0 %v12717_v32, %s10038_s12  ;;  %4884 = vrot.lane.b32.xlu1 %v12733_v23, %s10033_s23 }
 0x30d   : > { %4112 = vrot.lane.b32.xlu0 %v11915_v47, %s10040_s13  ;;  %4172 = vrot.lane.b32.xlu1 %v12717_v32, %s10040_s13  ;;  %v3292_v47 = vpop.f32.mrf.mxu0 }
 0x30e   : > { %9838 = vtanh.f32 %v3292_v47  ;;  %v4367_v47 = vpop.permute.xlu1 %4366 }
 0x30f   : > { %9840 = vtanh.f32 %v3223_v61  ;;  %v3294_v31 = vpop.f32.mrf.mxu0 }
 0x310   : > { %9842 = vtanh.f32 %v12695_v13 }
 0x311   : > { %4886 = vrot.lane.b32.xlu0 %v12727_v15, %s10033_s23  ;;  %4758 = vrot.lane.b32.xlu1 %v12727_v15, %s10034_s24  ;;  %9844 = vtanh.f32 %v3294_v31 }
 0x313   : > { %v3434_v14 = vpop.f32.mrf.mxu0 }
 0x314   : > { %9846 = vtanh.f32 %v3434_v14 }
 0x315   : > { %4756 = vrot.lane.b32.xlu0 %v12733_v23, %s10034_s24  ;;  %5018 = vrot.lane.b32.xlu1 %v12751_v12, %s10032_s22  ;;  %9848 = vtanh.f32 %v12697_v22  ;;  %v3436_v52 = vpop.f32.mrf.mxu0 }
 0x316   : > { %9850 = vtanh.f32 %v12699_v2 }
 0x317   : > { %9852 = vtanh.f32 %v3436_v52 }
 0x319   : > { %4630 = vrot.lane.b32.xlu1 %v12727_v15, %s10035_s25  ;;  %5016 = vrot.lane.b32.xlu0 %v12757_v29, %s10032_s22 }
 0x31b   : > { %v12803_v8 = vpop.eup %9838 }
 0x31c   : > { %v12810_v61 = vpop.eup %9840 }
 0x31d   : > { %4890 = vrot.lane.b32.xlu1 %v12751_v12, %s10033_s23  ;;  %4628 = vrot.lane.b32.xlu0 %v12733_v23, %s10035_s25  ;;  %v12824_v13 = vpop.eup %9842 }
 0x31e   : > { %v12830_v21 = vpop.eup %9844 }
 0x321   : > { %4762 = vrot.lane.b32.xlu1 %v12751_v12, %s10034_s24  ;;  %4888 = vrot.lane.b32.xlu0 %v12757_v29, %s10033_s23 }
 0x325   : > { %4500 = vrot.lane.b32.xlu1 %v12733_v23, %s10036_s26  ;;  %4760 = vrot.lane.b32.xlu0 %v12757_v29, %s10034_s24 }
 0x329   : > { %4634 = vrot.lane.b32.xlu1 %v12751_v12, %s10035_s25  ;;  %4498 = vrot.lane.b32.xlu0 %v11921_v18, %s10036_s26 }
 0x32d   : > { %4372 = vrot.lane.b32.xlu1 %v12733_v23, %s10037_s10  ;;  %4632 = vrot.lane.b32.xlu0 %v12757_v29, %s10035_s25 }
 0x331   : > { %4244 = vrot.lane.b32.xlu1 %v12733_v23, %s10038_s12  ;;  %4370 = vrot.lane.b32.xlu0 %v11921_v18, %s10037_s10 }
 0x335   : > { %4504 = vrot.lane.b32.xlu1 %v12757_v29, %s10036_s26  ;;  %4242 = vrot.lane.b32.xlu0 %v11921_v18, %s10038_s12 }
 0x339   : > { %4116 = vrot.lane.b32.xlu1 %v12733_v23, %s10040_s13  ;;  %4502 = vrot.lane.b32.xlu0 %v12727_v15, %s10036_s26 }
 0x33d   : > { %4114 = vrot.lane.b32.xlu0 %v11921_v18, %s10040_s13  ;;  %4376 = vrot.lane.b32.xlu1 %v12757_v29, %s10037_s10 }
 0x341   : > { %4374 = vrot.lane.b32.xlu0 %v12727_v15, %s10037_s10  ;;  %4248 = vrot.lane.b32.xlu1 %v12757_v29, %s10038_s12 }
 0x345   : > { %4246 = vrot.lane.b32.xlu0 %v12727_v15, %s10038_s12  ;;  %5022 = vrot.lane.b32.xlu1 %v12803_v8, %s10032_s22 }
 0x349   : > { %5020 = vrot.lane.b32.xlu0 %v12810_v61, %s10032_s22  ;;  %4120 = vrot.lane.b32.xlu1 %v12757_v29, %s10040_s13 }
 0x34d   : > { %4118 = vrot.lane.b32.xlu0 %v12727_v15, %s10040_s13  ;;  %4894 = vrot.lane.b32.xlu1 %v12803_v8, %s10033_s23 }
 0x351   : > { %4892 = vrot.lane.b32.xlu0 %v12810_v61, %s10033_s23  ;;  %4766 = vrot.lane.b32.xlu1 %v12803_v8, %s10034_s24 }
 0x355   : > { %4764 = vrot.lane.b32.xlu0 %v12810_v61, %s10034_s24  ;;  %5026 = vrot.lane.b32.xlu1 %v12824_v13, %s10032_s22 }
 0x359   : > { %5024 = vrot.lane.b32.xlu0 %v12830_v21, %s10032_s22  ;;  %4638 = vrot.lane.b32.xlu1 %v12803_v8, %s10035_s25 }
 0x35d   : > { %4636 = vrot.lane.b32.xlu0 %v12810_v61, %s10035_s25  ;;  %4898 = vrot.lane.b32.xlu1 %v12824_v13, %s10033_s23 }
 0x361   : > { %4896 = vrot.lane.b32.xlu0 %v12830_v21, %s10033_s23  ;;  %4770 = vrot.lane.b32.xlu1 %v12824_v13, %s10034_s24 }
 0x365   : > { %4768 = vrot.lane.b32.xlu0 %v12830_v21, %s10034_s24  ;;  %4508 = vrot.lane.b32.xlu1 %v12810_v61, %s10036_s26 }
 0x369   : > { %4506 = vrot.lane.b32.xlu0 %v12751_v12, %s10036_s26  ;;  %4642 = vrot.lane.b32.xlu1 %v12824_v13, %s10035_s25 }
 0x36b   : > { %v12852_v31 = vpop.permute.xlu0 %4556  ;;  %v12854_v0 = vpop.permute.xlu1 %4428 }
 0x36c   : > { %18031 = vst [vmem:[#allocation20_spill] sm:$0xff] %v12852_v31  ;;  %18032 = vst [vmem:[#allocation39_spill] sm:$0xff] %v12854_v0  ;;  %v4589_v56 = vsel %vm18033_vm3, %v12852_v31, %v12684_v34  ;;  %v4461_v34 = vsel %vm18036_vm7, %v12854_v0, %v4367_v47  ;;  %vm18040_vm3 = vcmp.lt.s32.totalorder %v10260_v11, 95  ;;  %v18042_v0 = vld [vmem:[#allocation9_spill] sm:$0xff] }
 0x36d   : > { %4640 = vrot.lane.b32.xlu0 %v12830_v21, %s10035_s25  ;;  %4380 = vrot.lane.b32.xlu1 %v12810_v61, %s10037_s10  ;;  %vm18047_vm7 = vmmov %vm18039_vm10 }
 0x36e   : > { %8872 = vmatpush1.msk.msra.mxu0 %vm18034_vm6, %v4589_v56  ;;  %vm18043_vm6 = vcmp.le.s32.totalorder %v18042_v0, 30 }
 0x36f   : > { %v12866_v25 = vpop.permute.xlu0 %4368  ;;  %v12868_v38 = vpop.permute.xlu1 %4240 }
 0x370   : > { %v4460_v33 = vsel %vm18035_vm4, %v4367_v47, %v12866_v25 }
 0x371   : > { %4378 = vrot.lane.b32.xlu0 %v12751_v12, %s10037_s10  ;;  %4252 = vrot.lane.b32.xlu1 %v12810_v61, %s10038_s12 }
 0x372   : > { %8873 = vmatprep.subr.msk.mxu0 %vm18037_vm8, %v4460_v33  ;;  %vm18050_vm8 = vcmp.lt.s32.totalorder %v10260_v11, 33 }
 0x373   : > { %8874 = vmatpush1.msk.msra.mxu0 %vm10407_vm11, %v4461_v34  ;;  %v4239_v31 = vpop.permute.xlu0 %4238  ;;  %v5015_v1 = vpop.permute.xlu1 %5014  ;;  %vm18041_vm11 = vmmov %vm18040_vm3 }
 0x374   : > { %v4332_v50 = vsel %vm18039_vm10, %v4239_v31, %v12868_v38  ;;  %vm18051_vm10 = vmmov %vm18050_vm8 }
 0x375   : > { %4250 = vrot.lane.b32.xlu0 %v12751_v12, %s10038_s12  ;;  %4512 = vrot.lane.b32.xlu1 %v12830_v21, %s10036_s26 }
 0x376   : > { %5166 = vmatprep.subr.mxu0 %v4332_v50  ;;  %v18044_v50 = vld [vmem:[#allocation11_spill] sm:$0xff] }
 0x377   : > { %v5013_v47 = vpop.permute.xlu0 %5012  ;;  %v4111_v33 = vpop.permute.xlu1 %4110  ;;  %vm18045_vm4 = vcmp.le.s32.totalorder %v18044_v50, 30 }
 0x378   : > { %v5098_v34 = vsel %vm18040_vm3, %v12579_v28, %v5013_v47  ;;  %v5097_v56 = vsel %vm18041_vm11, %v5013_v47, %v5015_v1  ;;  %vm18054_vm3 = vcmp.lt.s32.totalorder %v10260_v11, 96  ;;  %vm18055_vm11 = vcmask 588800  }
 0x379   : > { %4510 = vrot.lane.b32.xlu0 %v12803_v8, %s10036_s26  ;;  %4124 = vrot.lane.b32.xlu1 %v12810_v61, %s10040_s13 }
 0x37a   : > { %8879 = vmatprep.subr.msk.mxu1 %vm18043_vm6, %v5097_v56  ;;  %vm18056_vm6 = vmmov %vm18054_vm3 }
 0x37b   : > { %8880 = vmatpush1.msk.msra.mxu1 %vm18045_vm4, %v5098_v34  ;;  %v12905_v14 = vpop.permute.xlu0 %4300  ;;  %v4885_v28 = vpop.permute.xlu1 %4884 }
 0x37c   : > { %18046 = vst [vmem:[#allocation23_spill] sm:$0xff] %v12905_v14  ;;  %v4333_v47 = vsel %vm18047_vm7, %v12905_v14, %v4239_v31  ;;  %vm18059_vm7 = vcmp.ge.s32.totalorder %v18042_v0, 1 }
 0x37d   : > { %4122 = vrot.lane.b32.xlu0 %v12751_v12, %s10040_s13  ;;  %4384 = vrot.lane.b32.xlu1 %v12830_v21, %s10037_s10 }
 0x37e   : > { %8875 = vmatpush1.msk.msra.mxu0 %vm10388_vm9, %v4333_v47  ;;  %v12935_v47 = vpop.eup %9846  ;;  %vm18052_vm9 = vcmp.ge.s32.totalorder %v18013_v37, 1  ;;  %v4970_v37 = vsel %vm18056_vm6, %v12607_v63, %v4885_v28  ;;  %vm18065_vm6 = vcmp.lt.s32.totalorder %v10260_v11, 127 }
 0x37f   : > { %v12916_v22 = vpop.permute.xlu0 %4112  ;;  %v12918_v56 = vpop.permute.xlu1 %4172 }
 0x380   : > { %18049 = vst [vmem:[#allocation41_spill] sm:$0xff] %v12918_v56  ;;  %v4205_v34 = vsel %vm18050_vm8, %v12918_v56, %v4111_v33  ;;  %v4204_v31 = vsel %vm18051_vm10, %v4111_v33, %v12916_v22  ;;  %vm18060_vm8 = vcmp.ge.s32.totalorder %v18044_v50, 1  ;;  %vm18061_vm10 = vcmp.lt.s32.totalorder %v10260_v11, 95 }
 0x381   : > { %4382 = vrot.lane.b32.xlu0 %v12803_v8, %s10037_s10  ;;  %4256 = vrot.lane.b32.xlu1 %v12830_v21, %s10038_s12 }
 0x382   : > { %8876 = vmatprep.subr.msk.mxu0 %vm18052_vm9, %v4204_v31  ;;  %v12955_v31 = vpop.eup %9848  ;;  %vm18062_vm9 = vmmov %vm18061_vm10 }
 0x383   : > { %8877 = vmatpush1.msk.msra.mxu0 %vm10458_vm14, %v4205_v34  ;;  %v4887_v33 = vpop.permute.xlu0 %4886  ;;  %v4759_v14 = vpop.permute.xlu1 %4758  ;;  %vm18057_vm14 = vcmp.lt.s32.totalorder %v10260_v11, 97 }
 0x384   : > { %v4969_v59 = vsel %vm18054_vm3, %v4885_v28, %v4887_v33  ;;  %8878 = vmatmul.mubr.msk.f32.vlgmr.msra.gmra.mxu0 %vm18055_vm11, %v12933_v43  ;;  %vm18058_vm4 = vmmov %vm18057_vm14  ;;  %vm18063_vm3 = vcmp.le.s32.totalorder %v11818_v10, 30  ;;  %vm18064_vm11 = vcmp.le.s32.totalorder %v11826_v39, 30 }
 0x385   : > { %4254 = vrot.lane.b32.xlu0 %v12803_v8, %s10038_s12  ;;  %5030 = vrot.lane.b32.xlu1 %v12935_v47, %s10032_s22 }
 0x386   : > { %5225 = vmatprep.subr.mxu1 %v4969_v59  ;;  %5344 = vmatprep.mubr.f32.mxu0 %v17568_v27 }
 0x387   : > { %5226 = vmatpush1.msra.mxu1 %v4970_v37  ;;  %v4757_v56 = vpop.permute.xlu0 %4756  ;;  %v12953_v34 = vpop.permute.xlu1 %5018 }
 0x388   : > { %v4842_v24 = vsel %vm18057_vm14, %v12641_v49, %v4757_v56  ;;  %v4841_v59 = vsel %vm18058_vm4, %v4757_v56, %v4759_v14  ;;  %vm18066_vm14 = vmmov %vm18065_vm6  ;;  %vm18067_vm4 = vcmp.le.s32.totalorder %v18042_v0, 30 }
 0x389   : > { %5028 = vrot.lane.b32.xlu0 %v12955_v31, %s10032_s22  ;;  %4128 = vrot.lane.b32.xlu1 %v12830_v21, %s10040_s13 }
 0x38a   : > { %8881 = vmatprep.subr.msk.mxu1 %vm18059_vm7, %v4841_v59  ;;  %vm18068_vm7 = vcmp.le.s32.totalorder %v18044_v50, 30 }
 0x38b   : > { %8882 = vmatpush1.msk.msra.mxu1 %vm18060_vm8, %v4842_v24  ;;  %v5017_v63 = vpop.permute.xlu0 %5016  ;;  %v4631_v2 = vpop.permute.xlu1 %4630  ;;  %vm18069_vm8 = vcmp.lt.s32.totalorder %v10260_v11, 96 }
 0x38c   : > { %v5096_v49 = vsel %vm18061_vm10, %v5015_v1, %v5017_v63  ;;  %v5095_v28 = vsel %vm18062_vm9, %v5017_v63, %v12953_v34  ;;  %vm18070_vm10 = vmmov %vm18069_vm8  ;;  %vm18071_vm9 = vcmp.lt.s32.totalorder %v10260_v11, 97 }
 0x38d   : > { %4126 = vrot.lane.b32.xlu0 %v12803_v8, %s10040_s13  ;;  %4902 = vrot.lane.b32.xlu1 %v12935_v47, %s10033_s23 }
 0x38e   : > { %8892 = vmatprep.subr.msk.mxu0 %vm18063_vm3, %v5095_v28  ;;  %vm18072_vm3 = vmmov %vm18071_vm9 }
 0x38f   : > { %8893 = vmatpush1.msk.msra.mxu0 %vm18064_vm11, %v5096_v49  ;;  %v4629_v24 = vpop.permute.xlu0 %4628  ;;  %v12984_v52 = vpop.permute.xlu1 %4890  ;;  %vm18073_vm11 = vcmp.ge.s32.totalorder %v11818_v10, 1 }
 0x390   : > { %v4714_v1 = vsel %vm18065_vm6, %v12667_v30, %v4629_v24  ;;  %v4713_v37 = vsel %vm18066_vm14, %v4629_v24, %v4631_v2  ;;  %v13007_v49 = vpop.eup %9850  ;;  %vm18074_vm6 = vcmp.ge.s32.totalorder %v11826_v39, 1  ;;  %vm18075_vm14 = vcmp.lt.s32.totalorder %v10260_v11, 1 }
 0x391   : > { %4900 = vrot.lane.b32.xlu0 %v12955_v31, %s10033_s23  ;;  %4774 = vrot.lane.b32.xlu1 %v12935_v47, %s10034_s24  ;;  %v13014_v24 = vpop.eup %9852 }
 0x392   : > { %8883 = vmatprep.subr.msk.mxu1 %vm18067_vm4, %v4713_v37  ;;  %vm18076_vm4 = vmmov %vm18075_vm14 }
 0x393   : > { %8884 = vmatpush1.msk.msra.mxu1 %vm18068_vm7, %v4714_v1  ;;  %v4889_v56 = vpop.permute.xlu0 %4888  ;;  %v12999_v59 = vpop.permute.xlu1 %4762  ;;  %vm18077_vm7 = vcmp.ge.s32.totalorder %v18042_v0, 1 }
 0x394   : > { %5231 = vmatprep.subr.mxu1 %v12733_v23  ;;  %v4967_v30 = vsel %vm18069_vm8, %v4889_v56, %v12984_v52  ;;  %v4968_v63 = vsel %vm18070_vm10, %v4887_v33, %v4889_v56  ;;  %vm18078_vm8 = vcmp.ge.s32.totalorder %v18044_v50, 1  ;;  %vm18079_vm10 = vcmp.lt.s32.totalorder %v10260_v11, 127 }
 0x395   : > { %5232 = vmatpush1.msra.mxu1 %v11921_v18  ;;  %4772 = vrot.lane.b32.xlu0 %v12955_v31, %s10034_s24 }
 0x396   : > { %5034 = vrot.lane.b32.xlu1 %v13007_v49, %s10032_s22  ;;  %5296 = vmatprep.subr.mxu0 %v4967_v30 }
 0x397   : > { %5297 = vmatpush1.msra.mxu0 %v4968_v63  ;;  %v4761_v23 = vpop.permute.xlu0 %4760  ;;  %v4501_v28 = vpop.permute.xlu1 %4500 }
 0x398   : > { %v4840_v1 = vsel %vm18071_vm9, %v4759_v14, %v4761_v23  ;;  %v4839_v33 = vsel %vm18072_vm3, %v4761_v23, %v12999_v59  ;;  %vm18080_vm9 = vmmov %vm18079_vm10  ;;  %vm18081_vm3 = vcmp.le.s32.totalorder %v11818_v10, 30 }
 0x399   : > { %5032 = vrot.lane.b32.xlu0 %v13014_v24, %s10032_s22  ;;  %8894 = vmatprep.subr.msk.mxu0 %vm18073_vm11, %v4839_v33  ;;  %vm18082_vm11 = vcmp.le.s32.totalorder %v11826_v39, 30 }
 0x39a   : > { %4646 = vrot.lane.b32.xlu1 %v12935_v47, %s10035_s25  ;;  %8895 = vmatpush1.msk.msra.mxu0 %vm18074_vm6, %v4840_v1  ;;  %vm18083_vm6 = vcmp.lt.s32.totalorder %v10260_v11, 31 }
 0x39b   : > { %v4499_v18 = vpop.permute.xlu0 %4498  ;;  %v13029_v37 = vpop.permute.xlu1 %4634 }
 0x39c   : > { %v4587_v14 = vsel %vm18075_vm14, %v12687_v41, %v4499_v18  ;;  %v4586_v56 = vsel %vm18076_vm4, %v4499_v18, %v4501_v28  ;;  %vm18084_vm14 = vmmov %vm18083_vm6  ;;  %vm18085_vm4 = vcmp.le.s32.totalorder %v18042_v0, 30 }
 0x39d   : > { %4644 = vrot.lane.b32.xlu0 %v12955_v31, %s10035_s25  ;;  %8885 = vmatprep.subr.msk.mxu1 %vm18077_vm7, %v4586_v56  ;;  %vm18086_vm7 = vcmp.le.s32.totalorder %v18044_v50, 30 }
 0x39e   : > { %4906 = vrot.lane.b32.xlu1 %v13007_v49, %s10033_s23  ;;  %8886 = vmatpush1.msk.msra.mxu1 %vm18078_vm8, %v4587_v14  ;;  %vm18087_vm8 = vcmp.lt.s32.totalorder %v10260_v11, 32 }
 0x39f   : > { %v4633_v30 = vpop.permute.xlu0 %4632  ;;  %v4373_v63 = vpop.permute.xlu1 %4372 }
 0x3a0   : > { %v4712_v41 = vsel %vm18079_vm10, %v4631_v2, %v4633_v30  ;;  %v4711_v23 = vsel %vm18080_vm9, %v4633_v30, %v13029_v37  ;;  %vm18088_vm10 = vmmov %vm18087_vm8  ;;  %vm18089_vm9 = vcmp.lt.s32.totalorder %v10260_v11, 1 }
 0x3a1   : > { %4904 = vrot.lane.b32.xlu0 %v13014_v24, %s10033_s23  ;;  %8896 = vmatprep.subr.msk.mxu0 %vm18081_vm3, %v4711_v23  ;;  %vm18090_vm3 = vmmov %vm18089_vm9 }
 0x3a2   : > { %4778 = vrot.lane.b32.xlu1 %v13007_v49, %s10034_s24  ;;  %8897 = vmatpush1.msk.msra.mxu0 %vm18082_vm11, %v4712_v41  ;;  %vm18091_vm11 = vcmp.ge.s32.totalorder %v11818_v10, 1 }
 0x3a3   : > { %v4371_v1 = vpop.permute.xlu0 %4370  ;;  %5302 = vmatprep.subr.mxu0 %v12757_v29  ;;  %v4245_v2 = vpop.permute.xlu1 %4244 }
 0x3a4   : > { %v4459_v33 = vsel %vm18083_vm6, %v12866_v25, %v4371_v1  ;;  %5303 = vmatpush1.msra.mxu0 %v12727_v15  ;;  %v4458_v18 = vsel %vm18084_vm14, %v4371_v1, %v4373_v63  ;;  %vm18092_vm6 = vcmp.ge.s32.totalorder %v11826_v39, 1  ;;  %vm18093_vm14 = vcmp.lt.s32.totalorder %v10260_v11, 33 }
 0x3a5   : > { %4776 = vrot.lane.b32.xlu0 %v13014_v24, %s10034_s24  ;;  %8887 = vmatprep.subr.msk.mxu1 %vm18085_vm4, %v4458_v18  ;;  %vm18094_vm4 = vmmov %vm18093_vm14  ;;  %v3576_v18 = vpop.f32.mrf.mxu0 }
 0x3a6   : > { %4516 = vrot.lane.b32.xlu1 %v12955_v31, %s10036_s26  ;;  %8888 = vmatpush1.msk.msra.mxu1 %vm18086_vm7, %v4459_v33  ;;  %vm18095_vm7 = vcmp.ge.s32.totalorder %v18042_v0, 1  ;;  %9854 = vtanh.f32 %v3576_v18 }
 0x3a7   : > { %v4243_v29 = vpop.permute.xlu0 %4242  ;;  %v13072_v14 = vpop.permute.xlu1 %4504  ;;  %9856 = vtanh.f32 %v12701_v3  ;;  %v18107_v3 = vld [vmem:[#allocation15_spill] sm:$0xff] }
 0x3a8   : > { %v4330_v25 = vsel %vm18087_vm8, %v4243_v29, %v4245_v2  ;;  %v4331_v15 = vsel %vm18088_vm10, %v12868_v38, %v4243_v29  ;;  %vm18096_vm8 = vcmp.ge.s32.totalorder %v18044_v50, 1  ;;  %vm18097_vm10 = vcmask 588800  }
 0x3a9   : > { %4514 = vrot.lane.b32.xlu0 %v12824_v13, %s10036_s26  ;;  %5237 = vmatprep.subr.mxu1 %v4330_v25  ;;  %9858 = vtanh.f32 %v12703_v36 }
 0x3aa   : > { %4650 = vrot.lane.b32.xlu1 %v13007_v49, %s10035_s25  ;;  %5238 = vmatpush1.msra.mxu1 %v4331_v15 }
 0x3ab   : > { %v4503_v56 = vpop.permute.xlu0 %4502  ;;  %v4117_v30 = vpop.permute.xlu1 %4116 }
 0x3ac   : > { %v4585_v41 = vsel %vm18089_vm9, %v4501_v28, %v4503_v56  ;;  %v4584_v23 = vsel %vm18090_vm3, %v4503_v56, %v13072_v14  ;;  %vm18098_vm9 = vcmp.lt.s32.totalorder %v10260_v11, 31 }
 0x3ad   : > { %4648 = vrot.lane.b32.xlu0 %v13014_v24, %s10035_s25  ;;  %8898 = vmatprep.subr.msk.mxu0 %vm18091_vm11, %v4584_v23  ;;  %vm18099_vm3 = vmmov %vm18098_vm9  ;;  %vm18100_vm11 = vcmp.le.s32.totalorder %v11818_v10, 30 }
 0x3ae   : > { %4388 = vrot.lane.b32.xlu1 %v12955_v31, %s10037_s10  ;;  %8899 = vmatpush1.msk.msra.mxu0 %vm18092_vm6, %v4585_v41  ;;  %vm18101_vm6 = vcmp.le.s32.totalorder %v11826_v39, 30 }
 0x3af   : > { %v4115_v38 = vpop.permute.xlu0 %4114  ;;  %v13096_v1 = vpop.permute.xlu1 %4376 }
 0x3b0   : > { %v4203_v28 = vsel %vm18093_vm14, %v12916_v22, %v4115_v38  ;;  %v4202_v33 = vsel %vm18094_vm4, %v4115_v38, %v4117_v30  ;;  %vm18102_vm14 = vcmp.lt.s32.totalorder %v10260_v11, 32 }
 0x3b1   : > { %4386 = vrot.lane.b32.xlu0 %v12824_v13, %s10037_s10  ;;  %8889 = vmatprep.subr.msk.mxu1 %vm18095_vm7, %v4202_v33  ;;  %vm18103_vm4 = vmmov %vm18102_vm14  ;;  %vm18104_vm7 = vcmp.lt.s32.totalorder %v10260_v11, 95 }
 0x3b2   : > { %4260 = vrot.lane.b32.xlu1 %v12955_v31, %s10038_s12  ;;  %8890 = vmatpush1.msk.msra.mxu1 %vm18096_vm8, %v4203_v28  ;;  %vm18105_vm8 = vmmov %vm18104_vm7 }
 0x3b3   : > { %v4375_v29 = vpop.permute.xlu0 %4374  ;;  %v13111_v25 = vpop.permute.xlu1 %4248  ;;  %8891 = vmatmul.mubr.msk.f32.vlgmr.msra.gmra.mxu1 %vm18097_vm10, %v12933_v43  ;;  %vm18108_vm10 = vcmp.le.s32.totalorder %v18107_v3, 30 }
 0x3b4   : > { %v4457_v22 = vsel %vm18098_vm9, %v4373_v63, %v4375_v29  ;;  %v4456_v0 = vsel %vm18099_vm3, %v4375_v29, %v13096_v1  ;;  %5415 = vmatprep.mubr.f32.mxu1 %v17568_v27  ;;  %vm18109_vm9 = vcmp.lt.s32.totalorder %v10260_v11, 33 }
 0x3b5   : > { %4258 = vrot.lane.b32.xlu0 %v12824_v13, %s10038_s12  ;;  %8900 = vmatprep.subr.msk.mxu0 %vm18100_vm11, %v4456_v0  ;;  %vm18110_vm3 = vmmov %vm18109_vm9  ;;  %vm18112_vm11 = vcmp.ge.s32.totalorder %v11826_v39, 1 }
 0x3b6   : > { %4520 = vrot.lane.b32.xlu1 %v13014_v24, %s10036_s26  ;;  %8901 = vmatpush1.msk.msra.mxu0 %vm18101_vm6, %v4457_v22  ;;  %v13167_v22 = vpop.eup %9854  ;;  %vm18113_vm6 = vcmask 588800  }
 0x3b7   : > { %v4247_v50 = vpop.permute.xlu0 %4246  ;;  %v5023_v63 = vpop.permute.xlu1 %5022 }
 0x3b8   : > { %v4328_v15 = vsel %vm18102_vm14, %v4247_v50, %v13111_v25  ;;  %v4329_v56 = vsel %vm18103_vm4, %v4245_v2, %v4247_v50  ;;  %vm18114_vm14 = vcmp.lt.s32.totalorder %v10260_v11, 96 }
 0x3b9   : > { %4518 = vrot.lane.b32.xlu0 %v12935_v47, %s10036_s26  ;;  %5308 = vmatprep.subr.mxu0 %v4328_v15  ;;  %vm18115_vm4 = vmmov %vm18114_vm14 }
 0x3ba   : > { %4132 = vrot.lane.b32.xlu1 %v12955_v31, %s10040_s13  ;;  %5309 = vmatpush1.msra.mxu0 %v4329_v56 }
 0x3bb   : > { %v5021_v41 = vpop.permute.xlu0 %5020  ;;  %v13139_v23 = vpop.permute.xlu1 %4120 }
 0x3bc   : > { %v5094_v38 = vsel %vm18104_vm7, %v12953_v34, %v5021_v41  ;;  %v5093_v2 = vsel %vm18105_vm8, %v5021_v41, %v5023_v63  ;;  %v13185_v41 = vpop.eup %9856  ;;  %vm18117_vm7 = vcmp.lt.s32.totalorder %v10260_v11, 97 }
 0x3bd   : > { %4130 = vrot.lane.b32.xlu0 %v12824_v13, %s10040_s13  ;;  %8905 = vmatprep.subr.msk.mxu1 %vm10626_vm12, %v5093_v2  ;;  %vm18111_vm12 = vcmp.ge.s32.totalorder %v11818_v10, 1  ;;  %vm18118_vm8 = vmmov %vm18117_vm7 }
 0x3be   : > { %4392 = vrot.lane.b32.xlu1 %v13014_v24, %s10037_s10  ;;  %8906 = vmatpush1.msk.msra.mxu1 %vm18108_vm10, %v5094_v38  ;;  %vm18121_vm10 = vcmp.lt.s32.totalorder %v10260_v11, 95 }
 0x3bf   : > { %v4119_v33 = vpop.permute.xlu0 %4118  ;;  %v4895_v18 = vpop.permute.xlu1 %4894 }
 0x3c0   : > { %v4201_v34 = vsel %vm18109_vm9, %v4117_v30, %v4119_v33  ;;  %v4200_v29 = vsel %vm18110_vm3, %v4119_v33, %v13139_v23  ;;  %vm18122_vm9 = vmmov %vm18121_vm10  ;;  %vm18124_vm3 = vcmp.le.s32.totalorder %v12012_v53, 30 }
 0x3c1   : > { %4390 = vrot.lane.b32.xlu0 %v12935_v47, %s10037_s10  ;;  %8902 = vmatprep.subr.msk.mxu0 %vm18111_vm12, %v4200_v29  ;;  %vm18125_vm12 = vcmp.lt.s32.totalorder %v10260_v11, 127 }
 0x3c2   : > { %4264 = vrot.lane.b32.xlu1 %v13014_v24, %s10038_s12  ;;  %8903 = vmatpush1.msk.msra.mxu0 %vm18112_vm11, %v4201_v34  ;;  %vm18126_vm11 = vmmov %vm18125_vm12 }
 0x3c3   : > { %v4893_v0 = vpop.permute.xlu0 %4892  ;;  %v4767_v30 = vpop.permute.xlu1 %4766  ;;  %8904 = vmatmul.mubr.msk.f32.vlgmr.msra.gmra.mxu0 %vm18113_vm6, %v12933_v43 }
 0x3c4   : > { %v4965_v50 = vsel %vm18114_vm14, %v4893_v0, %v4895_v18  ;;  %v4966_v10 = vsel %vm18115_vm4, %v12984_v52, %v4893_v0  ;;  %5486 = vmatprep.mubr.f32.mxu0 %v17568_v27  ;;  %v3578_v52 = vpop.f32.mrf.mxu0  ;;  %vm18129_vm14 = vcmp.le.s32.totalorder %v18107_v3, 30 }
 0x3c5   : > { %4262 = vrot.lane.b32.xlu0 %v12935_v47, %s10038_s12  ;;  %8907 = vmatprep.subr.msk.mxu1 %vm10603_vm2, %v4965_v50  ;;  %vm18120_vm2 = vcmp.ge.s32.totalorder %v18107_v3, 1  ;;  %9860 = vtanh.f32 %v3578_v52 }
 0x3c6   : > { %5038 = vrot.lane.b32.xlu1 %v13167_v22, %s10032_s22  ;;  %5368 = vmatpush1.msra.mxu1 %v4966_v10  ;;  %v18127_v10 = vld [vmem:[#allocation12_spill] sm:$0xff] }
 0x3c7   : > { %v4765_v15 = vpop.permute.xlu0 %4764  ;;  %v13183_v56 = vpop.permute.xlu1 %5026  ;;  %vm18128_vm6 = vcmp.le.s32.totalorder %v18127_v10, 30 }
 0x3c8   : > { %v4838_v38 = vsel %vm18117_vm7, %v12999_v59, %v4765_v15  ;;  %v4837_v2 = vsel %vm18118_vm8, %v4765_v15, %v4767_v30  ;;  %vm18130_vm7 = vmmov %vm18115_vm4 }
 0x3c9   : > { %5036 = vrot.lane.b32.xlu0 %v13185_v41, %s10032_s22  ;;  %8908 = vmatprep.subr.msk.mxu1 %vm10681_vm1, %v4837_v2  ;;  %vm18123_vm1 = vcmp.le.s32.totalorder %v12000_v62, 30 }
 0x3ca   : > { %4136 = vrot.lane.b32.xlu1 %v13014_v24, %s10040_s13  ;;  %8909 = vmatpush1.msk.msra.mxu1 %vm18120_vm2, %v4838_v38  ;;  %v13238_v38 = vpop.eup %9858  ;;  %vm18131_vm2 = vmmov %vm18118_vm8 }
 0x3cb   : > { %v5025_v36 = vpop.permute.xlu0 %5024  ;;  %v4639_v33 = vpop.permute.xlu1 %4638 }
 0x3cc   : > { %v5092_v59 = vsel %vm18121_vm10, %v5023_v63, %v5025_v36  ;;  %v5091_v34 = vsel %vm18122_vm9, %v5025_v36, %v13183_v56  ;;  %vm18132_vm10 = vcmp.ge.s32.totalorder %v12000_v62, 1  ;;  %vm18133_vm9 = vcmp.ge.s32.totalorder %v12012_v53, 1 }
 0x3cd   : > { %4134 = vrot.lane.b32.xlu0 %v12935_v47, %s10040_s13  ;;  %8919 = vmatprep.subr.msk.mxu0 %vm18123_vm1, %v5091_v34  ;;  %vm18134_vm1 = vcmp.lt.s32.totalorder %v10260_v11, 1 }
 0x3ce   : > { %4910 = vrot.lane.b32.xlu1 %v13167_v22, %s10033_s23  ;;  %8920 = vmatpush1.msk.msra.mxu0 %vm18124_vm3, %v5092_v59  ;;  %vm18135_vm3 = vmmov %vm18134_vm1 }
 0x3cf   : > { %v4637_v29 = vpop.permute.xlu0 %4636  ;;  %v13214_v0 = vpop.permute.xlu1 %4898 }
 0x3d0   : > { %v4710_v63 = vsel %vm18125_vm12, %v13029_v37, %v4637_v29  ;;  %v4709_v50 = vsel %vm18126_vm11, %v4637_v29, %v4639_v33  ;;  %vm18136_vm12 = vcmp.ge.s32.totalorder %v18127_v10, 1  ;;  %vm18137_vm11 = vcmp.ge.s32.totalorder %v18107_v3, 1 }
 0x3d1   : > { %4908 = vrot.lane.b32.xlu0 %v13185_v41, %s10033_s23  ;;  %8910 = vmatprep.subr.msk.mxu1 %vm18128_vm6, %v4709_v50  ;;  %vm18138_vm6 = vcmp.lt.s32.totalorder %v10260_v11, 127 }
 0x3d2   : > { %4782 = vrot.lane.b32.xlu1 %v13167_v22, %s10034_s24  ;;  %8911 = vmatpush1.msk.msra.mxu1 %vm18129_vm14, %v4710_v63  ;;  %vm18139_vm14 = vmmov %vm18138_vm6 }
 0x3d3   : > { %v4897_v39 = vpop.permute.xlu0 %4896  ;;  %5373 = vmatprep.subr.mxu1 %v12810_v61  ;;  %v13230_v15 = vpop.permute.xlu1 %4770 }
 0x3d4   : > { %5374 = vmatpush1.msra.mxu1 %v12751_v12  ;;  %v4963_v37 = vsel %vm18115_vm4, %v4897_v39, %v13214_v0  ;;  %v4964_v52 = vsel %vm18130_vm7, %v4895_v18, %v4897_v39  ;;  %v13244_v12 = vpop.eup %9860  ;;  %vm18140_vm4 = vcmp.le.s32.totalorder %v12000_v62, 30  ;;  %vm18141_vm7 = vcmp.le.s32.totalorder %v12012_v53, 30 }
 0x3d5   : > { %4780 = vrot.lane.b32.xlu0 %v13185_v41, %s10034_s24  ;;  %5438 = vmatprep.subr.mxu0 %v4963_v37 }
 0x3d6   : > { %5042 = vrot.lane.b32.xlu1 %v13238_v38, %s10032_s22  ;;  %5439 = vmatpush1.msra.mxu0 %v4964_v52 }
 0x3d7   : > { %v4769_v61 = vpop.permute.xlu0 %4768  ;;  %v4509_v2 = vpop.permute.xlu1 %4508 }
 0x3d8   : > { %v4836_v28 = vsel %vm18118_vm8, %v4767_v30, %v4769_v61  ;;  %v4835_v18 = vsel %vm18131_vm2, %v4769_v61, %v13230_v15  ;;  %vm18142_vm8 = vcmp.lt.s32.totalorder %v10260_v11, 31 }
 0x3d9   : > { %5040 = vrot.lane.b32.xlu0 %v13244_v12, %s10032_s22  ;;  %8921 = vmatprep.subr.msk.mxu0 %vm18132_vm10, %v4835_v18  ;;  %vm18143_vm2 = vmmov %vm18142_vm8  ;;  %vm18144_vm10 = vcmp.le.s32.totalorder %v18127_v10, 30 }
 0x3da   : > { %4654 = vrot.lane.b32.xlu1 %v13167_v22, %s10035_s25  ;;  %8922 = vmatpush1.msk.msra.mxu0 %vm18133_vm9, %v4836_v28  ;;  %vm18145_vm9 = vcmp.le.s32.totalorder %v18107_v3, 30 }
 0x3db   : > { %v4507_v36 = vpop.permute.xlu0 %4506  ;;  %v13259_v59 = vpop.permute.xlu1 %4642 }
 0x3dc   : > { %v4583_v30 = vsel %vm18134_vm1, %v13072_v14, %v4507_v36  ;;  %v4582_v34 = vsel %vm18135_vm3, %v4507_v36, %v4509_v2  ;;  %vm18146_vm1 = vcmp.lt.s32.totalorder %v10260_v11, 32 }
 0x3dd   : > { %4652 = vrot.lane.b32.xlu0 %v13185_v41, %s10035_s25  ;;  %8912 = vmatprep.subr.msk.mxu1 %vm18136_vm12, %v4582_v34  ;;  %vm18147_vm3 = vmmov %vm18146_vm1  ;;  %vm18148_vm12 = vcmp.lt.s32.totalorder %v10260_v11, 1 }
 0x3de   : > { %4914 = vrot.lane.b32.xlu1 %v13238_v38, %s10033_s23  ;;  %8913 = vmatpush1.msk.msra.mxu1 %vm18137_vm11, %v4583_v30  ;;  %vm18149_vm11 = vmmov %vm18148_vm12 }
 0x3df   : > { %v4641_v29 = vpop.permute.xlu0 %4640  ;;  %v4381_v63 = vpop.permute.xlu1 %4380 }
 0x3e0   : > { %v4708_v14 = vsel %vm18138_vm6, %v4639_v33, %v4641_v29  ;;  %v4707_v50 = vsel %vm18139_vm14, %v4641_v29, %v13259_v59  ;;  %vm18150_vm6 = vcmp.ge.s32.totalorder %v12000_v62, 1  ;;  %vm18151_vm14 = vcmp.ge.s32.totalorder %v12012_v53, 1  ;;  %v3718_v53 = vpop.f32.mrf.mxu0 }
 0x3e1   : > { %4912 = vrot.lane.b32.xlu0 %v13244_v12, %s10033_s23  ;;  %8923 = vmatprep.subr.msk.mxu0 %vm18140_vm4, %v4707_v50  ;;  %vm18152_vm4 = vcmp.lt.s32.totalorder %v10260_v11, 33  ;;  %9862 = vtanh.f32 %v3718_v53 }
 0x3e2   : > { %4786 = vrot.lane.b32.xlu1 %v13238_v38, %s10034_s24  ;;  %8924 = vmatpush1.msk.msra.mxu0 %vm18141_vm7, %v4708_v14  ;;  %vm18153_vm7 = vmmov %vm18152_vm4  ;;  %9864 = vtanh.f32 %v12705_v48 }
 0x3e3   : > { %v4379_v39 = vpop.permute.xlu0 %4378  ;;  %5444 = vmatprep.subr.mxu0 %v12830_v21  ;;  %v4253_v33 = vpop.permute.xlu1 %4252  ;;  %9866 = vtanh.f32 %v12707_v19 }
 0x3e4   : > { %v4455_v37 = vsel %vm18142_vm8, %v13096_v1, %v4379_v39  ;;  %5445 = vmatpush1.msra.mxu0 %v12803_v8  ;;  %v4454_v52 = vsel %vm18143_vm2, %v4379_v39, %v4381_v63  ;;  %vm18154_vm8 = vcmp.ge.s32.totalorder %v18127_v10, 1  ;;  %vm18155_vm2 = vcmp.ge.s32.totalorder %v18107_v3, 1 }
 0x3e5   : > { %4784 = vrot.lane.b32.xlu0 %v13244_v12, %s10034_s24  ;;  %8914 = vmatprep.subr.msk.mxu1 %vm18144_vm10, %v4454_v52  ;;  %vm18156_vm10 = vcmask 588800  }
 0x3e6   : > { %4524 = vrot.lane.b32.xlu1 %v13185_v41, %s10036_s26  ;;  %8915 = vmatpush1.msk.msra.mxu1 %vm18145_vm9, %v4455_v37  ;;  %vm18157_vm9 = vcmp.lt.s32.totalorder %v10260_v11, 31 }
 0x3e7   : > { %v4251_v21 = vpop.permute.xlu0 %4250  ;;  %v13302_v61 = vpop.permute.xlu1 %4512 }
 0x3e8   : > { %v4326_v8 = vsel %vm18146_vm1, %v4251_v21, %v4253_v33  ;;  %v4327_v1 = vsel %vm18147_vm3, %v13111_v25, %v4251_v21  ;;  %vm18158_vm1 = vmmov %vm18157_vm9  ;;  %vm18159_vm3 = vcmp.le.s32.totalorder %v12000_v62, 30 }
 0x3e9   : > { %4522 = vrot.lane.b32.xlu0 %v13007_v49, %s10036_s26  ;;  %5379 = vmatprep.subr.mxu1 %v4326_v8  ;;  %v18164_v8 = vld [vmem:[#allocation21_spill] sm:$0xff] }
 0x3ea   : > { %4658 = vrot.lane.b32.xlu1 %v13238_v38, %s10035_s25  ;;  %5380 = vmatpush1.msra.mxu1 %v4327_v1 }
 0x3eb   : > { %v4511_v28 = vpop.permute.xlu0 %4510  ;;  %v4125_v18 = vpop.permute.xlu1 %4124 }
 0x3ec   : > { %v4581_v36 = vsel %vm18148_vm12, %v4509_v2, %v4511_v28  ;;  %v4580_v30 = vsel %vm18149_vm11, %v4511_v28, %v13302_v61  ;;  %vm18160_vm12 = vcmp.lt.s32.totalorder %v10260_v11, 32 }
 0x3ed   : > { %4656 = vrot.lane.b32.xlu0 %v13244_v12, %s10035_s25  ;;  %8925 = vmatprep.subr.msk.mxu0 %vm18150_vm6, %v4580_v30  ;;  %vm18161_vm11 = vmmov %vm18160_vm12 }
 0x3ee   : > { %4396 = vrot.lane.b32.xlu1 %v13185_v41, %s10037_s10  ;;  %8926 = vmatpush1.msk.msra.mxu0 %vm18151_vm14, %v4581_v36  ;;  %vm18165_vm14 = vcmp.le.s32.totalorder %v18164_v8, 30  ;;  %v13399_v36 = vpop.eup %9862 }
 0x3ef   : > { %v4123_v25 = vpop.permute.xlu0 %4122  ;;  %v13326_v34 = vpop.permute.xlu1 %4384 }
 0x3f0   : > { %v4199_v2 = vsel %vm18152_vm4, %v13139_v23, %v4123_v25  ;;  %v4198_v29 = vsel %vm18153_vm7, %v4123_v25, %v4125_v18  ;;  %vm18168_vm7 = vmmov %vm18152_vm4 }
 0x3f1   : > { %4394 = vrot.lane.b32.xlu0 %v13007_v49, %s10037_s10  ;;  %8916 = vmatprep.subr.msk.mxu1 %vm18154_vm8, %v4198_v29  ;;  %vm18169_vm8 = vcmp.ge.s32.totalorder %v12000_v62, 1  ;;  %v3720_v29 = vpop.f32.mrf.mxu0 }
 0x3f2   : > { %4268 = vrot.lane.b32.xlu1 %v13185_v41, %s10038_s12  ;;  %8917 = vmatpush1.msk.msra.mxu1 %vm18155_vm2, %v4199_v2  ;;  %vm18170_vm2 = vmmov %vm18156_vm10  ;;  %v13413_v2 = vpop.eup %9864  ;;  %9868 = vtanh.f32 %v3720_v29 }
 0x3f3   : > { %v4383_v14 = vpop.permute.xlu0 %4382  ;;  %v13341_v50 = vpop.permute.xlu1 %4256  ;;  %8918 = vmatmul.mubr.msk.f32.vlgmr.msra.gmra.mxu1 %vm18156_vm10, %v12933_v43  ;;  %vm18171_vm10 = vcmp.lt.s32.totalorder %v10260_v11, 96 }
 0x3f4   : > { %v4453_v23 = vsel %vm18157_vm9, %v4381_v63, %v4383_v14  ;;  %v4452_v10 = vsel %vm18158_vm1, %v4383_v14, %v13326_v34  ;;  %5557 = vmatprep.mubr.f32.mxu1 %v17568_v27  ;;  %vm18172_vm9 = vmmov %vm18171_vm10 }
 0x3f5   : > { %4266 = vrot.lane.b32.xlu0 %v13007_v49, %s10038_s12  ;;  %8927 = vmatprep.subr.msk.mxu0 %vm18159_vm3, %v4452_v10  ;;  %vm18175_vm3 = vcmp.ge.s32.totalorder %v18164_v8, 1 }
 0x3f6   : > { %4528 = vrot.lane.b32.xlu1 %v13244_v12, %s10036_s26  ;;  %8928 = vmatpush1.msk.msra.mxu0 %vm12102_vm0, %v4453_v23  ;;  %vm18162_vm0 = vcmp.lt.s32.totalorder %v10260_v11, 95 }
 0x3f7   : > { %v4255_v3 = vpop.permute.xlu0 %4254  ;;  %v5031_v63 = vpop.permute.xlu1 %5030  ;;  %vm18163_vm6 = vmmov %vm18162_vm0 }
 0x3f8   : > { %v4325_v39 = vsel %vm18160_vm12, %v4253_v33, %v4255_v3  ;;  %v4324_v37 = vsel %vm18161_vm11, %v4255_v3, %v13341_v50  ;;  %vm18176_vm12 = vcmp.ge.s32.totalorder %v18166_v60, 1  ;;  %vm18177_vm11 = vmmov %vm18162_vm0 }
 0x3f9   : > { %4526 = vrot.lane.b32.xlu0 %v13167_v22, %s10036_s26  ;;  %5450 = vmatprep.subr.mxu0 %v4324_v37 }
 0x3fa   : > { %4140 = vrot.lane.b32.xlu1 %v13185_v41, %s10040_s13  ;;  %8929 = vmatpush1.msk.msra.mxu0 %vm12082_vm13, %v4325_v39  ;;  %vm18167_vm13 = vcmp.le.s32.totalorder %v18166_v60, 30 }
 0x3fb   : > { %v5029_v58 = vpop.permute.xlu0 %5028  ;;  %v13371_v52 = vpop.permute.xlu1 %4128 }
 0x3fc   : > { %v5090_v33 = vsel %vm18162_vm0, %v13183_v56, %v5029_v58  ;;  %v5089_v21 = vsel %vm18163_vm6, %v5029_v58, %v5031_v63  ;;  %vm18178_vm6 = vcmp.le.s32.totalorder %v12111_v20, 30 }
 0x3fd   : > { %4138 = vrot.lane.b32.xlu0 %v13007_v49, %s10040_s13  ;;  %8933 = vmatprep.subr.msk.mxu1 %vm18165_vm14, %v5089_v21  ;;  %vm18179_vm14 = vcmp.le.s32.totalorder %v12118_v51, 30 }
 0x3fe   : > { %4400 = vrot.lane.b32.xlu1 %v13244_v12, %s10037_s10  ;;  %8934 = vmatpush1.msk.msra.mxu1 %vm18167_vm13, %v5090_v33  ;;  %vm18180_vm13 = vcmp.lt.s32.totalorder %v10260_v11, 127 }
 0x3ff   : > { %v4127_v48 = vpop.permute.xlu0 %4126  ;;  %v4903_v1 = vpop.permute.xlu1 %4902 }
 0x400   : > { %v4197_v56 = vsel %vm18152_vm4, %v4125_v18, %v4127_v48  ;;  %v4196_v28 = vsel %vm18168_vm7, %v4127_v48, %v13371_v52  ;;  %vm18181_vm4 = vmmov %vm18180_vm13  ;;  %vm18182_vm7 = vcmp.le.s32.totalorder %v18164_v8, 30  ;;  %v13468_v48 = vpop.eup %9866 }
 0x401   : > { %4398 = vrot.lane.b32.xlu0 %v13167_v22, %s10037_s10  ;;  %8930 = vmatprep.subr.msk.mxu0 %vm18169_vm8, %v4196_v28  ;;  %vm18183_vm8 = vcmp.le.s32.totalorder %v18166_v60, 30 }
 0x402   : > { %4272 = vrot.lane.b32.xlu1 %v13244_v12, %s10038_s12  ;;  %8931 = vmatpush1.msk.msra.mxu0 %vm12132_vm15, %v4197_v56  ;;  %vm18173_vm15 = vcmp.lt.s32.totalorder %v10260_v11, 97  ;;  %v13474_v56 = vpop.eup %9868 }
 0x403   : > { %v4901_v30 = vpop.permute.xlu0 %4900  ;;  %v4775_v18 = vpop.permute.xlu1 %4774  ;;  %8932 = vmatmul.mubr.msk.f32.vlgmr.msra.gmra.mxu0 %vm18170_vm2, %v12933_v43  ;;  %vm18174_vm1 = vmmov %vm18173_vm15 }
 0x404   : > { %v4961_v25 = vsel %vm18171_vm10, %v4901_v30, %v4903_v1  ;;  %v4962_v62 = vsel %vm18172_vm9, %v13214_v0, %v4901_v30  ;;  %5628 = vmatprep.mubr.f32.mxu0 %v17568_v27  ;;  %vm18184_vm2 = vmmov %vm18172_vm9 }
 0x405   : > { %4270 = vrot.lane.b32.xlu0 %v13167_v22, %s10038_s12  ;;  %5509 = vmatprep.subr.mxu1 %v4961_v25  ;;  %vm18185_vm10 = vmmov %vm18184_vm2 }
 0x406   : > { %5046 = vrot.lane.b32.xlu1 %v13399_v36, %s10032_s22  ;;  %5510 = vmatpush1.msra.mxu1 %v4962_v62  ;;  %vm18186_vm9 = vmmov %vm18174_vm1 }
 0x407   : > { %v4773_v57 = vpop.permute.xlu0 %4772 }
 0x408   : > { %v4834_v0 = vsel %vm18173_vm15, %v13230_v15, %v4773_v57  ;;  %v13419_v53 = vpop.permute.xlu1 %5034  ;;  %v4833_v14 = vsel %vm18174_vm1, %v4773_v57, %v4775_v18  ;;  %vm18187_vm15 = vmmov %vm18174_vm1  ;;  %vm18188_vm1 = vcmp.ge.s32.totalorder %v12111_v20, 1 }
 0x409   : > { %5044 = vrot.lane.b32.xlu0 %v13413_v2, %s10032_s22  ;;  %8935 = vmatprep.subr.msk.mxu1 %vm18175_vm3, %v4833_v14  ;;  %vm18189_vm3 = vcmp.ge.s32.totalorder %v12118_v51, 1 }
 0x40a   : > { %4144 = vrot.lane.b32.xlu1 %v13244_v12, %s10040_s13  ;;  %8936 = vmatpush1.msk.msra.mxu1 %vm18176_vm12, %v4834_v0  ;;  %vm18190_vm12 = vcmp.lt.s32.totalorder %v10260_v11, 1 }
 0x40b   : > { %v5033_v19 = vpop.permute.xlu0 %5032 }
 0x40c   : > { %v5088_v15 = vsel %vm18177_vm11, %v5031_v63, %v5033_v19  ;;  %v4647_v23 = vpop.permute.xlu1 %4646  ;;  %v5087_v10 = vsel %vm18162_vm0, %v5033_v19, %v13419_v53  ;;  %vm18191_vm11 = vmmov %vm18190_vm12  ;;  %vm18192_vm0 = vcmp.ge.s32.totalorder %v18164_v8, 1 }
 0x40d   : > { %4142 = vrot.lane.b32.xlu0 %v13167_v22, %s10040_s13  ;;  %8946 = vmatprep.subr.msk.mxu0 %vm18178_vm6, %v5087_v10  ;;  %vm18193_vm6 = vcmp.ge.s32.totalorder %v18166_v60, 1 }
 0x40e   : > { %4918 = vrot.lane.b32.xlu1 %v13399_v36, %s10033_s23  ;;  %8947 = vmatpush1.msk.msra.mxu0 %vm18179_vm14, %v5088_v15  ;;  %vm18194_vm14 = vmmov %vm18181_vm4 }
 0x40f   : > { %v4645_v3 = vpop.permute.xlu0 %4644 }
 0x410   : > { %v4706_v63 = vsel %vm18180_vm13, %v13259_v59, %v4645_v3  ;;  %v13447_v39 = vpop.permute.xlu1 %4906  ;;  %v4705_v37 = vsel %vm18181_vm4, %v4645_v3, %v4647_v23  ;;  %vm18195_vm13 = vmmov %vm18181_vm4  ;;  %vm18196_vm4 = vcmp.le.s32.totalorder %v12111_v20, 30 }
 0x411   : > { %4916 = vrot.lane.b32.xlu0 %v13413_v2, %s10033_s23  ;;  %8937 = vmatprep.subr.msk.mxu1 %vm18182_vm7, %v4705_v37  ;;  %vm18197_vm7 = vcmp.le.s32.totalorder %v12118_v51, 30 }
 0x412   : > { %4790 = vrot.lane.b32.xlu1 %v13399_v36, %s10034_s24  ;;  %8938 = vmatpush1.msk.msra.mxu1 %vm18183_vm8, %v4706_v63  ;;  %vm18198_vm8 = vcmp.lt.s32.totalorder %v10260_v11, 31 }
 0x413   : > { %v4905_v58 = vpop.permute.xlu0 %4904  ;;  %5515 = vmatprep.subr.mxu1 %v12955_v31 }
 0x414   : > { %v13460_v59 = vpop.permute.xlu1 %4778  ;;  %5516 = vmatpush1.msra.mxu1 %v12824_v13  ;;  %v4959_v33 = vsel %vm18184_vm2, %v4905_v58, %v13447_v39  ;;  %v4960_v21 = vsel %vm18185_vm10, %v4903_v1, %v4905_v58  ;;  %vm18199_vm2 = vmmov %vm18198_vm8  ;;  %vm18200_vm10 = vcmp.le.s32.totalorder %v18164_v8, 30 }
 0x415   : > { %4788 = vrot.lane.b32.xlu0 %v13413_v2, %s10034_s24  ;;  %5580 = vmatprep.subr.mxu0 %v4959_v33 }
 0x416   : > { %5050 = vrot.lane.b32.xlu1 %v13468_v48, %s10032_s22  ;;  %5581 = vmatpush1.msra.mxu0 %v4960_v21 }
 0x417   : > { %v4777_v31 = vpop.permute.xlu0 %4776 }
 0x418   : > { %v4832_v13 = vsel %vm18186_vm9, %v4775_v18, %v4777_v31  ;;  %v4517_v28 = vpop.permute.xlu1 %4516  ;;  %v4831_v1 = vsel %vm18187_vm15, %v4777_v31, %v13460_v59  ;;  %vm18201_vm9 = vcmp.le.s32.totalorder %v18166_v60, 30  ;;  %vm18202_vm15 = vcmp.lt.s32.totalorder %v10260_v11, 32 }
 0x419   : > { %5048 = vrot.lane.b32.xlu0 %v13474_v56, %s10032_s22  ;;  %8948 = vmatprep.subr.msk.mxu0 %vm18188_vm1, %v4831_v1  ;;  %vm18203_vm1 = vmmov %vm18202_vm15 }
 0x41a   : > { %4662 = vrot.lane.b32.xlu1 %v13399_v36, %s10035_s25  ;;  %8949 = vmatpush1.msk.msra.mxu0 %vm18189_vm3, %v4832_v13  ;;  %vm18204_vm3 = vmmov %vm18191_vm11 }
 0x41b   : > { %v4515_v30 = vpop.permute.xlu0 %4514 }
 0x41c   : > { %v4579_v18 = vsel %vm18190_vm12, %v13302_v61, %v4515_v30  ;;  %v13492_v25 = vpop.permute.xlu1 %4650  ;;  %v4578_v62 = vsel %vm18191_vm11, %v4515_v30, %v4517_v28  ;;  %vm18205_vm12 = vmmov %vm18204_vm3  ;;  %vm18206_vm11 = vcmp.ge.s32.totalorder %v12111_v20, 1 }
 0x41d   : > { %4660 = vrot.lane.b32.xlu0 %v13413_v2, %s10035_s25  ;;  %8939 = vmatprep.subr.msk.mxu1 %vm18192_vm0, %v4578_v62  ;;  %vm18207_vm0 = vcmp.ge.s32.totalorder %v12118_v51, 1 }
 0x41e   : > { %4922 = vrot.lane.b32.xlu1 %v13468_v48, %s10033_s23  ;;  %8940 = vmatpush1.msk.msra.mxu1 %vm18193_vm6, %v4579_v18  ;;  %vm18208_vm6 = vcmp.lt.s32.totalorder %v10260_v11, 33 }
 0x41f   : > { %v4649_v57 = vpop.permute.xlu0 %4648 }
 0x420   : > { %v4704_v61 = vsel %vm18194_vm14, %v4647_v23, %v4649_v57  ;;  %v4389_v29 = vpop.permute.xlu1 %4388  ;;  %v4703_v0 = vsel %vm18195_vm13, %v4649_v57, %v13492_v25  ;;  %vm18209_vm14 = vmmov %vm18208_vm6  ;;  %vm18210_vm13 = vcmp.ge.s32.totalorder %v18164_v8, 1 }
 0x421   : > { %4920 = vrot.lane.b32.xlu0 %v13474_v56, %s10033_s23  ;;  %8950 = vmatprep.subr.msk.mxu0 %vm18196_vm4, %v4703_v0  ;;  %vm18211_vm4 = vcmp.ge.s32.totalorder %v18166_v60, 1 }
 0x422   : > { %4794 = vrot.lane.b32.xlu1 %v13468_v48, %s10034_s24  ;;  %8951 = vmatpush1.msk.msra.mxu0 %vm18197_vm7, %v4704_v61  ;;  %vm18212_vm7 = vcmask 588800  }
 0x423   : > { %v4387_v14 = vpop.permute.xlu0 %4386  ;;  %5586 = vmatprep.subr.mxu0 %v13014_v24 }
 0x424   : > { %v4451_v19 = vsel %vm18198_vm8, %v13326_v34, %v4387_v14  ;;  %v4261_v15 = vpop.permute.xlu1 %4260  ;;  %5587 = vmatpush1.msra.mxu0 %v12935_v47  ;;  %v4450_v23 = vsel %vm18199_vm2, %v4387_v14, %v4389_v29  ;;  %vm18213_vm8 = vmmov %vm18199_vm2  ;;  %v18219_v14 = vld [vmem:[#allocation37_spill] sm:$0xff] }
 0x425   : > { %4792 = vrot.lane.b32.xlu0 %v13474_v56, %s10034_s24  ;;  %8941 = vmatprep.subr.msk.mxu1 %vm18200_vm10, %v4450_v23  ;;  %vm18214_vm10 = vcmp.le.s32.totalorder %v12111_v20, 30 }
 0x426   : > { %4532 = vrot.lane.b32.xlu1 %v13413_v2, %s10036_s26  ;;  %8942 = vmatpush1.msk.msra.mxu1 %vm18201_vm9, %v4451_v19  ;;  %vm18215_vm9 = vcmp.le.s32.totalorder %v12118_v51, 30 }
 0x427   : > { %v4259_v24 = vpop.permute.xlu0 %4258 }
 0x428   : > { %v13532_v34 = vpop.permute.xlu1 %4520  ;;  %v4322_v47 = vsel %vm18202_vm15, %v4259_v24, %v4261_v15  ;;  %v4323_v10 = vsel %vm18203_vm1, %v13341_v50, %v4259_v24  ;;  %vm18216_vm15 = vmmov %vm18203_vm1 }
 0x429   : > { %4530 = vrot.lane.b32.xlu0 %v13238_v38, %s10036_s26  ;;  %5521 = vmatprep.subr.mxu1 %v4322_v47 }
 0x42a   : > { %4666 = vrot.lane.b32.xlu1 %v13468_v48, %s10035_s25  ;;  %5522 = vmatpush1.msra.mxu1 %v4323_v10 }
 0x42b   : > { %v4519_v3 = vpop.permute.xlu0 %4518 }
 0x42c   : > { %v4577_v63 = vsel %vm18204_vm3, %v4517_v28, %v4519_v3  ;;  %v4133_v37 = vpop.permute.xlu1 %4132  ;;  %v4576_v58 = vsel %vm18205_vm12, %v4519_v3, %v13532_v34  ;;  %v3860_v28 = vpop.f32.mrf.mxu0  ;;  %vm18217_vm3 = vcmp.lt.s32.totalorder %v10260_v11, 95 }
 0x42d   : > { %4664 = vrot.lane.b32.xlu0 %v13474_v56, %s10035_s25  ;;  %8952 = vmatprep.subr.msk.mxu0 %vm18206_vm11, %v4576_v58  ;;  %9870 = vtanh.f32 %v3860_v28  ;;  %vm18218_vm12 = vmmov %vm18217_vm3  ;;  %vm18220_vm11 = vnez %v18219_v14 }
 0x42e   : > { %4404 = vrot.lane.b32.xlu1 %v13413_v2, %s10037_s10  ;;  %8953 = vmatpush1.msk.msra.mxu0 %vm18207_vm0, %v4577_v63  ;;  %9872 = vtanh.f32 %v12709_v55  ;;  %v18221_v55 = vld [vmem:[#allocation36_spill] sm:$0xff] }
 0x42f   : > { %v4131_v50 = vpop.permute.xlu0 %4130  ;;  %vm18222_vm0 = vcmp.le.s32.totalorder %v18221_v55, 30  ;;  %9874 = vtanh.f32 %v12711_v7 }
 0x430   : > { %v4195_v33 = vsel %vm18208_vm6, %v13371_v52, %v4131_v50  ;;  %v13559_v21 = vpop.permute.xlu1 %4392  ;;  %v4194_v31 = vsel %vm18209_vm14, %v4131_v50, %v4133_v37  ;;  %vm18223_vm14 = vmmov %vm18208_vm6 }
 0x431   : > { %4402 = vrot.lane.b32.xlu0 %v13238_v38, %s10037_s10  ;;  %8943 = vmatprep.subr.msk.mxu1 %vm18210_vm13, %v4194_v31  ;;  %vm18224_vm13 = vcmp.ge.s32.totalorder %v12111_v20, 1 }
 0x432   : > { %4276 = vrot.lane.b32.xlu1 %v13413_v2, %s10038_s12  ;;  %8944 = vmatpush1.msk.msra.mxu1 %vm18211_vm4, %v4195_v33  ;;  %vm18225_vm4 = vcmp.ge.s32.totalorder %v12118_v51, 1  ;;  %v18228_v51 = vld [vmem:[#allocation35_spill] sm:$0xff]  ;;  %v18232_v33 = vld [vmem:[#allocation42_spill] sm:$0xff] }
 0x433   : > { %v4391_v13 = vpop.permute.xlu0 %4390  ;;  %8945 = vmatmul.mubr.msk.f32.vlgmr.msra.gmra.mxu1 %vm18212_vm7, %v12933_v43 }
 0x434   : > { %v4449_v52 = vsel %vm18213_vm8, %v4389_v29, %v4391_v13  ;;  %v13575_v1 = vpop.permute.xlu1 %4264  ;;  %v4448_v8 = vsel %vm18199_vm2, %v4391_v13, %v13559_v21  ;;  %5699 = vmatprep.mubr.f32.mxu1 %v17568_v27  ;;  %vm18226_vm8 = vcmp.lt.s32.totalorder %v10260_v11, 96 }
 0x435   : > { %4274 = vrot.lane.b32.xlu0 %v13238_v38, %s10038_s12  ;;  %8954 = vmatprep.subr.msk.mxu0 %vm18214_vm10, %v4448_v8  ;;  %vm18227_vm2 = vmmov %vm18226_vm8  ;;  %vm18229_vm10 = vnez %v18228_v51 }
 0x436   : > { %4536 = vrot.lane.b32.xlu1 %v13474_v56, %s10036_s26  ;;  %8955 = vmatpush1.msk.msra.mxu0 %vm18215_vm9, %v4449_v52  ;;  %vm18230_vm9 = vcmp.lt.s32.totalorder %v10260_v11, 97 }
 0x437   : > { %v4263_v60 = vpop.permute.xlu0 %4262 }
 0x438   : > { %v5039_v30 = vpop.permute.xlu1 %5038  ;;  %v4320_v18 = vsel %vm18216_vm15, %v4263_v60, %v13575_v1  ;;  %v4321_v62 = vsel %vm18203_vm1, %v4261_v15, %v4263_v60  ;;  %vm18231_vm15 = vmmov %vm18230_vm9  ;;  %vm18233_vm1 = vnez %v18232_v33 }
 0x439   : > { %4534 = vrot.lane.b32.xlu0 %v13399_v36, %s10036_s26  ;;  %5592 = vmatprep.subr.mxu0 %v4320_v18 }
 0x43a   : > { %4148 = vrot.lane.b32.xlu1 %v13413_v2, %s10040_s13  ;;  %5593 = vmatpush1.msra.mxu0 %v4321_v62  ;;  %v13627_v24 = vpop.eup %9870 }
 0x43b   : > { %v5037_v57 = vpop.permute.xlu0 %5036  ;;  %v13643_v63 = vpop.eup %9872 }
 0x43c   : > { %v5086_v61 = vsel %vm18217_vm3, %v13419_v53, %v5037_v57  ;;  %v13602_v29 = vpop.permute.xlu1 %4136  ;;  %v5085_v0 = vsel %vm18218_vm12, %v5037_v57, %v5039_v30  ;;  %vm18234_vm3 = vcmp.ge.s32.totalorder %v18221_v55, 1 }
 0x43d   : > { %4146 = vrot.lane.b32.xlu0 %v13238_v38, %s10040_s13  ;;  %8959 = vmatprep.subr.msk.mxu1 %vm18220_vm11, %v5085_v0  ;;  %vm18235_vm11 = vmmov %vm18218_vm12 }
 0x43e   : > { %4408 = vrot.lane.b32.xlu1 %v13474_v56, %s10037_s10  ;;  %8960 = vmatpush1.msk.msra.mxu1 %vm18222_vm0, %v5086_v61  ;;  %vm18236_vm0 = vcmp.le.s32.totalorder %v12211_v16, 30  ;;  %v13698_v61 = vpop.eup %9874 }
 0x43f   : > { %v4135_v19 = vpop.permute.xlu0 %4134 }
 0x440   : > { %v4193_v53 = vsel %vm18208_vm6, %v4133_v37, %v4135_v19  ;;  %v4911_v15 = vpop.permute.xlu1 %4910  ;;  %v4192_v23 = vsel %vm18223_vm14, %v4135_v19, %v13602_v29  ;;  %v3862_v37 = vpop.f32.mrf.mxu0  ;;  %vm18237_vm6 = vcmp.le.s32.totalorder %v12218_v4, 30  ;;  %vm18238_vm14 = vcmp.lt.s32.totalorder %v10260_v11, 127 }
 0x441   : > { %4406 = vrot.lane.b32.xlu0 %v13399_v36, %s10037_s10  ;;  %8956 = vmatprep.subr.msk.mxu0 %vm18224_vm13, %v4192_v23  ;;  %9876 = vtanh.f32 %v3862_v37  ;;  %vm18239_vm13 = vmmov %vm18238_vm14 }
 0x442   : > { %4280 = vrot.lane.b32.xlu1 %v13474_v56, %s10038_s12  ;;  %8957 = vmatpush1.msk.msra.mxu0 %vm18225_vm4, %v4193_v53 }
 0x443   : > { %v4909_v47 = vpop.permute.xlu0 %4908  ;;  %8958 = vmatmul.mubr.msk.f32.vlgmr.msra.gmra.mxu0 %vm18212_vm7, %v12933_v43  ;;  %vm18242_vm7 = vcmp.le.s32.totalorder %v18221_v55, 30 }
 0x444   : > { %v4783_v10 = vpop.permute.xlu1 %4782  ;;  %v4957_v3 = vsel %vm18226_vm8, %v4909_v47, %v4911_v15  ;;  %v4958_v20 = vsel %vm18227_vm2, %v13447_v39, %v4909_v47  ;;  %5770 = vmatprep.mubr.f32.mxu0 %v17568_v27  ;;  %vm18243_vm8 = vmmov %vm18227_vm2 }
 0x445   : > { %4278 = vrot.lane.b32.xlu0 %v13399_v36, %s10038_s12  ;;  %8961 = vmatprep.subr.msk.mxu1 %vm18229_vm10, %v4957_v3  ;;  %vm18244_vm10 = vmmov %vm18230_vm9 }
 0x446   : > { %5054 = vrot.lane.b32.xlu1 %v13627_v24, %s10032_s22  ;;  %5652 = vmatpush1.msra.mxu1 %v4958_v20 }
 0x447   : > { %v4781_v43 = vpop.permute.xlu0 %4780 }
 0x448   : > { %v4830_v39 = vsel %vm18230_vm9, %v13460_v59, %v4781_v43  ;;  %v13649_v58 = vpop.permute.xlu1 %5042  ;;  %v4829_v50 = vsel %vm18231_vm15, %v4781_v43, %v4783_v10  ;;  %vm18245_vm15 = vcmp.ge.s32.totalorder %v12211_v16, 1 }
 0x449   : > { %5052 = vrot.lane.b32.xlu0 %v13643_v63, %s10032_s22  ;;  %8962 = vmatprep.subr.msk.mxu1 %vm18233_vm1, %v4829_v50  ;;  %vm18246_vm1 = vcmp.ge.s32.totalorder %v12218_v4, 1 }
 0x44a   : > { %4152 = vrot.lane.b32.xlu1 %v13474_v56, %s10040_s13  ;;  %8963 = vmatpush1.msk.msra.mxu1 %vm18234_vm3, %v4830_v39  ;;  %vm18247_vm3 = vcmp.lt.s32.totalorder %v10260_v11, 1 }
 0x44b   : > { %v5041_v7 = vpop.permute.xlu0 %5040 }
 0x44c   : > { %v5084_v59 = vsel %vm18218_vm12, %v5039_v30, %v5041_v7  ;;  %v4655_v31 = vpop.permute.xlu1 %4654  ;;  %v5083_v13 = vsel %vm18235_vm11, %v5041_v7, %v13649_v58  ;;  %v18240_v30 = vld [vmem:[#allocation32_spill] sm:$0xff]  ;;  %vm18248_vm12 = vmmov %vm18247_vm3 }
 0x44d   : > { %4150 = vrot.lane.b32.xlu0 %v13399_v36, %s10040_s13  ;;  %8973 = vmatprep.subr.msk.mxu0 %vm18236_vm0, %v5083_v13  ;;  %vm18241_vm4 = vcmp.le.s32.totalorder %v18240_v30, 30  ;;  %vm18249_vm11 = vcmp.ge.s32.totalorder %v18240_v30, 1  ;;  %vm18250_vm0 = vcmp.ge.s32.totalorder %v18221_v55, 1 }
 0x44e   : > { %4926 = vrot.lane.b32.xlu1 %v13627_v24, %s10033_s23  ;;  %8974 = vmatpush1.msk.msra.mxu0 %vm18237_vm6, %v5084_v59  ;;  %v13704_v0 = vpop.eup %9876  ;;  %vm18251_vm6 = vmmov %vm18239_vm13 }
 0x44f   : > { %v4653_v28 = vpop.permute.xlu0 %4652 }
 0x450   : > { %v4702_v52 = vsel %vm18238_vm14, %v13492_v25, %v4653_v28  ;;  %v13677_v8 = vpop.permute.xlu1 %4914  ;;  %v4701_v60 = vsel %vm18239_vm13, %v4653_v28, %v4655_v31  ;;  %vm18252_vm14 = vmmov %vm18251_vm6  ;;  %vm18253_vm13 = vcmp.le.s32.totalorder %v12211_v16, 30 }
 0x451   : > { %4924 = vrot.lane.b32.xlu0 %v13643_v63, %s10033_s23  ;;  %8964 = vmatprep.subr.msk.mxu1 %vm18241_vm4, %v4701_v60  ;;  %vm18254_vm4 = vcmp.le.s32.totalorder %v12218_v4, 30  ;;  %v4002_v60 = vpop.f32.mrf.mxu0 }
 0x452   : > { %4798 = vrot.lane.b32.xlu1 %v13627_v24, %s10034_s24  ;;  %8965 = vmatpush1.msk.msra.mxu1 %vm18242_vm7, %v4702_v52  ;;  %vm18255_vm7 = vcmp.lt.s32.totalorder %v10260_v11, 31  ;;  %9878 = vtanh.f32 %v4002_v60 }
 0x453   : > { %v4913_v18 = vpop.permute.xlu0 %4912  ;;  %5657 = vmatprep.subr.mxu1 %v13185_v41  ;;  %9880 = vtanh.f32 %v12713_v42 }
 0x454   : > { %v13690_v25 = vpop.permute.xlu1 %4786  ;;  %5658 = vmatpush1.msra.mxu1 %v13007_v49  ;;  %v4955_v62 = vsel %vm18243_vm8, %v4913_v18, %v13677_v8  ;;  %v4956_v57 = vsel %vm18227_vm2, %v4911_v15, %v4913_v18  ;;  %vm18256_vm8 = vmmov %vm18255_vm7  ;;  %vm18257_vm2 = vcmp.le.s32.totalorder %v18240_v30, 30  ;;  %9882 = vtanh.f32 %v12715_v5 }
 0x455   : > { %4796 = vrot.lane.b32.xlu0 %v13643_v63, %s10034_s24  ;;  %5722 = vmatprep.subr.mxu0 %v4955_v62 }
 0x456   : > { %5058 = vrot.lane.b32.xlu1 %v13698_v61, %s10032_s22  ;;  %5723 = vmatpush1.msra.mxu0 %v4956_v57 }
 0x457   : > { %v4785_v41 = vpop.permute.xlu0 %4784 }
 0x458   : > { %v4828_v49 = vsel %vm18244_vm10, %v4783_v10, %v4785_v41  ;;  %v4525_v14 = vpop.permute.xlu1 %4524  ;;  %v4827_v19 = vsel %vm18230_vm9, %v4785_v41, %v13690_v25  ;;  %vm18258_vm10 = vcmp.le.s32.totalorder %v18221_v55, 30  ;;  %vm18259_vm9 = vcmp.lt.s32.totalorder %v10260_v11, 32 }
 0x459   : > { %5056 = vrot.lane.b32.xlu0 %v13704_v0, %s10032_s22  ;;  %8975 = vmatprep.subr.msk.mxu0 %vm18245_vm15, %v4827_v19  ;;  %vm18260_vm15 = vmmov %vm18259_vm9 }
 0x45a   : > { %4670 = vrot.lane.b32.xlu1 %v13627_v24, %s10035_s25  ;;  %8976 = vmatpush1.msk.msra.mxu0 %vm18246_vm1, %v4828_v49  ;;  %vm18261_vm1 = vmmov %vm18247_vm3 }
 0x45b   : > { %v4523_v53 = vpop.permute.xlu0 %4522 }
 0x45c   : > { %v4575_v15 = vsel %vm18247_vm3, %v13532_v34, %v4523_v53  ;;  %v13722_v23 = vpop.permute.xlu1 %4658  ;;  %v4574_v47 = vsel %vm18248_vm12, %v4523_v53, %v4525_v14  ;;  %vm18262_vm3 = vmmov %vm18261_vm1  ;;  %vm18263_vm12 = vcmp.ge.s32.totalorder %v12211_v16, 1 }
 0x45d   : > { %4668 = vrot.lane.b32.xlu0 %v13643_v63, %s10035_s25  ;;  %8966 = vmatprep.subr.msk.mxu1 %vm18249_vm11, %v4574_v47  ;;  %vm18264_vm11 = vcmp.ge.s32.totalorder %v12218_v4, 1 }
 0x45e   : > { %4930 = vrot.lane.b32.xlu1 %v13698_v61, %s10033_s23  ;;  %8967 = vmatpush1.msk.msra.mxu1 %vm18250_vm0, %v4575_v15  ;;  %vm18265_vm0 = vcmp.lt.s32.totalorder %v10260_v11, 33  ;;  %v18277_v15 = vld [vmem:[#allocation54_spill] sm:$0xff] }
 0x45f   : > { %v4657_v10 = vpop.permute.xlu0 %4656 }
 0x460   : > { %v4700_v34 = vsel %vm18251_vm6, %v4655_v31, %v4657_v10  ;;  %v4397_v3 = vpop.permute.xlu1 %4396  ;;  %v4699_v20 = vsel %vm18252_vm14, %v4657_v10, %v13722_v23  ;;  %vm18266_vm6 = vmmov %vm18265_vm0  ;;  %vm18267_vm14 = vcmp.ge.s32.totalorder %v18240_v30, 1 }
 0x461   : > { %4928 = vrot.lane.b32.xlu0 %v13704_v0, %s10033_s23  ;;  %8977 = vmatprep.subr.msk.mxu0 %vm18253_vm13, %v4699_v20  ;;  %vm18268_vm13 = vcmp.ge.s32.totalorder %v18221_v55, 1 }
 0x462   : > { %4802 = vrot.lane.b32.xlu1 %v13698_v61, %s10034_s24  ;;  %8978 = vmatpush1.msk.msra.mxu0 %vm18254_vm4, %v4700_v34  ;;  %vm18269_vm4 = vcmask 588800   ;;  %v13864_v34 = vpop.eup %9878 }
 0x463   : > { %v4395_v51 = vpop.permute.xlu0 %4394  ;;  %5728 = vmatprep.subr.mxu0 %v13244_v12 }
 0x464   : > { %v4447_v43 = vsel %vm18255_vm7, %v13559_v21, %v4395_v51  ;;  %v4269_v37 = vpop.permute.xlu1 %4268  ;;  %5729 = vmatpush1.msra.mxu0 %v13167_v22  ;;  %v4446_v39 = vsel %vm18256_vm8, %v4395_v51, %v4397_v3  ;;  %vm18270_vm8 = vmmov %vm18255_vm7 }
 0x465   : > { %4800 = vrot.lane.b32.xlu0 %v13704_v0, %s10034_s24  ;;  %8968 = vmatprep.subr.msk.mxu1 %vm18257_vm2, %v4446_v39  ;;  %vm18271_vm2 = vcmp.le.s32.totalorder %v12211_v16, 30 }
 0x466   : > { %4540 = vrot.lane.b32.xlu1 %v13643_v63, %s10036_s26  ;;  %8969 = vmatpush1.msk.msra.mxu1 %vm18258_vm10, %v4447_v43  ;;  %vm18272_vm10 = vnez %v17882_v35  ;;  %v13878_v43 = vpop.eup %9880 }
 0x467   : > { %v4267_v12 = vpop.permute.xlu0 %4266 }
 0x468   : > { %v13762_v21 = vpop.permute.xlu1 %4528  ;;  %v4318_v22 = vsel %vm18259_vm9, %v4267_v12, %v4269_v37  ;;  %v4319_v50 = vsel %vm18260_vm15, %v13575_v1, %v4267_v12  ;;  %vm18273_vm15 = vmmov %vm18259_vm9 }
 0x469   : > { %4538 = vrot.lane.b32.xlu0 %v13468_v48, %s10036_s26  ;;  %5663 = vmatprep.subr.mxu1 %v4318_v22 }
 0x46a   : > { %4674 = vrot.lane.b32.xlu1 %v13698_v61, %s10035_s25  ;;  %5664 = vmatpush1.msra.mxu1 %v4319_v50 }
 0x46b   : > { %v4527_v33 = vpop.permute.xlu0 %4526 }
 0x46c   : > { %v4573_v7 = vsel %vm18261_vm1, %v4525_v14, %v4527_v33  ;;  %v4141_v59 = vpop.permute.xlu1 %4140  ;;  %v4572_v31 = vsel %vm18262_vm3, %v4527_v33, %v13762_v21  ;;  %vm18274_vm1 = vnez %v17876_v46  ;;  %vm18275_vm3 = vcmp.lt.s32.totalorder %v10260_v11, 95  ;;  %v18279_v46 = vld [vmem:[#allocation56_spill] sm:$0xff] }
 0x46d   : > { %4672 = vrot.lane.b32.xlu0 %v13704_v0, %s10035_s25  ;;  %8979 = vmatprep.subr.msk.mxu0 %vm18263_vm12, %v4572_v31  ;;  %vm18276_vm12 = vmmov %vm18275_vm3 }
 0x46e   : > { %4412 = vrot.lane.b32.xlu1 %v13643_v63, %s10037_s10  ;;  %8980 = vmatpush1.msk.msra.mxu0 %vm18264_vm11, %v4573_v7  ;;  %vm18278_vm11 = vcmp.le.s32.totalorder %v18277_v15, 30 }
 0x46f   : > { %v4139_v1 = vpop.permute.xlu0 %4138 }
 0x470   : > { %v4191_v13 = vsel %vm18265_vm0, %v13602_v29, %v4139_v1  ;;  %v13789_v28 = vpop.permute.xlu1 %4400  ;;  %v4190_v52 = vsel %vm18266_vm6, %v4139_v1, %v4141_v59  ;;  %v13804_v29 = vld [vmem:[%s17243_s2] sm:$0xff]  ;;  %vm18280_vm0 = vcmp.le.s32.totalorder %v18279_v46, 30 }
 0x471   : > { %4410 = vrot.lane.b32.xlu0 %v13468_v48, %s10037_s10  ;;  %8970 = vmatprep.subr.msk.mxu1 %vm18267_vm14, %v4190_v52  ;;  %vm18281_vm14 = vmmov %vm18266_vm6 }
 0x472   : > { %4284 = vrot.lane.b32.xlu1 %v13643_v63, %s10038_s12  ;;  %8971 = vmatpush1.msk.msra.mxu1 %vm18268_vm13, %v4191_v13  ;;  %vm18282_vm13 = vcmp.ge.s32.totalorder %v12211_v16, 1 }
 0x473   : > { %v4399_v4 = vpop.permute.xlu0 %4398  ;;  %8972 = vmatmul.mubr.msk.f32.vlgmr.msra.gmra.mxu1 %vm18269_vm4, %v13804_v29  ;;  %vm18283_vm4 = vnez %v17893_v44 }
 0x474   : > { %v4445_v30 = vsel %vm18255_vm7, %v4397_v3, %v4399_v4  ;;  %v13810_v18 = vpop.permute.xlu1 %4272  ;;  %v4444_v55 = vsel %vm18270_vm8, %v4399_v4, %v13789_v28  ;;  %5841 = vmatprep.mubr.f32.mxu1 %v17568_v27  ;;  %vm18284_vm7 = vcmask 588800   ;;  %vm18285_vm8 = vcmp.lt.s32.totalorder %v10260_v11, 96  ;;  %v13933_v4 = vpop.eup %9882 }
 0x475   : > { %4282 = vrot.lane.b32.xlu0 %v13468_v48, %s10038_s12  ;;  %8981 = vmatprep.subr.msk.mxu0 %vm18271_vm2, %v4444_v55  ;;  %vm18286_vm2 = vmmov %vm18285_vm8 }
 0x476   : > { %4544 = vrot.lane.b32.xlu1 %v13704_v0, %s10036_s26  ;;  %8982 = vmatpush1.msk.msra.mxu0 %vm18272_vm10, %v4445_v30  ;;  %vm18287_vm10 = vcmp.lt.s32.totalorder %v10260_v11, 97 }
 0x477   : > { %v4271_v62 = vpop.permute.xlu0 %4270 }
 0x478   : > { %v4317_v57 = vsel %vm18259_vm9, %v4269_v37, %v4271_v62  ;;  %v5047_v41 = vpop.permute.xlu1 %5046  ;;  %v4316_v49 = vsel %vm18273_vm15, %v4271_v62, %v13810_v18  ;;  %v4004_v37 = vpop.f32.mrf.mxu0  ;;  %vm18288_vm9 = vmmov %vm18287_vm10  ;;  %vm18289_vm15 = vcmp.ge.s32.totalorder %v18277_v15, 1 }
 0x479   : > { %4542 = vrot.lane.b32.xlu0 %v13627_v24, %s10036_s26  ;;  %5734 = vmatprep.subr.mxu0 %v4316_v49  ;;  %9884 = vtanh.f32 %v4004_v37 }
 0x47a   : > { %4156 = vrot.lane.b32.xlu1 %v13643_v63, %s10040_s13  ;;  %8983 = vmatpush1.msk.msra.mxu0 %vm18274_vm1, %v4317_v57  ;;  %vm18290_vm1 = vcmp.ge.s32.totalorder %v18279_v46, 1 }
 0x47b   : > { %v5045_v35 = vpop.permute.xlu0 %5044 }
 0x47c   : > { %v5082_v14 = vsel %vm18275_vm3, %v13649_v58, %v5045_v35  ;;  %v13839_v19 = vpop.permute.xlu1 %4144  ;;  %v5081_v53 = vsel %vm18276_vm12, %v5045_v35, %v5047_v41  ;;  %vm18291_vm12 = vmmov %vm18275_vm3 }
 0x47d   : > { %4154 = vrot.lane.b32.xlu0 %v13468_v48, %s10040_s13  ;;  %8987 = vmatprep.subr.msk.mxu1 %vm18278_vm11, %v5081_v53  ;;  %vm18292_vm11 = vcmp.le.s32.totalorder %v12310_v17, 30 }
 0x47e   : > { %4416 = vrot.lane.b32.xlu1 %v13704_v0, %s10037_s10  ;;  %8988 = vmatpush1.msk.msra.mxu1 %vm18280_vm0, %v5082_v14  ;;  %vm18293_vm0 = vcmp.le.s32.totalorder %v12317_v26, 30 }
 0x47f   : > { %v4143_v42 = vpop.permute.xlu0 %4142 }
 0x480   : > { %v4189_v58 = vsel %vm18266_vm6, %v4141_v59, %v4143_v42  ;;  %v4919_v47 = vpop.permute.xlu1 %4918  ;;  %v4188_v10 = vsel %vm18281_vm14, %v4143_v42, %v13839_v19  ;;  %vm18294_vm6 = vcmp.lt.s32.totalorder %v10260_v11, 127 }
 0x481   : > { %4414 = vrot.lane.b32.xlu0 %v13627_v24, %s10037_s10  ;;  %8984 = vmatprep.subr.msk.mxu0 %vm18282_vm13, %v4188_v10  ;;  %vm18295_vm14 = vmmov %vm18294_vm6  ;;  %vm18296_vm13 = vcmp.le.s32.totalorder %v18277_v15, 30 }
 0x482   : > { %4288 = vrot.lane.b32.xlu1 %v13704_v0, %s10038_s12  ;;  %8985 = vmatpush1.msk.msra.mxu0 %vm18283_vm4, %v4189_v58  ;;  %vm18297_vm4 = vcmp.le.s32.totalorder %v18279_v46, 30 }
 0x483   : > { %v4917_v3 = vpop.permute.xlu0 %4916  ;;  %8986 = vmatmul.mubr.msk.f32.vlgmr.msra.gmra.mxu0 %vm18284_vm7, %v13804_v29  ;;  %vm18298_vm7 = vmmov %vm18286_vm2 }
 0x484   : > { %v4791_v20 = vpop.permute.xlu1 %4790  ;;  %v4953_v51 = vsel %vm18285_vm8, %v4917_v3, %v4919_v47  ;;  %v4954_v16 = vsel %vm18286_vm2, %v13677_v8, %v4917_v3  ;;  %5912 = vmatprep.mubr.f32.mxu0 %v17568_v27  ;;  %vm18299_vm8 = vmmov %vm18286_vm2 }
 0x485   : > { %4286 = vrot.lane.b32.xlu0 %v13627_v24, %s10038_s12  ;;  %5793 = vmatprep.subr.mxu1 %v4953_v51  ;;  %vm18300_vm2 = vmmov %vm18288_vm9 }
 0x486   : > { %5062 = vrot.lane.b32.xlu1 %v13864_v34, %s10032_s22  ;;  %5794 = vmatpush1.msra.mxu1 %v4954_v16  ;;  %v13939_v60 = vpop.eup %9884 }
 0x487   : > { %v4789_v44 = vpop.permute.xlu0 %4788 }
 0x488   : > { %v4826_v8 = vsel %vm18287_vm10, %v13690_v25, %v4789_v44  ;;  %v13884_v39 = vpop.permute.xlu1 %5050  ;;  %v4825_v12 = vsel %vm18288_vm9, %v4789_v44, %v4791_v20  ;;  %vm18301_vm10 = vmmov %vm18300_vm2  ;;  %vm18302_vm9 = vcmp.ge.s32.totalorder %v12310_v17, 1 }
 0x489   : > { %5060 = vrot.lane.b32.xlu0 %v13878_v43, %s10032_s22  ;;  %8989 = vmatprep.subr.msk.mxu1 %vm18289_vm15, %v4825_v12  ;;  %vm18303_vm15 = vcmp.ge.s32.totalorder %v12317_v26, 1 }
 0x48a   : > { %4160 = vrot.lane.b32.xlu1 %v13704_v0, %s10040_s13  ;;  %8990 = vmatpush1.msk.msra.mxu1 %vm18290_vm1, %v4826_v8  ;;  %vm18304_vm1 = vcmp.lt.s32.totalorder %v10260_v11, 1 }
 0x48b   : > { %v5049_v5 = vpop.permute.xlu0 %5048 }
 0x48c   : > { %v5080_v25 = vsel %vm18275_vm3, %v5047_v41, %v5049_v5  ;;  %v4663_v22 = vpop.permute.xlu1 %4662  ;;  %v5079_v50 = vsel %vm18291_vm12, %v5049_v5, %v13884_v39  ;;  %vm18305_vm3 = vmmov %vm18304_vm1  ;;  %vm18306_vm12 = vcmp.ge.s32.totalorder %v18277_v15, 1 }
 0x48d   : > { %4158 = vrot.lane.b32.xlu0 %v13627_v24, %s10040_s13  ;;  %9000 = vmatprep.subr.msk.mxu0 %vm18292_vm11, %v5079_v50  ;;  %vm18307_vm11 = vcmp.ge.s32.totalorder %v18279_v46, 1 }
 0x48e   : > { %4934 = vrot.lane.b32.xlu1 %v13864_v34, %s10033_s23  ;;  %9001 = vmatpush1.msk.msra.mxu0 %vm18293_vm0, %v5080_v25  ;;  %vm18308_vm0 = vmmov %vm18294_vm6 }
 0x48f   : > { %v4661_v33 = vpop.permute.xlu0 %4660 }
 0x490   : > { %v4698_v7 = vsel %vm18294_vm6, %v13722_v23, %v4661_v33  ;;  %v13912_v59 = vpop.permute.xlu1 %4922  ;;  %v4697_v31 = vsel %vm18295_vm14, %v4661_v33, %v4663_v22  ;;  %vm18309_vm6 = vmmov %vm18308_vm0  ;;  %vm18310_vm14 = vcmp.le.s32.totalorder %v12310_v17, 30 }
 0x491   : > { %4932 = vrot.lane.b32.xlu0 %v13878_v43, %s10033_s23  ;;  %8991 = vmatprep.subr.msk.mxu1 %vm18296_vm13, %v4697_v31  ;;  %vm18311_vm13 = vcmp.le.s32.totalorder %v12317_v26, 30 }
 0x492   : > { %4806 = vrot.lane.b32.xlu1 %v13864_v34, %s10034_s24  ;;  %8992 = vmatpush1.msk.msra.mxu1 %vm18297_vm4, %v4698_v7  ;;  %vm18312_vm4 = vcmp.lt.s32.totalorder %v10260_v11, 31 }
 0x493   : > { %v4921_v1 = vpop.permute.xlu0 %4920  ;;  %5799 = vmatprep.subr.mxu1 %v13413_v2 }
 0x494   : > { %v13925_v23 = vpop.permute.xlu1 %4794  ;;  %5800 = vmatpush1.msra.mxu1 %v13238_v38  ;;  %v4951_v13 = vsel %vm18298_vm7, %v4921_v1, %v13912_v59  ;;  %v4952_v52 = vsel %vm18299_vm8, %v4919_v47, %v4921_v1  ;;  %vm18313_vm7 = vmmov %vm18312_vm4  ;;  %vm18314_vm8 = vcmp.le.s32.totalorder %v18277_v15, 30 }
 0x495   : > { %4804 = vrot.lane.b32.xlu0 %v13878_v43, %s10034_s24  ;;  %5864 = vmatprep.subr.mxu0 %v4951_v13 }
 0x496   : > { %5066 = vrot.lane.b32.xlu1 %v13933_v4, %s10032_s22  ;;  %5865 = vmatpush1.msra.mxu0 %v4952_v52  ;;  %v18332_v52 = vld [vmem:[#allocation76_spill] sm:$0xff] }
 0x497   : > { %v4793_v2 = vpop.permute.xlu0 %4792 }
 0x498   : > { %v4824_v38 = vsel %vm18300_vm2, %v4791_v20, %v4793_v2  ;;  %v4533_v30 = vpop.permute.xlu1 %4532  ;;  %v4823_v55 = vsel %vm18301_vm10, %v4793_v2, %v13925_v23  ;;  %vm18315_vm2 = vcmp.le.s32.totalorder %v18279_v46, 30  ;;  %vm18316_vm10 = vcmp.lt.s32.totalorder %v10260_v11, 32  ;;  %v18334_v2 = vld [vmem:[#allocation75_spill] sm:$0xff] }
 0x499   : > { %5064 = vrot.lane.b32.xlu0 %v13939_v60, %s10032_s22  ;;  %9002 = vmatprep.subr.msk.mxu0 %vm18302_vm9, %v4823_v55  ;;  %vm18317_vm9 = vmmov %vm18316_vm10 }
 0x49a   : > { %4678 = vrot.lane.b32.xlu1 %v13864_v34, %s10035_s25  ;;  %9003 = vmatpush1.msk.msra.mxu0 %vm18303_vm15, %v4824_v38  ;;  %vm18318_vm15 = vmmov %vm18304_vm1 }
 0x49b   : > { %v4531_v62 = vpop.permute.xlu0 %4530 }
 0x49c   : > { %v4571_v57 = vsel %vm18304_vm1, %v13762_v21, %v4531_v62  ;;  %v13957_v41 = vpop.permute.xlu1 %4666  ;;  %v4570_v49 = vsel %vm18305_vm3, %v4531_v62, %v4533_v30  ;;  %vm18319_vm3 = vcmp.ge.s32.totalorder %v12310_v17, 1 }
 0x49d   : > { %4676 = vrot.lane.b32.xlu0 %v13878_v43, %s10035_s25  ;;  %8993 = vmatprep.subr.msk.mxu1 %vm18306_vm12, %v4570_v49  ;;  %vm18320_vm12 = vcmp.ge.s32.totalorder %v12317_v26, 1 }
 0x49e   : > { %4938 = vrot.lane.b32.xlu1 %v13933_v4, %s10033_s23  ;;  %8994 = vmatpush1.msk.msra.mxu1 %vm18307_vm11, %v4571_v57  ;;  %vm18321_vm11 = vcmp.lt.s32.totalorder %v10260_v11, 33  ;;  %v5204_v57 = vpop.f32.mrf.mxu0 }
 0x49f   : > { %v4665_v35 = vpop.permute.xlu0 %4664  ;;  %9886 = vtanh.f32 %v5204_v57 }
 0x4a0   : > { %v4696_v21 = vsel %vm18308_vm0, %v4663_v22, %v4665_v35  ;;  %v4405_v14 = vpop.permute.xlu1 %4404  ;;  %v4695_v53 = vsel %vm18309_vm6, %v4665_v35, %v13957_v41  ;;  %vm18322_vm0 = vmmov %vm18321_vm11  ;;  %vm18323_vm6 = vcmp.ge.s32.totalorder %v18277_v15, 1 }
 0x4a1   : > { %4936 = vrot.lane.b32.xlu0 %v13939_v60, %s10033_s23  ;;  %9004 = vmatprep.subr.msk.mxu0 %vm18310_vm14, %v4695_v53  ;;  %vm18324_vm14 = vcmp.ge.s32.totalorder %v18279_v46, 1  ;;  %v5206_v53 = vpop.f32.mrf.mxu0 }
 0x4a2   : > { %4810 = vrot.lane.b32.xlu1 %v13933_v4, %s10034_s24  ;;  %9005 = vmatpush1.msk.msra.mxu0 %vm18311_vm13, %v4696_v21  ;;  %vm18325_vm13 = vcmask 588800  }
 0x4a3   : > { %v4403_v42 = vpop.permute.xlu0 %4402  ;;  %5870 = vmatprep.subr.mxu0 %v13474_v56 }
 0x4a4   : > { %v4443_v58 = vsel %vm18312_vm4, %v13789_v28, %v4403_v42  ;;  %v4277_v47 = vpop.permute.xlu1 %4276  ;;  %5871 = vmatpush1.msra.mxu0 %v13399_v36  ;;  %v4442_v10 = vsel %vm18313_vm7, %v4403_v42, %v4405_v14  ;;  %vm18326_vm7 = vmmov %vm18312_vm4 }
 0x4a5   : > { %4808 = vrot.lane.b32.xlu0 %v13939_v60, %s10034_s24  ;;  %8995 = vmatprep.subr.msk.mxu1 %vm18314_vm8, %v4442_v10  ;;  %vm18327_vm8 = vcmp.le.s32.totalorder %v12310_v17, 30 }
 0x4a6   : > { %4548 = vrot.lane.b32.xlu1 %v13878_v43, %s10036_s26  ;;  %8996 = vmatpush1.msk.msra.mxu1 %vm18315_vm2, %v4443_v58  ;;  %vm18328_vm2 = vcmp.le.s32.totalorder %v12317_v26, 30  ;;  %v5346_v58 = vpop.f32.mrf.mxu0 }
 0x4a7   : > { %v4275_v56 = vpop.permute.xlu0 %4274 }
 0x4a8   : > { %v13997_v28 = vpop.permute.xlu1 %4536  ;;  %v4314_v36 = vsel %vm18316_vm10, %v4275_v56, %v4277_v47  ;;  %v4315_v3 = vsel %vm18317_vm9, %v13810_v18, %v4275_v56  ;;  %vm18329_vm10 = vmmov %vm18317_vm9  ;;  %v18345_v56 = vld [vmem:[#allocation81_spill] sm:$0xff] }
 0x4a9   : > { %4546 = vrot.lane.b32.xlu0 %v13698_v61, %s10036_s26  ;;  %5805 = vmatprep.subr.mxu1 %v4314_v36  ;;  %v5348_v36 = vpop.f32.mrf.mxu0 }
 0x4aa   : > { %4682 = vrot.lane.b32.xlu1 %v13933_v4, %s10035_s25  ;;  %5806 = vmatpush1.msra.mxu1 %v4315_v3 }
 0x4ab   : > { %v4535_v20 = vpop.permute.xlu0 %4534 }
 0x4ac   : > { %v4569_v51 = vsel %vm18318_vm15, %v4533_v30, %v4535_v20  ;;  %v4149_v16 = vpop.permute.xlu1 %4148  ;;  %v4568_v44 = vsel %vm18304_vm1, %v4535_v20, %v13997_v28  ;;  %vm18330_vm15 = vcmp.lt.s32.totalorder %v10260_v11, 95  ;;  %v5275_v30 = vpop.f32.mrf.mxu1 }
 0x4ad   : > { %4680 = vrot.lane.b32.xlu0 %v13939_v60, %s10035_s25  ;;  %9006 = vmatprep.subr.msk.mxu0 %vm18319_vm3, %v4568_v44  ;;  %vm18331_vm1 = vmmov %vm18330_vm15  ;;  %vm18333_vm3 = vnez %v18332_v52 }
 0x4ae   : > { %4420 = vrot.lane.b32.xlu1 %v13878_v43, %s10037_s10  ;;  %9007 = vmatpush1.msk.msra.mxu0 %vm18320_vm12, %v4569_v51  ;;  %vm18335_vm12 = vcmp.le.s32.totalorder %v18334_v2, 30  ;;  %v5277_v35 = vpop.f32.mrf.mxu1 }
 0x4af   : > { %v4147_v18 = vpop.permute.xlu0 %4146  ;;  %9888 = vtanh.f32 %v5277_v35 }
 0x4b0   : > { %v4187_v37 = vsel %vm18321_vm11, %v13839_v19, %v4147_v18  ;;  %v14024_v8 = vpop.permute.xlu1 %4408  ;;  %v4186_v12 = vsel %vm18322_vm0, %v4147_v18, %v4149_v16  ;;  %vm18336_vm11 = vmmov %vm18322_vm0  ;;  %9890 = vtanh.f32 %v5206_v53 }
 0x4b1   : > { %4418 = vrot.lane.b32.xlu0 %v13698_v61, %s10037_s10  ;;  %8997 = vmatprep.subr.msk.mxu1 %vm18323_vm6, %v4186_v12  ;;  %vm18337_vm6 = vcmp.ge.s32.totalorder %v12310_v17, 1  ;;  %9892 = vtanh.f32 %v5275_v30  ;;  %v18353_v12 = vld [vmem:[#allocation71_spill] sm:$0xff] }
 0x4b2   : > { %4292 = vrot.lane.b32.xlu1 %v13878_v43, %s10038_s12  ;;  %8998 = vmatpush1.msk.msra.mxu1 %vm18324_vm14, %v4187_v37  ;;  %vm18338_vm14 = vcmp.ge.s32.totalorder %v12317_v26, 1  ;;  %v18341_v26 = vld [vmem:[#allocation74_spill] sm:$0xff]  ;;  %9894 = vtanh.f32 %v5346_v58 }
 0x4b3   : > { %v4407_v5 = vpop.permute.xlu0 %4406  ;;  %8999 = vmatmul.mubr.msk.f32.vlgmr.msra.gmra.mxu1 %vm18325_vm13, %v13804_v29  ;;  %9896 = vtanh.f32 %v5348_v36 }
 0x4b4   : > { %v4441_v19 = vsel %vm18312_vm4, %v4405_v14, %v4407_v5  ;;  %v14040_v25 = vpop.permute.xlu1 %4280  ;;  %v4440_v15 = vsel %vm18326_vm7, %v4407_v5, %v14024_v8  ;;  %5983 = vmatprep.mubr.f32.mxu1 %v17568_v27  ;;  %vm18339_vm4 = vcmp.lt.s32.totalorder %v10260_v11, 96  ;;  %v14144_v5 = vpop.eup %9886 }
 0x4b5   : > { %4290 = vrot.lane.b32.xlu0 %v13698_v61, %s10038_s12  ;;  %9008 = vmatprep.subr.msk.mxu0 %vm18327_vm8, %v4440_v15  ;;  %vm18340_vm7 = vmmov %vm18339_vm4  ;;  %vm18342_vm8 = vnez %v18341_v26 }
 0x4b6   : > { %4552 = vrot.lane.b32.xlu1 %v13939_v60, %s10036_s26  ;;  %9009 = vmatpush1.msk.msra.mxu0 %vm18328_vm2, %v4441_v19  ;;  %vm18343_vm2 = vcmp.lt.s32.totalorder %v10260_v11, 97 }
 0x4b7   : > { %v4279_v46 = vpop.permute.xlu0 %4278 }
 0x4b8   : > { %v5055_v22 = vpop.permute.xlu1 %5054  ;;  %v4312_v50 = vsel %vm18329_vm10, %v4279_v46, %v14040_v25  ;;  %v4313_v33 = vsel %vm18317_vm9, %v4277_v47, %v4279_v46  ;;  %vm18344_vm10 = vmmov %vm18343_vm2  ;;  %vm18346_vm9 = vnez %v18345_v56 }
 0x4b9   : > { %4550 = vrot.lane.b32.xlu0 %v13864_v34, %s10036_s26  ;;  %5876 = vmatprep.subr.mxu0 %v4312_v50 }
 0x4ba   : > { %4164 = vrot.lane.b32.xlu1 %v13878_v43, %s10040_s13  ;;  %5877 = vmatpush1.msra.mxu0 %v4313_v33 }
 0x4bb   : > { %v5053_v7 = vpop.permute.xlu0 %5052 }
 0x4bc   : > { %v5078_v31 = vsel %vm18330_vm15, %v13884_v39, %v5053_v7  ;;  %v14066_v1 = vpop.permute.xlu1 %4152  ;;  %v5077_v13 = vsel %vm18331_vm1, %v5053_v7, %v5055_v22  ;;  %vm18347_vm15 = vcmp.ge.s32.totalorder %v18334_v2, 1 }
 0x4bd   : > { %4162 = vrot.lane.b32.xlu0 %v13698_v61, %s10040_s13  ;;  %9013 = vmatprep.subr.msk.mxu1 %vm18333_vm3, %v5077_v13  ;;  %vm18348_vm3 = vmmov %vm18331_vm1 }
 0x4be   : > { %4424 = vrot.lane.b32.xlu1 %v13939_v60, %s10037_s10  ;;  %9014 = vmatpush1.msk.msra.mxu1 %vm18335_vm12, %v5078_v31  ;;  %vm18349_vm12 = vcmp.le.s32.totalorder %v12410_v9, 30 }
 0x4bf   : > { %v4151_v38 = vpop.permute.xlu0 %4150 }
 0x4c0   : > { %v4185_v39 = vsel %vm18336_vm11, %v4149_v16, %v4151_v38  ;;  %v4927_v55 = vpop.permute.xlu1 %4926  ;;  %v4184_v62 = vsel %vm18322_vm0, %v4151_v38, %v14066_v1  ;;  %vm18350_vm11 = vcmp.le.s32.totalorder %v12417_v6, 30  ;;  %vm18351_vm0 = vcmp.lt.s32.totalorder %v10260_v11, 127 }
 0x4c1   : > { %4422 = vrot.lane.b32.xlu0 %v13864_v34, %s10037_s10  ;;  %9010 = vmatprep.subr.msk.mxu0 %vm18337_vm6, %v4184_v62  ;;  %vm18352_vm6 = vmmov %vm18351_vm0 }
 0x4c2   : > { %4296 = vrot.lane.b32.xlu1 %v13939_v60, %s10038_s12  ;;  %9011 = vmatpush1.msk.msra.mxu0 %vm18338_vm14, %v4185_v39  ;;  %vm18354_vm14 = vcmp.le.s32.totalorder %v18353_v12, 30 }
 0x4c3   : > { %v4925_v49 = vpop.permute.xlu0 %4924  ;;  %9012 = vmatmul.mubr.msk.f32.vlgmr.msra.gmra.mxu0 %vm18325_vm13, %v13804_v29  ;;  %vm18355_vm13 = vcmp.le.s32.totalorder %v18334_v2, 30  ;;  %v5488_v56 = vpop.f32.mrf.mxu0 }
 0x4c4   : > { %v4799_v21 = vpop.permute.xlu1 %4798  ;;  %v4949_v14 = vsel %vm18339_vm4, %v4925_v49, %v4927_v55  ;;  %v4950_v17 = vsel %vm18340_vm7, %v13912_v59, %v4925_v49  ;;  %6054 = vmatprep.mubr.f32.mxu0 %v17568_v27  ;;  %vm18356_vm7 = vmmov %vm18339_vm4 }
 0x4c5   : > { %4294 = vrot.lane.b32.xlu0 %v13864_v34, %s10038_s12  ;;  %9015 = vmatprep.subr.msk.mxu1 %vm18342_vm8, %v4949_v14  ;;  %vm18357_vm8 = vmmov %vm18343_vm2 }
 0x4c6   : > { %4166 = vrot.lane.b32.xlu1 %v13864_v34, %s10040_s13  ;;  %5936 = vmatpush1.msra.mxu1 %v4950_v17 }
 0x4c7   : > { %v4797_v42 = vpop.permute.xlu0 %4796 }
 0x4c8   : > { %v4822_v59 = vsel %vm18343_vm2, %v13925_v23, %v4797_v42  ;;  %v14108_v47 = vpop.permute.xlu1 %5058  ;;  %v4821_v10 = vsel %vm18344_vm10, %v4797_v42, %v4799_v21  ;;  %vm18358_vm10 = vcmp.ge.s32.totalorder %v12410_v9, 1 }
 0x4c9   : > { %5068 = vrot.lane.b32.xlu0 %v12717_v32, %s10032_s22  ;;  %9016 = vmatprep.subr.msk.mxu1 %vm18346_vm9, %v4821_v10  ;;  %vm18359_vm9 = vcmp.ge.s32.totalorder %v12417_v6, 1  ;;  %s10041_s22 = smov 126  }
 0x4ca   : > { %4940 = vrot.lane.b32.xlu1 %v12717_v32, %s10033_s23  ;;  %9017 = vmatpush1.msk.msra.mxu1 %vm18347_vm15, %v4822_v59  ;;  %vm18361_vm15 = vcmp.lt.s32.totalorder %v10260_v11, 1  ;;  %v14234_v59 = vpop.f32.mrf.mxu1 }
 0x4cb   : > { %v5057_v23 = vpop.permute.xlu0 %5056 }
 0x4cc   : > { %v5076_v3 = vsel %vm18331_vm1, %v5055_v22, %v5057_v23  ;;  %v4671_v20 = vpop.permute.xlu1 %4670  ;;  %v5075_v51 = vsel %vm18348_vm3, %v5057_v23, %v14108_v47  ;;  %vm18362_vm1 = vmmov %vm18361_vm15  ;;  %vm18363_vm3 = vcmp.ge.s32.totalorder %v18353_v12, 1 }
 0x4cd   : > { %4168 = vrot.lane.b32.xlu0 %v13939_v60, %s10040_s13  ;;  %9027 = vmatprep.subr.msk.mxu0 %vm18349_vm12, %v5075_v51  ;;  %vm18364_vm12 = vcmp.ge.s32.totalorder %v18334_v2, 1  ;;  %v5490_v51 = vpop.f32.mrf.mxu0 }
 0x4ce   : > { %4684 = vrot.lane.b32.xlu1 %v12717_v32, %s10035_s25  ;;  %9028 = vmatpush1.msk.msra.mxu0 %vm18350_vm11, %v5076_v3  ;;  %vm18365_vm11 = vmmov %vm18351_vm0  ;;  %9898 = vtanh.f32 %v5490_v51  ;;  %v18406_v51 = vld [vmem:[#allocation29_spill] sm:$0xff] }
 0x4cf   : > { %v4669_v16 = vpop.permute.xlu0 %4668  ;;  %9900 = vtanh.f32 %v5488_v56 }
 0x4d0   : > { %v4694_v44 = vsel %vm18351_vm0, %v13957_v41, %v4669_v16  ;;  %v14136_v18 = vpop.permute.xlu1 %4930  ;;  %v4693_v37 = vsel %vm18352_vm6, %v4669_v16, %v4671_v20  ;;  %v14150_v41 = vpop.eup %9888  ;;  %vm18366_vm6 = vcmp.le.s32.totalorder %v12410_v9, 30 }
 0x4d1   : > { %4812 = vrot.lane.b32.xlu0 %v12717_v32, %s10034_s24  ;;  %9018 = vmatprep.subr.msk.mxu1 %vm18354_vm14, %v4693_v37  ;;  %v14161_v50 = vpop.eup %9890  ;;  %vm18367_vm14 = vcmp.le.s32.totalorder %v12417_v6, 30 }
 0x4d2   : > { %4426 = vrot.lane.b32.xlu1 %v13933_v4, %s10037_s10  ;;  %9019 = vmatpush1.msk.msra.mxu1 %vm18355_vm13, %v4694_v44  ;;  %v14165_v33 = vpop.eup %9892  ;;  %vm18368_vm13 = vcmp.lt.s32.totalorder %v10260_v11, 31  ;;  %s17206_s10 = scalar_lea.hbm %s17249_s8, %s9120_s17 }
 0x4d3   : > { %v4929_v19 = vpop.permute.xlu0 %4928  ;;  %5941 = vmatprep.subr.mxu1 %v13643_v63  ;;  %v9507_v52 = vpack.i.bf16 %v14165_v33, %v14161_v50  ;;  %v14182_v38 = vpop.eup %9894 }
 0x4d4   : > { %v14153_v15 = vpop.permute.xlu1 %4802  ;;  %5942 = vmatpush1.msra.mxu1 %v13468_v48  ;;  %v4947_v46 = vsel %vm18339_vm4, %v4929_v19, %v14136_v18  ;;  %v4948_v22 = vsel %vm18356_vm7, %v4927_v55, %v4929_v19  ;;  %v9512_v48 = vpack.i.bf16 %v14144_v5, %v14150_v41  ;;  %v14187_v30 = vpop.eup %9896  ;;  %vm18369_vm4 = vmmov %vm18368_vm13  ;;  %vm18370_vm7 = vcmp.le.s32.totalorder %v18353_v12, 30 }
 0x4d5   : > { %4554 = vrot.lane.b32.xlu0 %v13933_v4, %s10036_s26  ;;  %6006 = vmatprep.subr.mxu0 %v4947_v46  ;;  %18360 = vst [vmem:[#allocation24_spill] sm:$0xff] %v14187_v30  ;;  %v9532_v49 = vpack.i.bf16 %v14187_v30, %v14182_v38 }
 0x4d6   : > { %4170 = vrot.lane.b32.xlu1 %v13933_v4, %s10040_s13  ;;  %6007 = vmatpush1.msra.mxu0 %v4948_v22 }
 0x4d7   : > { %v4801_v63 = vpop.permute.xlu0 %4800 }
 0x4d8   : > { %v4820_v7 = vsel %vm18357_vm8, %v4799_v21, %v4801_v63  ;;  %v4541_v31 = vpop.permute.xlu1 %4540  ;;  %v4819_v13 = vsel %vm18343_vm2, %v4801_v63, %v14153_v15  ;;  %vm18371_vm8 = vcmp.le.s32.totalorder %v18334_v2, 30  ;;  %vm18372_vm2 = vcmp.lt.s32.totalorder %v10260_v11, 32 }
 0x4d9   : > { %4298 = vrot.lane.b32.xlu0 %v13933_v4, %s10038_s12  ;;  %9029 = vmatprep.subr.msk.mxu0 %vm18358_vm10, %v4819_v13  ;;  %vm18373_vm10 = vmmov %vm18372_vm2  ;;  %s8570_s12 = scalar_lea.sflag [#allocation3], %s296_s21 }
 0x4da   : > { %9030 = vmatpush1.msk.msra.mxu0 %vm18359_vm9, %v4820_v7  ;;  %9513 = vrot.lane.b32.xlu1 %v9512_v48, %s10035_s25  ;;  %vm18374_vm9 = vmmov %vm18362_vm1 }
 0x4db   : > { %v4539_v39 = vpop.permute.xlu0 %4538 }
 0x4dc   : > { %v4567_v55 = vsel %vm18361_vm15, %v13997_v28, %v4539_v39  ;;  %v14192_v62 = vpop.permute.xlu1 %4674  ;;  %v4566_v57 = vsel %vm18362_vm1, %v4539_v39, %v4541_v31  ;;  %vm18375_vm15 = vmmov %vm18362_vm1  ;;  %vm18376_vm1 = vcmp.ge.s32.totalorder %v12410_v9, 1  ;;  %v18390_v39 = vld [vmem:[#allocation92_spill] sm:$0xff] }
 0x4dd   : > { %9020 = vmatprep.subr.msk.mxu1 %vm18363_vm3, %v4566_v57  ;;  %9508 = vrot.lane.b32.xlu0 %v9507_v52, %s10035_s25  ;;  %vm18377_vm3 = vcmp.ge.s32.totalorder %v12417_v6, 1  ;;  %v14290_v57 = vpop.eup %9898 }
 0x4de   : > { %9021 = vmatpush1.msk.msra.mxu1 %vm18364_vm12, %v4567_v55  ;;  %9523 = vrot.lane.b32.xlu1 %v9512_v48, %s10041_s22  ;;  %vm18378_vm12 = vcmp.lt.s32.totalorder %v10260_v11, 33  ;;  %v18392_v55 = vld [vmem:[#allocation93_spill] sm:$0xff] }
 0x4df   : > { %v4673_v28 = vpop.permute.xlu0 %4672 }
 0x4e0   : > { %v4692_v35 = vsel %vm18365_vm11, %v4671_v20, %v4673_v28  ;;  %v4413_v21 = vpop.permute.xlu1 %4412  ;;  %v4691_v14 = vsel %vm18351_vm0, %v4673_v28, %v14192_v62  ;;  %vm18379_vm11 = vmmov %vm18378_vm12  ;;  %vm18380_vm0 = vcmp.ge.s32.totalorder %v18353_v12, 1 }
 0x4e1   : > { %9031 = vmatprep.subr.msk.mxu0 %vm18366_vm6, %v4691_v14  ;;  %9518 = vrot.lane.b32.xlu0 %v9507_v52, %s10041_s22  ;;  %vm18381_vm6 = vcmp.ge.s32.totalorder %v18334_v2, 1 }
 0x4e2   : > { %9032 = vmatpush1.msk.msra.mxu0 %vm18367_vm14, %v4692_v35  ;;  %9533 = vrot.lane.b32.xlu1 %v9532_v49, %s10041_s22  ;;  %vm18382_vm14 = vcmask 588800  }
 0x4e3   : > { %v4411_v17 = vpop.permute.xlu0 %4410  ;;  %6012 = vmatprep.subr.mxu0 %v13704_v0 }
 0x4e4   : > { %v4439_v26 = vsel %vm18368_vm13, %v14024_v8, %v4411_v17  ;;  %v4285_v53 = vpop.permute.xlu1 %4284  ;;  %6013 = vmatpush1.msra.mxu0 %v13627_v24  ;;  %v4438_v42 = vsel %vm18369_vm4, %v4411_v17, %v4413_v21  ;;  %vm18383_vm13 = vmmov %vm18369_vm4 }
 0x4e5   : > { %9022 = vmatprep.subr.msk.mxu1 %vm18370_vm7, %v4438_v42  ;;  %9528 = vrot.lane.b32.xlu0 %v9532_v49, %s10035_s25  ;;  %vm18384_vm7 = vcmp.le.s32.totalorder %v12410_v9, 30  ;;  %v14292_v49 = vpop.eup %9900 }
 0x4e6   : > { %9023 = vmatpush1.msk.msra.mxu1 %vm18371_vm8, %v4439_v26  ;;  %vm18385_vm8 = vnez %v17958_v45 }
 0x4e7   : > { %v4283_v58 = vpop.permute.xlu0 %4282 }
 0x4e8   : > { %v14227_v0 = vpop.permute.xlu1 %4544  ;;  %v4310_v8 = vsel %vm18372_vm2, %v4283_v58, %v4285_v53  ;;  %v4311_v24 = vsel %vm18373_vm10, %v14040_v25, %v4283_v58  ;;  %v14245_v25 = vpop.f32.mrf.mxu1  ;;  %vm18386_vm10 = vmmov %vm18372_vm2 }
 0x4e9   : > { %5947 = vmatprep.subr.mxu1 %v4310_v8 }
 0x4ea   : > { %5948 = vmatpush1.msra.mxu1 %v4311_v24 }
 0x4eb   : > { %v4543_v10 = vpop.permute.xlu0 %4542 }
 0x4ec   : > { %v4565_v23 = vsel %vm18374_vm9, %v4541_v31, %v4543_v10  ;;  %v4157_v36 = vpop.permute.xlu1 %4156  ;;  %v4564_v3 = vsel %vm18375_vm15, %v4543_v10, %v14227_v0  ;;  %vm18387_vm9 = vnez %v17952_v54  ;;  %vm18388_vm15 = vcmp.lt.s32.totalorder %v10260_v11, 95 }
 0x4ed   : > { %9033 = vmatprep.subr.msk.mxu0 %vm18376_vm1, %v4564_v3  ;;  %vm18389_vm1 = vmmov %vm18388_vm15 }
 0x4ee   : > { %9034 = vmatpush1.msk.msra.mxu0 %vm18377_vm3, %v4565_v23  ;;  %vm18391_vm3 = vcmp.le.s32.totalorder %v18390_v39, 30 }
 0x4ef   : > { %v4155_v20 = vpop.permute.xlu0 %4154 }
 0x4f0   : > { %v4183_v16 = vsel %vm18378_vm12, %v14066_v1, %v4155_v20  ;;  %v14250_v44 = vpop.permute.xlu1 %4416  ;;  %v4182_v37 = vsel %vm18379_vm11, %v4155_v20, %v4157_v36  ;;  %vm18393_vm12 = vcmp.le.s32.totalorder %v18392_v55, 30  ;;  %v18404_v20 = vld [vmem:[#allocation17_spill] sm:$0xff] }
 0x4f1   : > { %9024 = vmatprep.subr.msk.mxu1 %vm18380_vm0, %v4182_v37  ;;  %vm18394_vm0 = vmmov %vm18379_vm11 }
 0x4f2   : > { %9025 = vmatpush1.msk.msra.mxu1 %vm18381_vm6, %v4183_v16  ;;  %vm18395_vm6 = vcmp.ge.s32.totalorder %v12410_v9, 1 }
 0x4f3   : > { %v4415_v6 = vpop.permute.xlu0 %4414  ;;  %9026 = vmatmul.mubr.msk.f32.vlgmr.msra.gmra.mxu1 %vm18382_vm14, %v13804_v29  ;;  %v5559_v19 = vpop.f32.mrf.mxu1 }
 0x4f4   : > { %v4437_v1 = vsel %vm18383_vm13, %v4413_v21, %v4415_v6  ;;  %v14262_v46 = vpop.permute.xlu1 %4288  ;;  %v4436_v12 = vsel %vm18369_vm4, %v4415_v6, %v14250_v44  ;;  %9902 = vtanh.f32 %v5559_v19  ;;  %6125 = vmatprep.mubr.f32.mxu1 %v17568_v27  ;;  %vm18396_vm13 = vcmp.lt.s32.totalorder %v10260_v11, 96 }
 0x4f5   : > { %9035 = vmatprep.subr.msk.mxu0 %vm18384_vm7, %v4436_v12  ;;  %v5561_v2 = vpop.f32.mrf.mxu1  ;;  %vm18397_vm4 = vmmov %vm18396_vm13 }
 0x4f6   : > { %9036 = vmatpush1.msk.msra.mxu0 %vm18385_vm8, %v4437_v1  ;;  %9904 = vtanh.f32 %v5561_v2  ;;  %vm18400_vm8 = vcmp.ge.s32.totalorder %v18390_v39, 1 }
 0x4f7   : > { %v4287_v22 = vpop.permute.xlu0 %4286 }
 0x4f8   : > { %v4309_v48 = vsel %vm18372_vm2, %v4285_v53, %v4287_v22  ;;  %v5063_v63 = vpop.permute.xlu1 %5062  ;;  %v4308_v7 = vsel %vm18386_vm10, %v4287_v22, %v14262_v46  ;;  %vm18401_vm2 = vcmp.ge.s32.totalorder %v18392_v55, 1  ;;  %vm18402_vm10 = vmmov %vm18389_vm1 }
 0x4f9   : > { %6018 = vmatprep.subr.mxu0 %v4308_v7 }
 0x4fa   : > { %9037 = vmatpush1.msk.msra.mxu0 %vm18387_vm9, %v4309_v48  ;;  %vm18403_vm9 = vmmov %vm18389_vm1 }
 0x4fb   : > { %v5061_v31 = vpop.permute.xlu0 %5060 }
 0x4fc   : > { %v5074_v45 = vsel %vm18388_vm15, %v14108_v47, %v5061_v31  ;;  %v14282_v13 = vpop.permute.xlu1 %4160  ;;  %v5073_v52 = vsel %vm18389_vm1, %v5061_v31, %v5063_v63  ;;  %vm18405_vm15 = vcmp.le.s32.totalorder %v18404_v20, 30  ;;  %vm18407_vm1 = vcmp.le.s32.totalorder %v18406_v51, 30 }
 0x4fd   : > { %9041 = vmatprep.subr.msk.mxu1 %vm18391_vm3, %v5073_v52  ;;  %vm18408_vm3 = vcmp.lt.s32.totalorder %v10260_v11, 127 }
 0x4fe   : > { %9042 = vmatpush1.msk.msra.mxu1 %vm18393_vm12, %v5074_v45  ;;  %vm18409_vm12 = vmmov %vm18408_vm3 }
 0x4ff   : > { %v4159_v54 = vpop.permute.xlu0 %4158 }
 0x500   : > { %v4181_v28 = vsel %vm18379_vm11, %v4157_v36, %v4159_v54  ;;  %v4935_v47 = vpop.permute.xlu1 %4934  ;;  %v4180_v35 = vsel %vm18394_vm0, %v4159_v54, %v14282_v13  ;;  %vm18410_vm11 = vcmp.le.s32.totalorder %v18390_v39, 30  ;;  %vm18411_vm0 = vcmp.le.s32.totalorder %v18392_v55, 30 }
 0x501   : > { %v14299_v21 = vpop.eup %9902  ;;  %9038 = vmatprep.subr.msk.mxu0 %vm18395_vm6, %v4180_v35  ;;  %vm18413_vm6 = vmmov %vm18397_vm4 }
 0x502   : > { %9039 = vmatpush1.msk.msra.mxu0 %vm12530_vm5, %v4181_v28  ;;  %v9537_v14 = vpack.i.bf16 %v14299_v21, %v14290_v57  ;;  %vm18398_vm5 = vcmp.lt.s32.totalorder %v10260_v11, 97 }
 0x503   : > { %v14307_v17 = vpop.eup %9904  ;;  %v4933_v26 = vpop.permute.xlu0 %4932  ;;  %9040 = vmatmul.mubr.msk.f32.vlgmr.msra.gmra.mxu0 %vm18382_vm14, %v13804_v29  ;;  %vm18399_vm7 = vmmov %vm18398_vm5 }
 0x504   : > { %v5630_v53 = vpop.f32.mrf.mxu0  ;;  %v4807_v42 = vpop.permute.xlu1 %4806  ;;  %v4945_v58 = vsel %vm18396_vm13, %v4933_v26, %v4935_v47  ;;  %v4946_v9 = vsel %vm18397_vm4, %v14136_v18, %v4933_v26  ;;  %9538 = vrot.lane.b32.xlu0 %v9537_v14, %s10035_s25  ;;  %v9542_v40 = vpack.i.bf16 %v14292_v49, %v14307_v17  ;;  %6196 = vmatprep.mubr.f32.mxu0 %v17568_v27  ;;  %vm18414_vm14 = vmmov %vm18397_vm4 }
 0x505   : > { %9906 = vtanh.f32 %v5630_v53  ;;  %6077 = vmatprep.subr.mxu1 %v4945_v58  ;;  %vm18415_vm13 = vmmov %vm18398_vm5 }
 0x506   : > { %v5632_v8 = vpop.f32.mrf.mxu0  ;;  %6078 = vmatpush1.msra.mxu1 %v4946_v9  ;;  %9543 = vrot.lane.b32.xlu1 %v9542_v40, %s10035_s25  ;;  %vm18416_vm4 = vmmov %vm18398_vm5 }
 0x507   : > { %9908 = vtanh.f32 %v5632_v8  ;;  %v4805_v24 = vpop.permute.xlu0 %4804 }
 0x508   : > { %v4818_v10 = vsel %vm18398_vm5, %v14153_v15, %v4805_v24  ;;  %v14324_v18 = vpop.permute.xlu1 %5066  ;;  %v4817_v56 = vsel %vm18399_vm7, %v4805_v24, %v4807_v42  ;;  %9548 = vrot.lane.b32.xlu0 %v9537_v14, %s10041_s22  ;;  %vm18417_vm5 = vcmp.ge.s32.totalorder %v18404_v20, 1  ;;  %vm18418_vm7 = vcmp.ge.s32.totalorder %v18406_v51, 1 }
 0x509   : > { %9043 = vmatprep.subr.msk.mxu1 %vm18400_vm8, %v4817_v56  ;;  %vm18419_vm8 = vcmp.lt.s32.totalorder %v10260_v11, 1 }
 0x50a   : > { %9044 = vmatpush1.msk.msra.mxu1 %vm18401_vm2, %v4818_v10  ;;  %9553 = vrot.lane.b32.xlu1 %v9542_v40, %s10041_s22  ;;  %vm18420_vm2 = vmmov %vm18419_vm8 }
 0x50b   : > { %v5065_v23 = vpop.permute.xlu0 %5064 }
 0x50c   : > { %v5072_v36 = vsel %vm18402_vm10, %v5063_v63, %v5065_v23  ;;  %v4679_v15 = vpop.permute.xlu1 %4678  ;;  %v5071_v3 = vsel %vm18403_vm9, %v5065_v23, %v14324_v18  ;;  %vm18421_vm10 = vcmp.ge.s32.totalorder %v18390_v39, 1  ;;  %vm18422_vm9 = vcmp.ge.s32.totalorder %v18392_v55, 1 }
 0x50d   : > { %9054 = vmatprep.subr.msk.mxu0 %vm18405_vm15, %v5071_v3  ;;  %vm18423_vm15 = vmmov %vm18408_vm3 }
 0x50e   : > { %9055 = vmatpush1.msk.msra.mxu0 %vm18407_vm1, %v5072_v36  ;;  %vm18424_vm1 = vmmov %vm18408_vm3 }
 0x50f   : > { %v4677_v16 = vpop.permute.xlu0 %4676 }
 0x510   : > { %v4689_v37 = vsel %vm18408_vm3, %v4677_v16, %v4679_v15  ;;  %v4690_v6 = vsel %vm18409_vm12, %v14192_v62, %v4677_v16  ;;  %v14348_v19 = vpop.permute.xlu1 %4938  ;;  %vm18425_vm3 = vcmp.le.s32.totalorder %v18404_v20, 30  ;;  %vm18426_vm12 = vcmp.le.s32.totalorder %v18406_v51, 30 }
 0x511   : > { %9045 = vmatprep.subr.msk.mxu1 %vm18410_vm11, %v4689_v37  ;;  %vm18427_vm11 = vcmp.lt.s32.totalorder %v10260_v11, 31 }
 0x512   : > { %v14350_v1 = vpop.eup %9906  ;;  %9046 = vmatpush1.msk.msra.mxu1 %vm18411_vm0, %v4690_v6  ;;  %vm18428_vm0 = vmmov %vm18427_vm11 }
 0x513   : > { %v4937_v2 = vpop.permute.xlu0 %4936  ;;  %6083 = vmatprep.subr.mxu1 %v13878_v43 }
 0x514   : > { %v14356_v12 = vpop.eup %9908  ;;  %v4944_v22 = vsel %vm18413_vm6, %v4935_v47, %v4937_v2  ;;  %v14361_v48 = vpop.permute.xlu1 %4810  ;;  %6084 = vmatpush1.msra.mxu1 %v13698_v61  ;;  %v4943_v62 = vsel %vm18414_vm14, %v4937_v2, %v14348_v19  ;;  %vm18429_vm6 = vcmp.le.s32.totalorder %v18390_v39, 30  ;;  %vm18430_vm14 = vcmp.le.s32.totalorder %v18392_v55, 30 }
 0x515   : > { %18412 = vst [vmem:[#allocation44_spill] sm:$0xff] %v14356_v12  ;;  %v9557_v63 = vpack.i.bf16 %v14356_v12, %v14350_v1  ;;  %6148 = vmatprep.subr.mxu0 %v4943_v62  ;;  %v18449_v62 = vld [vmem:[#allocation18_spill] sm:$0xff]  ;;  %v6933_v12 = vld [vmem:[%s17244_s3 + $0x388] sm:$0xff] }
 0x516   : > { %6149 = vmatpush1.msra.mxu0 %v4944_v22 }
 0x517   : > { %9558 = vrot.lane.b32.xlu0 %v9557_v63, %s10035_s25  ;;  %v4809_v7 = vpop.permute.xlu0 %4808  ;;  %9563 = vrot.lane.b32.xlu1 %v9557_v63, %s10041_s22 }
 0x518   : > { %v4815_v43 = vsel %vm18415_vm13, %v4809_v7, %v14361_v48  ;;  %v4816_v61 = vsel %vm18416_vm4, %v4807_v42, %v4809_v7  ;;  %v4549_v31 = vpop.permute.xlu1 %4548  ;;  %vm18431_vm13 = vcmp.lt.s32.totalorder %v10260_v11, 32 }
 0x519   : > { %9056 = vmatprep.subr.msk.mxu0 %vm18417_vm5, %v4815_v43  ;;  %vm18432_vm4 = vmmov %vm18431_vm13  ;;  %v18451_v43 = vld [vmem:[#allocation113_spill] sm:$0xff] }
 0x51a   : > { %9057 = vmatpush1.msk.msra.mxu0 %vm18418_vm7, %v4816_v61  ;;  %vm18433_vm5 = vmmov %vm18420_vm2  ;;  %v18453_v61 = vld [vmem:[#allocation31_spill] sm:$0xff] }
 0x51b   : > { %v4547_v45 = vpop.permute.xlu0 %4546  ;;  %vm18434_vm7 = vmmov %vm18420_vm2 }
 0x51c   : > { %v4562_v52 = vsel %vm18419_vm8, %v4547_v45, %v4549_v31  ;;  %v4563_v54 = vsel %vm18420_vm2, %v14227_v0, %v4547_v45  ;;  %v14385_v28 = vpop.permute.xlu1 %4682  ;;  %vm18435_vm8 = vcmp.ge.s32.totalorder %v18404_v20, 1  ;;  %vm18436_vm2 = vcmp.ge.s32.totalorder %v18406_v51, 1  ;;  %v18455_v45 = vld [vmem:[#allocation111_spill] sm:$0xff] }
 0x51d   : > { %9047 = vmatprep.subr.msk.mxu1 %vm18421_vm10, %v4562_v52  ;;  %vm18437_vm10 = vcmp.lt.s32.totalorder %v10260_v11, 33 }
 0x51e   : > { %9048 = vmatpush1.msk.msra.mxu1 %vm18422_vm9, %v4563_v54  ;;  %vm18438_vm9 = vmmov %vm18437_vm10  ;;  %v18458_v54 = vld [vmem:[#allocation110_spill] sm:$0xff] }
 0x51f   : > { %v4681_v47 = vpop.permute.xlu0 %4680 }
 0x520   : > { %v4687_v35 = vsel %vm18423_vm15, %v4681_v47, %v14385_v28  ;;  %v4688_v14 = vsel %vm18424_vm1, %v4679_v15, %v4681_v47  ;;  %v4421_v26 = vpop.permute.xlu1 %4420  ;;  %vm18439_vm15 = vcmp.ge.s32.totalorder %v18390_v39, 1  ;;  %vm18440_vm1 = vcmp.ge.s32.totalorder %v18392_v55, 1 }
 0x521   : > { %9058 = vmatprep.subr.msk.mxu0 %vm18425_vm3, %v4687_v35  ;;  %vm18441_vm3 = vcmask 588800  }
 0x522   : > { %9059 = vmatpush1.msk.msra.mxu0 %vm18426_vm12, %v4688_v14  ;;  %vm18442_vm12 = vmmov %vm18428_vm0 }
 0x523   : > { %v4419_v0 = vpop.permute.xlu0 %4418  ;;  %6154 = vmatprep.subr.mxu0 %v13939_v60 }
 0x524   : > { %v4434_v53 = vsel %vm18427_vm11, %v4419_v0, %v4421_v26  ;;  %v4435_v42 = vsel %vm18428_vm0, %v14250_v44, %v4419_v0  ;;  %v4293_v58 = vpop.permute.xlu1 %4292  ;;  %6155 = vmatpush1.msra.mxu0 %v13864_v34  ;;  %vm18443_vm11 = vmmov %vm18428_vm0  ;;  %vm18444_vm0 = vcmp.le.s32.totalorder %v18404_v20, 30  ;;  %v18466_v0 = vld [vmem:[#allocation19_spill] sm:$0xff] }
 0x525   : > { %9049 = vmatprep.subr.msk.mxu1 %vm18429_vm6, %v4434_v53  ;;  %vm18445_vm6 = vcmp.le.s32.totalorder %v18406_v51, 30 }
 0x526   : > { %9050 = vmatpush1.msk.msra.mxu1 %vm18430_vm14, %v4435_v42  ;;  %vm18446_vm14 = vmmov %vm18432_vm4  ;;  %v18468_v42 = vld [vmem:[#allocation115_spill] sm:$0xff] }
 0x527   : > { %v4291_v9 = vpop.permute.xlu0 %4290 }
 0x528   : > { %v4307_v60 = vsel %vm18431_vm13, %v14262_v46, %v4291_v9  ;;  %v4553_v40 = vpop.permute.xlu1 %4552  ;;  %v4306_v8 = vsel %vm18432_vm4, %v4291_v9, %v4293_v58  ;;  %vm18447_vm13 = vmmov %vm18432_vm4  ;;  %vm18448_vm4 = vcmp.lt.s32.totalorder %v10260_v11, 95 }
 0x529   : > { %6089 = vmatprep.subr.mxu1 %v4306_v8  ;;  %v18477_v8 = vld [vmem:[#allocation20_spill] sm:$0xff] }
 0x52a   : > { %6090 = vmatpush1.msra.mxu1 %v4307_v60  ;;  %v18474_v60 = vld [vmem:[#allocation108_spill] sm:$0xff] }
 0x52b   : > { %v4551_v44 = vpop.permute.xlu0 %4550 }
 0x52c   : > { %v4560_v34 = vsel %vm18433_vm5, %v4551_v44, %v4553_v40  ;;  %v4561_v24 = vsel %vm18434_vm7, %v4549_v31, %v4551_v44  ;;  %v4165_v10 = vpop.permute.xlu1 %4164  ;;  %vm18450_vm5 = vmmov %vm18448_vm4  ;;  %vm18452_vm7 = vnez %v18451_v43 }
 0x52d   : > { %9060 = vmatprep.subr.msk.mxu0 %vm18435_vm8, %v4560_v34  ;;  %vm18454_vm8 = vcmp.lt.s32.totalorder %v10260_v11, 96 }
 0x52e   : > { %9061 = vmatpush1.msk.msra.mxu0 %vm18436_vm2, %v4561_v24  ;;  %vm18456_vm2 = vcmp.le.s32.totalorder %v18455_v45, 30  ;;  %v18481_v24 = vld [vmem:[#allocation39_spill] sm:$0xff] }
 0x52f   : > { %v4163_v46 = vpop.permute.xlu0 %4162 }
 0x530   : > { %v4178_v56 = vsel %vm18437_vm10, %v4163_v46, %v4165_v10  ;;  %v4179_v23 = vsel %vm18438_vm9, %v14282_v13, %v4163_v46  ;;  %v4425_v36 = vpop.permute.xlu1 %4424  ;;  %vm18457_vm10 = vmmov %vm18454_vm8  ;;  %vm18459_vm9 = vnez %v18458_v54  ;;  %v6849_v54 = vld [vmem:[%s17244_s3 + $0xe8] sm:$0xff] }
 0x531   : > { %9051 = vmatprep.subr.msk.mxu1 %vm18439_vm15, %v4178_v56  ;;  %vm18460_vm15 = vcmp.lt.s32.totalorder %v10260_v11, 33 }
 0x532   : > { %9052 = vmatpush1.msk.msra.mxu1 %vm18440_vm1, %v4179_v23  ;;  %vm18461_vm1 = vmmov %vm18460_vm15  ;;  %v18490_v23 = vld [vmem:[#allocation41_spill] sm:$0xff] }
 0x533   : > { %v4423_v15 = vpop.permute.xlu0 %4422  ;;  %9053 = vmatmul.mubr.msk.f32.vlgmr.msra.gmra.mxu1 %vm18441_vm3, %v13804_v29  ;;  %vm18462_vm3 = vcmp.ge.s32.totalorder %v18404_v20, 1  ;;  %v18470_v20 = vld [vmem:[#allocation34_spill] sm:$0xff] }
 0x534   : > { %v4432_v3 = vsel %vm18442_vm12, %v4423_v15, %v4425_v36  ;;  %v4433_v16 = vsel %vm18443_vm11, %v4421_v26, %v4423_v15  ;;  %v4297_v37 = vpop.permute.xlu1 %4296  ;;  %6267 = vmatprep.mubr.f32.mxu1 %v17568_v27  ;;  %vm18463_vm12 = vcmp.ge.s32.totalorder %v18406_v51, 1  ;;  %vm18464_vm11 = vcmask 588800  }
 0x535   : > { %9062 = vmatprep.subr.msk.mxu0 %vm18444_vm0, %v4432_v3  ;;  %vm18465_vm0 = vcmp.lt.s32.totalorder %v10260_v11, 97  ;;  %v14532_v3 = vpop.f32.mrf.mxu1 }
 0x536   : > { %9063 = vmatpush1.msk.msra.mxu0 %vm18445_vm6, %v4433_v16  ;;  %vm18467_vm6 = vmmov %vm18465_vm0 }
 0x537   : > { %v4295_v13 = vpop.permute.xlu0 %4294 }
 0x538   : > { %v4305_v39 = vsel %vm18446_vm14, %v4293_v58, %v4295_v13  ;;  %v4167_v55 = vpop.permute.xlu1 %4166  ;;  %v4304_v6 = vsel %vm18447_vm13, %v4295_v13, %v4297_v37  ;;  %vm18469_vm14 = vnez %v18468_v42  ;;  %vm18471_vm13 = vcmp.lt.s32.totalorder %v10260_v11, 127  ;;  %v6912_v42 = vld [vmem:[%s17244_s3 + $0x2e0] sm:$0xff] }
 0x539   : > { %6160 = vmatprep.subr.mxu0 %v4304_v6  ;;  %v4177_v35 = vsel %vm18461_vm1, %v4165_v10, %v4167_v55 }
 0x53a   : > { %6161 = vmatpush1.msra.mxu0 %v4305_v39 }
 0x53b   : > { %v5069_v2 = vpop.permute.xlu0 %5068 }
 0x53c   : > { %v5070_v22 = vsel %vm18448_vm4, %v14324_v18, %v5069_v2  ;;  %v5101_v63 = vsel %vm18450_vm5, %v5069_v2, %v18449_v62  ;;  %v4941_v7 = vpop.permute.xlu1 %4940  ;;  %vm18472_vm4 = vcmp.ge.s32.totalorder %v18455_v45, 1  ;;  %vm18473_vm5 = vmmov %vm18471_vm13 }
 0x53d   : > { %9067 = vmatprep.subr.msk.mxu1 %vm18452_vm7, %v5101_v63  ;;  %v4973_v31 = vsel %vm18454_vm8, %v4941_v7, %v18453_v61  ;;  %v4942_v52 = vsel %vm18457_vm10, %v14348_v19, %v4941_v7  ;;  %vm18475_vm7 = vcmp.le.s32.totalorder %v18474_v60, 30  ;;  %vm18476_vm8 = vmmov %vm18456_vm2 }
 0x53e   : > { %9068 = vmatpush1.msk.msra.mxu1 %vm18456_vm2, %v5070_v22  ;;  %vm18478_vm2 = vcmp.lt.s32.totalorder %v10260_v11, 1  ;;  %vm18483_vm1 = vmmov %vm18472_vm4 }
 0x53f   : > { %v4169_v18 = vpop.permute.xlu0 %4168  ;;  %9069 = vmatprep.subr.msk.mxu1 %vm18459_vm9, %v4973_v31  ;;  %vm18479_vm10 = vmmov %vm18478_vm2  ;;  %vm18480_vm9 = vcmp.ge.s32.totalorder %v18474_v60, 1  ;;  %v6842_v60 = vld [vmem:[%s17244_s3 + $0xb0] sm:$0xff] }
 0x540   : > { %v4176_v47 = vsel %vm18460_vm15, %v4167_v55, %v4169_v18  ;;  %6220 = vmatpush1.msra.mxu1 %v4942_v52  ;;  %v4685_v14 = vpop.permute.xlu1 %4684  ;;  %vm18482_vm15 = vcmp.lt.s32.totalorder %v10260_v11, 31  ;;  %v6851_v52 = vld [vmem:[%s17244_s3 + $0xf8] sm:$0xff] }
 0x541   : > { %9064 = vmatprep.subr.msk.mxu0 %vm18462_vm3, %v4176_v47  ;;  %v4717_v51 = vsel %vm18471_vm13, %v4685_v14, %v18470_v20  ;;  %v4686_v58 = vsel %vm18473_vm5, %v14385_v28, %v4685_v14  ;;  %vm18484_vm3 = vmmov %vm18482_vm15  ;;  %v6848_v47 = vld [vmem:[%s17244_s3 + $0xe0] sm:$0xff]  ;;  %v6915_v14 = vld [vmem:[%s17244_s3 + $0x2f8] sm:$0xff] }
 0x542   : > { %9065 = vmatpush1.msk.msra.mxu0 %vm18463_vm12, %v4177_v35  ;;  %vm18485_vm12 = vmmov %vm18475_vm7  ;;  %v6847_v35 = vld [vmem:[%s17244_s3 + $0xd8] sm:$0xff] }
 0x543   : > { %v4813_v26 = vpop.permute.xlu0 %4812  ;;  %9066 = vmatmul.mubr.msk.f32.vlgmr.msra.gmra.mxu0 %vm18464_vm11, %v13804_v29  ;;  %vm18486_vm11 = vmmov %vm18476_vm8  ;;  %v5772_v16 = vpop.f32.mrf.mxu0  ;;  %7076 = vmatprep.subr.mxu0 %v6851_v52  ;;  %v6911_v20 = vld [vmem:[%s17244_s3 + $0x2d8] sm:$0xff]  ;;  %v6830_v52 = vld [vmem:[%s17244_s3 + $0x50] sm:$0xff] }
 0x544   : > { %v4814_v19 = vsel %vm18465_vm0, %v14361_v48, %v4813_v26  ;;  %v4845_v53 = vsel %vm18467_vm6, %v4813_v26, %v18466_v0  ;;  %v4427_v9 = vpop.permute.xlu1 %4426  ;;  %vm18488_vm0 = vcmp.lt.s32.totalorder %v10260_v11, 32  ;;  %vm18494_vm5 = vmmov %vm18483_vm1  ;;  %v6914_v26 = vld [vmem:[%s17244_s3 + $0x2f0] sm:$0xff]  ;;  %v6913_v0 = vld [vmem:[%s17244_s3 + $0x2e8] sm:$0xff] }
 0x545   : > { %9070 = vmatprep.subr.msk.mxu1 %vm18469_vm14, %v4845_v53  ;;  %v4430_v10 = vsel %vm18482_vm15, %v4427_v9, %v18481_v24  ;;  %vm18489_vm6 = vmmov %vm18488_vm0  ;;  %vm18491_vm14 = vcmp.lt.s32.totalorder %v10260_v11, 33  ;;  %v5774_v13 = vpop.f32.mrf.mxu0  ;;  %v6845_v53 = vld [vmem:[%s17244_s3 + $0xc8] sm:$0xff]  ;;  %v6906_v24 = vld [vmem:[%s17244_s3 + $0x2b0] sm:$0xff] }
 0x546   : > { %9071 = vmatpush1.msk.msra.mxu1 %vm18472_vm4, %v4814_v19  ;;  %vm18492_vm13 = vmmov %vm18491_vm14  ;;  %9910 = vtanh.f32 %v5774_v13  ;;  %v6846_v19 = vld [vmem:[%s17244_s3 + $0xd0] sm:$0xff] }
 0x547   : > { %v4555_v48 = vpop.permute.xlu0 %4554  ;;  %9072 = vmatprep.subr.msk.mxu1 %vm18475_vm7, %v4717_v51  ;;  %vm18493_vm4 = vmmov %vm18480_vm9  ;;  %vm18495_vm7 = vcmask 588800   ;;  %9912 = vtanh.f32 %v5772_v16  ;;  %v6844_v51 = vld [vmem:[%s17244_s3 + $0xc0] sm:$0xff]  ;;  %v6901_v16 = vld [vmem:[%s17244_s3 + $0x288] sm:$0xff] }
 0x548   : > { %9073 = vmatpush1.msk.msra.mxu1 %vm18476_vm8, %v4686_v58  ;;  %v4558_v44 = vsel %vm18478_vm2, %v4555_v48, %v18477_v8  ;;  %v4559_v34 = vsel %vm18479_vm10, %v4553_v40, %v4555_v48  ;;  %v4171_v46 = vpop.permute.xlu1 %4170  ;;  %v6910_v58 = vld [vmem:[%s17244_s3 + $0x2d0] sm:$0xff]  ;;  %v6909_v48 = vld [vmem:[%s17244_s3 + $0x2c8] sm:$0xff]  ;;  %v6908_v8 = vld [vmem:[%s17244_s3 + $0x2c0] sm:$0xff]  ;;  %vm6466_vm8 = vcmp.lt.s32.totalorder %v10260_v11, 126  ;;  %vm18502_vm2 = vcmp.lt.s32.totalorder %v10260_v11, 127 }
 0x549   : > { %6225 = vmatprep.subr.mxu1 %v12717_v32  ;;  %v4431_v32 = vsel %vm18484_vm3, %v4425_v36, %v4427_v9  ;;  %v4174_v15 = vsel %vm18491_vm14, %v4171_v46, %v18490_v23  ;;  %v4175_v36 = vsel %vm18492_vm13, %v4169_v18, %v4171_v46  ;;  %v6850_v18 = vld [vmem:[%s17244_s3 + $0xf0] sm:$0xff]  ;;  %v6843_v9 = vld [vmem:[%s17244_s3 + $0xb8] sm:$0xff]  ;;  %v6836_v23 = vld [vmem:[%s17244_s3 + $0x80] sm:$0xff] }
 0x54a   : > { %6226 = vmatpush1.msra.mxu1 %v13933_v4  ;;  %v18487_v4 = vld [vmem:[#allocation23_spill] sm:$0xff]  ;;  %7077 = vmatpush1.msra.mxu0 %v6850_v18  ;;  %v6838_v46 = vld [vmem:[%s17244_s3 + $0x90] sm:$0xff]  ;;  %v6896_v18 = vld [vmem:[%s17244_s3 + $0x260] sm:$0xff] }
 0x54b   : > { %v4299_v28 = vpop.permute.xlu0 %4298  ;;  %9074 = vmatprep.subr.msk.mxu1 %vm18480_vm9, %v4558_v44  ;;  %7078 = vmatprep.subr.mxu0 %v6849_v54  ;;  %v6841_v44 = vld [vmem:[%s17244_s3 + $0xa8] sm:$0xff]  ;;  %v6834_v13 = vld [vmem:[%s17244_s3 + $0x70] sm:$0xff]  ;;  %vm18503_vm10 = vmmov %vm18502_vm2 }
 0x54c   : > { %9075 = vmatpush1.msk.msra.mxu1 %vm18483_vm1, %v4559_v34  ;;  %v4302_v40 = vsel %vm18488_vm0, %v4299_v28, %v18487_v4  ;;  %v4303_v56 = vsel %vm18489_vm6, %v4297_v37, %v4299_v28  ;;  %v14534_v37 = vpop.f32.mrf.mxu1  ;;  %7079 = vmatpush1.msra.mxu0 %v6848_v47  ;;  %v6907_v34 = vld [vmem:[%s17244_s3 + $0x2b8] sm:$0xff]  ;;  %v6840_v28 = vld [vmem:[%s17244_s3 + $0xa0] sm:$0xff]  ;;  %v6829_v54 = vld [vmem:[%s17244_s3 + $0x48] sm:$0xff] }
 0x54d   : > { %9076 = vmatprep.subr.msk.mxu1 %vm18485_vm12, %v4430_v10  ;;  %7080 = vmatprep.subr.mxu0 %v6847_v35  ;;  %v6839_v10 = vld [vmem:[%s17244_s3 + $0x98] sm:$0xff]  ;;  %v6904_v4 = vld [vmem:[%s17244_s3 + $0x2a0] sm:$0xff]  ;;  %vm18504_vm9 = vmmov %vm18502_vm2 }
 0x54e   : > { %9077 = vmatpush1.msk.msra.mxu1 %vm18486_vm11, %v4431_v32  ;;  %7081 = vmatpush1.msra.mxu0 %v6846_v19  ;;  %v6905_v32 = vld [vmem:[%s17244_s3 + $0x2a8] sm:$0xff]  ;;  %v6895_v47 = vld [vmem:[%s17244_s3 + $0x258] sm:$0xff]  ;;  %v6828_v35 = vld [vmem:[%s17244_s3 + $0x40] sm:$0xff]  ;;  %v14701_v19 = vpop.permute.xlu1 %9513 }
 0x54f   : > { %6231 = vmatprep.subr.mxu1 %v4302_v40  ;;  %7082 = vmatprep.subr.mxu0 %v6845_v53  ;;  %v6837_v40 = vld [vmem:[%s17244_s3 + $0x88] sm:$0xff]  ;;  %vm18506_vm15 = vmmov %vm18502_vm2 }
 0x550   : > { %6232 = vmatpush1.msra.mxu1 %v4303_v56  ;;  %7083 = vmatpush1.msra.mxu0 %v6844_v51  ;;  %v6903_v56 = vld [vmem:[%s17244_s3 + $0x298] sm:$0xff]  ;;  %vm18509_vm1 = vmmov %vm18502_vm2 }
 0x551   : > { %9078 = vmatprep.subr.msk.mxu1 %vm18493_vm4, %v4174_v15  ;;  %7084 = vmatprep.subr.mxu0 %v6843_v9  ;;  %v6902_v15 = vld [vmem:[%s17244_s3 + $0x290] sm:$0xff]  ;;  %vm18510_vm3 = vmmov %vm18509_vm1 }
 0x552   : > { %9079 = vmatpush1.msk.msra.mxu1 %vm18494_vm5, %v4175_v36  ;;  %7085 = vmatpush1.msra.mxu0 %v6842_v60  ;;  %v6835_v36 = vld [vmem:[%s17244_s3 + $0x78] sm:$0xff]  ;;  %v14705_v53 = vpop.permute.xlu1 %9523  ;;  %vm18513_vm12 = vmmov %vm18509_vm1 }
 0x553   : > { %9080 = vmatmul.mubr.msk.f32.vlgmr.msra.gmra.mxu1 %vm18495_vm7, %v13804_v29  ;;  %v14536_v6 = vpop.eup %9910  ;;  %7165 = vmatprep.subr.mxu1 %v6915_v14  ;;  %v6827_v14 = vld [vmem:[%s17244_s3 + $0x38] sm:$0xff]  ;;  %18497 = vst [vmem:[#allocation46_spill] sm:$0xff] %v14705_v53  ;;  %vm18517_vm11 = vmmov %vm18509_vm1 }
 0x554   : > { %v14538_v2 = vpop.eup %9912  ;;  %7166 = vmatpush1.msra.mxu1 %v6914_v26  ;;  %7086 = vmatprep.subr.mxu0 %v6841_v44  ;;  %v6826_v26 = vld [vmem:[%s17244_s3 + $0x30] sm:$0xff]  ;;  %vm18520_vm0 = vmmov %vm18509_vm1 }
 0x555   : > { %7167 = vmatprep.subr.mxu1 %v6913_v0  ;;  %7087 = vmatpush1.msra.mxu0 %v6840_v28  ;;  %v14703_v0 = vpop.permute.xlu0 %9508  ;;  %vm18522_vm6 = vmmov %vm18520_vm0 }
 0x556   : > { %7168 = vmatpush1.msra.mxu1 %v6912_v42  ;;  %7088 = vmatprep.subr.mxu0 %v6839_v10  ;;  %vm18523_vm14 = vmmov %vm18520_vm0 }
 0x557   : > { %7169 = vmatprep.subr.mxu1 %v6911_v20  ;;  %7089 = vmatpush1.msra.mxu0 %v6838_v46  ;;  %v14709_v20 = vpop.permute.xlu1 %9533  ;;  %v6894_v46 = vld [vmem:[%s17244_s3 + $0x250] sm:$0xff]  ;;  %vm18524_vm13 = vmmov %vm18520_vm0 }
 0x558   : > { %7170 = vmatpush1.msra.mxu1 %v6910_v58  ;;  %7090 = vmatprep.subr.mxu0 %v6837_v40  ;;  %v6893_v40 = vld [vmem:[%s17244_s3 + $0x248] sm:$0xff]  ;;  %vm18525_vm4 = vmmov %vm18520_vm0 }
 0x559   : > { %7171 = vmatprep.subr.mxu1 %v6909_v48  ;;  %7091 = vmatpush1.msra.mxu0 %v6836_v23  ;;  %v14707_v42 = vpop.permute.xlu0 %9518  ;;  %v6892_v23 = vld [vmem:[%s17244_s3 + $0x240] sm:$0xff]  ;;  %vm18527_vm5 = vmmov %vm18520_vm0 }
 0x55a   : > { %7172 = vmatpush1.msra.mxu1 %v6908_v8  ;;  %7092 = vmatprep.subr.mxu0 %v6835_v36  ;;  %v6891_v36 = vld [vmem:[%s17244_s3 + $0x238] sm:$0xff]  ;;  %vm18529_vm7 = vmmov %vm18520_vm0 }
 0x55b   : > { %7173 = vmatprep.subr.mxu1 %v6907_v34  ;;  %7093 = vmatpush1.msra.mxu0 %v6834_v13 }
 0x55c   : > { %7174 = vmatpush1.msra.mxu1 %v6906_v24 }
 0x55d   : > { %7175 = vmatprep.subr.mxu1 %v6905_v32  ;;  %v14711_v58 = vpop.permute.xlu0 %9528  ;;  %v6825_v32 = vld [vmem:[%s17244_s3 + $0x28] sm:$0xff] }
 0x55e   : > { %7176 = vmatpush1.msra.mxu1 %v6904_v4  ;;  %v6824_v4 = vld [vmem:[%s17244_s3 + $0x20] sm:$0xff] }
 0x55f   : > { %7177 = vmatprep.subr.mxu1 %v6903_v56  ;;  %v6823_v56 = vld [vmem:[%s17244_s3 + $0x18] sm:$0xff] }
 0x560   : > { %7178 = vmatpush1.msra.mxu1 %v6902_v15  ;;  %v6822_v15 = vld [vmem:[%s17244_s3 + $0x10] sm:$0xff] }
 0x561   : > { %7179 = vmatprep.subr.mxu1 %v6901_v16 }
 0x573   : > { %v5843_v39 = vpop.f32.mrf.mxu1 }
 0x574   : > { %9914 = vtanh.f32 %v5843_v39  ;;  %v6900_v39 = vld [vmem:[%s17244_s3 + $0x280] sm:$0xff] }
 0x575   : > { %v5845_v55 = vpop.f32.mrf.mxu1  ;;  %7180 = vmatpush1.msra.mxu1 %v6900_v39  ;;  %v6821_v39 = vld [vmem:[%s17244_s3 + $0x8] sm:$0xff] }
 0x576   : > { %9916 = vtanh.f32 %v5845_v55  ;;  %v6833_v55 = vld [vmem:[%s17244_s3 + $0x68] sm:$0xff]  ;;  %v14717_v8 = vpop.permute.xlu0 %9538 }
 0x577   : > { %7094 = vmatprep.subr.mxu0 %v6833_v55  ;;  %v6890_v55 = vld [vmem:[%s17244_s3 + $0x230] sm:$0xff] }
 0x578   : > { %v14715_v48 = vpop.permute.xlu1 %9543 }
 0x57a   : > { %v14723_v10 = vpop.permute.xlu0 %9548 }
 0x57c   : > { %v14721_v28 = vpop.permute.xlu1 %9553 }
 0x581   : > { %v14540_v22 = vpop.eup %9914 }
 0x582   : > { %v9567_v29 = vpack.i.bf16 %v14540_v22, %v14536_v6 }
 0x583   : > { %v14544_v62 = vpop.eup %9916  ;;  %v5914_v63 = vpop.f32.mrf.mxu0 }
 0x584   : > { %9918 = vtanh.f32 %v5914_v63  ;;  %9568 = vrot.lane.b32.xlu0 %v9567_v29, %s10035_s25  ;;  %v9572_v7 = vpack.i.bf16 %v14538_v2, %v14544_v62  ;;  %v6832_v63 = vld [vmem:[%s17244_s3 + $0x60] sm:$0xff] }
 0x585   : > { %v5916_v43 = vpop.f32.mrf.mxu0  ;;  %7095 = vmatpush1.msra.mxu0 %v6832_v63  ;;  %v6889_v63 = vld [vmem:[%s17244_s3 + $0x228] sm:$0xff] }
 0x586   : > { %9920 = vtanh.f32 %v5916_v43  ;;  %9573 = vrot.lane.b32.xlu1 %v9572_v7, %s10035_s25  ;;  %v6831_v43 = vld [vmem:[%s17244_s3 + $0x58] sm:$0xff] }
 0x587   : > { %7096 = vmatprep.subr.mxu0 %v6831_v43  ;;  %v6888_v43 = vld [vmem:[%s17244_s3 + $0x220] sm:$0xff] }
 0x588   : > { %9578 = vrot.lane.b32.xlu0 %v9567_v29, %s10041_s22  ;;  %v6899_v29 = vld [vmem:[%s17244_s3 + $0x278] sm:$0xff]  ;;  %7097 = vmatpush1.msra.mxu0 %v6830_v52 }
 0x589   : > { %7181 = vmatprep.subr.mxu1 %v6899_v29  ;;  %7098 = vmatprep.subr.mxu0 %v6829_v54  ;;  %v14749_v16 = vpop.permute.xlu0 %9558  ;;  %v14751_v13 = vpop.permute.xlu1 %9563  ;;  %v6820_v29 = vld [vmem:[%s17244_s3] sm:$0xff]  ;;  %v6887_v52 = vld [vmem:[%s17244_s3 + $0x218] sm:$0xff] }
 0x58a   : > { %9583 = vrot.lane.b32.xlu1 %v9572_v7, %s10041_s22  ;;  %v6898_v7 = vld [vmem:[%s17244_s3 + $0x270] sm:$0xff]  ;;  %7099 = vmatpush1.msra.mxu0 %v6828_v35 }
 0x58b   : > { %7182 = vmatpush1.msra.mxu1 %v6898_v7  ;;  %7100 = vmatprep.subr.mxu0 %v6827_v14  ;;  %v6883_v7 = vld [vmem:[%s17244_s3 + $0x1f8] sm:$0xff]  ;;  %v6886_v35 = vld [vmem:[%s17244_s3 + $0x210] sm:$0xff] }
 0x58c   : > { %7101 = vmatpush1.msra.mxu0 %v6826_v26  ;;  %v6880_v26 = vld [vmem:[%s17244_s3 + $0x1e0] sm:$0xff] }
 0x58d   : > { %7102 = vmatprep.subr.mxu0 %v6825_v32  ;;  %v6878_v32 = vld [vmem:[%s17244_s3 + $0x1d0] sm:$0xff] }
 0x58e   : > { %7103 = vmatpush1.msra.mxu0 %v6824_v4 }
 0x58f   : > { %7104 = vmatprep.subr.mxu0 %v6823_v56  ;;  %v6877_v56 = vld [vmem:[%s17244_s3 + $0x1c8] sm:$0xff] }
 0x590   : > { %7105 = vmatpush1.msra.mxu0 %v6822_v15  ;;  %v6876_v15 = vld [vmem:[%s17244_s3 + $0x1c0] sm:$0xff] }
 0x591   : > { %v14552_v61 = vpop.eup %9918  ;;  %7106 = vmatprep.subr.mxu0 %v6821_v39 }
 0x592   : > { %7107 = vmatpush1.msra.mxu0 %v6820_v29  ;;  %v6875_v29 = vld [vmem:[%s17244_s3 + $0x1b8] sm:$0xff] }
 0x593   : > { %v14554_v31 = vpop.eup %9920  ;;  %7108 = vmatprep.subr.mxu0 %v6883_v7 }
 0x594   : > { %18496 = vst [vmem:[#allocation25_spill] sm:$0xff] %v14554_v31  ;;  %v9592_v45 = vpack.i.bf16 %v14554_v31, %v14552_v61  ;;  %v6864_v31 = vld [vmem:[%s17244_s3 + $0x160] sm:$0xff] }
 0x596   : > { %9593 = vrot.lane.b32.xlu1 %v9592_v45, %s10041_s22  ;;  %9588 = vrot.lane.b32.xlu0 %v9592_v45, %s10035_s25  ;;  %v6897_v45 = vld [vmem:[%s17244_s3 + $0x268] sm:$0xff] }
 0x597   : > { %7183 = vmatprep.subr.mxu1 %v6897_v45  ;;  %v6882_v45 = vld [vmem:[%s17244_s3 + $0x1f0] sm:$0xff] }
 0x598   : > { %7184 = vmatpush1.msra.mxu1 %v6896_v18  ;;  %7109 = vmatpush2.msra.mxu0 %v6882_v45  ;;  %v6874_v45 = vld [vmem:[%s17244_s3 + $0x1b0] sm:$0xff] }
 0x599   : > { %7185 = vmatprep.subr.mxu1 %v6895_v47  ;;  %v6881_v47 = vld [vmem:[%s17244_s3 + $0x1e8] sm:$0xff] }
 0x59a   : > { %7186 = vmatpush1.msra.mxu1 %v6894_v46  ;;  %7110 = vmatprep.subr.mxu0 %v6881_v47  ;;  %v6947_v46 = vld [vmem:[%s17244_s3 + $0x3f8] sm:$0xff]  ;;  %v6873_v47 = vld [vmem:[%s17244_s3 + $0x1a8] sm:$0xff] }
 0x59b   : > { %7187 = vmatprep.subr.mxu1 %v6893_v40  ;;  %7111 = vmatpush2.msra.mxu0 %v6880_v26  ;;  %v6872_v26 = vld [vmem:[%s17244_s3 + $0x1a0] sm:$0xff] }
 0x59c   : > { %7188 = vmatpush1.msra.mxu1 %v6892_v23  ;;  %v6946_v23 = vld [vmem:[%s17244_s3 + $0x3f0] sm:$0xff] }
 0x59d   : > { %7189 = vmatprep.subr.mxu1 %v6891_v36 }
 0x59e   : > { %7190 = vmatpush1.msra.mxu1 %v6890_v55  ;;  %v6945_v55 = vld [vmem:[%s17244_s3 + $0x3e8] sm:$0xff] }
 0x59f   : > { %7191 = vmatprep.subr.mxu1 %v6889_v63 }
 0x5a0   : > { %7192 = vmatpush1.msra.mxu1 %v6888_v43  ;;  %v6944_v43 = vld [vmem:[%s17244_s3 + $0x3e0] sm:$0xff] }
 0x5a1   : > { %7193 = vmatprep.subr.mxu1 %v6887_v52  ;;  %v6943_v52 = vld [vmem:[%s17244_s3 + $0x3d8] sm:$0xff] }
 0x5a2   : > { %7194 = vmatpush1.msra.mxu1 %v6886_v35  ;;  %v6942_v35 = vld [vmem:[%s17244_s3 + $0x3d0] sm:$0xff] }
 0x5b3   : > { %v14713_v9 = vpop.f32.mrf.mxu1 }
 0x5b5   : > { %v14719_v44 = vpop.f32.mrf.mxu1 }
 0x5c3   : > { %v6056_v51 = vpop.f32.mrf.mxu0 }
 0x5c5   : > { %v6058_v60 = vpop.f32.mrf.mxu0 }
 0x5c6   : > { %9922 = vtanh.f32 %v6058_v60  ;;  %v6879_v60 = vld [vmem:[%s17244_s3 + $0x1d8] sm:$0xff] }
 0x5c7   : > { %7112 = vmatprep.subr.mxu0 %v6879_v60 }
 0x5c8   : > { %7113 = vmatpush2.msra.mxu0 %v6878_v32 }
 0x5c9   : > { %7114 = vmatprep.subr.mxu0 %v6877_v56 }
 0x5ca   : > { %7115 = vmatpush2.msra.mxu0 %v6876_v15  ;;  %v6940_v15 = vld [vmem:[%s17244_s3 + $0x3c0] sm:$0xff] }
 0x5cb   : > { %7116 = vmatprep.subr.mxu0 %v6875_v29  ;;  %v6939_v29 = vld [vmem:[%s17244_s3 + $0x3b8] sm:$0xff] }
 0x5cc   : > { %7117 = vmatpush2.msra.mxu0 %v6874_v45  ;;  %v9510_v45 = vunpack.i.l.bf16 %v14703_v0 }
 0x5cd   : > { %7118 = vmatprep.subr.mxu0 %v6873_v47  ;;  %v9521_v47 = vunpack.i.h.bf16 %v14707_v42 }
 0x5ce   : > { %7119 = vmatpush2.msra.mxu0 %v6872_v26  ;;  %v9525_v26 = vunpack.i.l.bf16 %v14705_v53 }
 0x5d3   : > { %v14787_v14 = vpop.eup %9922 }
 0x5d4   : > { %18498 = vst [vmem:[#allocation26_spill] sm:$0xff] %v14787_v14 }
 0x5f3   : > { %v6127_v34 = vpop.f32.mrf.mxu1 }
 0x5f4   : > { %9924 = vtanh.f32 %v6127_v34  ;;  %v6884_v34 = vld [vmem:[%s17244_s3 + $0x200] sm:$0xff] }
 0x5f5   : > { %9926 = vtanh.f32 %v6056_v51  ;;  %v6129_v24 = vpop.f32.mrf.mxu1  ;;  %v6885_v51 = vld [vmem:[%s17244_s3 + $0x208] sm:$0xff] }
 0x5f6   : > { %9928 = vtanh.f32 %v6129_v24  ;;  %v14777_v18 = vpop.permute.xlu0 %9568  ;;  %7195 = vmatprep.subr.mxu1 %v6885_v51 }
 0x5f7   : > { %7196 = vmatpush1.msra.mxu1 %v6884_v34  ;;  %9930 = vtanh.f32 %v14234_v59  ;;  %v6941_v34 = vld [vmem:[%s17244_s3 + $0x3c8] sm:$0xff] }
 0x5f8   : > { %v14779_v54 = vpop.permute.xlu1 %9573  ;;  %7197 = vmatprep.subr.mxu1 %v6947_v46  ;;  %9932 = vtanh.f32 %v14245_v25 }
 0x5f9   : > { %7198 = vmatpush2.msra.mxu1 %v6946_v23 }
 0x5fa   : > { %v14832_v63 = vpop.permute.xlu0 %9578  ;;  %7199 = vmatprep.subr.mxu1 %v6945_v55  ;;  %v6870_v55 = vld [vmem:[%s17244_s3 + $0x190] sm:$0xff] }
 0x5fb   : > { %7200 = vmatpush2.msra.mxu1 %v6944_v43  ;;  %v9511_v43 = vunpack.i.h.bf16 %v14703_v0  ;;  %v6869_v0 = vld [vmem:[%s17244_s3 + $0x188] sm:$0xff] }
 0x5fc   : > { %v14834_v7 = vpop.permute.xlu1 %9583  ;;  %7201 = vmatprep.subr.mxu1 %v6943_v52  ;;  %v6938_v52 = vld [vmem:[%s17244_s3 + $0x3b0] sm:$0xff] }
 0x5fd   : > { %7202 = vmatpush2.msra.mxu1 %v6942_v35  ;;  %v9520_v35 = vunpack.i.l.bf16 %v14707_v42  ;;  %v6867_v42 = vld [vmem:[%s17244_s3 + $0x178] sm:$0xff] }
 0x5fe   : > { %7203 = vmatprep.subr.mxu1 %v6941_v34  ;;  %v6868_v34 = vld [vmem:[%s17244_s3 + $0x180] sm:$0xff] }
 0x5ff   : > { %7204 = vmatpush2.msra.mxu1 %v6940_v15  ;;  %v6496_v27 = vsel %vm6466_vm8, %v9520_v35, %v9521_v47 }
 0x600   : > { %7205 = vmatprep.subr.mxu1 %v6939_v29  ;;  %v14936_v29 = vsel %vm18503_vm10, %v9510_v45, %v9511_v43  ;;  %vm18531_vm10 = vmmov %vm18520_vm0 }
 0x601   : > { %v14801_v24 = vpop.eup %9924  ;;  %7206 = vmatpush2.msra.mxu1 %v6938_v52  ;;  %v6934_v52 = vld [vmem:[%s17244_s3 + $0x390] sm:$0xff] }
 0x602   : > { %18499 = vst [vmem:[#allocation48_spill] sm:$0xff] %v14801_v24  ;;  %v14809_v4 = vpop.eup %9926  ;;  %v9597_v40 = vpack.i.bf16 %v14801_v24, %v14787_v14  ;;  %v6931_v24 = vld [vmem:[%s17244_s3 + $0x378] sm:$0xff]  ;;  %v6500_v14 = vmax.f32 %v14936_v29, %v6496_v27  ;;  %v6861_v27 = vld [vmem:[%s17244_s3 + $0x148] sm:$0xff] }
 0x603   : > { %18500 = vst [vmem:[#allocation27_spill] sm:$0xff] %v14809_v4  ;;  %v14822_v36 = vpop.eup %9928  ;;  %v6198_v39 = vpop.f32.mrf.mxu0 }
 0x604   : > { %18501 = vst [vmem:[#allocation50_spill] sm:$0xff] %v14822_v36  ;;  %9598 = vrot.lane.b32.xlu0 %v9597_v40, %s10035_s25  ;;  %v9602_v59 = vpack.i.bf16 %v14809_v4, %v14822_v36  ;;  %9934 = vtanh.f32 %v6198_v39  ;;  %v17486_v39 = vunpack.i.l.bf16 %v14701_v19  ;;  %v14945_v15 = vpop.eup %9930  ;;  %v18507_v36 = vunpack.i.h.bf16 %v14705_v53 }
 0x605   : > { %v6200_v25 = vpop.f32.mrf.mxu0  ;;  %v14962_v30 = vpop.eup %9932 }
 0x606   : > { %9936 = vtanh.f32 %v6200_v25  ;;  %9603 = vrot.lane.b32.xlu1 %v9602_v59, %s10035_s25 }
 0x607   : > { %9938 = vtanh.f32 %v14532_v3 }
 0x608   : > { %v14858_v51 = vpop.permute.xlu0 %9588  ;;  %9608 = vrot.lane.b32.xlu0 %v9597_v40, %s10041_s22  ;;  %v14861_v60 = vpop.permute.xlu1 %9593  ;;  %v6871_v40 = vld [vmem:[%s17244_s3 + $0x198] sm:$0xff]  ;;  %9940 = vtanh.f32 %v14534_v37 }
 0x609   : > { %v17478_v32 = vunpack.i.h.bf16 %v14858_v51  ;;  %v17481_v46 = vunpack.i.l.bf16 %v14858_v51  ;;  %v17479_v56 = vunpack.i.h.bf16 %v14861_v60  ;;  %v17480_v23 = vunpack.i.l.bf16 %v14861_v60  ;;  %7120 = vmatprep.subr.mxu0 %v6871_v40  ;;  %v6927_v37 = vld [vmem:[%s17244_s3 + $0x358] sm:$0xff] }
 0x60a   : > { %9613 = vrot.lane.b32.xlu1 %v9602_v59, %s10041_s22  ;;  %7121 = vmatpush2.msra.mxu0 %v6870_v55  ;;  %v6935_v55 = vld [vmem:[%s17244_s3 + $0x398] sm:$0xff]  ;;  %v6398_v40 = vsel %vm18504_vm9, %v9511_v43, %v17486_v39  ;;  %9942 = vtanh.f32 %v14713_v9  ;;  %v6854_v9 = vld [vmem:[%s17244_s3 + $0x110] sm:$0xff]  ;;  %vm18532_vm9 = vmmov %vm18520_vm0 }
 0x60b   : > { %v14893_v59 = vsel %vm18502_vm2, %v17481_v46, %v17478_v32  ;;  %v14901_v25 = vsel %vm6466_vm8, %v17480_v23, %v17479_v56  ;;  %v6937_v56 = vld [vmem:[%s17244_s3 + $0x3a8] sm:$0xff]  ;;  %v6936_v32 = vld [vmem:[%s17244_s3 + $0x3a0] sm:$0xff]  ;;  %7122 = vmatprep.subr.mxu0 %v6869_v0  ;;  %v6866_v23 = vld [vmem:[%s17244_s3 + $0x170] sm:$0xff]  ;;  %v9535_v46 = vunpack.i.l.bf16 %v14709_v20  ;;  %9944 = vtanh.f32 %v14719_v44 }
 0x60c   : > { %7123 = vmatpush2.msra.mxu0 %v6868_v34  ;;  %7207 = vmatprep.subr.mxu1 %v6937_v56  ;;  %v6865_v0 = vld [vmem:[%s17244_s3 + $0x168] sm:$0xff]  ;;  %v6495_v56 = vsel %vm6466_vm8, %v9521_v47, %v9525_v26  ;;  %v9530_v34 = vunpack.i.l.bf16 %v14711_v58  ;;  %v6863_v43 = vld [vmem:[%s17244_s3 + $0x158] sm:$0xff]  ;;  %vm18530_vm2 = vmmov %vm18520_vm0 }
 0x60d   : > { %7124 = vmatprep.subr.mxu0 %v6867_v42  ;;  %7208 = vmatpush2.msra.mxu1 %v6936_v32  ;;  %v6932_v32 = vld [vmem:[%s17244_s3 + $0x380] sm:$0xff]  ;;  %v18505_v42 = vunpack.i.h.bf16 %v14701_v19  ;;  %v6923_v44 = vld [vmem:[%s17244_s3 + $0x338] sm:$0xff] }
 0x60e   : > { %7125 = vmatpush2.msra.mxu0 %v6866_v23  ;;  %7209 = vmatprep.subr.mxu1 %v6935_v55  ;;  %v6497_v23 = vsel %vm6466_vm8, %v18507_v36, %v9520_v35  ;;  %v6862_v55 = vld [vmem:[%s17244_s3 + $0x150] sm:$0xff]  ;;  %v6494_v36 = vsel %vm6466_vm8, %v9525_v26, %v9535_v46  ;;  %v9531_v35 = vunpack.i.h.bf16 %v14711_v58  ;;  %v15032_v26 = vmax.f32 %v14161_v50, %v6500_v14 }
 0x60f   : > { %v6400_v39 = vsel %vm18506_vm15, %v18505_v42, %v9510_v45  ;;  %7126 = vmatprep.subr.mxu0 %v6865_v0  ;;  %7210 = vmatpush2.msra.mxu1 %v6934_v52  ;;  %v6501_v45 = vmax.f32 %v6398_v40, %v6495_v56  ;;  %v17501_v42 = vunpack.i.h.bf16 %v14709_v20  ;;  %v18508_v0 = vunpack.i.l.bf16 %v14701_v19  ;;  %v6860_v56 = vld [vmem:[%s17244_s3 + $0x140] sm:$0xff]  ;;  %vm18537_vm15 = vmmov %vm18520_vm0 }
 0x610   : > { %7127 = vmatpush2.msra.mxu0 %v6864_v31  ;;  %7211 = vmatprep.subr.mxu1 %v6933_v12  ;;  %v6930_v12 = vld [vmem:[%s17244_s3 + $0x370] sm:$0xff]  ;;  %v6396_v3 = vsel %vm18510_vm3, %v9530_v34, %v9531_v35  ;;  %v18511_v50 = vunpack.i.h.bf16 %v14717_v8  ;;  %vm18541_vm3 = vmmov %vm18520_vm0 }
 0x611   : > { %v14970_v47 = vpop.eup %9934  ;;  %v6397_v52 = vsel %vm18509_vm1, %v18508_v0, %v9530_v34  ;;  %7128 = vmatprep.subr.mxu0 %v6863_v43  ;;  %7212 = vmatpush2.msra.mxu1 %v6932_v32  ;;  %v6929_v43 = vld [vmem:[%s17244_s3 + $0x368] sm:$0xff]  ;;  %v9632_v32 = vpack.i.bf16 %v14962_v30, %v14945_v15  ;;  %v6499_v0 = vmax.f32 %v6400_v39, %v6497_v23  ;;  %v18514_v39 = vunpack.i.h.bf16 %v14723_v10  ;;  %vm18538_vm1 = vmmov %vm18520_vm0 }
 0x612   : > { %7129 = vmatpush2.msra.mxu0 %v6862_v55  ;;  %7213 = vmatprep.subr.mxu1 %v6931_v24  ;;  %v6859_v55 = vld [vmem:[%s17244_s3 + $0x138] sm:$0xff]  ;;  %v6928_v24 = vld [vmem:[%s17244_s3 + $0x360] sm:$0xff]  ;;  %v6493_v29 = vsel %vm6466_vm8, %v9535_v46, %v17501_v42  ;;  %v15035_v31 = vmax.f32 %v14165_v33, %v6501_v45  ;;  %v6858_v46 = vld [vmem:[%s17244_s3 + $0x130] sm:$0xff]  ;;  %v18512_v33 = vunpack.i.l.bf16 %v14717_v8  ;;  %v18515_v34 = vunpack.i.l.bf16 %v14723_v10 }
 0x613   : > { %v14986_v4 = vpop.eup %9936  ;;  %v6269_v40 = vpop.f32.mrf.mxu1  ;;  %7130 = vmatprep.subr.mxu0 %v6861_v27  ;;  %7214 = vmatpush2.msra.mxu1 %v6930_v12  ;;  %v6857_v45 = vld [vmem:[%s17244_s3 + $0x128] sm:$0xff]  ;;  %v15074_v12 = vmax.f32 %v14144_v5, %v6499_v0  ;;  %v6855_v5 = vld [vmem:[%s17244_s3 + $0x118] sm:$0xff] }
 0x614   : > { %v9622_v53 = vpack.i.bf16 %v14986_v4, %v14970_v47  ;;  %7131 = vmatpush2.msra.mxu0 %v6860_v56  ;;  %7215 = vmatprep.subr.mxu1 %v6929_v43  ;;  %v6391_v14 = vsel %vm18513_vm12, %v18512_v33, %v18511_v50  ;;  %v6488_v23 = vsel %vm6466_vm8, %v18515_v34, %v18514_v39  ;;  %v6925_v27 = vld [vmem:[%s17244_s3 + $0x348] sm:$0xff]  ;;  %9946 = vtanh.f32 %v6269_v40  ;;  %v6852_v50 = vld [vmem:[%s17244_s3 + $0x100] sm:$0xff]  ;;  %v6919_v33 = vld [vmem:[%s17244_s3 + $0x318] sm:$0xff]  ;;  %v15129_v34 = vpop.eup %9938 }
 0x615   : > { %7132 = vmatprep.subr.mxu0 %v6859_v55  ;;  %7216 = vmatpush2.msra.mxu1 %v6928_v24  ;;  %v6503_v56 = vmax.f32 %v6396_v3, %v6493_v29  ;;  %v6271_v55 = vpop.f32.mrf.mxu1  ;;  %v9642_v24 = vpack.i.bf16 %v15035_v31, %v15032_v26  ;;  %v6853_v40 = vld [vmem:[%s17244_s3 + $0x108] sm:$0xff]  ;;  %v6922_v29 = vld [vmem:[%s17244_s3 + $0x330] sm:$0xff]  ;;  %v9555_v39 = vunpack.i.l.bf16 %v14721_v28  ;;  %vm18542_vm12 = vmmov %vm18520_vm0 }
 0x616   : > { %9623 = vrot.lane.b32.xlu1 %v9622_v53, %s10041_s22  ;;  %9618 = vrot.lane.b32.xlu0 %v9622_v53, %s10035_s25  ;;  %v6502_v53 = vmax.f32 %v6397_v52, %v6494_v36  ;;  %v6926_v36 = vld [vmem:[%s17244_s3 + $0x350] sm:$0xff]  ;;  %v6856_v52 = vld [vmem:[%s17244_s3 + $0x120] sm:$0xff]  ;;  %9948 = vtanh.f32 %v6271_v55  ;;  %v15148_v55 = vpop.eup %9940 }
 0x617   : > { %7133 = vmatpush2.msra.mxu0 %v6858_v46  ;;  %7217 = vmatprep.subr.mxu1 %v6927_v37  ;;  %v15104_v0 = vmax.f32 %v14182_v38, %v6503_v56  ;;  %v17499_v46 = vunpack.i.h.bf16 %v14715_v48  ;;  %v17497_v37 = vunpack.i.h.bf16 %v14721_v28  ;;  %v6921_v38 = vld [vmem:[%s17244_s3 + $0x328] sm:$0xff]  ;;  %v6918_v56 = vld [vmem:[%s17244_s3 + $0x310] sm:$0xff] }
 0x618   : > { %v15077_v43 = vmax.f32 %v14150_v41, %v6502_v53  ;;  %7134 = vmatprep.subr.mxu0 %v6857_v45  ;;  %7218 = vmatpush2.msra.mxu1 %v6926_v36  ;;  %v6924_v41 = vld [vmem:[%s17244_s3 + $0x340] sm:$0xff]  ;;  %v18518_v36 = vunpack.i.l.bf16 %v14723_v10 }
 0x619   : > { %7135 = vmatpush2.msra.mxu0 %v6856_v52  ;;  %7219 = vmatprep.subr.mxu1 %v6925_v27 }
 0x61a   : > { %9633 = vrot.lane.b32.xlu1 %v9632_v32, %s10041_s22  ;;  %9628 = vrot.lane.b32.xlu0 %v9632_v32, %s10035_s25  ;;  %v6508_v32 = vmax.f32 %v6391_v14, %v6488_v23  ;;  %v9652_v53 = vpack.i.bf16 %v15077_v43, %v15074_v12  ;;  %v9545_v14 = vunpack.i.l.bf16 %v14715_v48  ;;  %v18516_v23 = vunpack.i.l.bf16 %v14717_v8 }
 0x61b   : > { %7136 = vmatprep.subr.mxu0 %v6855_v5  ;;  %7220 = vmatpush2.msra.mxu1 %v6924_v41  ;;  %v6489_v52 = vsel %vm6466_vm8, %v17497_v37, %v18518_v36  ;;  %v18519_v5 = vunpack.i.h.bf16 %v14717_v8 }
 0x61c   : > { %v15109_v3 = vmax.f32 %v14290_v57, %v6508_v32  ;;  %7137 = vmatpush2.msra.mxu0 %v6854_v9  ;;  %7221 = vmatprep.subr.mxu1 %v6923_v44  ;;  %v6920_v57 = vld [vmem:[%s17244_s3 + $0x320] sm:$0xff]  ;;  %v6392_v45 = vsel %vm18517_vm11, %v17499_v46, %v18516_v23  ;;  %v6917_v32 = vld [vmem:[%s17244_s3 + $0x308] sm:$0xff]  ;;  %v18521_v9 = vunpack.i.h.bf16 %v14723_v10  ;;  %v9565_v10 = vunpack.i.l.bf16 %v14751_v13 }
 0x61d   : > { %7138 = vmatprep.subr.mxu0 %v6853_v40  ;;  %7222 = vmatpush2.msra.mxu1 %v6922_v29  ;;  %v6390_v41 = vsel %vm18520_vm0, %v18519_v5, %v9545_v14  ;;  %v6507_v40 = vmax.f32 %v6392_v45, %v6489_v52  ;;  %v15166_v29 = vpop.eup %9942  ;;  %v9585_v5 = vunpack.i.l.bf16 %v14834_v7  ;;  %vm6723_vm11 = vcmp.lt.s32.totalorder %v10260_v11, 64 }
 0x61e   : > { %9643 = vrot.lane.b32.xlu1 %v9642_v24, %s10042_s20  ;;  %9638 = vrot.lane.b32.xlu0 %v9642_v24, %s10033_s23  ;;  %v9662_v27 = vpack.i.bf16 %v15109_v3, %v15104_v0  ;;  %v6916_v24 = vld [vmem:[%s17244_s3 + $0x300] sm:$0xff]  ;;  %v6487_v44 = vsel %vm6466_vm8, %v18521_v9, %v9555_v39  ;;  %v15172_v8 = vpop.eup %9944  ;;  %v9571_v9 = vunpack.i.h.bf16 %v14777_v18  ;;  %vm18545_vm0 = vcmp.lt.s32.totalorder %v10260_v11, 96  ;;  %v7682_v11 = vld [vmem:[%s17245_s4 + $0xf8] sm:$0xff] }
 0x61f   : > { %7139 = vmatpush2.msra.mxu0 %v6852_v50  ;;  %7223 = vmatprep.subr.mxu1 %v6921_v38  ;;  %v9560_v50 = vunpack.i.l.bf16 %v14749_v16  ;;  %v9672_v38 = vpack.i.bf16 %v15148_v55, %v15129_v34  ;;  %v6509_v23 = vmax.f32 %v6390_v41, %v6487_v44  ;;  %v15183_v36 = vmax.f32 %v14292_v49, %v6507_v40 }
 0x620   : > { %7224 = vmatpush2.msra.mxu1 %v6920_v57  ;;  %v17493_v57 = vunpack.i.h.bf16 %v14751_v13  ;;  %v6486_v49 = vsel %vm6466_vm8, %v9555_v39, %v9565_v10  ;;  %v9570_v44 = vunpack.i.l.bf16 %v14777_v18  ;;  %v9581_v39 = vunpack.i.h.bf16 %v14832_v63 }
 0x621   : > { %7225 = vmatprep.subr.mxu1 %v6919_v33  ;;  %v15176_v33 = vpop.eup %9946  ;;  %v15202_v41 = vmax.f32 %v14299_v21, %v6509_v23  ;;  %v9580_v40 = vunpack.i.l.bf16 %v14832_v63  ;;  %v17495_v63 = vunpack.i.h.bf16 %v14779_v54 }
 0x622   : > { %9653 = vrot.lane.b32.xlu1 %v9652_v53, %s10042_s20  ;;  %9648 = vrot.lane.b32.xlu0 %v9652_v53, %s10033_s23  ;;  %v17492_v53 = vunpack.i.h.bf16 %v14749_v16  ;;  %v6383_v18 = vsel %vm18525_vm4, %v9570_v44, %v9571_v9  ;;  %vm18552_vm4 = vmmov %vm18545_vm0 }
 0x623   : > { %7226 = vmatpush2.msra.mxu1 %v6918_v56  ;;  %v15180_v45 = vpop.eup %9948  ;;  %v9682_v56 = vpack.i.bf16 %v15172_v8, %v15166_v29  ;;  %v9702_v23 = vpack.i.bf16 %v15183_v36, %v15202_v41 }
 0x624   : > { %7227 = vmatprep.subr.mxu1 %v6917_v32  ;;  %v6388_v52 = vsel %vm18522_vm6, %v9560_v50, %v17492_v53  ;;  %v6485_v32 = vsel %vm6466_vm8, %v9565_v10, %v17493_v57  ;;  %v6479_v10 = vsel %vm6466_vm8, %v9581_v39, %v9585_v5  ;;  %vm18547_vm6 = vmmov %vm18538_vm1 }
 0x625   : > { %7228 = vmatpush2.msra.mxu1 %v6916_v24  ;;  %v9575_v24 = vunpack.i.l.bf16 %v14779_v54 }
 0x626   : > { %9663 = vrot.lane.b32.xlu1 %v9662_v27, %s10042_s20  ;;  %9658 = vrot.lane.b32.xlu0 %v9662_v27, %s10033_s23  ;;  %v6389_v27 = vsel %vm18523_vm14, %v9545_v14, %v9560_v50  ;;  %v9692_v14 = vpack.i.bf16 %v15180_v45, %v15176_v33  ;;  %vm18550_vm14 = vmmov %vm18545_vm0 }
 0x627   : > { %v6510_v50 = vmax.f32 %v6389_v27, %v6486_v49  ;;  %v6382_v21 = vsel %vm18524_vm13, %v9571_v9, %v9575_v24  ;;  %v17496_v27 = vunpack.i.h.bf16 %v14834_v7  ;;  %v18528_v9 = vunpack.i.l.bf16 %v14861_v60  ;;  %vm18551_vm13 = vmmov %vm18545_vm0 }
 0x628   : > { %v6517_v49 = vmax.f32 %v6382_v21, %v6479_v10 }
 0x629   : > { %v6478_v57 = vsel %vm6466_vm8, %v9585_v5, %v18528_v9 }
 0x62a   : > { %9673 = vrot.lane.b32.xlu1 %v9672_v38, %s10041_s22  ;;  %9668 = vrot.lane.b32.xlu0 %v9672_v38, %s10035_s25  ;;  %v6511_v38 = vmax.f32 %v6388_v52, %v6485_v32  ;;  %v6480_v52 = vsel %vm6466_vm8, %v9580_v40, %v9581_v39 }
 0x62b   : > { %v6516_v39 = vmax.f32 %v6383_v18, %v6480_v52 }
 0x62c   : > { %v15230_v32 = vmax.f32 %v14350_v1, %v6511_v38  ;;  %v6481_v1 = vsel %vm6466_vm8, %v17496_v27, %v9580_v40  ;;  %v18536_v27 = vld [vmem:[#allocation48_spill] sm:$0xff] }
 0x62d   : > { %v15256_v38 = vmax.f32 %v14536_v6, %v6516_v39  ;;  %v6979_v6 = vld [vmem:[%s17244_s3 + $0x4f8] sm:$0xff] }
 0x62e   : > { %9683 = vrot.lane.b32.xlu1 %v9682_v56, %s10041_s22  ;;  %9678 = vrot.lane.b32.xlu0 %v9682_v56, %s10035_s25  ;;  %v15227_v56 = vmax.f32 %v14307_v17, %v6510_v50  ;;  %v6384_v17 = vsel %vm18529_vm7, %v17495_v63, %v9570_v44  ;;  %vm18557_vm7 = vmmov %vm18538_vm1 }
 0x62f   : > { %v6515_v21 = vmax.f32 %v6384_v17, %v6481_v1  ;;  %7254 = vmatprep.subr.mxu0 %v6979_v6 }
 0x630   : > { %v9712_v5 = vpack.i.bf16 %v15230_v32, %v15227_v56 }
 0x632   : > { %9693 = vrot.lane.b32.xlu1 %v9692_v14, %s10041_s22  ;;  %9688 = vrot.lane.b32.xlu0 %v9692_v14, %s10035_s25  ;;  %v18526_v14 = vunpack.i.l.bf16 %v14858_v51 }
 0x634   : > { %v6381_v53 = vsel %vm18527_vm5, %v9575_v24, %v18526_v14  ;;  %v15251_v24 = vmax.f32 %v14540_v22, %v6517_v49  ;;  %v15266_v22 = vmax.f32 %v14538_v2, %v6515_v21  ;;  %v7043_v2 = vld [vmem:[%s17244_s3 + $0x6f8] sm:$0xff]  ;;  %vm18556_vm5 = vmmov %vm18538_vm1 }
 0x635   : > { %v6518_v50 = vmax.f32 %v6381_v53, %v6478_v57  ;;  %7343 = vmatprep.subr.mxu1 %v7043_v2 }
 0x636   : > { %9703 = vrot.lane.b32.xlu1 %v9702_v23, %s10042_s20  ;;  %9698 = vrot.lane.b32.xlu0 %v9702_v23, %s10033_s23  ;;  %v9722_v40 = vpack.i.bf16 %v15251_v24, %v15256_v38 }
 0x637   : > { %v15261_v44 = vmax.f32 %v14544_v62, %v6518_v50 }
 0x639   : > { %v9732_v53 = vpack.i.bf16 %v15261_v44, %v15266_v22 }
 0x63a   : > { %9713 = vrot.lane.b32.xlu1 %v9712_v5, %s10042_s20  ;;  %9708 = vrot.lane.b32.xlu0 %v9712_v5, %s10033_s23 }
 0x63e   : > { %9723 = vrot.lane.b32.xlu1 %v9722_v40, %s10042_s20  ;;  %9718 = vrot.lane.b32.xlu0 %v9722_v40, %s10033_s23 }
 0x642   : > { %9733 = vrot.lane.b32.xlu1 %v9732_v53, %s10042_s20  ;;  %9728 = vrot.lane.b32.xlu0 %v9732_v53, %s10033_s23 }
 0x676   : > { %v9599_v62 = vpop.permute.xlu0 %9598 }
 0x677   : > { %v9601_v10 = vunpack.i.h.bf16 %v9599_v62  ;;  %v9600_v23 = vunpack.i.l.bf16 %v9599_v62  ;;  %v18533_v62 = vmax.f32 %v14893_v59, %v14901_v25 }
 0x678   : > { %v15280_v57 = vpop.permute.xlu1 %9603 }
 0x679   : > { %v17494_v52 = vunpack.i.h.bf16 %v15280_v57  ;;  %v9605_v49 = vunpack.i.l.bf16 %v15280_v57  ;;  %v6375_v17 = vsel %vm18530_vm2, %v9600_v23, %v9601_v10  ;;  %vm18559_vm2 = vmmov %vm18538_vm1 }
 0x67a   : > { %v9609_v18 = vpop.permute.xlu0 %9608 }
 0x67b   : > { %v9611_v14 = vunpack.i.h.bf16 %v9609_v18  ;;  %v9610_v9 = vunpack.i.l.bf16 %v9609_v18  ;;  %v6376_v40 = vsel %vm18531_vm10, %v17494_v52, %v9600_v23  ;;  %v6374_v6 = vsel %vm18532_vm9, %v9601_v10, %v9605_v49  ;;  %v18535_v10 = vld [vmem:[#allocation27_spill] sm:$0xff]  ;;  %vm18564_vm10 = vmmov %vm18538_vm1 }
 0x67c   : > { %v15284_v39 = vpop.permute.xlu1 %9613  ;;  %v15308_v18 = vmax.f32 %v14552_v61, %v18533_v62  ;;  %vm18565_vm9 = vmmov %vm18538_vm1 }
 0x67d   : > { %v6472_v1 = vsel %vm6466_vm8, %v9610_v9, %v9611_v14  ;;  %v17498_v50 = vunpack.i.h.bf16 %v15284_v39  ;;  %v9615_v5 = vunpack.i.l.bf16 %v15284_v39 }
 0x67e   : > { %v6524_v21 = vmax.f32 %v6375_v17, %v6472_v1  ;;  %v18534_v17 = vld [vmem:[#allocation26_spill] sm:$0xff] }
 0x67f   : > { %v6473_v53 = vsel %vm6466_vm8, %v17498_v50, %v9610_v9  ;;  %v6471_v2 = vsel %vm6466_vm8, %v9611_v14, %v9615_v5 }
 0x680   : > { %v15311_v1 = vmax.f32 %v18534_v17, %v6524_v21  ;;  %v6523_v23 = vmax.f32 %v6376_v40, %v6473_v53  ;;  %v6525_v52 = vmax.f32 %v6374_v6, %v6471_v2 }
 0x682   : > { %v15314_v63 = vmax.f32 %v18535_v10, %v6523_v23  ;;  %v15317_v37 = vmax.f32 %v18536_v27, %v6525_v52  ;;  %v9742_v14 = vpack.i.bf16 %v15311_v1, %v15308_v18 }
 0x684   : > { %9743 = vrot.lane.b32.xlu1 %v9742_v14, %s10042_s20  ;;  %9738 = vrot.lane.b32.xlu0 %v9742_v14, %s10033_s23  ;;  %v9752_v61 = vpack.i.bf16 %v15314_v63, %v15317_v37 }
 0x688   : > { %v15325_v59 = vpop.permute.xlu0 %9618  ;;  %v15327_v25 = vpop.permute.xlu1 %9623  ;;  %9753 = vrot.lane.b32.xlu1 %v9752_v61, %s10042_s20  ;;  %9748 = vrot.lane.b32.xlu0 %v9752_v61, %s10033_s23 }
 0x689   : > { %v17500_v27 = vunpack.i.h.bf16 %v15325_v59  ;;  %v9620_v52 = vunpack.i.l.bf16 %v15325_v59  ;;  %v17502_v9 = vunpack.i.h.bf16 %v15327_v25  ;;  %v9625_v21 = vunpack.i.l.bf16 %v15327_v25 }
 0x68b   : > { %v6372_v40 = vsel %vm18537_vm15, %v9620_v52, %v17500_v27  ;;  %v6373_v6 = vsel %vm18538_vm1, %v9605_v49, %v9620_v52  ;;  %v6469_v53 = vsel %vm6466_vm8, %v9625_v21, %v17502_v9  ;;  %v6470_v2 = vsel %vm6466_vm8, %v9615_v5, %v9625_v21  ;;  %v18539_v27 = vld [vmem:[#allocation50_spill] sm:$0xff]  ;;  %vm18567_vm15 = vmmov %vm18538_vm1 }
 0x68c   : > { %v6526_v62 = vmax.f32 %v6373_v6, %v6470_v2  ;;  %v6527_v17 = vmax.f32 %v6372_v40, %v6469_v53  ;;  %v9629_v23 = vpop.permute.xlu0 %9628  ;;  %v9634_v10 = vpop.permute.xlu1 %9633  ;;  %v18543_v40 = vunpack.i.h.bf16 %v14709_v20 }
 0x68d   : > { %v9631_v14 = vunpack.i.h.bf16 %v9629_v23  ;;  %v9630_v61 = vunpack.i.l.bf16 %v9629_v23  ;;  %v9636_v50 = vunpack.i.h.bf16 %v9634_v10  ;;  %v9635_v46 = vunpack.i.l.bf16 %v9634_v10  ;;  %v18544_v10 = vld [vmem:[#allocation24_spill] sm:$0xff] }
 0x68e   : > { %v15348_v42 = vmax.f32 %v18539_v27, %v6526_v62  ;;  %v15351_v49 = vmax.f32 %v14970_v47, %v6527_v17 }
 0x68f   : > { %v6394_v52 = vsel %vm18541_vm3, %v9630_v61, %v9631_v14  ;;  %v6395_v5 = vsel %vm18542_vm12, %v9531_v35, %v9630_v61  ;;  %v6491_v21 = vsel %vm6466_vm8, %v9635_v46, %v9636_v50  ;;  %v6492_v27 = vsel %vm6466_vm8, %v18543_v40, %v9635_v46  ;;  %vm18572_vm3 = vmmov %vm18538_vm1 }
 0x690   : > { %18540 = vst [vmem:[#allocation28_spill] sm:$0xff] %v15351_v49  ;;  %v9644_v47 = vpop.permute.xlu1 %9643  ;;  %v9639_v6 = vpop.permute.xlu0 %9638  ;;  %v9762_v53 = vpack.i.bf16 %v15351_v49, %v15348_v42  ;;  %v6504_v2 = vmax.f32 %v6395_v5, %v6492_v27  ;;  %v6505_v58 = vmax.f32 %v6394_v52, %v6491_v21  ;;  %vm18576_vm12 = vmmov %vm18545_vm0 }
 0x691   : > { %v9646_v62 = vunpack.i.h.bf16 %v9644_v47  ;;  %v9645_v17 = vunpack.i.l.bf16 %v9644_v47  ;;  %v9641_v35 = vunpack.i.h.bf16 %v9639_v6  ;;  %v9640_v23 = vunpack.i.l.bf16 %v9639_v6 }
 0x692   : > { %9763 = vrot.lane.b32.xlu1 %v9762_v53, %s10042_s20  ;;  %v15370_v20 = vmax.f32 %v18544_v10, %v6504_v2  ;;  %v15373_v46 = vmax.f32 %v14945_v15, %v6505_v58  ;;  %9758 = vrot.lane.b32.xlu0 %v9762_v53, %s10033_s23  ;;  %v18546_v6 = vunpack.i.h.bf16 %v14715_v48  ;;  %v18548_v10 = vunpack.i.h.bf16 %v14721_v28 }
 0x693   : > { %v6753_v61 = vsel %vm6723_vm11, %v9645_v17, %v9646_v62  ;;  %v6656_v40 = vsel %vm18545_vm0, %v9640_v23, %v9641_v35 }
 0x694   : > { %v15380_v52 = vpop.permute.xlu1 %9653  ;;  %v15382_v5 = vpop.permute.xlu0 %9648  ;;  %v6393_v2 = vsel %vm18547_vm6, %v9631_v14, %v18546_v6  ;;  %v9772_v53 = vpack.i.bf16 %v15373_v46, %v15370_v20  ;;  %v6757_v58 = vmax.f32 %v6656_v40, %v6753_v61  ;;  %v6490_v9 = vsel %vm6466_vm8, %v9636_v50, %v18548_v10  ;;  %vm18577_vm6 = vmmov %vm18545_vm0 }
 0x695   : > { %v9656_v21 = vunpack.i.h.bf16 %v15380_v52  ;;  %v9651_v47 = vunpack.i.h.bf16 %v15382_v5  ;;  %v17504_v15 = vunpack.i.l.bf16 %v15382_v5  ;;  %v18549_v49 = vunpack.i.l.bf16 %v15380_v52 }
 0x696   : > { %9773 = vrot.lane.b32.xlu1 %v9772_v53, %s10042_s20  ;;  %9768 = vrot.lane.b32.xlu0 %v9772_v53, %s10033_s23  ;;  %v6789_v50 = vmax.f32 %v15032_v26, %v6757_v58  ;;  %v6506_v6 = vmax.f32 %v6393_v2, %v6490_v9  ;;  %v6977_v9 = vld [vmem:[%s17244_s3 + $0x4e8] sm:$0xff] }
 0x697   : > { %v6752_v27 = vsel %vm6723_vm11, %v9646_v62, %v9656_v21  ;;  %v6754_v48 = vsel %vm6723_vm11, %v18549_v49, %v9645_v17  ;;  %v6657_v14 = vsel %vm18550_vm14, %v17504_v15, %v9640_v23  ;;  %v6655_v61 = vsel %vm18551_vm13, %v9641_v35, %v9651_v47  ;;  %v6978_v35 = vld [vmem:[%s17244_s3 + $0x4f0] sm:$0xff]  ;;  %vm18578_vm14 = vmmov %vm18545_vm0 }
 0x698   : > { %v6756_v28 = vmax.f32 %v6657_v14, %v6754_v48  ;;  %v15413_v62 = vpop.permute.xlu1 %9663  ;;  %v15415_v40 = vpop.permute.xlu0 %9658  ;;  %7140 = vmatprep.mubr.f32.mxu0 %v6789_v50  ;;  %v6758_v10 = vmax.f32 %v6655_v61, %v6752_v27  ;;  %v6976_v27 = vld [vmem:[%s17244_s3 + $0x4e0] sm:$0xff]  ;;  %vm18579_vm13 = vmmov %vm18545_vm0 }
 0x699   : > { %v9665_v49 = vunpack.i.l.bf16 %v15413_v62  ;;  %v9660_v17 = vunpack.i.l.bf16 %v15415_v40 }
 0x69a   : > { %v6788_v23 = vmax.f32 %v15074_v12, %v6756_v28  ;;  %v15441_v28 = vmax.f32 %v14962_v30, %v6506_v6  ;;  %v18555_v30 = vunpack.i.h.bf16 %v14779_v54  ;;  %v6790_v6 = vmax.f32 %v15035_v31, %v6758_v10 }
 0x69b   : > { %v6751_v26 = vsel %vm6723_vm11, %v9656_v21, %v9665_v49  ;;  %v6654_v53 = vsel %vm18552_vm4, %v9651_v47, %v9660_v17  ;;  %v6975_v47 = vld [vmem:[%s17244_s3 + $0x4d8] sm:$0xff]  ;;  %vm18580_vm4 = vmmov %vm18545_vm0 }
 0x69c   : > { %v9674_v12 = vpop.permute.xlu1 %9673  ;;  %v9669_v2 = vpop.permute.xlu0 %9668  ;;  %7141 = vmatmul.mubr.f32.vlgmr.msra.gmra.mxu0 %v6788_v23  ;;  %v6759_v58 = vmax.f32 %v6654_v53, %v6751_v26  ;;  %v6974_v23 = vld [vmem:[%s17244_s3 + $0x4d0] sm:$0xff]  ;;  %v18553_v26 = vunpack.i.h.bf16 %v14834_v7  ;;  %v6973_v7 = vld [vmem:[%s17244_s3 + $0x4c8] sm:$0xff] }
 0x69d   : > { %v9676_v48 = vunpack.i.h.bf16 %v9674_v12  ;;  %v9675_v14 = vunpack.i.l.bf16 %v9674_v12  ;;  %v9671_v21 = vunpack.i.h.bf16 %v9669_v2  ;;  %v9670_v61 = vunpack.i.l.bf16 %v9669_v2  ;;  %7255 = vmatpush1.msra.mxu0 %v6978_v35 }
 0x69e   : > { %v6791_v50 = vmax.f32 %v15077_v43, %v6759_v58  ;;  %7256 = vmatprep.subr.mxu0 %v6977_v9  ;;  %v18554_v35 = vunpack.i.h.bf16 %v14751_v13  ;;  %v7042_v9 = vld [vmem:[%s17244_s3 + $0x6f0] sm:$0xff]  ;;  %v18558_v2 = vunpack.i.h.bf16 %v14749_v16  ;;  %v6971_v16 = vld [vmem:[%s17244_s3 + $0x4b8] sm:$0xff] }
 0x69f   : > { %v6482_v53 = vsel %vm6466_vm8, %v9676_v48, %v18553_v26  ;;  %v6385_v43 = vsel %vm18556_vm5, %v9671_v21, %v18555_v30  ;;  %7257 = vmatpush1.msra.mxu0 %v6976_v27  ;;  %v6483_v13 = vsel %vm6466_vm8, %v9675_v14, %v9676_v48  ;;  %v6386_v54 = vsel %vm18557_vm7, %v9670_v61, %v9671_v21  ;;  %v6972_v27 = vld [vmem:[%s17244_s3 + $0x4c0] sm:$0xff]  ;;  %vm18581_vm5 = vmmov %vm18545_vm0 }
 0x6a0   : > { %v6484_v12 = vsel %vm6466_vm8, %v18554_v35, %v9675_v14  ;;  %v6387_v31 = vsel %vm18559_vm2, %v18558_v2, %v9670_v61  ;;  %v9684_v10 = vpop.permute.xlu1 %9683  ;;  %v9679_v58 = vpop.permute.xlu0 %9678  ;;  %7229 = vmatprep.mubr.f32.mxu1 %v6791_v50  ;;  %7258 = vmatprep.subr.mxu0 %v6975_v47  ;;  %v6514_v26 = vmax.f32 %v6385_v43, %v6482_v53  ;;  %v9666_v14 = vunpack.i.h.bf16 %v15413_v62  ;;  %v6970_v50 = vld [vmem:[%s17244_s3 + $0x4b0] sm:$0xff]  ;;  %vm18582_vm7 = vmmov %vm18545_vm0 }
 0x6a1   : > { %v6512_v35 = vmax.f32 %v6387_v31, %v6484_v12  ;;  %v9686_v30 = vunpack.i.h.bf16 %v9684_v10  ;;  %v9685_v48 = vunpack.i.l.bf16 %v9684_v10  ;;  %7230 = vmatmul.mubr.f32.vlgmr.msra.gmra.mxu1 %v6790_v6  ;;  %7259 = vmatpush1.msra.mxu0 %v6974_v23  ;;  %v9661_v21 = vunpack.i.h.bf16 %v15415_v40  ;;  %v7041_v23 = vld [vmem:[%s17244_s3 + $0x6e8] sm:$0xff]  ;;  %v18560_v12 = vld [vmem:[#allocation44_spill] sm:$0xff]  ;;  %vm18583_vm2 = vmmov %vm18545_vm0 }
 0x6a2   : > { %v9681_v61 = vunpack.i.h.bf16 %v9679_v58  ;;  %v9680_v47 = vunpack.i.l.bf16 %v9679_v58  ;;  %7260 = vmatprep.subr.mxu0 %v6973_v7  ;;  %7344 = vmatpush1.msra.mxu1 %v7042_v9  ;;  %v6513_v53 = vmax.f32 %v6386_v54, %v6483_v13  ;;  %v18561_v6 = vunpack.i.h.bf16 %v15284_v39  ;;  %v6969_v9 = vld [vmem:[%s17244_s3 + $0x4a8] sm:$0xff]  ;;  %v7040_v13 = vld [vmem:[%s17244_s3 + $0x6e0] sm:$0xff] }
 0x6a3   : > { %v15489_v43 = vmax.f32 %v18560_v12, %v6512_v35  ;;  %v6475_v7 = vsel %vm6466_vm8, %v9685_v48, %v9686_v30  ;;  %7261 = vmatpush1.msra.mxu0 %v6972_v27  ;;  %v18562_v54 = vunpack.i.h.bf16 %v14861_v60  ;;  %v18563_v31 = vunpack.i.h.bf16 %v15280_v57  ;;  %v6968_v60 = vld [vmem:[%s17244_s3 + $0x4a0] sm:$0xff]  ;;  %7345 = vmatprep.subr.mxu1 %v7041_v23  ;;  %v18568_v23 = vld [vmem:[#allocation46_spill] sm:$0xff] }
 0x6a4   : > { %v6474_v2 = vsel %vm6466_vm8, %v9686_v30, %v18561_v6  ;;  %v6378_v58 = vsel %vm18565_vm9, %v9680_v47, %v9681_v61  ;;  %v18566_v27 = vunpack.i.h.bf16 %v14858_v51  ;;  %v9694_v30 = vpop.permute.xlu1 %9693  ;;  %v9689_v12 = vpop.permute.xlu0 %9688  ;;  %7262 = vmatprep.subr.mxu0 %v6971_v16  ;;  %v15521_v57 = vmax.f32 %v15148_v55, %v6514_v26  ;;  %v6967_v16 = vld [vmem:[%s17244_s3 + $0x498] sm:$0xff]  ;;  %7346 = vmatpush1.msra.mxu1 %v7040_v13  ;;  %vm18585_vm9 = vmmov %vm18545_vm0 }
 0x6a5   : > { %v6476_v39 = vsel %vm6466_vm8, %v18562_v54, %v9685_v48  ;;  %v6377_v10 = vsel %vm18564_vm10, %v9681_v61, %v18563_v31  ;;  %v9696_v54 = vunpack.i.h.bf16 %v9694_v30  ;;  %7263 = vmatpush1.msra.mxu0 %v6970_v50  ;;  %v9695_v61 = vunpack.i.l.bf16 %v9694_v30  ;;  %v7039_v13 = vld [vmem:[%s17244_s3 + $0x6d8] sm:$0xff]  ;;  %v18573_v30 = vld [vmem:[#allocation25_spill] sm:$0xff]  ;;  %vm18584_vm10 = vmmov %vm18545_vm0 }
 0x6a6   : > { %v6379_v35 = vsel %vm18567_vm15, %v18566_v27, %v9680_v47  ;;  %v6522_v48 = vmax.f32 %v6377_v10, %v6474_v2  ;;  %v9691_v51 = vunpack.i.h.bf16 %v9689_v12  ;;  %v9690_v31 = vunpack.i.l.bf16 %v9689_v12  ;;  %7264 = vmatprep.subr.mxu0 %v6969_v9  ;;  %v6966_v9 = vld [vmem:[%s17244_s3 + $0x490] sm:$0xff]  ;;  %7347 = vmatprep.subr.mxu1 %v7039_v13  ;;  %vm18586_vm15 = vmmov %vm18545_vm0 }
 0x6a7   : > { %v6520_v6 = vmax.f32 %v6379_v35, %v6476_v39  ;;  %v9782_v47 = vpack.i.bf16 %v15489_v43, %v15441_v28  ;;  %v15529_v55 = vmax.f32 %v15129_v34, %v6513_v53  ;;  %v6521_v50 = vmax.f32 %v6378_v58, %v6475_v7  ;;  %7265 = vmatpush1.msra.mxu0 %v6968_v60 }
 0x6a8   : > { %v15532_v26 = vmax.f32 %v15172_v8, %v6522_v48  ;;  %v18569_v2 = vunpack.i.h.bf16 %v18568_v23  ;;  %v15546_v34 = vsel %vm6466_vm8, %v9695_v61, %v9696_v54  ;;  %v18570_v8 = vunpack.i.h.bf16 %v15327_v25  ;;  %v15561_v27 = vpop.permute.xlu1 %9703  ;;  %v15563_v35 = vpop.permute.xlu0 %9698  ;;  %v6965_v25 = vld [vmem:[%s17244_s3 + $0x488] sm:$0xff]  ;;  %7266 = vmatprep.subr.mxu0 %v6967_v16 }
 0x6a9   : > { %v18571_v7 = vunpack.i.h.bf16 %v14701_v19  ;;  %v15558_v58 = vsel %vm18572_vm3, %v9690_v31, %v9691_v51  ;;  %9783 = vrot.lane.b32.xlu1 %v9782_v47, %s10042_s20  ;;  %v15569_v12 = vmax.f32 %v18573_v30, %v6520_v6  ;;  %v18574_v60 = vunpack.i.h.bf16 %v15325_v59  ;;  %7267 = vmatpush1.msra.mxu0 %v6966_v9  ;;  %v6963_v59 = vld [vmem:[%s17244_s3 + $0x478] sm:$0xff]  ;;  %v6962_v9 = vld [vmem:[%s17244_s3 + $0x470] sm:$0xff]  ;;  %vm18588_vm3 = vmmov %vm18545_vm0 }
 0x6aa   : > { %v6498_v39 = vsel %vm6466_vm8, %v9696_v54, %v18569_v2  ;;  %v6468_v53 = vsel %vm6466_vm8, %v18570_v8, %v9695_v61  ;;  %vm18575_vm8 = vmmov %vm18538_vm1  ;;  %v6964_v54 = vld [vmem:[%s17244_s3 + $0x480] sm:$0xff]  ;;  %v9705_v23 = vunpack.i.l.bf16 %v15561_v27  ;;  %v9701_v2 = vunpack.i.h.bf16 %v15563_v35  ;;  %9778 = vrot.lane.b32.xlu0 %v9782_v47, %s10033_s23  ;;  %7268 = vmatprep.subr.mxu0 %v6965_v25 }
 0x6ab   : > { %v6401_v10 = vsel %vm18538_vm1, %v9691_v51, %v18571_v7  ;;  %v6371_v48 = vsel %vm18575_vm8, %v18574_v60, %v9690_v31  ;;  %v9706_v51 = vunpack.i.h.bf16 %v15561_v27  ;;  %v15585_v6 = vmax.f32 %v15166_v29, %v6521_v50  ;;  %v7038_v29 = vld [vmem:[%s17244_s3 + $0x6d0] sm:$0xff]  ;;  %7269 = vmatpush1.msra.mxu0 %v6964_v54  ;;  %vm18587_vm1 = vmmov %vm18545_vm0 }
 0x6ac   : > { %v6530_v19 = vmax.f32 %v6401_v10, %v6498_v39  ;;  %v6528_v61 = vmax.f32 %v6371_v48, %v6468_v53  ;;  %v6529_v31 = vmax.f32 %v15558_v58, %v15546_v34  ;;  %v9700_v16 = vunpack.i.l.bf16 %v15563_v35  ;;  %v15615_v34 = vpop.permute.xlu1 %9713  ;;  %v15617_v8 = vpop.permute.xlu0 %9708  ;;  %7270 = vmatprep.subr.mxu0 %v6963_v59  ;;  %v6961_v58 = vld [vmem:[%s17244_s3 + $0x468] sm:$0xff]  ;;  %v6960_v48 = vld [vmem:[%s17244_s3 + $0x460] sm:$0xff]  ;;  %7348 = vmatpush1.msra.mxu1 %v7038_v29  ;;  %vm18589_vm8 = vmmov %vm18545_vm0 }
 0x6ad   : > { %v9792_v39 = vpack.i.bf16 %v15521_v57, %v15529_v55  ;;  %v6745_v50 = vsel %vm6723_vm11, %v9666_v14, %v9705_v23  ;;  %v6746_v47 = vsel %vm6723_vm11, %v9706_v51, %v9666_v14  ;;  %v6649_v13 = vsel %vm18576_vm12, %v9701_v2, %v9661_v21  ;;  %7271 = vmatpush1.msra.mxu0 %v6962_v9  ;;  %vm18590_vm12 = vmmov %vm18545_vm0 }
 0x6ae   : > { %v6648_v53 = vsel %vm18545_vm0, %v9661_v21, %v9700_v16  ;;  %v9716_v14 = vunpack.i.h.bf16 %v15615_v34  ;;  %v9715_v7 = vunpack.i.l.bf16 %v15615_v34  ;;  %v9711_v10 = vunpack.i.h.bf16 %v15617_v8  ;;  %7272 = vmatprep.subr.mxu0 %v6961_v58  ;;  %v6958_v58 = vld [vmem:[%s17244_s3 + $0x450] sm:$0xff] }
 0x6af   : > { %9793 = vrot.lane.b32.xlu1 %v9792_v39, %s10042_s20  ;;  %v15631_v25 = vmax.f32 %v15180_v45, %v6530_v19  ;;  %v15634_v30 = vmax.f32 %v14986_v4, %v6528_v61  ;;  %v9710_v21 = vunpack.i.l.bf16 %v15617_v8  ;;  %v6765_v60 = vmax.f32 %v6648_v53, %v6745_v50  ;;  %9788 = vrot.lane.b32.xlu0 %v9792_v39, %s10033_s23 }
 0x6b0   : > { %v6743_v45 = vsel %vm6723_vm11, %v9715_v7, %v9716_v14  ;;  %v6744_v4 = vsel %vm6723_vm11, %v9705_v23, %v9715_v7  ;;  %v9802_v19 = vpack.i.bf16 %v15585_v6, %v15569_v12  ;;  %v6764_v54 = vmax.f32 %v6649_v13, %v6746_v47  ;;  %v9724_v39 = vpop.permute.xlu1 %9723  ;;  %v9719_v9 = vpop.permute.xlu0 %9718  ;;  %v6959_v23 = vld [vmem:[%s17244_s3 + $0x458] sm:$0xff]  ;;  %7273 = vmatpush1.msra.mxu0 %v6960_v48 }
 0x6b1   : > { %v6646_v61 = vsel %vm18577_vm6, %v9710_v21, %v9711_v10  ;;  %v6647_v59 = vsel %vm18578_vm14, %v9700_v16, %v9710_v21  ;;  %v6797_v29 = vmax.f32 %v15109_v3, %v6765_v60  ;;  %v9726_v50 = vunpack.i.h.bf16 %v9724_v39  ;;  %7274 = vmatprep.subr.mxu0 %v6959_v23  ;;  %vm18591_vm6 = vmmov %vm18545_vm0 }
 0x6b2   : > { %v9725_v47 = vunpack.i.l.bf16 %v9724_v39  ;;  %v9721_v13 = vunpack.i.h.bf16 %v9719_v9  ;;  %v9720_v53 = vunpack.i.l.bf16 %v9719_v9  ;;  %v6796_v7 = vmax.f32 %v15183_v36, %v6764_v54  ;;  %v6957_v36 = vld [vmem:[%s17244_s3 + $0x448] sm:$0xff]  ;;  %7275 = vmatpush1.msra.mxu0 %v6958_v58  ;;  %vm18592_vm14 = vmmov %vm18545_vm0 }
 0x6b3   : > { %9803 = vrot.lane.b32.xlu1 %v9802_v19, %s10042_s20  ;;  %7146 = vmatprep.mubr.f32.mxu0 %v6797_v29  ;;  %v9812_v16 = vpack.i.bf16 %v15634_v30, %v15532_v26  ;;  %v6767_v21 = vmax.f32 %v6646_v61, %v6743_v45  ;;  %v6766_v3 = vmax.f32 %v6647_v59, %v6744_v4 }
 0x6b4   : > { %9798 = vrot.lane.b32.xlu0 %v9802_v19, %s10033_s23  ;;  %v6737_v60 = vsel %vm6723_vm11, %v9725_v47, %v9726_v50  ;;  %v6640_v48 = vsel %vm18579_vm13, %v9720_v53, %v9721_v13  ;;  %7147 = vmatmul.mubr.f32.gmra.mxu0 %v6796_v7  ;;  %v15674_v45 = vpop.permute.xlu1 %9733  ;;  %v15676_v4 = vpop.permute.xlu0 %9728  ;;  %v15681_v61 = vmax.f32 %v15176_v33, %v6529_v31  ;;  %v7037_v33 = vld [vmem:[%s17244_s3 + $0x6c8] sm:$0xff]  ;;  %vm18593_vm13 = vmmov %vm18545_vm0 }
 0x6b5   : > { %v6799_v54 = vmax.f32 %v15227_v56, %v6767_v21  ;;  %v6798_v19 = vmax.f32 %v15202_v41, %v6766_v3  ;;  %v6773_v59 = vmax.f32 %v6640_v48, %v6737_v60  ;;  %v9736_v39 = vunpack.i.h.bf16 %v15674_v45  ;;  %7276 = vmatprep.subr.mxu0 %v6957_v36  ;;  %7349 = vmatprep.subr.mxu1 %v7037_v33  ;;  %v7035_v3 = vld [vmem:[%s17244_s3 + $0x6b8] sm:$0xff]  ;;  %v6954_v60 = vld [vmem:[%s17244_s3 + $0x430] sm:$0xff]  ;;  %v6953_v36 = vld [vmem:[%s17244_s3 + $0x428] sm:$0xff] }
 0x6b6   : > { %v9735_v9 = vunpack.i.l.bf16 %v15674_v45  ;;  %v9731_v29 = vunpack.i.h.bf16 %v15676_v4  ;;  %v9730_v23 = vunpack.i.l.bf16 %v15676_v4  ;;  %v7034_v48 = vld [vmem:[%s17244_s3 + $0x6b0] sm:$0xff] }
 0x6b7   : > { %9813 = vrot.lane.b32.xlu1 %v9812_v16, %s10042_s20  ;;  %7235 = vmatprep.mubr.f32.mxu1 %v6799_v54  ;;  %v6805_v56 = vmax.f32 %v15256_v38, %v6773_v59  ;;  %v15697_v41 = vsel %vm6723_vm11, %v9726_v50, %v9736_v39  ;;  %v6956_v50 = vld [vmem:[%s17244_s3 + $0x440] sm:$0xff]  ;;  %v6951_v59 = vld [vmem:[%s17244_s3 + $0x418] sm:$0xff]  ;;  %v6950_v33 = vld [vmem:[%s17244_s3 + $0x410] sm:$0xff] }
 0x6b8   : > { %9808 = vrot.lane.b32.xlu0 %v9812_v16, %s10033_s23  ;;  %v6738_v31 = vsel %vm6723_vm11, %v9735_v9, %v9725_v47  ;;  %v15707_v38 = vsel %vm18580_vm4, %v9721_v13, %v9731_v29  ;;  %v6641_v7 = vsel %vm18581_vm5, %v9730_v23, %v9720_v53  ;;  %v7036_v16 = vld [vmem:[%s17244_s3 + $0x6c0] sm:$0xff]  ;;  %7236 = vmatmul.mubr.f32.gmra.mxu1 %v6798_v19  ;;  %v6955_v13 = vld [vmem:[%s17244_s3 + $0x438] sm:$0xff]  ;;  %vm18594_vm4 = vmmov %vm18545_vm0 }
 0x6b9   : > { %7152 = vmatprep.mubr.f32.mxu0 %v6805_v56  ;;  %v6772_v47 = vmax.f32 %v6641_v7, %v6738_v31  ;;  %v6774_v21 = vmax.f32 %v15707_v38, %v15697_v41  ;;  %v9817_v53 = vpack.i.bf16 %v15631_v25, %v15681_v61  ;;  %7277 = vmatpush1.msra.mxu0 %v6956_v50  ;;  %v6952_v54 = vld [vmem:[%s17244_s3 + $0x420] sm:$0xff]  ;;  %v7031_v56 = vld [vmem:[%s17244_s3 + $0x698] sm:$0xff]  ;;  %v7030_v31 = vld [vmem:[%s17244_s3 + $0x690] sm:$0xff] }
 0x6ba   : > { %7350 = vmatpush1.msra.mxu1 %v7036_v16  ;;  %7278 = vmatprep.subr.mxu0 %v6955_v13  ;;  %v7032_v19 = vld [vmem:[%s17244_s3 + $0x6a0] sm:$0xff]  ;;  %v6949_v7 = vld [vmem:[%s17244_s3 + $0x408] sm:$0xff]  ;;  %v7011_v13 = vld [vmem:[%s17244_s3 + $0x5f8] sm:$0xff] }
 0x6bb   : > { %6719 = vrot.lane.b32.xlu1 %v15681_v61, %s10042_s20  ;;  %v6804_v58 = vmax.f32 %v15266_v22, %v6772_v47  ;;  %v7033_v22 = vld [vmem:[%s17244_s3 + $0x6a8] sm:$0xff]  ;;  %7351 = vmatprep.subr.mxu1 %v7035_v3  ;;  %v6948_v16 = vld [vmem:[%s17244_s3 + $0x400] sm:$0xff]  ;;  %v7010_v3 = vld [vmem:[%s17244_s3 + $0x5f0] sm:$0xff] }
 0x6bc   : > { %9818 = vrot.lane.b32.xlu0 %v9817_v53, %s10033_s23  ;;  %7279 = vmatpush1.msra.mxu0 %v6954_v60  ;;  %v7029_v50 = vld [vmem:[%s17244_s3 + $0x688] sm:$0xff]  ;;  %v7028_v47 = vld [vmem:[%s17244_s3 + $0x680] sm:$0xff]  ;;  %v7027_v53 = vld [vmem:[%s17244_s3 + $0x678] sm:$0xff]  ;;  %s298_s23 = scalar_lea.vmem [#allocation2], %s8646_s19  ;;  %s9976_s19 = scalar_lea.vmem %s9975_s9, 128 }
 0x6bd   : > { %7153 = vmatmul.mubr.f32.gmra.mxu0 %v6804_v58  ;;  %7352 = vmatpush1.msra.mxu1 %v7034_v48  ;;  %v7026_v58 = vld [vmem:[%s17244_s3 + $0x670] sm:$0xff]  ;;  %v7009_v60 = vld [vmem:[%s17244_s3 + $0x5e8] sm:$0xff]  ;;  %vm18595_vm5 = vmmov %vm18545_vm0  ;;  %s8583_s24 = sshll.u32 %s298_s23, 4  ;;  %s8584_s24 = int_to_ptr.vmem [resolvable:$true] %s8583_s24 }
 0x6be   : > { %7280 = vmatprep.subr.mxu0 %v6953_v36  ;;  %7353 = vmatprep.subr.mxu1 %v7033_v22  ;;  %v7025_v48 = vld [vmem:[%s17244_s3 + $0x668] sm:$0xff]  ;;  %v7008_v36 = vld [vmem:[%s17244_s3 + $0x5e0] sm:$0xff]  ;;  %s9970_s13 = scalar_lea.vmem %s8584_s24, 64  ;;  %p9977_p0 = scmp.lt.s32.totalorder %s8584_s24, %s9975_s9 }
 0x6bf   : > { %7281 = vmatpush1.msra.mxu0 %v6952_v54  ;;  %7354 = vmatpush1.msra.mxu1 %v7032_v19  ;;  %v7024_v22 = vld [vmem:[%s17244_s3 + $0x660] sm:$0xff]  ;;  %v7007_v54 = vld [vmem:[%s17244_s3 + $0x5d8] sm:$0xff]  ;;  %p9971_p11 = scmp.ne.s32.totalorder %s8584_s24, %s9970_s13  ;;  %p9978_p1 = scmp.lt.s32.totalorder %s9976_s19, %s9970_s13 }
 0x6c0   : > { %6721 = vrot.lane.b32.xlu0 %v15631_v25, %s10042_s20  ;;  %7282 = vmatprep.subr.mxu0 %v6951_v59  ;;  %v7023_v19 = vld [vmem:[%s17244_s3 + $0x658] sm:$0xff]  ;;  %v7006_v59 = vld [vmem:[%s17244_s3 + $0x5d0] sm:$0xff] }
 0x6c1   : > { %7355 = vmatprep.subr.mxu1 %v7031_v56  ;;  %7283 = vmatpush1.msra.mxu0 %v6950_v33  ;;  %v7022_v56 = vld [vmem:[%s17244_s3 + $0x650] sm:$0xff]  ;;  %v7005_v33 = vld [vmem:[%s17244_s3 + $0x5c8] sm:$0xff]  ;;  %p9972_p12 = pnand %p9971_p11, %p10128_p5  ;;  %p9979_p2 = por %p9978_p1, %p9977_p0 }
 0x6c2   : > { %7356 = vmatpush1.msra.mxu1 %v7030_v31  ;;  %7284 = vmatprep.subr.mxu0 %v6949_v7  ;;  %v7021_v31 = vld [vmem:[%s17244_s3 + $0x648] sm:$0xff]  ;;  %v7004_v7 = vld [vmem:[%s17244_s3 + $0x5c0] sm:$0xff] }
 0x6c3   : > { %7357 = vmatprep.subr.mxu1 %v7029_v50  ;;  %7285 = vmatpush1.msra.mxu0 %v6948_v16  ;;  %v7020_v50 = vld [vmem:[%s17244_s3 + $0x640] sm:$0xff]  ;;  %v7003_v16 = vld [vmem:[%s17244_s3 + $0x5b8] sm:$0xff]  ;;  %p9973_p13 = pneg %p9972_p12 }
 0x6c4   : > { %7358 = vmatpush1.msra.mxu1 %v7028_v47  ;;  %7286 = vmatprep.subr.mxu0 %v7011_v13  ;;  %v7019_v47 = vld [vmem:[%s17244_s3 + $0x638] sm:$0xff]  ;;  %v7002_v13 = vld [vmem:[%s17244_s3 + $0x5b0] sm:$0xff] }
 0x6c5   : > { %7359 = vmatprep.subr.mxu1 %v7027_v53  ;;  %7287 = vmatpush2.msra.mxu0 %v7010_v3  ;;  %v7018_v53 = vld [vmem:[%s17244_s3 + $0x630] sm:$0xff]  ;;  %v7001_v3 = vld [vmem:[%s17244_s3 + $0x5a8] sm:$0xff]  ;;  %p9980_p3 = pnand %p9979_p2, %p9973_p13 }
 0x6c6   : > { %7360 = vmatpush1.msra.mxu1 %v7026_v58  ;;  %7288 = vmatprep.subr.mxu0 %v7009_v60  ;;  %v7017_v58 = vld [vmem:[%s17244_s3 + $0x628] sm:$0xff]  ;;  %v7000_v60 = vld [vmem:[%s17244_s3 + $0x5a0] sm:$0xff] }
 0x6c7   : > { %7361 = vmatprep.subr.mxu1 %v7025_v48  ;;  %7289 = vmatpush2.msra.mxu0 %v7008_v36  ;;  %v7016_v48 = vld [vmem:[%s17244_s3 + $0x620] sm:$0xff]  ;;  %v6999_v36 = vld [vmem:[%s17244_s3 + $0x598] sm:$0xff] }
 0x6c8   : > { %7362 = vmatpush1.msra.mxu1 %v7024_v22  ;;  %7290 = vmatprep.subr.mxu0 %v7007_v54  ;;  %v7015_v22 = vld [vmem:[%s17244_s3 + $0x618] sm:$0xff]  ;;  %v6998_v54 = vld [vmem:[%s17244_s3 + $0x590] sm:$0xff] }
 0x6c9   : > { %7363 = vmatprep.subr.mxu1 %v7023_v19  ;;  %7291 = vmatpush2.msra.mxu0 %v7006_v59  ;;  %v7014_v19 = vld [vmem:[%s17244_s3 + $0x610] sm:$0xff]  ;;  %v6997_v59 = vld [vmem:[%s17244_s3 + $0x588] sm:$0xff] }
 0x6ca   : > { %7364 = vmatpush1.msra.mxu1 %v7022_v56  ;;  %7292 = vmatprep.subr.mxu0 %v7005_v33  ;;  %v7013_v56 = vld [vmem:[%s17244_s3 + $0x608] sm:$0xff]  ;;  %v6996_v33 = vld [vmem:[%s17244_s3 + $0x580] sm:$0xff] }
 0x6cb   : > { %7365 = vmatprep.subr.mxu1 %v7021_v31  ;;  %7293 = vmatpush2.msra.mxu0 %v7004_v7  ;;  %v7012_v31 = vld [vmem:[%s17244_s3 + $0x600] sm:$0xff]  ;;  %v6995_v7 = vld [vmem:[%s17244_s3 + $0x578] sm:$0xff] }
 0x6cc   : > { %7366 = vmatpush1.msra.mxu1 %v7020_v50  ;;  %7294 = vmatprep.subr.mxu0 %v7003_v16  ;;  %v7075_v50 = vld [vmem:[%s17244_s3 + $0x7f8] sm:$0xff]  ;;  %v6994_v16 = vld [vmem:[%s17244_s3 + $0x570] sm:$0xff] }
 0x6cd   : > { %7367 = vmatprep.subr.mxu1 %v7019_v47  ;;  %7295 = vmatpush2.msra.mxu0 %v7002_v13  ;;  %v7074_v47 = vld [vmem:[%s17244_s3 + $0x7f0] sm:$0xff]  ;;  %v6993_v13 = vld [vmem:[%s17244_s3 + $0x568] sm:$0xff] }
 0x6ce   : > { %7368 = vmatpush1.msra.mxu1 %v7018_v53  ;;  %7296 = vmatprep.subr.mxu0 %v7001_v3  ;;  %v7073_v53 = vld [vmem:[%s17244_s3 + $0x7e8] sm:$0xff]  ;;  %v6992_v3 = vld [vmem:[%s17244_s3 + $0x560] sm:$0xff] }
 0x6cf   : > { %7369 = vmatprep.subr.mxu1 %v7017_v58  ;;  %7297 = vmatpush2.msra.mxu0 %v7000_v60  ;;  %v7072_v58 = vld [vmem:[%s17244_s3 + $0x7e0] sm:$0xff]  ;;  %v6991_v60 = vld [vmem:[%s17244_s3 + $0x558] sm:$0xff] }
 0x6d0   : > { %7370 = vmatpush1.msra.mxu1 %v7016_v48  ;;  %7298 = vmatprep.subr.mxu0 %v6999_v36  ;;  %v7071_v48 = vld [vmem:[%s17244_s3 + $0x7d8] sm:$0xff]  ;;  %v6990_v36 = vld [vmem:[%s17244_s3 + $0x550] sm:$0xff] }
 0x6d1   : > { %7371 = vmatprep.subr.mxu1 %v7015_v22  ;;  %7299 = vmatpush2.msra.mxu0 %v6998_v54  ;;  %v7070_v22 = vld [vmem:[%s17244_s3 + $0x7d0] sm:$0xff]  ;;  %v6989_v54 = vld [vmem:[%s17244_s3 + $0x548] sm:$0xff] }
 0x6d2   : > { %7372 = vmatpush1.msra.mxu1 %v7014_v19  ;;  %7300 = vmatprep.subr.mxu0 %v6997_v59  ;;  %v7069_v19 = vld [vmem:[%s17244_s3 + $0x7c8] sm:$0xff]  ;;  %v6988_v59 = vld [vmem:[%s17244_s3 + $0x540] sm:$0xff] }
 0x6d3   : > { %7373 = vmatprep.subr.mxu1 %v7013_v56  ;;  %7301 = vmatpush2.msra.mxu0 %v6996_v33  ;;  %v7068_v56 = vld [vmem:[%s17244_s3 + $0x7c0] sm:$0xff]  ;;  %v6987_v33 = vld [vmem:[%s17244_s3 + $0x538] sm:$0xff] }
 0x6d4   : > { %7374 = vmatpush1.msra.mxu1 %v7012_v31  ;;  %7302 = vmatprep.subr.mxu0 %v6995_v7  ;;  %v7067_v31 = vld [vmem:[%s17244_s3 + $0x7b8] sm:$0xff]  ;;  %v6986_v7 = vld [vmem:[%s17244_s3 + $0x530] sm:$0xff] }
 0x6d5   : > { %7375 = vmatprep.subr.mxu1 %v7075_v50  ;;  %7303 = vmatpush2.msra.mxu0 %v6994_v16  ;;  %v7066_v50 = vld [vmem:[%s17244_s3 + $0x7b0] sm:$0xff]  ;;  %v6985_v16 = vld [vmem:[%s17244_s3 + $0x528] sm:$0xff] }
 0x6d6   : > { %7376 = vmatpush2.msra.mxu1 %v7074_v47  ;;  %7304 = vmatprep.subr.mxu0 %v6993_v13  ;;  %v7065_v47 = vld [vmem:[%s17244_s3 + $0x7a8] sm:$0xff]  ;;  %v6984_v13 = vld [vmem:[%s17244_s3 + $0x520] sm:$0xff] }
 0x6d7   : > { %7377 = vmatprep.subr.mxu1 %v7073_v53  ;;  %7305 = vmatpush2.msra.mxu0 %v6992_v3  ;;  %v7064_v53 = vld [vmem:[%s17244_s3 + $0x7a0] sm:$0xff]  ;;  %v6983_v3 = vld [vmem:[%s17244_s3 + $0x518] sm:$0xff] }
 0x6d8   : > { %7378 = vmatpush2.msra.mxu1 %v7072_v58  ;;  %7306 = vmatprep.subr.mxu0 %v6991_v60  ;;  %v7063_v58 = vld [vmem:[%s17244_s3 + $0x798] sm:$0xff]  ;;  %v6982_v60 = vld [vmem:[%s17244_s3 + $0x510] sm:$0xff] }
 0x6d9   : > { %7379 = vmatprep.subr.mxu1 %v7071_v48  ;;  %7307 = vmatpush2.msra.mxu0 %v6990_v36  ;;  %v7062_v48 = vld [vmem:[%s17244_s3 + $0x790] sm:$0xff]  ;;  %v6981_v36 = vld [vmem:[%s17244_s3 + $0x508] sm:$0xff] }
 0x6da   : > { %7380 = vmatpush2.msra.mxu1 %v7070_v22  ;;  %7308 = vmatprep.subr.mxu0 %v6989_v54  ;;  %v7061_v22 = vld [vmem:[%s17244_s3 + $0x788] sm:$0xff]  ;;  %v6980_v54 = vld [vmem:[%s17244_s3 + $0x500] sm:$0xff] }
 0x6db   : > { %7381 = vmatprep.subr.mxu1 %v7069_v19  ;;  %7309 = vmatpush2.msra.mxu0 %v6988_v59  ;;  %v7060_v19 = vld [vmem:[%s17244_s3 + $0x780] sm:$0xff]  ;;  %v7059_v59 = vld [vmem:[%s17244_s3 + $0x778] sm:$0xff] }
 0x6dc   : > { %7382 = vmatpush2.msra.mxu1 %v7068_v56  ;;  %7310 = vmatprep.subr.mxu0 %v6987_v33  ;;  %v7058_v56 = vld [vmem:[%s17244_s3 + $0x770] sm:$0xff]  ;;  %v7057_v33 = vld [vmem:[%s17244_s3 + $0x768] sm:$0xff] }
 0x6dd   : > { %7383 = vmatprep.subr.mxu1 %v7067_v31  ;;  %7311 = vmatpush2.msra.mxu0 %v6986_v7  ;;  %v7056_v31 = vld [vmem:[%s17244_s3 + $0x760] sm:$0xff]  ;;  %v7055_v7 = vld [vmem:[%s17244_s3 + $0x758] sm:$0xff] }
 0x6de   : > { %7384 = vmatpush2.msra.mxu1 %v7066_v50  ;;  %7312 = vmatprep.subr.mxu0 %v6985_v16  ;;  %v7054_v50 = vld [vmem:[%s17244_s3 + $0x750] sm:$0xff]  ;;  %v7053_v16 = vld [vmem:[%s17244_s3 + $0x748] sm:$0xff] }
 0x6df   : > { %7385 = vmatprep.subr.mxu1 %v7065_v47  ;;  %7313 = vmatpush2.msra.mxu0 %v6984_v13  ;;  %v7052_v47 = vld [vmem:[%s17244_s3 + $0x740] sm:$0xff]  ;;  %v7051_v13 = vld [vmem:[%s17244_s3 + $0x738] sm:$0xff] }
 0x6e0   : > { %7386 = vmatpush2.msra.mxu1 %v7064_v53  ;;  %7314 = vmatprep.subr.mxu0 %v6983_v3  ;;  %v7050_v53 = vld [vmem:[%s17244_s3 + $0x730] sm:$0xff]  ;;  %v7049_v3 = vld [vmem:[%s17244_s3 + $0x728] sm:$0xff] }
 0x6e1   : > { %7387 = vmatprep.subr.mxu1 %v7063_v58  ;;  %7315 = vmatpush2.msra.mxu0 %v6982_v60  ;;  %v7048_v58 = vld [vmem:[%s17244_s3 + $0x720] sm:$0xff]  ;;  %v7047_v60 = vld [vmem:[%s17244_s3 + $0x718] sm:$0xff] }
 0x6e2   : > { %7388 = vmatpush2.msra.mxu1 %v7062_v48  ;;  %7316 = vmatprep.subr.mxu0 %v6981_v36  ;;  %v7046_v48 = vld [vmem:[%s17244_s3 + $0x710] sm:$0xff]  ;;  %v7045_v36 = vld [vmem:[%s17244_s3 + $0x708] sm:$0xff] }
 0x6e3   : > { %7389 = vmatprep.subr.mxu1 %v7061_v22  ;;  %7317 = vmatpush2.msra.mxu0 %v6980_v54  ;;  %v7044_v22 = vld [vmem:[%s17244_s3 + $0x700] sm:$0xff] }
 0x6e4   : > { %7390 = vmatpush2.msra.mxu1 %v7060_v19  ;;  %9124 = vmatprep.subr.mxu0 %v7682_v11  ;;  %v7746_v11 = vld [vmem:[%s17245_s4 + $0x2f8] sm:$0xff] }
 0x6e5   : > { %7391 = vmatprep.subr.mxu1 %v7059_v59 }
 0x6e6   : > { %7392 = vmatpush2.msra.mxu1 %v7058_v56 }
 0x6e7   : > { %7393 = vmatprep.subr.mxu1 %v7057_v33 }
 0x6e8   : > { %7394 = vmatpush2.msra.mxu1 %v7056_v31 }
 0x6e9   : > { %7395 = vmatprep.subr.mxu1 %v7055_v7 }
 0x6ea   : > { %7396 = vmatpush2.msra.mxu1 %v7054_v50 }
 0x6eb   : > { %7397 = vmatprep.subr.mxu1 %v7053_v16 }
 0x6ec   : > { %7398 = vmatpush2.msra.mxu1 %v7052_v47 }
 0x6ed   : > { %7399 = vmatprep.subr.mxu1 %v7051_v13 }
 0x6ee   : > { %7400 = vmatpush2.msra.mxu1 %v7050_v53 }
 0x6ef   : > { %7401 = vmatprep.subr.mxu1 %v7049_v3 }
 0x6f0   : > { %7402 = vmatpush2.msra.mxu1 %v7048_v58 }
 0x6f1   : > { %7403 = vmatprep.subr.mxu1 %v7047_v60 }
 0x6f2   : > { %7404 = vmatpush2.msra.mxu1 %v7046_v48 }
 0x6f3   : > { %7405 = vmatprep.subr.mxu1 %v7045_v36 }
 0x6f4   : > { %7406 = vmatpush2.msra.mxu1 %v7044_v22 }
 0x6f6   : > { %v16017_v54 = vpop.permute.xlu1 %9743  ;;  %v16019_v19 = vpop.permute.xlu0 %9738 }
 0x6f7   : > { %v9745_v59 = vunpack.i.l.bf16 %v16017_v54  ;;  %v9740_v56 = vunpack.i.l.bf16 %v16019_v19  ;;  %v9746_v7 = vunpack.i.h.bf16 %v16017_v54  ;;  %v9741_v50 = vunpack.i.h.bf16 %v16019_v19 }
 0x6f9   : > { %v6735_v33 = vsel %vm6723_vm11, %v9736_v39, %v9745_v59  ;;  %v6638_v31 = vsel %vm18582_vm7, %v9731_v29, %v9740_v56  ;;  %v6806_v29 = vmax.f32 %v15251_v24, %v6774_v21  ;;  %vm18596_vm7 = vmmov %vm18545_vm0 }
 0x6fa   : > { %v16037_v16 = vpop.permute.xlu1 %9753  ;;  %v16039_v47 = vpop.permute.xlu0 %9748  ;;  %v6775_v13 = vmax.f32 %v6638_v31, %v6735_v33 }
 0x6fb   : > { %v9756_v53 = vunpack.i.h.bf16 %v16037_v16  ;;  %v9755_v39 = vunpack.i.l.bf16 %v16037_v16  ;;  %v17505_v3 = vunpack.i.h.bf16 %v16039_v47  ;;  %v9750_v58 = vunpack.i.l.bf16 %v16039_v47 }
 0x6fc   : > { %v6807_v60 = vmax.f32 %v15261_v44, %v6775_v13 }
 0x6fd   : > { %v6729_v48 = vsel %vm6723_vm11, %v9746_v7, %v9755_v39  ;;  %v6730_v36 = vsel %vm6723_vm11, %v9756_v53, %v9746_v7  ;;  %v6632_v22 = vsel %vm18583_vm2, %v9741_v50, %v9750_v58  ;;  %v6633_v44 = vsel %vm18584_vm10, %v17505_v3, %v9741_v50  ;;  %vm18598_vm2 = vmmov %vm18545_vm0 }
 0x6fe   : > { %7241 = vmatprep.mubr.f32.mxu1 %v6807_v60  ;;  %v6781_v41 = vmax.f32 %v6632_v22, %v6729_v48  ;;  %v6780_v38 = vmax.f32 %v6633_v44, %v6730_v36  ;;  %vm18599_vm10 = vmmov %vm18545_vm0 }
 0x6ff   : > { %7242 = vmatmul.mubr.f32.gmra.mxu1 %v6806_v29 }
 0x700   : > { %v6813_v24 = vmax.f32 %v15311_v1, %v6781_v41  ;;  %v6812_v21 = vmax.f32 %v15314_v63, %v6780_v38 }
 0x702   : > { %7158 = vmatprep.mubr.f32.mxu0 %v6813_v24 }
 0x703   : > { %7159 = vmatmul.mubr.f32.gmra.mxu0 %v6812_v21 }
 0x704   : > { %v16064_v33 = vpop.permute.xlu1 %9763  ;;  %v16068_v13 = vpop.permute.xlu0 %9758 }
 0x705   : > { %v9766_v31 = vunpack.i.h.bf16 %v16064_v33  ;;  %v9765_v7 = vunpack.i.l.bf16 %v16064_v33  ;;  %v9761_v63 = vunpack.i.h.bf16 %v16068_v13  ;;  %v9760_v60 = vunpack.i.l.bf16 %v16068_v13 }
 0x707   : > { %v6727_v50 = vsel %vm6723_vm11, %v9765_v7, %v9766_v31  ;;  %v6728_v1 = vsel %vm6723_vm11, %v9755_v39, %v9765_v7  ;;  %v6630_v29 = vsel %vm18585_vm9, %v9760_v60, %v9761_v63  ;;  %v6631_v48 = vsel %vm18586_vm15, %v9750_v58, %v9760_v60  ;;  %vm18600_vm9 = vmmov %vm18545_vm0 }
 0x708   : > { %v9774_v36 = vpop.permute.xlu1 %9773  ;;  %v9769_v22 = vpop.permute.xlu0 %9768  ;;  %v6783_v44 = vmax.f32 %v6630_v29, %v6727_v50  ;;  %v6782_v41 = vmax.f32 %v6631_v48, %v6728_v1  ;;  %vm18601_vm15 = vmmov %vm18545_vm0 }
 0x709   : > { %v9776_v38 = vunpack.i.h.bf16 %v9774_v36  ;;  %v9775_v24 = vunpack.i.l.bf16 %v9774_v36  ;;  %v9771_v21 = vunpack.i.h.bf16 %v9769_v22  ;;  %v9770_v39 = vunpack.i.l.bf16 %v9769_v22 }
 0x70a   : > { %v6815_v7 = vmax.f32 %v15348_v42, %v6783_v44  ;;  %v6814_v15 = vmax.f32 %v15317_v37, %v6782_v41 }
 0x70b   : > { %v6749_v3 = vsel %vm6723_vm11, %v9775_v24, %v9776_v38  ;;  %v6750_v58 = vsel %vm6723_vm11, %v9665_v49, %v9775_v24  ;;  %v6652_v50 = vsel %vm18587_vm1, %v9770_v39, %v9771_v21  ;;  %v6653_v1 = vsel %vm18588_vm3, %v9660_v17, %v9770_v39  ;;  %vm18603_vm1 = vmmov %vm18545_vm0 }
 0x70c   : > { %v6760_v60 = vmax.f32 %v6653_v1, %v6750_v58  ;;  %7247 = vmatprep.mubr.f32.mxu1 %v6815_v7  ;;  %v6761_v42 = vmax.f32 %v6652_v50, %v6749_v3  ;;  %vm7617_vm3 = vcmask 1041408  }
 0x70d   : > { %7248 = vmatmul.mubr.f32.gmra.mxu1 %v6814_v15 }
 0x70e   : > { %v6792_v37 = vmax.f32 %v15104_v0, %v6760_v60  ;;  %v6793_v29 = vmax.f32 %v15370_v20, %v6761_v42 }
 0x710   : > { %7318 = vmatprep.mubr.f32.mxu0 %v6793_v29 }
 0x711   : > { %7319 = vmatmul.mubr.f32.vlgmr.msra.gmra.mxu0 %v6792_v37 }
 0x71b   : > { %v9784_v62 = vpop.permute.xlu1 %9783 }
 0x71c   : > { %v9786_v49 = vunpack.i.h.bf16 %v9784_v62  ;;  %v9785_v48 = vunpack.i.l.bf16 %v9784_v62  ;;  %v9779_v36 = vpop.permute.xlu0 %9778 }
 0x71d   : > { %v9781_v3 = vunpack.i.h.bf16 %v9779_v36  ;;  %v9780_v15 = vunpack.i.l.bf16 %v9779_v36 }
 0x71e   : > { %v6747_v40 = vsel %vm6723_vm11, %v9785_v48, %v9706_v51  ;;  %v6748_v17 = vsel %vm6723_vm11, %v9776_v38, %v9785_v48  ;;  %v6742_v0 = vsel %vm6723_vm11, %v9716_v14, %v9786_v49 }
 0x71f   : > { %v6645_v22 = vsel %vm18589_vm8, %v9711_v10, %v9781_v3  ;;  %v6650_v27 = vsel %vm18590_vm12, %v9780_v15, %v9701_v2  ;;  %v6651_v51 = vsel %vm18545_vm0, %v9771_v21, %v9780_v15  ;;  %vm7634_vm8 = vcmask 1042432  }
 0x720   : > { %v6762_v41 = vmax.f32 %v6651_v51, %v6748_v17  ;;  %v6763_v24 = vmax.f32 %v6650_v27, %v6747_v40  ;;  %v6768_v39 = vmax.f32 %v6645_v22, %v6742_v0  ;;  %vm10043_vm12 = vmmov 0  }
 0x721   : > { %v9794_v20 = vpop.permute.xlu1 %9793  ;;  %v9789_v38 = vpop.permute.xlu0 %9788 }
 0x722   : > { %v9796_v44 = vunpack.i.h.bf16 %v9794_v20  ;;  %v9795_v34 = vunpack.i.l.bf16 %v9794_v20  ;;  %v9791_v14 = vunpack.i.h.bf16 %v9789_v38  ;;  %v9790_v10 = vunpack.i.l.bf16 %v9789_v38 }
 0x723   : > { %v6794_v35 = vmax.f32 %v15373_v46, %v6762_v41  ;;  %v6795_v58 = vmax.f32 %v15441_v28, %v6763_v24  ;;  %v6800_v15 = vmax.f32 %v15230_v32, %v6768_v39  ;;  %v18602_v39 = vunpack.i.l.bf16 %v15382_v5 }
 0x724   : > { %v6739_v8 = vsel %vm6723_vm11, %v9796_v44, %v9735_v9  ;;  %v6740_v2 = vsel %vm6723_vm11, %v9795_v34, %v9796_v44  ;;  %v6741_v21 = vsel %vm6723_vm11, %v9786_v49, %v9795_v34  ;;  %v6642_v45 = vsel %vm18591_vm6, %v9791_v14, %v9730_v23 }
 0x725   : > { %v9804_v7 = vpop.permute.xlu1 %9803  ;;  %v6643_v9 = vsel %vm18592_vm14, %v9790_v10, %v9791_v14  ;;  %v6644_v46 = vsel %vm18593_vm13, %v9781_v3, %v9790_v10  ;;  %7407 = vmatprep.mubr.f32.mxu1 %v6795_v58  ;;  %v6771_v37 = vmax.f32 %v6642_v45, %v6739_v8  ;;  %v18605_v45 = vld [vmem:[#allocation28_spill] sm:$0xff] }
 0x726   : > { %v9806_v50 = vunpack.i.h.bf16 %v9804_v7  ;;  %v9805_v1 = vunpack.i.l.bf16 %v9804_v7  ;;  %v9799_v60 = vpop.permute.xlu0 %9798  ;;  %v6769_v42 = vmax.f32 %v6644_v46, %v6741_v21  ;;  %7408 = vmatmul.mubr.f32.vlgmr.msra.gmra.mxu1 %v6794_v35  ;;  %v6770_v28 = vmax.f32 %v6643_v9, %v6740_v2 }
 0x727   : > { %v9801_v29 = vunpack.i.h.bf16 %v9799_v60  ;;  %v9800_v62 = vunpack.i.l.bf16 %v9799_v60  ;;  %v6803_v36 = vmax.f32 %v15521_v57, %v6771_v37  ;;  %v18604_v21 = vunpack.i.l.bf16 %v15380_v52  ;;  %v7714_v52 = vld [vmem:[%s17245_s4 + $0x1f8] sm:$0xff]  ;;  %v7697_v60 = vld [vmem:[%s17245_s4 + $0x170] sm:$0xff]  ;;  %v7712_v37 = vld [vmem:[%s17245_s4 + $0x1e8] sm:$0xff] }
 0x728   : > { %v6733_v4 = vsel %vm6723_vm11, %v9805_v1, %v9806_v50  ;;  %v6734_v23 = vsel %vm6723_vm11, %v9745_v59, %v9805_v1  ;;  %v6801_v48 = vmax.f32 %v15489_v43, %v6769_v42  ;;  %v6802_v59 = vmax.f32 %v15529_v55, %v6770_v28  ;;  %9159 = vmatprep.subr.mxu1 %v7714_v52  ;;  %v7665_v1 = vld [vmem:[%s17245_s4 + $0x70] sm:$0xff]  ;;  %v7680_v42 = vld [vmem:[%s17245_s4 + $0xe8] sm:$0xff]  ;;  %v7679_v28 = vld [vmem:[%s17245_s4 + $0xe0] sm:$0xff] }
 0x729   : > { %v9814_v49 = vpop.permute.xlu1 %9813  ;;  %v6636_v40 = vsel %vm18594_vm4, %v9800_v62, %v9801_v29  ;;  %v6637_v17 = vsel %vm18595_vm5, %v9740_v56, %v9800_v62  ;;  %7413 = vmatprep.mubr.f32.mxu1 %v6803_v36  ;;  %v7696_v62 = vld [vmem:[%s17245_s4 + $0x168] sm:$0xff]  ;;  %v7710_v36 = vld [vmem:[%s17245_s4 + $0x1d8] sm:$0xff] }
 0x72a   : > { %v9815_v3 = vunpack.i.l.bf16 %v9814_v49  ;;  %v9816_v54 = vunpack.i.h.bf16 %v9814_v49  ;;  %v9809_v0 = vpop.permute.xlu0 %9808  ;;  %7324 = vmatprep.mubr.f32.mxu0 %v6801_v48  ;;  %v6777_v43 = vmax.f32 %v6636_v40, %v6733_v4  ;;  %v6776_v20 = vmax.f32 %v6637_v17, %v6734_v23  ;;  %7414 = vmatmul.mubr.f32.gmra.mxu1 %v6802_v59  ;;  %v7711_v4 = vld [vmem:[%s17245_s4 + $0x1e0] sm:$0xff]  ;;  %v7678_v48 = vld [vmem:[%s17245_s4 + $0xd8] sm:$0xff]  ;;  %v7676_v59 = vld [vmem:[%s17245_s4 + $0xc8] sm:$0xff] }
 0x72b   : > { %v9811_v19 = vunpack.i.h.bf16 %v9809_v0  ;;  %7325 = vmatmul.mubr.f32.gmra.mxu0 %v6800_v15  ;;  %v9810_v22 = vunpack.i.l.bf16 %v9809_v0  ;;  %v7663_v23 = vld [vmem:[%s17245_s4 + $0x60] sm:$0xff]  ;;  %v7662_v40 = vld [vmem:[%s17245_s4 + $0x58] sm:$0xff]  ;;  %v7709_v15 = vld [vmem:[%s17245_s4 + $0x1d0] sm:$0xff] }
 0x72c   : > { %v6731_v57 = vsel %vm6723_vm11, %v9815_v3, %v9756_v53  ;;  %v6732_v56 = vsel %vm6723_vm11, %v9806_v50, %v9815_v3  ;;  %v6809_v32 = vmax.f32 %v15569_v12, %v6777_v43  ;;  %v6808_v27 = vmax.f32 %v15308_v18, %v6776_v20  ;;  %v7713_v50 = vld [vmem:[%s17245_s4 + $0x1f0] sm:$0xff]  ;;  %v7695_v49 = vld [vmem:[%s17245_s4 + $0x160] sm:$0xff]  ;;  %v7694_v17 = vld [vmem:[%s17245_s4 + $0x158] sm:$0xff] }
 0x72d   : > { %v6726_v55 = vsel %vm6723_vm11, %v9766_v31, %v9816_v54  ;;  %v6629_v16 = vsel %vm18596_vm7, %v9761_v63, %v9811_v19  ;;  %v18597_v53 = vunpack.i.h.bf16 %v16039_v47  ;;  %v6635_v12 = vsel %vm18599_vm10, %v9801_v29, %v9810_v22  ;;  %v6720_v44 = vpop.permute.xlu1 %6719  ;;  %v7664_v29 = vld [vmem:[%s17245_s4 + $0x68] sm:$0xff]  ;;  %v7677_v3 = vld [vmem:[%s17245_s4 + $0xd0] sm:$0xff]  ;;  %v7778_v52 = vld [vmem:[%s17245_s4 + $0x3f8] sm:$0xff] }
 0x72e   : > { %v9819_v18 = vpop.permute.xlu0 %9818  ;;  %7330 = vmatprep.mubr.f32.mxu0 %v6809_v32  ;;  %v6778_v34 = vmax.f32 %v6635_v12, %v6732_v56  ;;  %v6725_v13 = vsel %vm6723_vm11, %v9816_v54, %v6720_v44  ;;  %v6784_v38 = vmax.f32 %v6629_v16, %v6726_v55  ;;  %v7661_v54 = vld [vmem:[%s17245_s4 + $0x50] sm:$0xff]  ;;  %v7708_v43 = vld [vmem:[%s17245_s4 + $0x1c8] sm:$0xff]  ;;  %v7707_v56 = vld [vmem:[%s17245_s4 + $0x1c0] sm:$0xff] }
 0x72f   : > { %v6634_v51 = vsel %vm18598_vm2, %v9810_v22, %v18597_v53  ;;  %v9821_v33 = vunpack.i.h.bf16 %v9819_v18  ;;  %v9820_v41 = vunpack.i.l.bf16 %v9819_v18  ;;  %7331 = vmatmul.mubr.f32.gmra.mxu0 %v6808_v27  ;;  %v7693_v0 = vld [vmem:[%s17245_s4 + $0x150] sm:$0xff]  ;;  %v7660_v20 = vld [vmem:[%s17245_s4 + $0x48] sm:$0xff]  ;;  %v7659_v22 = vld [vmem:[%s17245_s4 + $0x40] sm:$0xff] }
 0x730   : > { %v6779_v31 = vmax.f32 %v6634_v51, %v6731_v57  ;;  %v6810_v8 = vmax.f32 %v15585_v6, %v6778_v34  ;;  %v6816_v9 = vmax.f32 %v18605_v45, %v6784_v38  ;;  %v7692_v57 = vld [vmem:[%s17245_s4 + $0x148] sm:$0xff]  ;;  %v7691_v32 = vld [vmem:[%s17245_s4 + $0x140] sm:$0xff]  ;;  %v7674_v27 = vld [vmem:[%s17245_s4 + $0xb8] sm:$0xff] }
 0x731   : > { %v6628_v47 = vsel %vm18600_vm9, %v9811_v19, %v9820_v41  ;;  %v6627_v10 = vsel %vm18601_vm15, %v9820_v41, %v9821_v33  ;;  %v6658_v35 = vsel %vm18603_vm1, %v9821_v33, %v18602_v39  ;;  %v7675_v19 = vld [vmem:[%s17245_s4 + $0xc0] sm:$0xff]  ;;  %v7706_v55 = vld [vmem:[%s17245_s4 + $0x1b8] sm:$0xff]  ;;  %v7673_v51 = vld [vmem:[%s17245_s4 + $0xb0] sm:$0xff] }
 0x732   : > { %v6811_v63 = vmax.f32 %v15532_v26, %v6779_v31  ;;  %v6722_v24 = vpop.permute.xlu0 %6721  ;;  %v6785_v14 = vmax.f32 %v6628_v47, %v6725_v13  ;;  %v7658_v16 = vld [vmem:[%s17245_s4 + $0x38] sm:$0xff]  ;;  %v7705_v12 = vld [vmem:[%s17245_s4 + $0x1b0] sm:$0xff]  ;;  %v7672_v33 = vld [vmem:[%s17245_s4 + $0xa8] sm:$0xff] }
 0x733   : > { %v6724_v2 = vsel %vm6723_vm11, %v6720_v44, %v6722_v24  ;;  %v6755_v26 = vsel %vm6723_vm11, %v6722_v24, %v18604_v21  ;;  %v7690_v53 = vld [vmem:[%s17245_s4 + $0x138] sm:$0xff]  ;;  %v7657_v44 = vld [vmem:[%s17245_s4 + $0x30] sm:$0xff]  ;;  %v7704_v41 = vld [vmem:[%s17245_s4 + $0x1a8] sm:$0xff]  ;;  %vm7600_vm11 = vcmask 1040384  }
 0x734   : > { %7419 = vmatprep.mubr.f32.mxu1 %v6811_v63  ;;  %v6786_v7 = vmax.f32 %v6627_v10, %v6724_v2  ;;  %v6787_v6 = vmax.f32 %v6658_v35, %v6755_v26  ;;  %v6817_v58 = vmax.f32 %v15634_v30, %v6785_v14  ;;  %v7666_v30 = vld [vmem:[%s17245_s4 + $0x78] sm:$0xff]  ;;  %v7689_v18 = vld [vmem:[%s17245_s4 + $0x130] sm:$0xff]  ;;  %v7656_v31 = vld [vmem:[%s17245_s4 + $0x28] sm:$0xff] }
 0x735   : > { %7420 = vmatmul.mubr.f32.gmra.mxu1 %v6810_v8  ;;  %9125 = vmatpush3.msra.mxu0 %v7666_v30  ;;  %v7688_v34 = vld [vmem:[%s17245_s4 + $0x128] sm:$0xff]  ;;  %v7671_v13 = vld [vmem:[%s17245_s4 + $0xa0] sm:$0xff]  ;;  %v7670_v24 = vld [vmem:[%s17245_s4 + $0x98] sm:$0xff] }
 0x736   : > { %7336 = vmatprep.mubr.f32.mxu0 %v6817_v58  ;;  %v6819_v5 = vmax.f32 %v15631_v25, %v6787_v6  ;;  %v6818_v46 = vmax.f32 %v15681_v61, %v6786_v7  ;;  %v7698_v25 = vld [vmem:[%s17245_s4 + $0x178] sm:$0xff]  ;;  %v7681_v61 = vld [vmem:[%s17245_s4 + $0xf0] sm:$0xff]  ;;  %v7703_v47 = vld [vmem:[%s17245_s4 + $0x1a0] sm:$0xff] }
 0x737   : > { %7337 = vmatmul.mubr.f32.gmra.mxu0 %v6816_v9  ;;  %9160 = vmatpush3.msra.mxu1 %v7698_v25  ;;  %v7655_v63 = vld [vmem:[%s17245_s4 + $0x20] sm:$0xff]  ;;  %v7702_v8 = vld [vmem:[%s17245_s4 + $0x198] sm:$0xff]  ;;  %v7669_v39 = vld [vmem:[%s17245_s4 + $0x90] sm:$0xff] }
 0x738   : > { %7425 = vmatprep.mubr.f32.mxu1 %v6819_v5  ;;  %9126 = vmatprep.subr.mxu0 %v7681_v61  ;;  %v7687_v38 = vld [vmem:[%s17245_s4 + $0x120] sm:$0xff]  ;;  %v7654_v14 = vld [vmem:[%s17245_s4 + $0x18] sm:$0xff]  ;;  %v7701_v35 = vld [vmem:[%s17245_s4 + $0x190] sm:$0xff] }
 0x739   : > { %7426 = vmatmul.mubr.f32.gmra.mxu1 %v6818_v46  ;;  %9161 = vmatprep.subr.mxu1 %v7713_v50  ;;  %v7686_v10 = vld [vmem:[%s17245_s4 + $0x118] sm:$0xff]  ;;  %v7653_v2 = vld [vmem:[%s17245_s4 + $0x10] sm:$0xff]  ;;  %v7668_v26 = vld [vmem:[%s17245_s4 + $0x88] sm:$0xff] }
 0x73a   : > { %9127 = vmatpush3.msra.mxu0 %v7665_v1  ;;  %9162 = vmatpush3.msra.mxu1 %v7697_v60  ;;  %v7685_v21 = vld [vmem:[%s17245_s4 + $0x110] sm:$0xff]  ;;  %v7700_v7 = vld [vmem:[%s17245_s4 + $0x188] sm:$0xff]  ;;  %v7667_v45 = vld [vmem:[%s17245_s4 + $0x80] sm:$0xff] }
 0x73b   : > { %9128 = vmatprep.subr.mxu0 %v7680_v42  ;;  %9163 = vmatprep.subr.mxu1 %v7712_v37  ;;  %v7652_v6 = vld [vmem:[%s17245_s4 + $0x8] sm:$0xff]  ;;  %v7699_v9 = vld [vmem:[%s17245_s4 + $0x180] sm:$0xff] }
 0x73c   : > { %9129 = vmatpush3.msra.mxu0 %v7664_v29  ;;  %9164 = vmatpush3.msra.mxu1 %v7696_v62  ;;  %v7684_v58 = vld [vmem:[%s17245_s4 + $0x108] sm:$0xff]  ;;  %v7651_v5 = vld [vmem:[%s17245_s4] sm:$0xff] }
 0x73d   : > { %9130 = vmatprep.subr.mxu0 %v7679_v28  ;;  %9165 = vmatprep.subr.mxu1 %v7711_v4  ;;  %v7683_v46 = vld [vmem:[%s17245_s4 + $0x100] sm:$0xff] }
 0x73e   : > { %9131 = vmatpush3.msra.mxu0 %v7663_v23  ;;  %9166 = vmatpush3.msra.mxu1 %v7695_v49 }
 0x73f   : > { %9132 = vmatprep.subr.mxu0 %v7678_v48  ;;  %9167 = vmatprep.subr.mxu1 %v7710_v36 }
 0x740   : > { %9133 = vmatpush3.msra.mxu0 %v7662_v40  ;;  %9168 = vmatpush3.msra.mxu1 %v7694_v17 }
 0x741   : > { %9134 = vmatprep.subr.mxu0 %v7677_v3  ;;  %9169 = vmatprep.subr.mxu1 %v7709_v15 }
 0x742   : > { %9135 = vmatpush3.msra.mxu0 %v7661_v54  ;;  %9170 = vmatpush3.msra.mxu1 %v7693_v0 }
 0x743   : > { %9136 = vmatprep.subr.mxu0 %v7676_v59  ;;  %9171 = vmatprep.subr.mxu1 %v7708_v43 }
 0x744   : > { %9137 = vmatpush3.msra.mxu0 %v7660_v20  ;;  %9172 = vmatpush3.msra.mxu1 %v7692_v57 }
 0x745   : > { %9138 = vmatprep.subr.mxu0 %v7675_v19  ;;  %9173 = vmatprep.subr.mxu1 %v7707_v56 }
 0x746   : > { %9139 = vmatpush3.msra.mxu0 %v7659_v22  ;;  %9174 = vmatpush3.msra.mxu1 %v7691_v32 }
 0x747   : > { %9140 = vmatprep.subr.mxu0 %v7674_v27  ;;  %9175 = vmatprep.subr.mxu1 %v7706_v55 }
 0x748   : > { %9141 = vmatpush3.msra.mxu0 %v7658_v16  ;;  %9176 = vmatpush3.msra.mxu1 %v7690_v53 }
 0x749   : > { %9142 = vmatprep.subr.mxu0 %v7673_v51  ;;  %9177 = vmatprep.subr.mxu1 %v7705_v12 }
 0x74a   : > { %9143 = vmatpush3.msra.mxu0 %v7657_v44  ;;  %9178 = vmatpush3.msra.mxu1 %v7689_v18 }
 0x74b   : > { %9144 = vmatprep.subr.mxu0 %v7672_v33  ;;  %9179 = vmatprep.subr.mxu1 %v7704_v41 }
 0x74c   : > { %9145 = vmatpush3.msra.mxu0 %v7656_v31  ;;  %9180 = vmatpush3.msra.mxu1 %v7688_v34 }
 0x74d   : > { %9146 = vmatprep.subr.mxu0 %v7671_v13  ;;  %9181 = vmatprep.subr.mxu1 %v7703_v47 }
 0x74e   : > { %9147 = vmatpush3.msra.mxu0 %v7655_v63  ;;  %9182 = vmatpush3.msra.mxu1 %v7687_v38 }
 0x74f   : > { %9148 = vmatprep.subr.mxu0 %v7670_v24  ;;  %9183 = vmatprep.subr.mxu1 %v7702_v8 }
 0x750   : > { %9149 = vmatpush3.msra.mxu0 %v7654_v14  ;;  %9184 = vmatpush3.msra.mxu1 %v7686_v10 }
 0x751   : > { %9150 = vmatprep.subr.mxu0 %v7669_v39  ;;  %9185 = vmatprep.subr.mxu1 %v7701_v35 }
 0x752   : > { %9151 = vmatpush3.msra.mxu0 %v7653_v2  ;;  %9186 = vmatpush3.msra.mxu1 %v7685_v21 }
 0x753   : > { %9152 = vmatprep.subr.mxu0 %v7668_v26  ;;  %9187 = vmatprep.subr.mxu1 %v7700_v7 }
 0x754   : > { %9153 = vmatpush3.msra.mxu0 %v7652_v6  ;;  %9188 = vmatpush3.msra.mxu1 %v7684_v58 }
 0x755   : > { %9154 = vmatprep.subr.mxu0 %v7667_v45  ;;  %9189 = vmatprep.subr.mxu1 %v7699_v9 }
 0x756   : > { %9155 = vmatpush3.msra.mxu0 %v7651_v5  ;;  %9190 = vmatpush3.msra.mxu1 %v7683_v46 }
 0x757   : > { %9194 = vmatprep.subr.mxu0 %v7746_v11  ;;  %9229 = vmatprep.subr.mxu1 %v7778_v52 }
 0x75c   : > { %v7142_v30 = vpop.f32.mrf.mxu0 }
 0x75e   : > { %v7144_v61 = vpop.f32.mrf.mxu0 }
 0x761   : > { %v7231_v25 = vpop.f32.mrf.mxu1 }
 0x762   : > { %v7232_v54 = vadd.f32 %v7231_v25, %v7142_v30 }
 0x763   : > { %v7233_v50 = vpop.f32.mrf.mxu1 }
 0x764   : > { %v7234_v22 = vadd.f32 %v7233_v50, %v7144_v61 }
 0x774   : > { %v7148_v1 = vpop.f32.mrf.mxu0 }
 0x776   : > { %v7150_v42 = vpop.f32.mrf.mxu0 }
 0x778   : > { %v7237_v60 = vpop.f32.mrf.mxu1 }
 0x779   : > { %v7238_v0 = vadd.f32 %v7237_v60, %v7148_v1 }
 0x77a   : > { %v7239_v37 = vpop.f32.mrf.mxu1 }
 0x77b   : > { %v7240_v43 = vadd.f32 %v7239_v37, %v7150_v42 }
 0x77d   : > { %v7154_v29 = vpop.f32.mrf.mxu0 }
 0x77f   : > { %v7156_v28 = vpop.f32.mrf.mxu0 }
 0x7bf   : > { %v7243_v62 = vpop.f32.mrf.mxu1 }
 0x7c0   : > { %v7244_v33 = vadd.f32 %v7243_v62, %v7154_v29 }
 0x7c1   : > { %v7245_v4 = vpop.f32.mrf.mxu1 }
 0x7c2   : > { %v7246_v13 = vadd.f32 %v7245_v4, %v7156_v28 }
 0x7c3   : > { %v7160_v23 = vpop.f32.mrf.mxu0 }
 0x7c5   : > { %v7162_v48 = vpop.f32.mrf.mxu0 }
 0x7cd   : > { %v7249_v49 = vpop.f32.mrf.mxu1 }
 0x7ce   : > { %v7250_v47 = vadd.f32 %v7249_v49, %v7160_v23 }
 0x7cf   : > { %v7251_v36 = vpop.f32.mrf.mxu1 }
 0x7d0   : > { %v7252_v38 = vadd.f32 %v7251_v36, %v7162_v48 }
 0x7d1   : > { %v7320_v40 = vpop.f32.mrf.mxu0 }
 0x7d2   : > { %v7321_v20 = vadd.f32 %v7320_v40, %v7232_v54 }
 0x7d3   : > { %v7322_v3 = vpop.f32.mrf.mxu0 }
 0x7d4   : > { %v7323_v53 = vadd.f32 %v7322_v3, %v7234_v22 }
 0x7e6   : > { %v7409_v17 = vpop.f32.mrf.mxu1 }
 0x7e7   : > { %v16396_v32 = vadd.f32 %v7409_v17, %v7321_v20 }
 0x7e8   : > { %v7411_v15 = vpop.f32.mrf.mxu1 }
 0x7e9   : > { %v16404_v41 = vadd.f32 %v7411_v15, %v7323_v53  ;;  %v7446_v34 = vrot.slane %v16396_v32, 4  ;;  %v7450_v63 = vrot.slane %v16396_v32, 5  ;;  %v7434_v14 = vrot.slane %v16396_v32, 1 }
 0x7ea   : > { %v7415_v19 = vpop.f32.mrf.mxu1  ;;  %v7454_v58 = vrot.slane %v16396_v32, 6  ;;  %v7458_v45 = vrot.slane %v16396_v32, 7 }
 0x7eb   : > { %v7326_v59 = vpop.f32.mrf.mxu0  ;;  %v7435_v6 = vrot.slane %v16404_v41, 1  ;;  %v7439_v46 = vrot.slane %v16404_v41, 2  ;;  %v7443_v25 = vrot.slane %v16404_v41, 3  ;;  %v7455_v61 = vrot.slane %v16404_v41, 6 }
 0x7ec   : > { %v7327_v57 = vadd.f32 %v7326_v59, %v7238_v0  ;;  %v7417_v51 = vpop.f32.mrf.mxu1  ;;  %v7459_v50 = vrot.slane %v16404_v41, 7 }
 0x7ed   : > { %v7328_v56 = vpop.f32.mrf.mxu0 }
 0x7ee   : > { %v16398_v27 = vadd.f32 %v7415_v19, %v7327_v57  ;;  %v7329_v55 = vadd.f32 %v7328_v56, %v7240_v43 }
 0x7ef   : > { %v7332_v16 = vpop.f32.mrf.mxu0 }
 0x7f0   : > { %v16400_v12 = vadd.f32 %v7417_v51, %v7329_v55  ;;  %v9087_v44 = vrot.slane %v16398_v27, 11  ;;  %v9089_v18 = vrot.slane %v16398_v27, 12  ;;  %v7333_v24 = vadd.f32 %v7332_v16, %v7244_v33 }
 0x7f1   : > { %v7334_v31 = vpop.f32.mrf.mxu0  ;;  %v7476_v2 = vrot.slane %v16398_v27, 7  ;;  %v7603_v62 = vsel %vm7600_vm11, %v7434_v14, %v16398_v27 }
 0x7f2   : > { %v16410_v10 = vsel %vm7600_vm11, %v7446_v34, %v9087_v44  ;;  %v7335_v39 = vadd.f32 %v7334_v31, %v7246_v13  ;;  %v7477_v35 = vrot.slane %v16400_v12, 7  ;;  %v16415_v21 = vsel %vm7600_vm11, %v7450_v63, %v9089_v18  ;;  %v7730_v13 = vld [vmem:[%s17245_s4 + $0x278] sm:$0xff] }
 0x7f3   : > { %v9084_v11 = vrot.slane %v16400_v12, 9  ;;  %v9086_v52 = vrot.slane %v16400_v12, 10  ;;  %v7604_v37 = vsel %vm7600_vm11, %v7435_v6, %v16400_v12  ;;  %v7601_v29 = vsel %vm7600_vm11, %v16396_v32, %v7476_v2 }
 0x7f4   : > { %v7602_v42 = vsel %vm7600_vm11, %v16404_v41, %v7477_v35  ;;  %v9092_v59 = vrot.slane %v16400_v12, 13  ;;  %v7523_v19 = vrot.slane %v7477_v35, 7 }
 0x7f5   : > { %v7421_v8 = vpop.f32.mrf.mxu1  ;;  %v7606_v17 = vsel %vm7600_vm11, %v7439_v46, %v9084_v11  ;;  %v7608_v3 = vsel %vm7600_vm11, %v7443_v25, %v9086_v52  ;;  %v7729_v11 = vld [vmem:[%s17245_s4 + $0x270] sm:$0xff] }
 0x7f6   : > { %v16417_v26 = vadd.f32 %v7421_v8, %v7333_v24  ;;  %v7745_v24 = vld [vmem:[%s17245_s4 + $0x2f0] sm:$0xff]  ;;  %v7614_v25 = vsel %vm7600_vm11, %v7455_v61, %v9092_v59  ;;  %v7616_v61 = vsel %vm7600_vm11, %v7459_v50, %v7523_v19  ;;  %v7727_v59 = vld [vmem:[%s17245_s4 + $0x260] sm:$0xff]  ;;  %v7774_v19 = vld [vmem:[%s17245_s4 + $0x3d8] sm:$0xff] }
 0x7f7   : > { %v7423_v7 = vpop.f32.mrf.mxu1  ;;  %v7338_v5 = vpop.f32.mrf.mxu0 }
 0x7f8   : > { %v16422_v9 = vadd.f32 %v7423_v7, %v7335_v39  ;;  %v7339_v30 = vadd.f32 %v7338_v5, %v7250_v47  ;;  %v7490_v23 = vrot.slane %v16417_v26, 6  ;;  %v9093_v49 = vrot.slane %v16417_v26, 7  ;;  %v7762_v47 = vld [vmem:[%s17245_s4 + $0x378] sm:$0xff]  ;;  %v7777_v7 = vld [vmem:[%s17245_s4 + $0x3f0] sm:$0xff] }
 0x7f9   : > { %v7340_v1 = vpop.f32.mrf.mxu0  ;;  %v7427_v60 = vpop.f32.mrf.mxu1  ;;  %v9099_v20 = vrot.slane %v16417_v26, 10  ;;  %v9101_v57 = vrot.slane %v16417_v26, 11 }
 0x7fa   : > { %v7341_v28 = vadd.f32 %v7340_v1, %v7252_v38  ;;  %v16440_v4 = vadd.f32 %v7427_v60, %v7339_v30  ;;  %v7491_v36 = vrot.slane %v16422_v9, 6  ;;  %v9094_v40 = vrot.slane %v16422_v9, 7  ;;  %v7744_v1 = vld [vmem:[%s17245_s4 + $0x2e8] sm:$0xff] }
 0x7fb   : > { %v7429_v48 = vpop.f32.mrf.mxu1  ;;  %v9098_v0 = vrot.slane %v16422_v9, 9  ;;  %v7618_v55 = vsel %vm7617_vm3, %v7601_v29, %v7490_v23  ;;  %v7620_v16 = vsel %vm7617_vm3, %v7603_v62, %v9093_v49  ;;  %v7623_v18 = vsel %vm7617_vm3, %v7606_v17, %v16422_v9  ;;  %v7776_v60 = vld [vmem:[%s17245_s4 + $0x3e8] sm:$0xff]  ;;  %v7775_v17 = vld [vmem:[%s17245_s4 + $0x3e0] sm:$0xff] }
 0x7fc   : > { %v16448_v15 = vadd.f32 %v7429_v48, %v7341_v28  ;;  %v7504_v54 = vrot.slane %v16440_v4, 5  ;;  %v9105_v43 = vrot.slane %v16440_v4, 6  ;;  %v7619_v53 = vsel %vm7617_vm3, %v7602_v42, %v7491_v36  ;;  %v7728_v62 = vld [vmem:[%s17245_s4 + $0x268] sm:$0xff] }
 0x7fd   : > { %v7621_v51 = vsel %vm7617_vm3, %v7604_v37, %v9094_v40  ;;  %v7625_v63 = vsel %vm7617_vm3, %v7608_v3, %v9098_v0  ;;  %v9111_v14 = vrot.slane %v16440_v4, 9  ;;  %v7626_v39 = vsel %vm7617_vm3, %v16410_v10, %v9099_v20  ;;  %v7761_v10 = vld [vmem:[%s17245_s4 + $0x370] sm:$0xff]  ;;  %v7760_v28 = vld [vmem:[%s17245_s4 + $0x368] sm:$0xff]  ;;  %v7743_v40 = vld [vmem:[%s17245_s4 + $0x2e0] sm:$0xff] }
 0x7fe   : > { %v7505_v56 = vrot.slane %v16448_v15, 5  ;;  %v9106_v22 = vrot.slane %v16448_v15, 6  ;;  %v9108_v44 = vrot.slane %v16448_v15, 7  ;;  %v7635_v34 = vsel %vm7634_vm8, %v7618_v55, %v7504_v54 }
 0x7ff   : > { %v7637_v38 = vsel %vm7634_vm8, %v7620_v16, %v9105_v43  ;;  %v7642_v8 = vsel %vm7634_vm8, %v7625_v63, %v16448_v15  ;;  %v7578_v6 = vrot.slane %v7504_v54, 5  ;;  %v7628_v5 = vsel %vm7617_vm3, %v16415_v21, %v9101_v57  ;;  %v7759_v43 = vld [vmem:[%s17245_s4 + $0x360] sm:$0xff]  ;;  %v7758_v16 = vld [vmem:[%s17245_s4 + $0x358] sm:$0xff]  ;;  %v7756_v63 = vld [vmem:[%s17245_s4 + $0x348] sm:$0xff] }
 0x800   : > { %v7636_v33 = vsel %vm7634_vm8, %v7619_v53, %v7505_v56  ;;  %v7638_v31 = vsel %vm7634_vm8, %v7621_v51, %v9106_v22  ;;  %v7640_v35 = vsel %vm7634_vm8, %v7623_v18, %v9108_v44  ;;  %v7551_v46 = vrot.slane %v7491_v36, 6  ;;  %v7773_v44 = vld [vmem:[%s17245_s4 + $0x3d0] sm:$0xff] }
 0x801   : > { %7978 = vmatprep.mubr.f32.mxu0 %v7636_v33  ;;  %8048 = vmatprep.mubr.f32.mxu1 %v7638_v31  ;;  %v16501_v52 = vsel %vm7634_vm8, %v7626_v39, %v9111_v14  ;;  %v9114_v30 = vrot.slane %v16448_v15, 11  ;;  %v9104_v21 = vrot.slane %v16422_v9, 13  ;;  %v16513_v42 = vsel %vm7634_vm8, %v7628_v5, %v7578_v6  ;;  %v7725_v33 = vld [vmem:[%s17245_s4 + $0x250] sm:$0xff]  ;;  %v7755_v14 = vld [vmem:[%s17245_s4 + $0x340] sm:$0xff]  ;;  %v7738_v39 = vld [vmem:[%s17245_s4 + $0x2b8] sm:$0xff] }
 0x802   : > { %7979 = vmatmul.mubr.f32.vlgmr.msra.gmra.mxu0 %v7635_v34  ;;  %8049 = vmatmul.mubr.f32.vlgmr.msra.gmra.mxu1 %v7637_v38  ;;  %v7631_v37 = vsel %vm7617_vm3, %v7614_v25, %v7551_v46  ;;  %v9116_v29 = vrot.slane %v16448_v15, 12  ;;  %v9091_v36 = vrot.slane %v16398_v27, 13  ;;  %v7550_v50 = vrot.slane %v7490_v23, 6  ;;  %v7757_v31 = vld [vmem:[%s17245_s4 + $0x350] sm:$0xff]  ;;  %v7740_v34 = vld [vmem:[%s17245_s4 + $0x2c8] sm:$0xff]  ;;  %v7739_v38 = vld [vmem:[%s17245_s4 + $0x2c0] sm:$0xff] }
 0x803   : > { %9195 = vmatpush3.msra.mxu0 %v7730_v13  ;;  %9230 = vmatpush3.msra.mxu1 %v7762_v47  ;;  %v16527_v49 = vsel %vm7634_vm8, %v7631_v37, %v9114_v30  ;;  %v7633_v48 = vsel %vm7617_vm3, %v7616_v61, %v9104_v21  ;;  %v9113_v54 = vrot.slane %v16440_v4, 11  ;;  %v7522_v0 = vrot.slane %v7476_v2, 7  ;;  %v7742_v2 = vld [vmem:[%s17245_s4 + $0x2d8] sm:$0xff]  ;;  %v7772_v13 = vld [vmem:[%s17245_s4 + $0x3c8] sm:$0xff]  ;;  %v7737_v5 = vld [vmem:[%s17245_s4 + $0x2b0] sm:$0xff] }
 0x804   : > { %9196 = vmatprep.subr.mxu0 %v7745_v24  ;;  %8118 = vmatprep.mubr.f32.mxu0 %v7640_v35  ;;  %v16540_v3 = vsel %vm7634_vm8, %v7633_v48, %v9116_v29  ;;  %v9103_v23 = vrot.slane %v16417_v26, 13  ;;  %v7613_v20 = vsel %vm7600_vm11, %v7454_v58, %v9091_v36  ;;  %v9115_v57 = vrot.slane %v16440_v4, 12  ;;  %v7726_v58 = vld [vmem:[%s17245_s4 + $0x258] sm:$0xff]  ;;  %v7724_v47 = vld [vmem:[%s17245_s4 + $0x248] sm:$0xff]  ;;  %v7771_v24 = vld [vmem:[%s17245_s4 + $0x3c0] sm:$0xff] }
 0x805   : > { %9231 = vmatprep.subr.mxu1 %v7777_v7  ;;  %8188 = vmatprep.mubr.f32.mxu1 %v7642_v8  ;;  %v7630_v22 = vsel %vm7617_vm3, %v7613_v20, %v7550_v50  ;;  %v7615_v55 = vsel %vm7600_vm11, %v7458_v45, %v7522_v0  ;;  %v7741_v45 = vld [vmem:[%s17245_s4 + $0x2d0] sm:$0xff]  ;;  %v7723_v8 = vld [vmem:[%s17245_s4 + $0x240] sm:$0xff]  ;;  %v7770_v35 = vld [vmem:[%s17245_s4 + $0x3b8] sm:$0xff] }
 0x806   : > { %9197 = vmatpush3.msra.mxu0 %v7729_v11  ;;  %9232 = vmatpush3.msra.mxu1 %v7761_v10  ;;  %v16573_v53 = vsel %vm7634_vm8, %v7630_v22, %v9113_v54  ;;  %v7632_v51 = vsel %vm7617_vm3, %v7615_v55, %v9103_v23  ;;  %v7722_v7 = vld [vmem:[%s17245_s4 + $0x238] sm:$0xff]  ;;  %v7769_v46 = vld [vmem:[%s17245_s4 + $0x3b0] sm:$0xff]  ;;  %v7736_v30 = vld [vmem:[%s17245_s4 + $0x2a8] sm:$0xff]  ;;  %v7438_v22 = vrot.slane %v16396_v32, 2  ;;  %v9107_v55 = vrot.slane %v16440_v4, 7 }
 0x807   : > { %9198 = vmatprep.subr.mxu0 %v7744_v1  ;;  %9233 = vmatprep.subr.mxu1 %v7776_v60  ;;  %v16583_v18 = vsel %vm7634_vm8, %v7632_v51, %v9115_v57  ;;  %v7754_v6 = vld [vmem:[%s17245_s4 + $0x338] sm:$0xff]  ;;  %v7721_v11 = vld [vmem:[%s17245_s4 + $0x230] sm:$0xff]  ;;  %v7768_v25 = vld [vmem:[%s17245_s4 + $0x3a8] sm:$0xff] }
 0x808   : > { %9199 = vmatpush3.msra.mxu0 %v7728_v62  ;;  %9234 = vmatpush3.msra.mxu1 %v7760_v28  ;;  %v7753_v10 = vld [vmem:[%s17245_s4 + $0x330] sm:$0xff]  ;;  %v7720_v21 = vld [vmem:[%s17245_s4 + $0x228] sm:$0xff]  ;;  %v7735_v60 = vld [vmem:[%s17245_s4 + $0x2a0] sm:$0xff] }
 0x809   : > { %9200 = vmatprep.subr.mxu0 %v7743_v40  ;;  %9235 = vmatprep.subr.mxu1 %v7775_v17  ;;  %v7752_v1 = vld [vmem:[%s17245_s4 + $0x328] sm:$0xff]  ;;  %v7767_v37 = vld [vmem:[%s17245_s4 + $0x3a0] sm:$0xff]  ;;  %v7734_v62 = vld [vmem:[%s17245_s4 + $0x298] sm:$0xff] }
 0x80a   : > { %9201 = vmatpush3.msra.mxu0 %v7727_v59  ;;  %9236 = vmatpush3.msra.mxu1 %v7759_v43  ;;  %v7719_v29 = vld [vmem:[%s17245_s4 + $0x220] sm:$0xff]  ;;  %v7766_v28 = vld [vmem:[%s17245_s4 + $0x398] sm:$0xff]  ;;  %v7733_v50 = vld [vmem:[%s17245_s4 + $0x290] sm:$0xff]  ;;  %v9083_v59 = vrot.slane %v16398_v27, 9  ;;  %v9085_v43 = vrot.slane %v16398_v27, 10 }
 0x80b   : > { %9202 = vmatprep.subr.mxu0 %v7742_v2  ;;  %9237 = vmatprep.subr.mxu1 %v7774_v19  ;;  %v7751_v61 = vld [vmem:[%s17245_s4 + $0x320] sm:$0xff]  ;;  %v7718_v48 = vld [vmem:[%s17245_s4 + $0x218] sm:$0xff]  ;;  %v7765_v40 = vld [vmem:[%s17245_s4 + $0x390] sm:$0xff]  ;;  %v9097_v2 = vrot.slane %v16417_v26, 9 }
 0x80c   : > { %9203 = vmatpush3.msra.mxu0 %v7726_v58  ;;  %9238 = vmatpush3.msra.mxu1 %v7758_v16  ;;  %v7750_v36 = vld [vmem:[%s17245_s4 + $0x318] sm:$0xff]  ;;  %v7717_v17 = vld [vmem:[%s17245_s4 + $0x210] sm:$0xff]  ;;  %v7732_v0 = vld [vmem:[%s17245_s4 + $0x288] sm:$0xff]  ;;  %v7442_v58 = vrot.slane %v16396_v32, 3  ;;  %v9088_v16 = vrot.slane %v16400_v12, 11  ;;  %v7605_v32 = vsel %vm7600_vm11, %v7438_v22, %v9083_v59 }
 0x80d   : > { %9204 = vmatprep.subr.mxu0 %v7741_v45  ;;  %9239 = vmatprep.subr.mxu1 %v7773_v44  ;;  %v7749_v54 = vld [vmem:[%s17245_s4 + $0x310] sm:$0xff]  ;;  %v7764_v23 = vld [vmem:[%s17245_s4 + $0x388] sm:$0xff]  ;;  %v7731_v19 = vld [vmem:[%s17245_s4 + $0x280] sm:$0xff]  ;;  %v7447_v44 = vrot.slane %v16404_v41, 4 }
 0x80e   : > { %9205 = vmatpush3.msra.mxu0 %v7725_v33  ;;  %9240 = vmatpush3.msra.mxu1 %v7757_v31  ;;  %v7716_v20 = vld [vmem:[%s17245_s4 + $0x208] sm:$0xff]  ;;  %v7763_v27 = vld [vmem:[%s17245_s4 + $0x380] sm:$0xff]  ;;  %v9100_v33 = vrot.slane %v16422_v9, 10  ;;  %v9090_v31 = vrot.slane %v16400_v12, 12  ;;  %v7810_v12 = vld [vmem:[%s17245_s4 + $0x4f8] sm:$0xff] }
 0x80f   : > { %9206 = vmatprep.subr.mxu0 %v7740_v34  ;;  %9241 = vmatprep.subr.mxu1 %v7772_v13  ;;  %v7748_v57 = vld [vmem:[%s17245_s4 + $0x308] sm:$0xff]  ;;  %v7715_v51 = vld [vmem:[%s17245_s4 + $0x200] sm:$0xff]  ;;  %v7607_v34 = vsel %vm7600_vm11, %v7442_v58, %v9085_v43  ;;  %v9112_v13 = vrot.slane %v16448_v15, 9  ;;  %v7826_v15 = vld [vmem:[%s17245_s4 + $0x578] sm:$0xff] }
 0x810   : > { %9207 = vmatpush3.msra.mxu0 %v7724_v47  ;;  %9242 = vmatpush3.msra.mxu1 %v7756_v63  ;;  %v7747_v45 = vld [vmem:[%s17245_s4 + $0x300] sm:$0xff]  ;;  %v9102_v47 = vrot.slane %v16422_v9, 11  ;;  %v7622_v63 = vsel %vm7617_vm3, %v7605_v32, %v16417_v26  ;;  %v7579_v9 = vrot.slane %v7505_v56, 5  ;;  %v7788_v59 = vld [vmem:[%s17245_s4 + $0x448] sm:$0xff]  ;;  %v7834_v22 = vld [vmem:[%s17245_s4 + $0x5b8] sm:$0xff] }
 0x811   : > { %9208 = vmatprep.subr.mxu0 %v7739_v38  ;;  %9243 = vmatprep.subr.mxu1 %v7771_v24  ;;  %v7624_v38 = vsel %vm7617_vm3, %v7607_v34, %v9097_v2  ;;  %v7842_v24 = vld [vmem:[%s17245_s4 + $0x5f8] sm:$0xff]  ;;  %v7820_v43 = vld [vmem:[%s17245_s4 + $0x548] sm:$0xff]  ;;  %v7787_v2 = vld [vmem:[%s17245_s4 + $0x440] sm:$0xff] }
 0x812   : > { %9209 = vmatpush3.msra.mxu0 %v7723_v8  ;;  %9244 = vmatpush3.msra.mxu1 %v7755_v14  ;;  %v7451_v8 = vrot.slane %v16404_v41, 5  ;;  %v7639_v14 = vsel %vm7634_vm8, %v7622_v63, %v9107_v55  ;;  %v7641_v26 = vsel %vm7634_vm8, %v7624_v38, %v16440_v4  ;;  %v7786_v55 = vld [vmem:[%s17245_s4 + $0x438] sm:$0xff]  ;;  %v7784_v32 = vld [vmem:[%s17245_s4 + $0x428] sm:$0xff]  ;;  %v7783_v63 = vld [vmem:[%s17245_s4 + $0x420] sm:$0xff] }
 0x813   : > { %9210 = vmatprep.subr.mxu0 %v7738_v39  ;;  %9245 = vmatprep.subr.mxu1 %v7770_v35  ;;  %v7794_v39 = vld [vmem:[%s17245_s4 + $0x478] sm:$0xff]  ;;  %v7610_v35 = vsel %vm7600_vm11, %v7447_v44, %v9088_v16  ;;  %v7801_v16 = vld [vmem:[%s17245_s4 + $0x4b0] sm:$0xff]  ;;  %v7816_v34 = vld [vmem:[%s17245_s4 + $0x528] sm:$0xff] }
 0x814   : > { %9211 = vmatpush3.msra.mxu0 %v7722_v7  ;;  %9246 = vmatpush3.msra.mxu1 %v7754_v6  ;;  %v7627_v41 = vsel %vm7617_vm3, %v7610_v35, %v9100_v33  ;;  %v7612_v56 = vsel %vm7600_vm11, %v7451_v8, %v9090_v31  ;;  %v7809_v6 = vld [vmem:[%s17245_s4 + $0x4f0] sm:$0xff]  ;;  %v7818_v58 = vld [vmem:[%s17245_s4 + $0x538] sm:$0xff]  ;;  %v7800_v33 = vld [vmem:[%s17245_s4 + $0x4a8] sm:$0xff] }
 0x815   : > { %9212 = vmatprep.subr.mxu0 %v7737_v5  ;;  %9247 = vmatprep.subr.mxu1 %v7769_v46  ;;  %v7644_v4 = vsel %vm7634_vm8, %v7627_v41, %v9112_v13  ;;  %v7629_v7 = vsel %vm7617_vm3, %v7612_v56, %v9102_v47  ;;  %v7841_v5 = vld [vmem:[%s17245_s4 + $0x5f0] sm:$0xff]  ;;  %v7832_v31 = vld [vmem:[%s17245_s4 + $0x5a8] sm:$0xff]  ;;  %v7799_v13 = vld [vmem:[%s17245_s4 + $0x4a0] sm:$0xff] }
 0x816   : > { %9213 = vmatpush3.msra.mxu0 %v7721_v11  ;;  %9248 = vmatpush3.msra.mxu1 %v7753_v10  ;;  %v7646_v46 = vsel %vm7634_vm8, %v7629_v7, %v7579_v9  ;;  %v7793_v11 = vld [vmem:[%s17245_s4 + $0x470] sm:$0xff]  ;;  %v7831_v47 = vld [vmem:[%s17245_s4 + $0x5a0] sm:$0xff]  ;;  %v7782_v8 = vld [vmem:[%s17245_s4 + $0x418] sm:$0xff] }
 0x817   : > { %9214 = vmatprep.subr.mxu0 %v7736_v30  ;;  %9249 = vmatprep.subr.mxu1 %v7768_v25  ;;  %v7825_v10 = vld [vmem:[%s17245_s4 + $0x570] sm:$0xff]  ;;  %v7808_v30 = vld [vmem:[%s17245_s4 + $0x4e8] sm:$0xff]  ;;  %v7815_v38 = vld [vmem:[%s17245_s4 + $0x520] sm:$0xff] }
 0x818   : > { %9215 = vmatpush3.msra.mxu0 %v7720_v21  ;;  %9250 = vmatpush3.msra.mxu1 %v7752_v1  ;;  %v7840_v25 = vld [vmem:[%s17245_s4 + $0x5e8] sm:$0xff]  ;;  %v7817_v44 = vld [vmem:[%s17245_s4 + $0x530] sm:$0xff]  ;;  %v7814_v9 = vld [vmem:[%s17245_s4 + $0x518] sm:$0xff] }
 0x819   : > { %9216 = vmatprep.subr.mxu0 %v7735_v60  ;;  %9251 = vmatprep.subr.mxu1 %v7767_v37  ;;  %v7792_v21 = vld [vmem:[%s17245_s4 + $0x468] sm:$0xff]  ;;  %v7807_v60 = vld [vmem:[%s17245_s4 + $0x4e0] sm:$0xff]  ;;  %v7813_v35 = vld [vmem:[%s17245_s4 + $0x510] sm:$0xff] }
 0x81a   : > { %9217 = vmatpush3.msra.mxu0 %v7719_v29  ;;  %9252 = vmatpush3.msra.mxu1 %v7751_v61  ;;  %v7824_v1 = vld [vmem:[%s17245_s4 + $0x568] sm:$0xff]  ;;  %v7839_v37 = vld [vmem:[%s17245_s4 + $0x5e0] sm:$0xff] }
 0x81b   : > { %9218 = vmatprep.subr.mxu0 %v7734_v62  ;;  %9253 = vmatprep.subr.mxu1 %v7766_v28  ;;  %v7791_v29 = vld [vmem:[%s17245_s4 + $0x460] sm:$0xff]  ;;  %v7806_v62 = vld [vmem:[%s17245_s4 + $0x4d8] sm:$0xff]  ;;  %v7796_v41 = vld [vmem:[%s17245_s4 + $0x488] sm:$0xff] }
 0x81c   : > { %9219 = vmatpush3.msra.mxu0 %v7718_v48  ;;  %9254 = vmatpush3.msra.mxu1 %v7750_v36  ;;  %v7823_v61 = vld [vmem:[%s17245_s4 + $0x560] sm:$0xff]  ;;  %v7838_v28 = vld [vmem:[%s17245_s4 + $0x5d8] sm:$0xff]  ;;  %v7780_v56 = vld [vmem:[%s17245_s4 + $0x408] sm:$0xff] }
 0x81d   : > { %9220 = vmatprep.subr.mxu0 %v7733_v50  ;;  %9255 = vmatprep.subr.mxu1 %v7765_v40  ;;  %v7790_v48 = vld [vmem:[%s17245_s4 + $0x458] sm:$0xff]  ;;  %v7805_v50 = vld [vmem:[%s17245_s4 + $0x4d0] sm:$0xff]  ;;  %v7795_v7 = vld [vmem:[%s17245_s4 + $0x480] sm:$0xff] }
 0x81e   : > { %9221 = vmatpush3.msra.mxu0 %v7717_v17  ;;  %9256 = vmatpush3.msra.mxu1 %v7749_v54  ;;  %v7822_v36 = vld [vmem:[%s17245_s4 + $0x558] sm:$0xff]  ;;  %v7837_v40 = vld [vmem:[%s17245_s4 + $0x5d0] sm:$0xff] }
 0x81f   : > { %9222 = vmatprep.subr.mxu0 %v7732_v0  ;;  %9257 = vmatprep.subr.mxu1 %v7764_v23  ;;  %v7789_v17 = vld [vmem:[%s17245_s4 + $0x450] sm:$0xff]  ;;  %v7804_v0 = vld [vmem:[%s17245_s4 + $0x4c8] sm:$0xff] }
 0x820   : > { %9223 = vmatpush3.msra.mxu0 %v7716_v20  ;;  %9258 = vmatpush3.msra.mxu1 %v7748_v57  ;;  %v7821_v54 = vld [vmem:[%s17245_s4 + $0x550] sm:$0xff]  ;;  %v7836_v23 = vld [vmem:[%s17245_s4 + $0x5c8] sm:$0xff]  ;;  %v7803_v20 = vld [vmem:[%s17245_s4 + $0x4c0] sm:$0xff] }
 0x821   : > { %9224 = vmatprep.subr.mxu0 %v7731_v19  ;;  %9259 = vmatprep.subr.mxu1 %v7763_v27  ;;  %v7835_v57 = vld [vmem:[%s17245_s4 + $0x5c0] sm:$0xff]  ;;  %v7802_v27 = vld [vmem:[%s17245_s4 + $0x4b8] sm:$0xff] }
 0x822   : > { %9225 = vmatpush3.msra.mxu0 %v7715_v51  ;;  %9260 = vmatpush3.msra.mxu1 %v7747_v45  ;;  %v7819_v19 = vld [vmem:[%s17245_s4 + $0x540] sm:$0xff]  ;;  %v7833_v51 = vld [vmem:[%s17245_s4 + $0x5b0] sm:$0xff] }
 0x823   : > { %8119 = vmatmul.mubr.f32.vlgmr.msra.gmra.mxu0 %v7639_v14  ;;  %8189 = vmatmul.mubr.f32.vlgmr.msra.gmra.mxu1 %v7641_v26  ;;  %v7785_v45 = vld [vmem:[%s17245_s4 + $0x430] sm:$0xff] }
 0x824   : > { %9264 = vmatprep.subr.mxu0 %v7810_v12  ;;  %9299 = vmatprep.subr.mxu1 %v7842_v24  ;;  %v7798_v12 = vld [vmem:[%s17245_s4 + $0x498] sm:$0xff]  ;;  %v7797_v14 = vld [vmem:[%s17245_s4 + $0x490] sm:$0xff] }
 0x825   : > { %9265 = vmatpush3.msra.mxu0 %v7794_v39  ;;  %8258 = vmatprep.mubr.f32.mxu0 %v7644_v4  ;;  %v7830_v24 = vld [vmem:[%s17245_s4 + $0x598] sm:$0xff]  ;;  %v7829_v26 = vld [vmem:[%s17245_s4 + $0x590] sm:$0xff]  ;;  %v7812_v4 = vld [vmem:[%s17245_s4 + $0x508] sm:$0xff] }
 0x826   : > { %9300 = vmatpush3.msra.mxu1 %v7826_v15  ;;  %8328 = vmatprep.mubr.f32.mxu1 %v7646_v46  ;;  %v7781_v39 = vld [vmem:[%s17245_s4 + $0x410] sm:$0xff]  ;;  %v7828_v15 = vld [vmem:[%s17245_s4 + $0x588] sm:$0xff]  ;;  %v7811_v46 = vld [vmem:[%s17245_s4 + $0x500] sm:$0xff] }
 0x827   : > { %9266 = vmatprep.subr.mxu0 %v7809_v6  ;;  %9301 = vmatprep.subr.mxu1 %v7841_v5  ;;  %v7827_v6 = vld [vmem:[%s17245_s4 + $0x580] sm:$0xff] }
 0x828   : > { %9267 = vmatpush3.msra.mxu0 %v7793_v11  ;;  %9302 = vmatpush3.msra.mxu1 %v7825_v10  ;;  %v7779_v5 = vld [vmem:[%s17245_s4 + $0x400] sm:$0xff]  ;;  %v7874_v11 = vld [vmem:[%s17245_s4 + $0x6f8] sm:$0xff] }
 0x829   : > { %9268 = vmatprep.subr.mxu0 %v7808_v30  ;;  %9303 = vmatprep.subr.mxu1 %v7840_v25  ;;  %v7906_v10 = vld [vmem:[%s17245_s4 + $0x7f8] sm:$0xff] }
 0x82a   : > { %9269 = vmatpush3.msra.mxu0 %v7792_v21  ;;  %9304 = vmatpush3.msra.mxu1 %v7824_v1  ;;  %v7858_v30 = vld [vmem:[%s17245_s4 + $0x678] sm:$0xff]  ;;  %v7873_v21 = vld [vmem:[%s17245_s4 + $0x6f0] sm:$0xff] }
 0x82b   : > { %9270 = vmatprep.subr.mxu0 %v7807_v60  ;;  %9305 = vmatprep.subr.mxu1 %v7839_v37  ;;  %v7890_v25 = vld [vmem:[%s17245_s4 + $0x778] sm:$0xff]  ;;  %v7905_v1 = vld [vmem:[%s17245_s4 + $0x7f0] sm:$0xff]  ;;  %v7872_v60 = vld [vmem:[%s17245_s4 + $0x6e8] sm:$0xff] }
 0x82c   : > { %9271 = vmatpush3.msra.mxu0 %v7791_v29  ;;  %9306 = vmatpush3.msra.mxu1 %v7823_v61  ;;  %v7904_v37 = vld [vmem:[%s17245_s4 + $0x7e8] sm:$0xff]  ;;  %v7903_v61 = vld [vmem:[%s17245_s4 + $0x7e0] sm:$0xff] }
 0x82d   : > { %9272 = vmatprep.subr.mxu0 %v7806_v62  ;;  %9307 = vmatprep.subr.mxu1 %v7838_v28  ;;  %v7888_v29 = vld [vmem:[%s17245_s4 + $0x768] sm:$0xff]  ;;  %v7855_v62 = vld [vmem:[%s17245_s4 + $0x660] sm:$0xff] }
 0x82e   : > { %9273 = vmatpush3.msra.mxu0 %v7790_v48  ;;  %9308 = vmatpush3.msra.mxu1 %v7822_v36  ;;  %v7887_v28 = vld [vmem:[%s17245_s4 + $0x760] sm:$0xff]  ;;  %v7870_v48 = vld [vmem:[%s17245_s4 + $0x6d8] sm:$0xff] }
 0x82f   : > { %9274 = vmatprep.subr.mxu0 %v7805_v50  ;;  %9309 = vmatprep.subr.mxu1 %v7837_v40  ;;  %v7902_v36 = vld [vmem:[%s17245_s4 + $0x7d8] sm:$0xff] }
 0x830   : > { %9275 = vmatpush3.msra.mxu0 %v7789_v17  ;;  %9310 = vmatpush3.msra.mxu1 %v7821_v54  ;;  %v7854_v50 = vld [vmem:[%s17245_s4 + $0x658] sm:$0xff]  ;;  %v7869_v17 = vld [vmem:[%s17245_s4 + $0x6d0] sm:$0xff] }
 0x831   : > { %9276 = vmatprep.subr.mxu0 %v7804_v0  ;;  %9311 = vmatprep.subr.mxu1 %v7836_v23  ;;  %v7886_v40 = vld [vmem:[%s17245_s4 + $0x758] sm:$0xff]  ;;  %v7901_v54 = vld [vmem:[%s17245_s4 + $0x7d0] sm:$0xff] }
 0x832   : > { %9277 = vmatpush3.msra.mxu0 %v7788_v59  ;;  %9312 = vmatpush3.msra.mxu1 %v7820_v43  ;;  %v7853_v0 = vld [vmem:[%s17245_s4 + $0x650] sm:$0xff]  ;;  %v7868_v59 = vld [vmem:[%s17245_s4 + $0x6c8] sm:$0xff] }
 0x833   : > { %9278 = vmatprep.subr.mxu0 %v7803_v20  ;;  %9313 = vmatprep.subr.mxu1 %v7835_v57  ;;  %v7885_v23 = vld [vmem:[%s17245_s4 + $0x750] sm:$0xff]  ;;  %v7900_v43 = vld [vmem:[%s17245_s4 + $0x7c8] sm:$0xff] }
 0x834   : > { %9279 = vmatpush3.msra.mxu0 %v7787_v2  ;;  %9314 = vmatpush3.msra.mxu1 %v7819_v19  ;;  %v7852_v20 = vld [vmem:[%s17245_s4 + $0x648] sm:$0xff]  ;;  %v7867_v2 = vld [vmem:[%s17245_s4 + $0x6c0] sm:$0xff] }
 0x835   : > { %9280 = vmatprep.subr.mxu0 %v7802_v27  ;;  %9315 = vmatprep.subr.mxu1 %v7834_v22  ;;  %v7884_v57 = vld [vmem:[%s17245_s4 + $0x748] sm:$0xff]  ;;  %v7899_v19 = vld [vmem:[%s17245_s4 + $0x7c0] sm:$0xff] }
 0x836   : > { %9281 = vmatpush3.msra.mxu0 %v7786_v55  ;;  %9316 = vmatpush3.msra.mxu1 %v7818_v58  ;;  %v7851_v27 = vld [vmem:[%s17245_s4 + $0x640] sm:$0xff]  ;;  %v7866_v55 = vld [vmem:[%s17245_s4 + $0x6b8] sm:$0xff] }
 0x837   : > { %9282 = vmatprep.subr.mxu0 %v7801_v16  ;;  %9317 = vmatprep.subr.mxu1 %v7833_v51  ;;  %v7883_v22 = vld [vmem:[%s17245_s4 + $0x740] sm:$0xff]  ;;  %v7898_v58 = vld [vmem:[%s17245_s4 + $0x7b8] sm:$0xff] }
 0x838   : > { %9283 = vmatpush3.msra.mxu0 %v7785_v45  ;;  %9318 = vmatpush3.msra.mxu1 %v7817_v44  ;;  %v7850_v16 = vld [vmem:[%s17245_s4 + $0x638] sm:$0xff]  ;;  %v7865_v45 = vld [vmem:[%s17245_s4 + $0x6b0] sm:$0xff] }
 0x839   : > { %9284 = vmatprep.subr.mxu0 %v7800_v33  ;;  %9319 = vmatprep.subr.mxu1 %v7832_v31  ;;  %v7882_v51 = vld [vmem:[%s17245_s4 + $0x738] sm:$0xff]  ;;  %v7897_v44 = vld [vmem:[%s17245_s4 + $0x7b0] sm:$0xff] }
 0x83a   : > { %9285 = vmatpush3.msra.mxu0 %v7784_v32  ;;  %9320 = vmatpush3.msra.mxu1 %v7816_v34  ;;  %v7849_v33 = vld [vmem:[%s17245_s4 + $0x630] sm:$0xff]  ;;  %v7864_v32 = vld [vmem:[%s17245_s4 + $0x6a8] sm:$0xff] }
 0x83b   : > { %9286 = vmatprep.subr.mxu0 %v7799_v13  ;;  %9321 = vmatprep.subr.mxu1 %v7831_v47  ;;  %v7881_v31 = vld [vmem:[%s17245_s4 + $0x730] sm:$0xff]  ;;  %v7896_v34 = vld [vmem:[%s17245_s4 + $0x7a8] sm:$0xff] }
 0x83c   : > { %9287 = vmatpush3.msra.mxu0 %v7783_v63  ;;  %9322 = vmatpush3.msra.mxu1 %v7815_v38  ;;  %v7848_v13 = vld [vmem:[%s17245_s4 + $0x628] sm:$0xff]  ;;  %v7863_v63 = vld [vmem:[%s17245_s4 + $0x6a0] sm:$0xff] }
 0x83d   : > { %9288 = vmatprep.subr.mxu0 %v7798_v12  ;;  %9323 = vmatprep.subr.mxu1 %v7830_v24  ;;  %v7880_v47 = vld [vmem:[%s17245_s4 + $0x728] sm:$0xff]  ;;  %v7895_v38 = vld [vmem:[%s17245_s4 + $0x7a0] sm:$0xff] }
 0x83e   : > { %9289 = vmatpush3.msra.mxu0 %v7782_v8  ;;  %9324 = vmatpush3.msra.mxu1 %v7814_v9  ;;  %v7847_v12 = vld [vmem:[%s17245_s4 + $0x620] sm:$0xff]  ;;  %v7862_v8 = vld [vmem:[%s17245_s4 + $0x698] sm:$0xff] }
 0x83f   : > { %9290 = vmatprep.subr.mxu0 %v7797_v14  ;;  %9325 = vmatprep.subr.mxu1 %v7829_v26  ;;  %v7879_v24 = vld [vmem:[%s17245_s4 + $0x720] sm:$0xff]  ;;  %v7894_v9 = vld [vmem:[%s17245_s4 + $0x798] sm:$0xff] }
 0x840   : > { %9291 = vmatpush3.msra.mxu0 %v7781_v39  ;;  %9326 = vmatpush3.msra.mxu1 %v7813_v35  ;;  %v7846_v14 = vld [vmem:[%s17245_s4 + $0x618] sm:$0xff]  ;;  %v7861_v39 = vld [vmem:[%s17245_s4 + $0x690] sm:$0xff] }
 0x841   : > { %9292 = vmatprep.subr.mxu0 %v7796_v41  ;;  %9327 = vmatprep.subr.mxu1 %v7828_v15  ;;  %v7878_v26 = vld [vmem:[%s17245_s4 + $0x718] sm:$0xff]  ;;  %v7893_v35 = vld [vmem:[%s17245_s4 + $0x790] sm:$0xff] }
 0x842   : > { %9293 = vmatpush3.msra.mxu0 %v7780_v56  ;;  %9328 = vmatpush3.msra.mxu1 %v7812_v4  ;;  %v7845_v41 = vld [vmem:[%s17245_s4 + $0x610] sm:$0xff]  ;;  %v7860_v56 = vld [vmem:[%s17245_s4 + $0x688] sm:$0xff] }
 0x843   : > { %9294 = vmatprep.subr.mxu0 %v7795_v7  ;;  %9329 = vmatprep.subr.mxu1 %v7827_v6  ;;  %v7877_v15 = vld [vmem:[%s17245_s4 + $0x710] sm:$0xff]  ;;  %v7892_v4 = vld [vmem:[%s17245_s4 + $0x788] sm:$0xff] }
 0x844   : > { %9295 = vmatpush3.msra.mxu0 %v7779_v5  ;;  %9330 = vmatpush3.msra.mxu1 %v7811_v46  ;;  %v7844_v7 = vld [vmem:[%s17245_s4 + $0x608] sm:$0xff]  ;;  %v7859_v5 = vld [vmem:[%s17245_s4 + $0x680] sm:$0xff] }
 0x845   : > { %8259 = vmatmul.mubr.f32.vlgmr.msra.gmra.mxu0 %v16501_v52  ;;  %8329 = vmatmul.mubr.f32.vlgmr.msra.gmra.mxu1 %v16513_v42  ;;  %v7857_v52 = vld [vmem:[%s17245_s4 + $0x670] sm:$0xff]  ;;  %v7876_v6 = vld [vmem:[%s17245_s4 + $0x708] sm:$0xff]  ;;  %v7891_v46 = vld [vmem:[%s17245_s4 + $0x780] sm:$0xff] }
 0x846   : > { %9334 = vmatprep.subr.mxu0 %v7874_v11  ;;  %9369 = vmatprep.subr.mxu1 %v7906_v10  ;;  %v7889_v42 = vld [vmem:[%s17245_s4 + $0x770] sm:$0xff]  ;;  %v7843_v11 = vld [vmem:[%s17245_s4 + $0x600] sm:$0xff] }
 0x847   : > { %9335 = vmatpush3.msra.mxu0 %v7858_v30  ;;  %8398 = vmatprep.mubr.f32.mxu0 %v16527_v49  ;;  %v7856_v49 = vld [vmem:[%s17245_s4 + $0x668] sm:$0xff]  ;;  %v7875_v10 = vld [vmem:[%s17245_s4 + $0x700] sm:$0xff]  ;;  %v18606_v30 = vmov 0.0  }
 0x848   : > { %9370 = vmatpush3.msra.mxu1 %v7890_v25  ;;  %8468 = vmatprep.mubr.f32.mxu1 %v16540_v3  ;;  %v7871_v3 = vld [vmem:[%s17245_s4 + $0x6e0] sm:$0xff]  ;;  %v8490_v25 = vld [vmem:[%s17247_s6 + $0x78] sm:$0xff] }
 0x849   : > { %9336 = vmatprep.subr.mxu0 %v7873_v21  ;;  %9371 = vmatprep.subr.mxu1 %v7905_v1  ;;  %v8489_v21 = vld [vmem:[%s17247_s6 + $0x70] sm:$0xff]  ;;  %v8488_v1 = vld [vmem:[%s17247_s6 + $0x68] sm:$0xff] }
 0x84a   : > { %9337 = vmatpush3.msra.mxu0 %v7857_v52  ;;  %9372 = vmatpush3.msra.mxu1 %v7889_v42  ;;  %v8485_v52 = vld [vmem:[%s17247_s6 + $0x50] sm:$0xff]  ;;  %v8484_v42 = vld [vmem:[%s17247_s6 + $0x48] sm:$0xff] }
 0x84b   : > { %9338 = vmatprep.subr.mxu0 %v7872_v60  ;;  %9373 = vmatprep.subr.mxu1 %v7904_v37  ;;  %v8483_v60 = vld [vmem:[%s17247_s6 + $0x40] sm:$0xff]  ;;  %v8482_v37 = vld [vmem:[%s17247_s6 + $0x38] sm:$0xff] }
 0x84c   : > { %9339 = vmatpush3.msra.mxu0 %v7856_v49  ;;  %9374 = vmatpush3.msra.mxu1 %v7888_v29  ;;  %v8481_v49 = vld [vmem:[%s17247_s6 + $0x30] sm:$0xff]  ;;  %v8480_v29 = vld [vmem:[%s17247_s6 + $0x28] sm:$0xff] }
 0x84d   : > { %9340 = vmatprep.subr.mxu0 %v7871_v3  ;;  %9375 = vmatprep.subr.mxu1 %v7903_v61  ;;  %v8479_v3 = vld [vmem:[%s17247_s6 + $0x20] sm:$0xff]  ;;  %v8478_v61 = vld [vmem:[%s17247_s6 + $0x18] sm:$0xff] }
 0x84e   : > { %9341 = vmatpush3.msra.mxu0 %v7855_v62  ;;  %9376 = vmatpush3.msra.mxu1 %v7887_v28  ;;  %v8477_v62 = vld [vmem:[%s17247_s6 + $0x10] sm:$0xff]  ;;  %v8476_v28 = vld [vmem:[%s17247_s6 + $0x8] sm:$0xff] }
 0x84f   : > { %9342 = vmatprep.subr.mxu0 %v7870_v48  ;;  %9377 = vmatprep.subr.mxu1 %v7902_v36  ;;  %v8475_v48 = vld [vmem:[%s17247_s6] sm:$0xff] }
 0x850   : > { %9343 = vmatpush3.msra.mxu0 %v7854_v50  ;;  %9378 = vmatpush3.msra.mxu1 %v7886_v40 }
 0x851   : > { %9344 = vmatprep.subr.mxu0 %v7869_v17  ;;  %9379 = vmatprep.subr.mxu1 %v7901_v54 }
 0x852   : > { %9345 = vmatpush3.msra.mxu0 %v7853_v0  ;;  %9380 = vmatpush3.msra.mxu1 %v7885_v23  ;;  %v9117_v0 = vld [vmem:[%s17246_s5] ss:$0 sm:$0xff] }
 0x853   : > { %9346 = vmatprep.subr.mxu0 %v7868_v59  ;;  %9381 = vmatprep.subr.mxu1 %v7900_v43 }
 0x854   : > { %9347 = vmatpush3.msra.mxu0 %v7852_v20  ;;  %9382 = vmatpush3.msra.mxu1 %v7884_v57 }
 0x855   : > { %9348 = vmatprep.subr.mxu0 %v7867_v2  ;;  %9383 = vmatprep.subr.mxu1 %v7899_v19 }
 0x856   : > { %9349 = vmatpush3.msra.mxu0 %v7851_v27  ;;  %9384 = vmatpush3.msra.mxu1 %v7883_v22 }
 0x857   : > { %9350 = vmatprep.subr.mxu0 %v7866_v55  ;;  %9385 = vmatprep.subr.mxu1 %v7898_v58 }
 0x858   : > { %9351 = vmatpush3.msra.mxu0 %v7850_v16  ;;  %9386 = vmatpush3.msra.mxu1 %v7882_v51 }
 0x859   : > { %9352 = vmatprep.subr.mxu0 %v7865_v45  ;;  %9387 = vmatprep.subr.mxu1 %v7897_v44 }
 0x85a   : > { %9353 = vmatpush3.msra.mxu0 %v7849_v33  ;;  %9388 = vmatpush3.msra.mxu1 %v7881_v31 }
 0x85b   : > { %9354 = vmatprep.subr.mxu0 %v7864_v32  ;;  %9389 = vmatprep.subr.mxu1 %v7896_v34 }
 0x85c   : > { %9355 = vmatpush3.msra.mxu0 %v7848_v13  ;;  %9390 = vmatpush3.msra.mxu1 %v7880_v47 }
 0x85d   : > { %9356 = vmatprep.subr.mxu0 %v7863_v63  ;;  %9391 = vmatprep.subr.mxu1 %v7895_v38 }
 0x85e   : > { %9357 = vmatpush3.msra.mxu0 %v7847_v12  ;;  %9392 = vmatpush3.msra.mxu1 %v7879_v24 }
 0x85f   : > { %9358 = vmatprep.subr.mxu0 %v7862_v8  ;;  %9393 = vmatprep.subr.mxu1 %v7894_v9 }
 0x860   : > { %9359 = vmatpush3.msra.mxu0 %v7846_v14  ;;  %9394 = vmatpush3.msra.mxu1 %v7878_v26  ;;  %v9118_v26 = vld [vmem:[%s17248_s7] ss:$0 sm:$0xff] }
 0x861   : > { %9360 = vmatprep.subr.mxu0 %v7861_v39  ;;  %9395 = vmatprep.subr.mxu1 %v7893_v35 }
 0x862   : > { %9361 = vmatpush3.msra.mxu0 %v7845_v41  ;;  %9396 = vmatpush3.msra.mxu1 %v7877_v15 }
 0x863   : > { %9362 = vmatprep.subr.mxu0 %v7860_v56  ;;  %9397 = vmatprep.subr.mxu1 %v7892_v4 }
 0x864   : > { %9363 = vmatpush3.msra.mxu0 %v7844_v7  ;;  %9398 = vmatpush3.msra.mxu1 %v7876_v6 }
 0x865   : > { %9364 = vmatprep.subr.mxu0 %v7859_v5  ;;  %9399 = vmatprep.subr.mxu1 %v7891_v46 }
 0x866   : > { %9365 = vmatpush3.msra.mxu0 %v7843_v11  ;;  %9400 = vmatpush3.msra.mxu1 %v7875_v10 }
 0x867   : > { %8399 = vmatmul.mubr.f32.vlgmr.msra.gmra.mxu0 %v16573_v53  ;;  %8469 = vmatmul.mubr.f32.vlgmr.msra.gmra.mxu1 %v16583_v18  ;;  %v8487_v53 = vld [vmem:[%s17247_s6 + $0x60] sm:$0xff]  ;;  %v8486_v18 = vld [vmem:[%s17247_s6 + $0x58] sm:$0xff] }
 0x868   : > { %9421 = vmatprep.subr.mxu0 %v18606_v30  ;;  %9453 = vmatprep.mubr.msk.f32.mxu0 %vm10043_vm12, %v18606_v30 }
 0x869   : > { %9422 = vmatpush3.msra.mxu0 %v8490_v25 }
 0x86a   : > { %9423 = vmatprep.subr.mxu0 %v18606_v30 }
 0x86b   : > { %9424 = vmatpush3.msra.mxu0 %v8489_v21 }
 0x86c   : > { %9425 = vmatprep.subr.mxu0 %v18606_v30 }
 0x86d   : > { %9426 = vmatpush3.msra.mxu0 %v8488_v1 }
 0x86e   : > { %9427 = vmatprep.subr.mxu0 %v18606_v30 }
 0x86f   : > { %9428 = vmatpush3.msra.mxu0 %v8487_v53 }
 0x870   : > { %9429 = vmatprep.subr.mxu0 %v18606_v30 }
 0x871   : > { %9430 = vmatpush3.msra.mxu0 %v8486_v18 }
 0x872   : > { %9431 = vmatprep.subr.mxu0 %v18606_v30 }
 0x873   : > { %9432 = vmatpush3.msra.mxu0 %v8485_v52 }
 0x874   : > { %9433 = vmatprep.subr.mxu0 %v18606_v30 }
 0x875   : > { %9434 = vmatpush3.msra.mxu0 %v8484_v42 }
 0x876   : > { %9435 = vmatprep.subr.mxu0 %v18606_v30 }
 0x877   : > { %9436 = vmatpush3.msra.mxu0 %v8483_v60 }
 0x878   : > { %9437 = vmatprep.subr.mxu0 %v18606_v30 }
 0x879   : > { %9438 = vmatpush3.msra.mxu0 %v8482_v37 }
 0x87a   : > { %9439 = vmatprep.subr.mxu0 %v18606_v30 }
 0x87b   : > { %9440 = vmatpush3.msra.mxu0 %v8481_v49 }
 0x87c   : > { %9441 = vmatprep.subr.mxu0 %v18606_v30 }
 0x87d   : > { %9442 = vmatpush3.msra.mxu0 %v8480_v29 }
 0x87e   : > { %9443 = vmatprep.subr.mxu0 %v18606_v30 }
 0x87f   : > { %9444 = vmatpush3.msra.mxu0 %v8479_v3 }
 0x880   : > { %9445 = vmatprep.subr.mxu0 %v18606_v30 }
 0x881   : > { %9446 = vmatpush3.msra.mxu0 %v8478_v61 }
 0x882   : > { %9447 = vmatprep.subr.mxu0 %v18606_v30 }
 0x883   : > { %9448 = vmatpush3.msra.mxu0 %v8477_v62 }
 0x884   : > { %9449 = vmatprep.subr.mxu0 %v18606_v30 }
 0x885   : > { %9450 = vmatpush3.msra.mxu0 %v8476_v28 }
 0x886   : > { %9451 = vmatprep.subr.mxu0 %v18606_v30 }
 0x887   : > { %9452 = vmatpush3.msra.mxu0 %v8475_v48 }
 0x8c2   : > { %v9156_v36 = vpop.f32.mrf.mxu0  ;;  %v9191_v40 = vpop.f32.mrf.mxu1 }
 0x8c4   : > { %v9157_v50 = vpop.f32.mrf.mxu0  ;;  %v9192_v23 = vpop.f32.mrf.mxu1 }
 0x8c5   : > { %v9158_v54 = vadd.f32 %v9157_v50, %v9156_v36  ;;  %v9193_v2 = vadd.f32 %v9192_v23, %v9191_v40 }
 0x8c7   : > { %v7981_v43 = vadd.f32 %v9158_v54, %v9117_v0 }
 0x8c9   : > { %v8051_v27 = vadd.f32 %v9193_v2, %v7981_v43 }
 0x8e3   : > { %v9226_v17 = vpop.f32.mrf.mxu0  ;;  %v9261_v20 = vpop.f32.mrf.mxu1 }
 0x8e5   : > { %v9227_v59 = vpop.f32.mrf.mxu0  ;;  %v9262_v22 = vpop.f32.mrf.mxu1 }
 0x8e6   : > { %v9228_v19 = vadd.f32 %v9227_v59, %v9226_v17  ;;  %v9263_v51 = vadd.f32 %v9262_v22, %v9261_v20 }
 0x8e8   : > { %v8121_v58 = vadd.f32 %v9228_v19, %v8051_v27 }
 0x8ea   : > { %v8191_v44 = vadd.f32 %v9263_v51, %v8121_v58 }
 0x905   : > { %v9296_v57 = vpop.f32.mrf.mxu0  ;;  %v9331_v16 = vpop.f32.mrf.mxu1 }
 0x907   : > { %v9297_v55 = vpop.f32.mrf.mxu0  ;;  %v9332_v33 = vpop.f32.mrf.mxu1 }
 0x908   : > { %v9298_v45 = vadd.f32 %v9297_v55, %v9296_v57  ;;  %v9333_v13 = vadd.f32 %v9332_v33, %v9331_v16 }
 0x90a   : > { %v8261_v31 = vadd.f32 %v9298_v45, %v8191_v44 }
 0x90c   : > { %v8331_v38 = vadd.f32 %v9333_v13, %v8261_v31 }
 0x927   : > { %v9366_v32 = vpop.f32.mrf.mxu0  ;;  %v9401_v34 = vpop.f32.mrf.mxu1 }
 0x929   : > { %v9367_v47 = vpop.f32.mrf.mxu0  ;;  %v9402_v63 = vpop.f32.mrf.mxu1 }
 0x92a   : > { %v9368_v12 = vadd.f32 %v9367_v47, %v9366_v32  ;;  %v9403_v8 = vadd.f32 %v9402_v63, %v9401_v34 }
 0x92c   : > { %v8401_v24 = vadd.f32 %v9368_v12, %v8331_v38 }
 0x92e   : > { %v8471_v9 = vadd.f32 %v9403_v8, %v8401_v24 }
 0x930   : > { %9950 = vtanh.f32 %v8471_v9 }
 0x93d   : > { %v9951_v14 = vpop.eup %9950 }
 0x93e   : > { %9454 = vmatmul.mubr.f32.vlgmr.msra.gmra.mxu0 %v9951_v14 }
 0x9fe   : > { %v8564_v39 = vpop.f32.mrf.mxu0 }
 0x9ff   : > { %v8565_v35 = vadd.f32 %v9118_v26, %v8564_v39 }
 0xa00   : > { %v9455_v41 = vpop.f32.mrf.mxu0 }
 0xa01   : > { %8568 = vst [vmem:[%s298_s23] sm:$0xf] %v8565_v35 }
 0xa02   : > { %9983 = shalt.err (!%p9980_p3)
}
 0xa03   : > { %s9984_s25 = scalar_lea.hbm %s17206_s10, 64  ;;  %s9988_s17 = scalar_lea.hbm %s17249_s8, 128 }
 0xa04   : > { %p9985_p4 = scmp.ne.s32.totalorder %s17206_s10, %s9984_s25  ;;  %p9989_p9 = scmp.lt.s32.totalorder %s17206_s10, %s17249_s8 }
 0xa05   : > { %p9990_p10 = scmp.lt.s32.totalorder %s9988_s17, %s9984_s25 }
 0xa06   : > { %p9986_p7 = pnand %p9985_p4, %p10128_p5 }
 0xa07   : > { %p9991_p11 = por %p9990_p10, %p9989_p9 }
 0xa08   : > { %p9987_p8 = pneg %p9986_p7 }
 0xa0a   : > { %p9992_p12 = pnand %p9991_p11, %p9987_p8 }
 0xa0c   : > { %9995 = shalt.err (!%p9992_p12)
}
 0xa0d   : > { %9456 = dma.vmem_to_hbm [thread:$0]  (%p10128_p5), %s8584_s24, 64, %s17206_s10, %s8570_s12  }
 0xa0e PF: > { %p9462_p13 = scmp.ge.s32.totalorder %s10030_s30, 2  ;;  %s8595_s26 = sand.u32 1, %s10018_s27  }
 0xa0f   : > { %s8596_s13 = scalar_lea.sflag [#allocation3], %s8595_s26 }
 0xa10   : > { %p9459_p0 = pnand %p9462_p13, %p10132_p6 }
 0xa12   : > { %p9460_p1 = pneg %p9459_p0 }
 0xa14   : > { %10013 = dma.done.wait (%p9460_p1), %s8596_s13, 64  }
 0xa15   : > { %10015 = vsyncadd (%p9460_p1), %s8596_s13, 4294967232  ;;  %p18_p2 = scmp.ge.s32.totalorder %s10115_s11, 4   ;;  %s18607_s27 = smov %s10022_s28 }
 0xa16   : > { %s18608_s28 = smov %s10026_s29  ;;  %s18609_s29 = smov %s10126_s14 }
 0xa17   : > { %s18610_s30 = smov %s10115_s11  ;;  %20 = sbr.rel (!%p18_p2) target bundleno = 3 (0x3), region = 87 }
 0xa1c   :  { %8601 = vsyncpa [#allocation3], 1 }
 0xa1d   :  { %8603 = vsyncpa [#allocation3 + $0x1], 1 }

</bundles_post_ra>
